<compile_context>
chip_gen: v6e
topology: v6e:2x2x1
jax: 0.10.0
libtpu: 0.0.40
codegen_flags: <defaults>
</compile_context>

<pallas_src>
import functools

import jax
import jax.numpy as jnp
from jax.experimental import pallas as pl
from jax.experimental.pallas import tpu as pltpu

LANE = 128
SUBLANE = 8

_VMEM = pl.BlockSpec(memory_space=pltpu.MemorySpace.VMEM)
# Safe on every generation for these chunk sizes; size chunk for 64 MiB on v7x.
_VMEM_LIMIT = 32 * 1024 * 1024


def _round_up(x: int, m: int) -> int:
    return (x + m - 1) // m * m


def _pick_chunk(T: int, target: int = 32) -> int:
    c = min(T, target)
    while T % c:
        c -= 1
    return c


def _gru_gates(gi_t, gh, bhn, h_prev, HP):
    """PyTorch GRU gate math (gate order r, z, n); all math in f32."""
    r = jax.nn.sigmoid(gi_t[:, 0:HP] + gh[:, 0:HP])
    z = jax.nn.sigmoid(gi_t[:, HP:2 * HP] + gh[:, HP:2 * HP])
    n = jnp.tanh(gi_t[:, 2 * HP:3 * HP] + r * (gh[:, 2 * HP:3 * HP] + bhn))
    return (1.0 - z) * n + z * h_prev


# ----------------------------------------------------------------------------
# Pallas kernels
# ----------------------------------------------------------------------------
def _make_bidir_kernel(CT: int, HP: int, nin: int, unroll):
    """One T-chunk of a full bidirectional GRU layer (grid axis = chunks)."""
    H3 = 3 * HP

    def kernel(*refs):
        xf = refs[0:nin]                      # fwd-time chunk views of x
        xb = refs[nin:2 * nin]                # bwd-time chunk views of x
        wf = refs[2 * nin:3 * nin]            # wih_f input splits [FPi, 3HP]
        wb = refs[3 * nin:4 * nin]            # wih_b input splits [FPi, 3HP]
        (bgi_f, bgi_b, whh_bd, bhn_f, bhn_b,
         out_f, out_b, gi_f, gi_b, h_ref) = refs[4 * nin:]

        c = pl.program_id(0)
        Bp = out_f.shape[1]

        @pl.when(c == 0)
        def _():
            h_ref[...] = jnp.zeros_like(h_ref)

        # Per-chunk input projection, written straight into the chunk scratch.
        def proj(x_refs, w_refs, bgi_ref, gi_ref):
            acc = None
            for xr, wr in zip(x_refs, w_refs):
                xm = xr[...].reshape(CT * Bp, xr.shape[2])
                d = jnp.dot(xm, wr[...], preferred_element_type=jnp.float32)
                acc = d if acc is None else acc + d
            gi_ref[...] = (acc + bgi_ref[...]).reshape(CT, Bp, H3)

        proj(xf, wf, bgi_f, gi_f)
        proj(xb, wb, bgi_b, gi_b)

        # Loop-invariant loads hoisted out of the recurrence.
        whh = whh_bd[...]                     # [2HP, 6HP] block-diagonal
        bnf = bhn_f[...]
        bnb = bhn_b[...]

        def step(i, h_cat):                   # h_cat = [h_f | h_b], f32, [Bp, 2HP]
            ib = CT - 1 - i
            gh = jnp.dot(h_cat.astype(whh.dtype), whh,
                         preferred_element_type=jnp.float32)   # [Bp, 6HP]
            h_f = _gru_gates(gi_f[i], gh[:, 0:H3], bnf, h_cat[:, 0:HP], HP)
            h_b = _gru_gates(gi_b[ib], gh[:, H3:2 * H3], bnb,
                             h_cat[:, HP:2 * HP], HP)
            out_f[i] = h_f.astype(out_f.dtype)          # fwd half, original order
            out_b[ib] = h_b.astype(out_b.dtype)         # bwd half
            return jnp.concatenate([h_f, h_b], axis=-1)

        h_ref[...] = jax.lax.fori_loop(0, CT, step, h_ref[...], unroll=unroll)

    return kernel


def _make_last_kernel(CT: int, NC: int, HP: int, nin: int, unroll):
    """Last GRU layer specialized for output[:, -1] with fused FC epilogue."""
    H3 = 3 * HP

    def kernel(*refs):
        x = refs[0:nin]                       # fwd-time chunk views only
        wf = refs[nin:2 * nin]
        wb = refs[2 * nin:3 * nin]
        (bgi_f, whh_f, bhn_f, bgi_b, bhn_b,
         wfc_f, wfc_b, bfc, out_ref, gi_f, h_ref) = refs[3 * nin:]

        c = pl.program_id(0)
        Bp = out_ref.shape[0]

        @pl.when(c == 0)
        def _():
            h_ref[...] = jnp.zeros_like(h_ref)
            out_ref[...] = jnp.zeros_like(out_ref)

        # Forward-direction projection for this chunk.
        acc = None
        for xr, wr in zip(x, wf):
            xm = xr[...].reshape(CT * Bp, xr.shape[2])
            d = jnp.dot(xm, wr[...], preferred_element_type=jnp.float32)
            acc = d if acc is None else acc + d
        gi_f[...] = (acc + bgi_f[...]).reshape(CT, Bp, H3)

        whh = whh_f[...]
        bnf = bhn_f[...]

        def step(i, h):
            gh = jnp.dot(h.astype(whh.dtype), whh,
                         preferred_element_type=jnp.float32)
            return _gru_gates(gi_f[i], gh, bnf, h, HP)

        h_fwd = jax.lax.fori_loop(0, CT, step, h_ref[...], unroll=unroll)
        h_ref[...] = h_fwd

        @pl.when(c == NC - 1)
        def _():
            # Backward direction: output[:, -1] only needs its FIRST step
            # (t = T-1, h0 = 0  =>  gh = 0 and the z*h term vanishes).
            gb = None
            for xr, wr in zip(x, wb):
                d = jnp.dot(xr[CT - 1], wr[...],
                            preferred_element_type=jnp.float32)
                gb = d if gb is None else gb + d
            gb = gb + bgi_b[...]
            r_b = jax.nn.sigmoid(gb[:, 0:HP])
            z_b = jax.nn.sigmoid(gb[:, HP:2 * HP])
            n_b = jnp.tanh(gb[:, 2 * HP:3 * HP] + r_b * bhn_b[...])
            h_b = (1.0 - z_b) * n_b

            # Fused FC epilogue: concat([h_fwd, h_b]) @ W_fc + b_fc.
            out_ref[...] = (
                jnp.dot(h_fwd.astype(wfc_f.dtype), wfc_f[...],
                        preferred_element_type=jnp.float32)
                + jnp.dot(h_b.astype(wfc_b.dtype), wfc_b[...],
                          preferred_element_type=jnp.float32)
                + bfc[...]).astype(out_ref.dtype)

    return kernel


# ----------------------------------------------------------------------------
# pallas_call wrappers
# ----------------------------------------------------------------------------
def gru_bidir_layer(xs, lp, *, t_chunk, act_dtype):
    """xs: tuple of [T, BP, FPi] -> (out_f, out_b), each [T, BP, HP]."""
    nin = len(xs)
    T, BP, _ = xs[0].shape
    HP = lp["bhn_f"].shape[1]
    CT = t_chunk
    NC = T // CT
    unroll = True if CT <= 8 else 8
    kernel = _make_bidir_kernel(CT, HP, nin, unroll)

    fwd_specs = [pl.BlockSpec((CT, BP, x.shape[2]), lambda c: (c, 0, 0))
                 for x in xs]
    bwd_specs = [pl.BlockSpec((CT, BP, x.shape[2]), lambda c: (NC - 1 - c, 0, 0))
                 for x in xs]
    w_specs = [_VMEM] * (2 * nin + 5)

    out_shape = (jax.ShapeDtypeStruct((T, BP, HP), act_dtype),
                 jax.ShapeDtypeStruct((T, BP, HP), act_dtype))
    out_specs = (pl.BlockSpec((CT, BP, HP), lambda c: (c, 0, 0)),
                 pl.BlockSpec((CT, BP, HP), lambda c: (NC - 1 - c, 0, 0)))

    args = (list(xs) + list(xs) + list(lp["wih_f"]) + list(lp["wih_b"])
            + [lp["bgi_f"], lp["bgi_b"], lp["whh_bd"], lp["bhn_f"], lp["bhn_b"]])

    return pl.pallas_call(
        kernel,
        grid=(NC,),
        out_shape=out_shape,
        in_specs=fwd_specs + bwd_specs + w_specs,
        out_specs=out_specs,
        scratch_shapes=[pltpu.VMEM((CT, BP, 3 * HP), jnp.float32),
                        pltpu.VMEM((CT, BP, 3 * HP), jnp.float32),
                        pltpu.VMEM((BP, 2 * HP), jnp.float32)],
        compiler_params=pltpu.CompilerParams(
            dimension_semantics=("arbitrary",),
            vmem_limit_bytes=_VMEM_LIMIT),
    )(*args)


def gru_last_layer_fc(xs, lp, *, t_chunk):
    """xs: tuple of [T, BP, FPi] -> logits [BP, CP] (last layer + FC fused)."""
    nin = len(xs)
    T, BP, _ = xs[0].shape
    HP = lp["bhn_f"].shape[1]
    CP = lp["bfc"].shape[1]
    CT = t_chunk
    NC = T // CT
    unroll = True if CT <= 8 else 8
    kernel = _make_last_kernel(CT, NC, HP, nin, unroll)

    x_specs = [pl.BlockSpec((CT, BP, x.shape[2]), lambda c: (c, 0, 0))
               for x in xs]
    w_specs = [_VMEM] * (2 * nin + 8)

    args = (list(xs) + list(lp["wih_f"]) + list(lp["wih_b"])
            + [lp["bgi_f"], lp["whh_f"], lp["bhn_f"], lp["bgi_b"], lp["bhn_b"],
               lp["wfc_f"], lp["wfc_b"], lp["bfc"]])

    return pl.pallas_call(
        kernel,
        grid=(NC,),
        out_shape=jax.ShapeDtypeStruct((BP, CP), jnp.float32),
        in_specs=x_specs + w_specs,
        out_specs=pl.BlockSpec((BP, CP), lambda c: (0, 0)),
        scratch_shapes=[pltpu.VMEM((CT, BP, 3 * HP), jnp.float32),
                        pltpu.VMEM((BP, HP), jnp.float32)],
        compiler_params=pltpu.CompilerParams(
            dimension_semantics=("arbitrary",),
            vmem_limit_bytes=_VMEM_LIMIT),
    )(*args)


# ----------------------------------------------------------------------------
# One-time weight preparation (torch layout -> lane-aligned kernel layout)
# ----------------------------------------------------------------------------
def _gate_pad_cols(w_t, H, HP):
    """[Fin, 3H] -> [Fin, 3*HP]; gate g at columns [g*HP, g*HP+H)."""
    out = jnp.zeros((w_t.shape[0], 3 * HP), jnp.float32)
    for g in range(3):
        out = out.at[:, g * HP:g * HP + H].set(w_t[:, g * H:(g + 1) * H])
    return out


def _pad_rows(w, FP):
    return jnp.zeros((FP, w.shape[1]), w.dtype).at[:w.shape[0]].set(w)


def _prep_gi_bias(b_ih, b_hh, H, HP):
    """b_ih (all gates) + b_hh (r, z only) folded into the hoisted projection."""
    b = b_ih.astype(jnp.float32).at[:2 * H].add(b_hh[:2 * H].astype(jnp.float32))
    out = jnp.zeros((1, 3 * HP), jnp.float32)
    for g in range(3):
        out = out.at[0, g * HP:g * HP + H].set(b[g * H:(g + 1) * H])
    return out


def _prep_bhn(b_hh, H, HP):
    """n-gate part of b_hh, kept separate (multiplied by r inside the step)."""
    return jnp.zeros((1, HP), jnp.float32).at[0, :H].set(
        b_hh[2 * H:].astype(jnp.float32))


def prepare_params(params, *, compute_dtype=jnp.float32):
    """Run ONCE at load time: pad / split / block-diag-pack all weights."""
    num_layers = len(params["gru"])
    emb = params["embedding"].astype(jnp.float32)
    V, E = emb.shape
    H = params["gru"][0]["w_hh_f"].shape[1]
    C = params["fc_b"].shape[0]
    HP = _round_up(H, LANE)
    EP = _round_up(E, LANE)
    CP = _round_up(C, LANE)
    cd = compute_dtype

    prep = {"emb": jnp.zeros((V, EP), jnp.float32).at[:, :E].set(emb),
            "layers": []}

    for l in range(num_layers):
        p = params["gru"][l]
        last = (l == num_layers - 1)

        def prep_wih(w):
            wt = _gate_pad_cols(w.T.astype(jnp.float32), H, HP)   # [Fin, 3HP]
            if l == 0:
                return [_pad_rows(wt, EP).astype(cd)]
            # layer > 0: split rows by input source (fwd half / bwd half).
            return [_pad_rows(wt[:H], HP).astype(cd),
                    _pad_rows(wt[H:], HP).astype(cd)]

        whh_f = _pad_rows(_gate_pad_cols(p["w_hh_f"].T.astype(jnp.float32), H, HP), HP)
        whh_b = _pad_rows(_gate_pad_cols(p["w_hh_b"].T.astype(jnp.float32), H, HP), HP)

        layer = {
            "wih_f": prep_wih(p["w_ih_f"]),
            "wih_b": prep_wih(p["w_ih_b"]),
            "bgi_f": _prep_gi_bias(p["b_ih_f"], p["b_hh_f"], H, HP),
            "bgi_b": _prep_gi_bias(p["b_ih_b"], p["b_hh_b"], H, HP),
            "bhn_f": _prep_bhn(p["b_hh_f"], H, HP),
            "bhn_b": _prep_bhn(p["b_hh_b"], H, HP),
        }
        if not last:
            # Block-diagonal W_hh: one K = 2*HP matmul yields both directions' gh.
            whh_bd = (jnp.zeros((2 * HP, 6 * HP), jnp.float32)
                      .at[0:HP, 0:3 * HP].set(whh_f)
                      .at[HP:2 * HP, 3 * HP:6 * HP].set(whh_b))
            layer["whh_bd"] = whh_bd.astype(cd)
        else:
            layer["whh_f"] = whh_f.astype(cd)
            wfc_t = params["fc_w"].T.astype(jnp.float32)           # [2H, C]
            layer["wfc_f"] = jnp.zeros((HP, CP), jnp.float32).at[:H, :C].set(
                wfc_t[:H]).astype(cd)
            layer["wfc_b"] = jnp.zeros((HP, CP), jnp.float32).at[:H, :C].set(
                wfc_t[H:]).astype(cd)
            layer["bfc"] = jnp.zeros((1, CP), jnp.float32).at[0, :C].set(
                params["fc_b"].astype(jnp.float32))
        prep["layers"].append(layer)

    return prep


# ----------------------------------------------------------------------------
# SeqClassifier forward
# ----------------------------------------------------------------------------
def seq_classifier_forward(tokens, prep, *, num_class, t_chunk=None,
                           compute_dtype=jnp.float32):
    """tokens: int32 [B, T] -> logits [B, num_class].

    Matches PyTorch: embed -> bidirectional GRU (batch_first) ->
    output[:, -1] -> Linear(2H, C).
    """
    B, T = tokens.shape
    BP = _round_up(B, SUBLANE)
    layers = prep["layers"]
    num_layers = len(layers)
    EP = prep["emb"].shape[1]

    if t_chunk is None:
        t_chunk = _pick_chunk(T, 32)
    assert T % t_chunk == 0, (T, t_chunk)

    # Embedding lookup (plain-JAX glue) -> time-major, zero-padded layout.
    # TODO(synk): fuse the gather/transpose/pad into the first-layer kernel via
    # PrefetchScalarGridSpec row gather to avoid this padded HBM round-trip.
    emb = prep["emb"][tokens]                                     # [B, T, EP]
    x0 = jnp.zeros((T, BP, EP), compute_dtype).at[:, :B, :].set(
        jnp.transpose(emb, (1, 0, 2)).astype(compute_dtype))

    xs = (x0,)
    for l in range(num_layers - 1):
        xs = gru_bidir_layer(xs, layers[l], t_chunk=t_chunk,
                             act_dtype=compute_dtype)
    logits = gru_last_layer_fc(xs, layers[-1], t_chunk=t_chunk)
    return logits[:B, :num_class]


# ----------------------------------------------------------------------------
# Pure-JAX reference (for verification)
# ----------------------------------------------------------------------------
def _gru_dir_ref(x, w_ih, w_hh, b_ih, b_hh, reverse):
    T, B, _ = x.shape
    H = w_hh.shape[0] // 3
    xs = x[::-1] if reverse else x

    def step(h, x_t):
        gi = x_t @ w_ih.T + b_ih
        gh = h @ w_hh.T + b_hh
        r = jax.nn.sigmoid(gi[:, :H] + gh[:, :H])
        z = jax.nn.sigmoid(gi[:, H:2 * H] + gh[:, H:2 * H])
        n = jnp.tanh(gi[:, 2 * H:] + r * gh[:, 2 * H:])
        h_new = (1.0 - z) * n + z * h
        return h_new, h_new

    _, outs = jax.lax.scan(step, jnp.zeros((B, H), jnp.float32), xs)
    return outs[::-1] if reverse else outs


def seq_classifier_ref(tokens, params, *, num_layers):
    emb = params["embedding"][tokens]
    x = jnp.transpose(emb, (1, 0, 2))
    for layer in range(num_layers):
        p = params["gru"][layer]
        of = _gru_dir_ref(x, p["w_ih_f"], p["w_hh_f"], p["b_ih_f"], p["b_hh_f"], False)
        ob = _gru_dir_ref(x, p["w_ih_b"], p["w_hh_b"], p["b_ih_b"], p["b_hh_b"], True)
        x = jnp.concatenate([of, ob], axis=-1)
    return x[-1] @ params["fc_w"].T + params["fc_b"]


# ----------------------------------------------------------------------------
# Deterministic parameter init (shapes match torch.nn.GRU / Linear)
# ----------------------------------------------------------------------------
def init_params(key, vocab, emb_dim, hidden, num_layers, num_class):
    ks = iter(jax.random.split(key, 4 + 8 * num_layers))
    scale = 1.0 / jnp.sqrt(hidden)

    def u(k, shape):
        return jax.random.uniform(k, shape, jnp.float32, -scale, scale)

    params = {
        "embedding": jax.random.normal(next(ks), (vocab, emb_dim), jnp.float32),
        "gru": [],
        "fc_w": u(next(ks), (num_class, 2 * hidden)),   # torch Linear: [out, in]
        "fc_b": u(next(ks), (num_class,)),
    }
    for layer in range(num_layers):
        in_size = emb_dim if layer == 0 else 2 * hidden
        params["gru"].append({
            "w_ih_f": u(next(ks), (3 * hidden, in_size)),
            "w_hh_f": u(next(ks), (3 * hidden, hidden)),
            "b_ih_f": u(next(ks), (3 * hidden,)),
            "b_hh_f": u(next(ks), (3 * hidden,)),
            "w_ih_b": u(next(ks), (3 * hidden, in_size)),
            "w_hh_b": u(next(ks), (3 * hidden, hidden)),
            "b_ih_b": u(next(ks), (3 * hidden,)),
            "b_hh_b": u(next(ks), (3 * hidden,)),
        })
    return params


# ----------------------------------------------------------------------------
if __name__ == "__main__":
    VOCAB, EMB, HIDDEN, NUM_LAYERS, NUM_CLASS = 50, 16, 32, 2, 6
    B, T = 2, 8

    key = jax.random.PRNGKey(0)
    k_param, k_tok = jax.random.split(key)
    params = init_params(k_param, VOCAB, EMB, HIDDEN, NUM_LAYERS, NUM_CLASS)
    tokens = jax.random.randint(k_tok, (B, T), 0, VOCAB, dtype=jnp.int32)

    ref = seq_classifier_ref(tokens, params, num_layers=NUM_LAYERS)

    # f32 path (tight check); t_chunk=4 -> grid of 2 chunks exercises streaming.
    prep = prepare_params(params, compute_dtype=jnp.float32)
    fwd = jax.jit(functools.partial(seq_classifier_forward, num_class=NUM_CLASS,
                                    t_chunk=4, compute_dtype=jnp.float32))
    logits = jax.block_until_ready(fwd(tokens, prep))
    assert logits.shape == (B, NUM_CLASS)
    # Tolerance allows for MXU f32 pass-decomposition differences vs XLA.
    assert jnp.allclose(logits, ref, atol=2e-3, rtol=2e-3), (logits, ref)

    # bf16 MXU-input path (v5e/v6e/v7x throughput option); gate math stays f32.
    prep_bf16 = prepare_params(params, compute_dtype=jnp.bfloat16)
    fwd_bf16 = jax.jit(functools.partial(seq_classifier_forward, num_class=NUM_CLASS,
                                         t_chunk=4, compute_dtype=jnp.bfloat16))
    logits_bf16 = jax.block_until_ready(fwd_bf16(tokens, prep_bf16))
    assert logits_bf16.shape == (B, NUM_CLASS)
    assert jnp.allclose(logits_bf16.astype(jnp.float32), ref, atol=1e-1, rtol=1e-1)

    print("KERNEL_OK")
</pallas_src>

<mosaic_0001>
module attributes {stable_mosaic.version = 11 : i64} {
  func.func @kernel(%arg0: i32, %arg1: memref<4x8x128xf32, #tpu.memory_space<vmem>>, %arg2: memref<4x8x128xf32, #tpu.memory_space<vmem>>, %arg3: memref<128x384xf32, #tpu.memory_space<vmem>>, %arg4: memref<128x384xf32, #tpu.memory_space<vmem>>, %arg5: memref<128x384xf32, #tpu.memory_space<vmem>>, %arg6: memref<128x384xf32, #tpu.memory_space<vmem>>, %arg7: memref<1x384xf32, #tpu.memory_space<vmem>>, %arg8: memref<128x384xf32, #tpu.memory_space<vmem>>, %arg9: memref<1x128xf32, #tpu.memory_space<vmem>>, %arg10: memref<1x384xf32, #tpu.memory_space<vmem>>, %arg11: memref<1x128xf32, #tpu.memory_space<vmem>>, %arg12: memref<128x128xf32, #tpu.memory_space<vmem>>, %arg13: memref<128x128xf32, #tpu.memory_space<vmem>>, %arg14: memref<1x128xf32, #tpu.memory_space<vmem>>, %arg15: memref<8x128xf32, #tpu.memory_space<vmem>>, %arg16: memref<4x8x384xf32, #tpu.memory_space<vmem>>, %arg17: memref<8x128xf32, #tpu.memory_space<vmem>>) attributes {dimension_semantics = [#tpu.dimension_semantics<arbitrary>], iteration_bounds = array<i64: 2>, scalar_prefetch = 0 : i64, scratch_operands = 2 : i64, tpu.core_type = #tpu.core_type<tc>, window_params = [{transform_indices = @transform_0, window_bounds = array<i64: 4, 8, 128>}, {transform_indices = @transform_1, window_bounds = array<i64: 4, 8, 128>}, {pipeline_mode = #tpu.pipeline_mode<synchronous>, transform_indices = @transform_2, window_bounds = array<i64: 128, 384>}, {pipeline_mode = #tpu.pipeline_mode<synchronous>, transform_indices = @transform_3, window_bounds = array<i64: 128, 384>}, {pipeline_mode = #tpu.pipeline_mode<synchronous>, transform_indices = @transform_4, window_bounds = array<i64: 128, 384>}, {pipeline_mode = #tpu.pipeline_mode<synchronous>, transform_indices = @transform_5, window_bounds = array<i64: 128, 384>}, {pipeline_mode = #tpu.pipeline_mode<synchronous>, transform_indices = @transform_6, window_bounds = array<i64: 1, 384>}, {pipeline_mode = #tpu.pipeline_mode<synchronous>, transform_indices = @transform_7, window_bounds = array<i64: 128, 384>}, {pipeline_mode = #tpu.pipeline_mode<synchronous>, transform_indices = @transform_8, window_bounds = array<i64: 1, 128>}, {pipeline_mode = #tpu.pipeline_mode<synchronous>, transform_indices = @transform_9, window_bounds = array<i64: 1, 384>}, {pipeline_mode = #tpu.pipeline_mode<synchronous>, transform_indices = @transform_10, window_bounds = array<i64: 1, 128>}, {pipeline_mode = #tpu.pipeline_mode<synchronous>, transform_indices = @transform_11, window_bounds = array<i64: 128, 128>}, {pipeline_mode = #tpu.pipeline_mode<synchronous>, transform_indices = @transform_12, window_bounds = array<i64: 128, 128>}, {pipeline_mode = #tpu.pipeline_mode<synchronous>, transform_indices = @transform_13, window_bounds = array<i64: 1, 128>}, {pipeline_mode = #tpu.pipeline_mode<synchronous>, transform_indices = @transform_14, window_bounds = array<i64: 8, 128>}]} {
    %c0_i32 = arith.constant 0 : i32
    %0 = arith.cmpi eq, %arg0, %c0_i32 : i32
    %1 = arith.extui %0 : i1 to i32
    %c0_i32_0 = arith.constant 0 : i32
    %2 = arith.cmpi ne, %1, %c0_i32_0 : i32
    scf.if %2 {
      %cst_51 = arith.constant 0.000000e+00 : f32
      %152 = vector.broadcast %cst_51 : f32 to vector<8x128xf32>
      %c0_52 = arith.constant 0 : index
      %c0_53 = arith.constant 0 : index
      %153 = vector.load %arg17[%c0_52, %c0_53] : memref<8x128xf32, #tpu.memory_space<vmem>>, vector<8x128xf32>
      tpu.vector_store %arg17[%c0_52, %c0_53], %152 {strides = array<i32>} : memref<8x128xf32, #tpu.memory_space<vmem>>, vector<8x128xf32>,
      %cst_54 = arith.constant 0.000000e+00 : f32
      %154 = vector.broadcast %cst_54 : f32 to vector<8x128xf32>
      %c0_55 = arith.constant 0 : index
      %c0_56 = arith.constant 0 : index
      %155 = vector.load %arg15[%c0_55, %c0_56] : memref<8x128xf32, #tpu.memory_space<vmem>>, vector<8x128xf32>
      tpu.vector_store %arg15[%c0_55, %c0_56], %154 {strides = array<i32>} : memref<8x128xf32, #tpu.memory_space<vmem>>, vector<8x128xf32>,
    } else {
    }
    %c0 = arith.constant 0 : index
    %c0_1 = arith.constant 0 : index
    %c0_2 = arith.constant 0 : index
    %3 = vector.load %arg1[%c0, %c0_1, %c0_2] : memref<4x8x128xf32, #tpu.memory_space<vmem>>, vector<4x8x128xf32>
    %4 = vector.shape_cast %3 : vector<4x8x128xf32> to vector<32x128xf32>
    %c0_3 = arith.constant 0 : index
    %c0_4 = arith.constant 0 : index
    %5 = vector.load %arg3[%c0_3, %c0_4] : memref<128x384xf32, #tpu.memory_space<vmem>>, vector<128x384xf32>
    %cst = arith.constant dense<0.000000e+00> : vector<32x384xf32>
    %6 = tpu.matmul %4, %5, %cst {dimension_numbers = #tpu.dot_dimension_numbers<[1], [0], [0], [1], [0, 0, 1, 1], [], []>} : vector<32x128xf32>, vector<128x384xf32>, vector<32x384xf32> -> vector<32x384xf32>
    %c0_5 = arith.constant 0 : index
    %c0_6 = arith.constant 0 : index
    %c0_7 = arith.constant 0 : index
    %7 = vector.load %arg2[%c0_5, %c0_6, %c0_7] : memref<4x8x128xf32, #tpu.memory_space<vmem>>, vector<4x8x128xf32>
    %8 = vector.shape_cast %7 : vector<4x8x128xf32> to vector<32x128xf32>
    %c0_8 = arith.constant 0 : index
    %c0_9 = arith.constant 0 : index
    %9 = vector.load %arg4[%c0_8, %c0_9] : memref<128x384xf32, #tpu.memory_space<vmem>>, vector<128x384xf32>
    %cst_10 = arith.constant dense<0.000000e+00> : vector<32x384xf32>
    %10 = tpu.matmul %8, %9, %cst_10 {dimension_numbers = #tpu.dot_dimension_numbers<[1], [0], [0], [1], [0, 0, 1, 1], [], []>} : vector<32x128xf32>, vector<128x384xf32>, vector<32x384xf32> -> vector<32x384xf32>
    %11 = arith.addf %6, %10 : vector<32x384xf32>
    %c0_11 = arith.constant 0 : index
    %c0_12 = arith.constant 0 : index
    %12 = vector.load %arg7[%c0_11, %c0_12] : memref<1x384xf32, #tpu.memory_space<vmem>>, vector<1x384xf32>
    %13 = vector.broadcast %12 : vector<1x384xf32> to vector<32x384xf32>
    %14 = arith.addf %11, %13 : vector<32x384xf32>
    %15 = vector.shape_cast %14 : vector<32x384xf32> to vector<4x8x384xf32>
    %c0_13 = arith.constant 0 : index
    %c0_14 = arith.constant 0 : index
    %c0_15 = arith.constant 0 : index
    %16 = vector.load %arg16[%c0_13, %c0_14, %c0_15] : memref<4x8x384xf32, #tpu.memory_space<vmem>>, vector<4x8x384xf32>
    tpu.vector_store %arg16[%c0_13, %c0_14, %c0_15], %15 {strides = array<i32>} : memref<4x8x384xf32, #tpu.memory_space<vmem>>, vector<4x8x384xf32>,
    %c0_16 = arith.constant 0 : index
    %c0_17 = arith.constant 0 : index
    %17 = vector.load %arg8[%c0_16, %c0_17] : memref<128x384xf32, #tpu.memory_space<vmem>>, vector<128x384xf32>
    %c0_18 = arith.constant 0 : index
    %c0_19 = arith.constant 0 : index
    %18 = vector.load %arg9[%c0_18, %c0_19] : memref<1x128xf32, #tpu.memory_space<vmem>>, vector<1x128xf32>
    %c0_20 = arith.constant 0 : index
    %c0_21 = arith.constant 0 : index
    %19 = vector.load %arg17[%c0_20, %c0_21] : memref<8x128xf32, #tpu.memory_space<vmem>>, vector<8x128xf32>
    %c0_i32_22 = arith.constant 0 : i32
    %cst_23 = arith.constant dense<0.000000e+00> : vector<8x384xf32>
    %20 = tpu.matmul %19, %17, %cst_23 {dimension_numbers = #tpu.dot_dimension_numbers<[1], [0], [0], [1], [0, 0, 1, 1], [], []>} : vector<8x128xf32>, vector<128x384xf32>, vector<8x384xf32> -> vector<8x384xf32>
    %21 = arith.index_cast %c0_i32_22 : i32 to index
    %c0_24 = arith.constant 0 : index
    %c0_25 = arith.constant 0 : index
    %22 = vector.load %arg16[%21, %c0_24, %c0_25] : memref<4x8x384xf32, #tpu.memory_space<vmem>>, vector<1x8x384xf32>
    %23 = vector.shape_cast %22 : vector<1x8x384xf32> to vector<8x384xf32>
    %24 = vector.extract_strided_slice %23 {offsets = [0, 0], sizes = [8, 128], strides = [1, 1]} : vector<8x384xf32> to vector<8x128xf32>
    %25 = vector.extract_strided_slice %20 {offsets = [0, 0], sizes = [8, 128], strides = [1, 1]} : vector<8x384xf32> to vector<8x128xf32>
    %26 = arith.addf %24, %25 : vector<8x128xf32>
    %27 = arith.negf %26 : vector<8x128xf32>
    %28 = math.exp %27 : vector<8x128xf32>
    %cst_26 = arith.constant 1.000000e+00 : f32
    %29 = vector.broadcast %cst_26 : f32 to vector<8x128xf32>
    %30 = arith.addf %29, %28 : vector<8x128xf32>
    %31 = arith.divf %29, %30 : vector<8x128xf32>
    %32 = vector.extract_strided_slice %23 {offsets = [0, 128], sizes = [8, 128], strides = [1, 1]} : vector<8x384xf32> to vector<8x128xf32>
    %33 = vector.extract_strided_slice %20 {offsets = [0, 128], sizes = [8, 128], strides = [1, 1]} : vector<8x384xf32> to vector<8x128xf32>
    %34 = arith.addf %32, %33 : vector<8x128xf32>
    %35 = arith.negf %34 : vector<8x128xf32>
    %36 = math.exp %35 : vector<8x128xf32>
    %cst_27 = arith.constant 1.000000e+00 : f32
    %37 = vector.broadcast %cst_27 : f32 to vector<8x128xf32>
    %38 = arith.addf %37, %36 : vector<8x128xf32>
    %39 = arith.divf %37, %38 : vector<8x128xf32>
    %40 = vector.extract_strided_slice %23 {offsets = [0, 256], sizes = [8, 128], strides = [1, 1]} : vector<8x384xf32> to vector<8x128xf32>
    %41 = vector.extract_strided_slice %20 {offsets = [0, 256], sizes = [8, 128], strides = [1, 1]} : vector<8x384xf32> to vector<8x128xf32>
    %42 = vector.broadcast %18 : vector<1x128xf32> to vector<8x128xf32>
    %43 = arith.addf %41, %42 : vector<8x128xf32>
    %44 = arith.mulf %31, %43 : vector<8x128xf32>
    %45 = arith.addf %40, %44 : vector<8x128xf32>
    %46 = math.tanh %45 : vector<8x128xf32>
    %cst_28 = arith.constant 1.000000e+00 : f32
    %47 = vector.broadcast %cst_28 : f32 to vector<8x128xf32>
    %48 = arith.subf %47, %39 : vector<8x128xf32>
    %49 = arith.mulf %48, %46 : vector<8x128xf32>
    %50 = arith.mulf %39, %19 : vector<8x128xf32>
    %51 = arith.addf %49, %50 : vector<8x128xf32>
    %c1_i32 = arith.constant 1 : i32
    %cst_29 = arith.constant dense<0.000000e+00> : vector<8x384xf32>
    %52 = tpu.matmul %51, %17, %cst_29 {dimension_numbers = #tpu.dot_dimension_numbers<[1], [0], [0], [1], [0, 0, 1, 1], [], []>} : vector<8x128xf32>, vector<128x384xf32>, vector<8x384xf32> -> vector<8x384xf32>
    %53 = arith.index_cast %c1_i32 : i32 to index
    %c0_30 = arith.constant 0 : index
    %c0_31 = arith.constant 0 : index
    %54 = vector.load %arg16[%53, %c0_30, %c0_31] : memref<4x8x384xf32, #tpu.memory_space<vmem>>, vector<1x8x384xf32>
    %55 = vector.shape_cast %54 : vector<1x8x384xf32> to vector<8x384xf32>
    %56 = vector.extract_strided_slice %55 {offsets = [0, 0], sizes = [8, 128], strides = [1, 1]} : vector<8x384xf32> to vector<8x128xf32>
    %57 = vector.extract_strided_slice %52 {offsets = [0, 0], sizes = [8, 128], strides = [1, 1]} : vector<8x384xf32> to vector<8x128xf32>
    %58 = arith.addf %56, %57 : vector<8x128xf32>
    %59 = arith.negf %58 : vector<8x128xf32>
    %60 = math.exp %59 : vector<8x128xf32>
    %cst_32 = arith.constant 1.000000e+00 : f32
    %61 = vector.broadcast %cst_32 : f32 to vector<8x128xf32>
    %62 = arith.addf %61, %60 : vector<8x128xf32>
    %63 = arith.divf %61, %62 : vector<8x128xf32>
    %64 = vector.extract_strided_slice %55 {offsets = [0, 128], sizes = [8, 128], strides = [1, 1]} : vector<8x384xf32> to vector<8x128xf32>
    %65 = vector.extract_strided_slice %52 {offsets = [0, 128], sizes = [8, 128], strides = [1, 1]} : vector<8x384xf32> to vector<8x128xf32>
    %66 = arith.addf %64, %65 : vector<8x128xf32>
    %67 = arith.negf %66 : vector<8x128xf32>
    %68 = math.exp %67 : vector<8x128xf32>
    %cst_33 = arith.constant 1.000000e+00 : f32
    %69 = vector.broadcast %cst_33 : f32 to vector<8x128xf32>
    %70 = arith.addf %69, %68 : vector<8x128xf32>
    %71 = arith.divf %69, %70 : vector<8x128xf32>
    %72 = vector.extract_strided_slice %55 {offsets = [0, 256], sizes = [8, 128], strides = [1, 1]} : vector<8x384xf32> to vector<8x128xf32>
    %73 = vector.extract_strided_slice %52 {offsets = [0, 256], sizes = [8, 128], strides = [1, 1]} : vector<8x384xf32> to vector<8x128xf32>
    %74 = vector.broadcast %18 : vector<1x128xf32> to vector<8x128xf32>
    %75 = arith.addf %73, %74 : vector<8x128xf32>
    %76 = arith.mulf %63, %75 : vector<8x128xf32>
    %77 = arith.addf %72, %76 : vector<8x128xf32>
    %78 = math.tanh %77 : vector<8x128xf32>
    %cst_34 = arith.constant 1.000000e+00 : f32
    %79 = vector.broadcast %cst_34 : f32 to vector<8x128xf32>
    %80 = arith.subf %79, %71 : vector<8x128xf32>
    %81 = arith.mulf %80, %78 : vector<8x128xf32>
    %82 = arith.mulf %71, %51 : vector<8x128xf32>
    %83 = arith.addf %81, %82 : vector<8x128xf32>
    %c2_i32 = arith.constant 2 : i32
    %cst_35 = arith.constant dense<0.000000e+00> : vector<8x384xf32>
    %84 = tpu.matmul %83, %17, %cst_35 {dimension_numbers = #tpu.dot_dimension_numbers<[1], [0], [0], [1], [0, 0, 1, 1], [], []>} : vector<8x128xf32>, vector<128x384xf32>, vector<8x384xf32> -> vector<8x384xf32>
    %85 = arith.index_cast %c2_i32 : i32 to index
    %c0_36 = arith.constant 0 : index
    %c0_37 = arith.constant 0 : index
    %86 = vector.load %arg16[%85, %c0_36, %c0_37] : memref<4x8x384xf32, #tpu.memory_space<vmem>>, vector<1x8x384xf32>
    %87 = vector.shape_cast %86 : vector<1x8x384xf32> to vector<8x384xf32>
    %88 = vector.extract_strided_slice %87 {offsets = [0, 0], sizes = [8, 128], strides = [1, 1]} : vector<8x384xf32> to vector<8x128xf32>
    %89 = vector.extract_strided_slice %84 {offsets = [0, 0], sizes = [8, 128], strides = [1, 1]} : vector<8x384xf32> to vector<8x128xf32>
    %90 = arith.addf %88, %89 : vector<8x128xf32>
    %91 = arith.negf %90 : vector<8x128xf32>
    %92 = math.exp %91 : vector<8x128xf32>
    %cst_38 = arith.constant 1.000000e+00 : f32
    %93 = vector.broadcast %cst_38 : f32 to vector<8x128xf32>
    %94 = arith.addf %93, %92 : vector<8x128xf32>
    %95 = arith.divf %93, %94 : vector<8x128xf32>
    %96 = vector.extract_strided_slice %87 {offsets = [0, 128], sizes = [8, 128], strides = [1, 1]} : vector<8x384xf32> to vector<8x128xf32>
    %97 = vector.extract_strided_slice %84 {offsets = [0, 128], sizes = [8, 128], strides = [1, 1]} : vector<8x384xf32> to vector<8x128xf32>
    %98 = arith.addf %96, %97 : vector<8x128xf32>
    %99 = arith.negf %98 : vector<8x128xf32>
    %100 = math.exp %99 : vector<8x128xf32>
    %cst_39 = arith.constant 1.000000e+00 : f32
    %101 = vector.broadcast %cst_39 : f32 to vector<8x128xf32>
    %102 = arith.addf %101, %100 : vector<8x128xf32>
    %103 = arith.divf %101, %102 : vector<8x128xf32>
    %104 = vector.extract_strided_slice %87 {offsets = [0, 256], sizes = [8, 128], strides = [1, 1]} : vector<8x384xf32> to vector<8x128xf32>
    %105 = vector.extract_strided_slice %84 {offsets = [0, 256], sizes = [8, 128], strides = [1, 1]} : vector<8x384xf32> to vector<8x128xf32>
    %106 = vector.broadcast %18 : vector<1x128xf32> to vector<8x128xf32>
    %107 = arith.addf %105, %106 : vector<8x128xf32>
    %108 = arith.mulf %95, %107 : vector<8x128xf32>
    %109 = arith.addf %104, %108 : vector<8x128xf32>
    %110 = math.tanh %109 : vector<8x128xf32>
    %cst_40 = arith.constant 1.000000e+00 : f32
    %111 = vector.broadcast %cst_40 : f32 to vector<8x128xf32>
    %112 = arith.subf %111, %103 : vector<8x128xf32>
    %113 = arith.mulf %112, %110 : vector<8x128xf32>
    %114 = arith.mulf %103, %83 : vector<8x128xf32>
    %115 = arith.addf %113, %114 : vector<8x128xf32>
    %c3_i32 = arith.constant 3 : i32
    %cst_41 = arith.constant dense<0.000000e+00> : vector<8x384xf32>
    %116 = tpu.matmul %115, %17, %cst_41 {dimension_numbers = #tpu.dot_dimension_numbers<[1], [0], [0], [1], [0, 0, 1, 1], [], []>} : vector<8x128xf32>, vector<128x384xf32>, vector<8x384xf32> -> vector<8x384xf32>
    %117 = arith.index_cast %c3_i32 : i32 to index
    %c0_42 = arith.constant 0 : index
    %c0_43 = arith.constant 0 : index
    %118 = vector.load %arg16[%117, %c0_42, %c0_43] : memref<4x8x384xf32, #tpu.memory_space<vmem>>, vector<1x8x384xf32>
    %119 = vector.shape_cast %118 : vector<1x8x384xf32> to vector<8x384xf32>
    %120 = vector.extract_strided_slice %119 {offsets = [0, 0], sizes = [8, 128], strides = [1, 1]} : vector<8x384xf32> to vector<8x128xf32>
    %121 = vector.extract_strided_slice %116 {offsets = [0, 0], sizes = [8, 128], strides = [1, 1]} : vector<8x384xf32> to vector<8x128xf32>
    %122 = arith.addf %120, %121 : vector<8x128xf32>
    %123 = arith.negf %122 : vector<8x128xf32>
    %124 = math.exp %123 : vector<8x128xf32>
    %cst_44 = arith.constant 1.000000e+00 : f32
    %125 = vector.broadcast %cst_44 : f32 to vector<8x128xf32>
    %126 = arith.addf %125, %124 : vector<8x128xf32>
    %127 = arith.divf %125, %126 : vector<8x128xf32>
    %128 = vector.extract_strided_slice %119 {offsets = [0, 128], sizes = [8, 128], strides = [1, 1]} : vector<8x384xf32> to vector<8x128xf32>
    %129 = vector.extract_strided_slice %116 {offsets = [0, 128], sizes = [8, 128], strides = [1, 1]} : vector<8x384xf32> to vector<8x128xf32>
    %130 = arith.addf %128, %129 : vector<8x128xf32>
    %131 = arith.negf %130 : vector<8x128xf32>
    %132 = math.exp %131 : vector<8x128xf32>
    %cst_45 = arith.constant 1.000000e+00 : f32
    %133 = vector.broadcast %cst_45 : f32 to vector<8x128xf32>
    %134 = arith.addf %133, %132 : vector<8x128xf32>
    %135 = arith.divf %133, %134 : vector<8x128xf32>
    %136 = vector.extract_strided_slice %119 {offsets = [0, 256], sizes = [8, 128], strides = [1, 1]} : vector<8x384xf32> to vector<8x128xf32>
    %137 = vector.extract_strided_slice %116 {offsets = [0, 256], sizes = [8, 128], strides = [1, 1]} : vector<8x384xf32> to vector<8x128xf32>
    %138 = vector.broadcast %18 : vector<1x128xf32> to vector<8x128xf32>
    %139 = arith.addf %137, %138 : vector<8x128xf32>
    %140 = arith.mulf %127, %139 : vector<8x128xf32>
    %141 = arith.addf %136, %140 : vector<8x128xf32>
    %142 = math.tanh %141 : vector<8x128xf32>
    %cst_46 = arith.constant 1.000000e+00 : f32
    %143 = vector.broadcast %cst_46 : f32 to vector<8x128xf32>
    %144 = arith.subf %143, %135 : vector<8x128xf32>
    %145 = arith.mulf %144, %142 : vector<8x128xf32>
    %146 = arith.mulf %135, %115 : vector<8x128xf32>
    %147 = arith.addf %145, %146 : vector<8x128xf32>
    %c4_i32 = arith.constant 4 : i32
    %c0_47 = arith.constant 0 : index
    %c0_48 = arith.constant 0 : index
    %148 = vector.load %arg17[%c0_47, %c0_48] : memref<8x128xf32, #tpu.memory_space<vmem>>, vector<8x128xf32>
    tpu.vector_store %arg17[%c0_47, %c0_48], %147 {strides = array<i32>} : memref<8x128xf32, #tpu.memory_space<vmem>>, vector<8x128xf32>,
    %c1_i32_49 = arith.constant 1 : i32
    %149 = arith.cmpi eq, %arg0, %c1_i32_49 : i32
    %150 = arith.extui %149 : i1 to i32
    %c0_i32_50 = arith.constant 0 : i32
    %151 = arith.cmpi ne, %150, %c0_i32_50 : i32
    scf.if %151 {
      %c3 = arith.constant 3 : index
      %c0_51 = arith.constant 0 : index
      %c0_52 = arith.constant 0 : index
      %152 = vector.load %arg1[%c3, %c0_51, %c0_52] : memref<4x8x128xf32, #tpu.memory_space<vmem>>, vector<1x8x128xf32>
      %153 = vector.shape_cast %152 : vector<1x8x128xf32> to vector<8x128xf32>
      %c0_53 = arith.constant 0 : index
      %c0_54 = arith.constant 0 : index
      %154 = vector.load %arg5[%c0_53, %c0_54] : memref<128x384xf32, #tpu.memory_space<vmem>>, vector<128x384xf32>
      %cst_55 = arith.constant dense<0.000000e+00> : vector<8x384xf32>
      %155 = tpu.matmul %153, %154, %cst_55 {dimension_numbers = #tpu.dot_dimension_numbers<[1], [0], [0], [1], [0, 0, 1, 1], [], []>} : vector<8x128xf32>, vector<128x384xf32>, vector<8x384xf32> -> vector<8x384xf32>
      %c3_56 = arith.constant 3 : index
      %c0_57 = arith.constant 0 : index
      %c0_58 = arith.constant 0 : index
      %156 = vector.load %arg2[%c3_56, %c0_57, %c0_58] : memref<4x8x128xf32, #tpu.memory_space<vmem>>, vector<1x8x128xf32>
      %157 = vector.shape_cast %156 : vector<1x8x128xf32> to vector<8x128xf32>
      %c0_59 = arith.constant 0 : index
      %c0_60 = arith.constant 0 : index
      %158 = vector.load %arg6[%c0_59, %c0_60] : memref<128x384xf32, #tpu.memory_space<vmem>>, vector<128x384xf32>
      %cst_61 = arith.constant dense<0.000000e+00> : vector<8x384xf32>
      %159 = tpu.matmul %157, %158, %cst_61 {dimension_numbers = #tpu.dot_dimension_numbers<[1], [0], [0], [1], [0, 0, 1, 1], [], []>} : vector<8x128xf32>, vector<128x384xf32>, vector<8x384xf32> -> vector<8x384xf32>
      %160 = arith.addf %155, %159 : vector<8x384xf32>
      %c0_62 = arith.constant 0 : index
      %c0_63 = arith.constant 0 : index
      %161 = vector.load %arg10[%c0_62, %c0_63] : memref<1x384xf32, #tpu.memory_space<vmem>>, vector<1x384xf32>
      %162 = vector.broadcast %161 : vector<1x384xf32> to vector<8x384xf32>
      %163 = arith.addf %160, %162 : vector<8x384xf32>
      %164 = vector.extract_strided_slice %163 {offsets = [0, 0], sizes = [8, 128], strides = [1, 1]} : vector<8x384xf32> to vector<8x128xf32>
      %165 = arith.negf %164 : vector<8x128xf32>
      %166 = math.exp %165 : vector<8x128xf32>
      %cst_64 = arith.constant 1.000000e+00 : f32
      %167 = vector.broadcast %cst_64 : f32 to vector<8x128xf32>
      %168 = arith.addf %167, %166 : vector<8x128xf32>
      %169 = arith.divf %167, %168 : vector<8x128xf32>
      %170 = vector.extract_strided_slice %163 {offsets = [0, 128], sizes = [8, 128], strides = [1, 1]} : vector<8x384xf32> to vector<8x128xf32>
      %171 = arith.negf %170 : vector<8x128xf32>
      %172 = math.exp %171 : vector<8x128xf32>
      %cst_65 = arith.constant 1.000000e+00 : f32
      %173 = vector.broadcast %cst_65 : f32 to vector<8x128xf32>
      %174 = arith.addf %173, %172 : vector<8x128xf32>
      %175 = arith.divf %173, %174 : vector<8x128xf32>
      %176 = vector.extract_strided_slice %163 {offsets = [0, 256], sizes = [8, 128], strides = [1, 1]} : vector<8x384xf32> to vector<8x128xf32>
      %c0_66 = arith.constant 0 : index
      %c0_67 = arith.constant 0 : index
      %177 = vector.load %arg11[%c0_66, %c0_67] : memref<1x128xf32, #tpu.memory_space<vmem>>, vector<1x128xf32>
      %178 = vector.broadcast %177 : vector<1x128xf32> to vector<8x128xf32>
      %179 = arith.mulf %169, %178 : vector<8x128xf32>
      %180 = arith.addf %176, %179 : vector<8x128xf32>
      %181 = math.tanh %180 : vector<8x128xf32>
      %cst_68 = arith.constant 1.000000e+00 : f32
      %182 = vector.broadcast %cst_68 : f32 to vector<8x128xf32>
      %183 = arith.subf %182, %175 : vector<8x128xf32>
      %184 = arith.mulf %183, %181 : vector<8x128xf32>
      %c0_69 = arith.constant 0 : index
      %c0_70 = arith.constant 0 : index
      %185 = vector.load %arg12[%c0_69, %c0_70] : memref<128x128xf32, #tpu.memory_space<vmem>>, vector<128x128xf32>
      %cst_71 = arith.constant dense<0.000000e+00> : vector<8x128xf32>
      %186 = tpu.matmul %147, %185, %cst_71 {dimension_numbers = #tpu.dot_dimension_numbers<[1], [0], [0], [1], [0, 0, 1, 1], [], []>} : vector<8x128xf32>, vector<128x128xf32>, vector<8x128xf32> -> vector<8x128xf32>
      %c0_72 = arith.constant 0 : index
      %c0_73 = arith.constant 0 : index
      %187 = vector.load %arg13[%c0_72, %c0_73] : memref<128x128xf32, #tpu.memory_space<vmem>>, vector<128x128xf32>
      %cst_74 = arith.constant dense<0.000000e+00> : vector<8x128xf32>
      %188 = tpu.matmul %184, %187, %cst_74 {dimension_numbers = #tpu.dot_dimension_numbers<[1], [0], [0], [1], [0, 0, 1, 1], [], []>} : vector<8x128xf32>, vector<128x128xf32>, vector<8x128xf32> -> vector<8x128xf32>
      %189 = arith.addf %186, %188 : vector<8x128xf32>
      %c0_75 = arith.constant 0 : index
      %c0_76 = arith.constant 0 : index
      %190 = vector.load %arg14[%c0_75, %c0_76] : memref<1x128xf32, #tpu.memory_space<vmem>>, vector<1x128xf32>
      %191 = vector.broadcast %190 : vector<1x128xf32> to vector<8x128xf32>
      %192 = arith.addf %189, %191 : vector<8x128xf32>
      %c0_77 = arith.constant 0 : index
      %c0_78 = arith.constant 0 : index
      %193 = vector.load %arg15[%c0_77, %c0_78] : memref<8x128xf32, #tpu.memory_space<vmem>>, vector<8x128xf32>
      tpu.vector_store %arg15[%c0_77, %c0_78], %192 {strides = array<i32>} : memref<8x128xf32, #tpu.memory_space<vmem>>, vector<8x128xf32>,
    } else {
    }
    return
  }
  func.func @transform_0(%arg0: i32) -> (i32, i32, i32) {
    %c0_i32 = arith.constant 0 : i32
    %c0_i32_0 = arith.constant 0 : i32
    %c0_i32_1 = arith.constant 0 : i32
    return %arg0, %c0_i32, %c0_i32_0 : i32, i32, i32
  }
  func.func @transform_1(%arg0: i32) -> (i32, i32, i32) {
    %c0_i32 = arith.constant 0 : i32
    %c0_i32_0 = arith.constant 0 : i32
    %c0_i32_1 = arith.constant 0 : i32
    return %arg0, %c0_i32, %c0_i32_0 : i32, i32, i32
  }
  func.func @transform_2(%arg0: i32) -> (i32, i32) {
    %c0_i32 = arith.constant 0 : i32
    %c0_i32_0 = arith.constant 0 : i32
    %c0_i32_1 = arith.constant 0 : i32
    return %c0_i32, %c0_i32_0 : i32, i32
  }
  func.func @transform_3(%arg0: i32) -> (i32, i32) {
    %c0_i32 = arith.constant 0 : i32
    %c0_i32_0 = arith.constant 0 : i32
    %c0_i32_1 = arith.constant 0 : i32
    return %c0_i32, %c0_i32_0 : i32, i32
  }
  func.func @transform_4(%arg0: i32) -> (i32, i32) {
    %c0_i32 = arith.constant 0 : i32
    %c0_i32_0 = arith.constant 0 : i32
    %c0_i32_1 = arith.constant 0 : i32
    return %c0_i32, %c0_i32_0 : i32, i32
  }
  func.func @transform_5(%arg0: i32) -> (i32, i32) {
    %c0_i32 = arith.constant 0 : i32
    %c0_i32_0 = arith.constant 0 : i32
    %c0_i32_1 = arith.constant 0 : i32
    return %c0_i32, %c0_i32_0 : i32, i32
  }
  func.func @transform_6(%arg0: i32) -> (i32, i32) {
    %c0_i32 = arith.constant 0 : i32
    %c0_i32_0 = arith.constant 0 : i32
    %c0_i32_1 = arith.constant 0 : i32
    return %c0_i32, %c0_i32_0 : i32, i32
  }
  func.func @transform_7(%arg0: i32) -> (i32, i32) {
    %c0_i32 = arith.constant 0 : i32
    %c0_i32_0 = arith.constant 0 : i32
    %c0_i32_1 = arith.constant 0 : i32
    return %c0_i32, %c0_i32_0 : i32, i32
  }
  func.func @transform_8(%arg0: i32) -> (i32, i32) {
    %c0_i32 = arith.constant 0 : i32
    %c0_i32_0 = arith.constant 0 : i32
    %c0_i32_1 = arith.constant 0 : i32
    return %c0_i32, %c0_i32_0 : i32, i32
  }
  func.func @transform_9(%arg0: i32) -> (i32, i32) {
    %c0_i32 = arith.constant 0 : i32
    %c0_i32_0 = arith.constant 0 : i32
    %c0_i32_1 = arith.constant 0 : i32
    return %c0_i32, %c0_i32_0 : i32, i32
  }
  func.func @transform_10(%arg0: i32) -> (i32, i32) {
    %c0_i32 = arith.constant 0 : i32
    %c0_i32_0 = arith.constant 0 : i32
    %c0_i32_1 = arith.constant 0 : i32
    return %c0_i32, %c0_i32_0 : i32, i32
  }
  func.func @transform_11(%arg0: i32) -> (i32, i32) {
    %c0_i32 = arith.constant 0 : i32
    %c0_i32_0 = arith.constant 0 : i32
    %c0_i32_1 = arith.constant 0 : i32
    return %c0_i32, %c0_i32_0 : i32, i32
  }
  func.func @transform_12(%arg0: i32) -> (i32, i32) {
    %c0_i32 = arith.constant 0 : i32
    %c0_i32_0 = arith.constant 0 : i32
    %c0_i32_1 = arith.constant 0 : i32
    return %c0_i32, %c0_i32_0 : i32, i32
  }
  func.func @transform_13(%arg0: i32) -> (i32, i32) {
    %c0_i32 = arith.constant 0 : i32
    %c0_i32_0 = arith.constant 0 : i32
    %c0_i32_1 = arith.constant 0 : i32
    return %c0_i32, %c0_i32_0 : i32, i32
  }
  func.func @transform_14(%arg0: i32) -> (i32, i32) {
    %c0_i32 = arith.constant 0 : i32
    %c0_i32_0 = arith.constant 0 : i32
    %c0_i32_1 = arith.constant 0 : i32
    return %c0_i32, %c0_i32_0 : i32, i32
  }
}

module attributes {stable_mosaic.version = 11 : i64} {
  func.func @kernel(%arg0: i32, %arg1: memref<4x8x128xf32, #tpu.memory_space<vmem>>, %arg2: memref<4x8x128xf32, #tpu.memory_space<vmem>>, %arg3: memref<128x384xf32, #tpu.memory_space<vmem>>, %arg4: memref<128x384xf32, #tpu.memory_space<vmem>>, %arg5: memref<1x384xf32, #tpu.memory_space<vmem>>, %arg6: memref<1x384xf32, #tpu.memory_space<vmem>>, %arg7: memref<256x768xf32, #tpu.memory_space<vmem>>, %arg8: memref<1x128xf32, #tpu.memory_space<vmem>>, %arg9: memref<1x128xf32, #tpu.memory_space<vmem>>, %arg10: memref<4x8x128xf32, #tpu.memory_space<vmem>>, %arg11: memref<4x8x128xf32, #tpu.memory_space<vmem>>, %arg12: memref<4x8x384xf32, #tpu.memory_space<vmem>>, %arg13: memref<4x8x384xf32, #tpu.memory_space<vmem>>, %arg14: memref<8x256xf32, #tpu.memory_space<vmem>>) attributes {dimension_semantics = [#tpu.dimension_semantics<arbitrary>], iteration_bounds = array<i64: 2>, scalar_prefetch = 0 : i64, scratch_operands = 3 : i64, tpu.core_type = #tpu.core_type<tc>, window_params = [{transform_indices = @transform_0, window_bounds = array<i64: 4, 8, 128>}, {transform_indices = @transform_1, window_bounds = array<i64: 4, 8, 128>}, {pipeline_mode = #tpu.pipeline_mode<synchronous>, transform_indices = @transform_2, window_bounds = array<i64: 128, 384>}, {pipeline_mode = #tpu.pipeline_mode<synchronous>, transform_indices = @transform_3, window_bounds = array<i64: 128, 384>}, {pipeline_mode = #tpu.pipeline_mode<synchronous>, transform_indices = @transform_4, window_bounds = array<i64: 1, 384>}, {pipeline_mode = #tpu.pipeline_mode<synchronous>, transform_indices = @transform_5, window_bounds = array<i64: 1, 384>}, {pipeline_mode = #tpu.pipeline_mode<synchronous>, transform_indices = @transform_6, window_bounds = array<i64: 256, 768>}, {pipeline_mode = #tpu.pipeline_mode<synchronous>, transform_indices = @transform_7, window_bounds = array<i64: 1, 128>}, {pipeline_mode = #tpu.pipeline_mode<synchronous>, transform_indices = @transform_8, window_bounds = array<i64: 1, 128>}, {transform_indices = @transform_9, window_bounds = array<i64: 4, 8, 128>}, {transform_indices = @transform_10, window_bounds = array<i64: 4, 8, 128>}]} {
    %c0_i32 = arith.constant 0 : i32
    %0 = arith.cmpi eq, %arg0, %c0_i32 : i32
    %1 = arith.extui %0 : i1 to i32
    %c0_i32_0 = arith.constant 0 : i32
    %2 = arith.cmpi ne, %1, %c0_i32_0 : i32
    scf.if %2 {
      %cst_96 = arith.constant 0.000000e+00 : f32
      %334 = vector.broadcast %cst_96 : f32 to vector<8x256xf32>
      %c0_97 = arith.constant 0 : index
      %c0_98 = arith.constant 0 : index
      %335 = vector.load %arg14[%c0_97, %c0_98] : memref<8x256xf32, #tpu.memory_space<vmem>>, vector<8x256xf32>
      tpu.vector_store %arg14[%c0_97, %c0_98], %334 {strides = array<i32>} : memref<8x256xf32, #tpu.memory_space<vmem>>, vector<8x256xf32>,
    } else {
    }
    %c0 = arith.constant 0 : index
    %c0_1 = arith.constant 0 : index
    %c0_2 = arith.constant 0 : index
    %3 = vector.load %arg1[%c0, %c0_1, %c0_2] : memref<4x8x128xf32, #tpu.memory_space<vmem>>, vector<4x8x128xf32>
    %4 = vector.shape_cast %3 : vector<4x8x128xf32> to vector<32x128xf32>
    %c0_3 = arith.constant 0 : index
    %c0_4 = arith.constant 0 : index
    %5 = vector.load %arg3[%c0_3, %c0_4] : memref<128x384xf32, #tpu.memory_space<vmem>>, vector<128x384xf32>
    %cst = arith.constant dense<0.000000e+00> : vector<32x384xf32>
    %6 = tpu.matmul %4, %5, %cst {dimension_numbers = #tpu.dot_dimension_numbers<[1], [0], [0], [1], [0, 0, 1, 1], [], []>} : vector<32x128xf32>, vector<128x384xf32>, vector<32x384xf32> -> vector<32x384xf32>
    %c0_5 = arith.constant 0 : index
    %c0_6 = arith.constant 0 : index
    %7 = vector.load %arg5[%c0_5, %c0_6] : memref<1x384xf32, #tpu.memory_space<vmem>>, vector<1x384xf32>
    %8 = vector.broadcast %7 : vector<1x384xf32> to vector<32x384xf32>
    %9 = arith.addf %6, %8 : vector<32x384xf32>
    %10 = vector.shape_cast %9 : vector<32x384xf32> to vector<4x8x384xf32>
    %c0_7 = arith.constant 0 : index
    %c0_8 = arith.constant 0 : index
    %c0_9 = arith.constant 0 : index
    %11 = vector.load %arg12[%c0_7, %c0_8, %c0_9] : memref<4x8x384xf32, #tpu.memory_space<vmem>>, vector<4x8x384xf32>
    tpu.vector_store %arg12[%c0_7, %c0_8, %c0_9], %10 {strides = array<i32>} : memref<4x8x384xf32, #tpu.memory_space<vmem>>, vector<4x8x384xf32>,
    %c0_10 = arith.constant 0 : index
    %c0_11 = arith.constant 0 : index
    %c0_12 = arith.constant 0 : index
    %12 = vector.load %arg2[%c0_10, %c0_11, %c0_12] : memref<4x8x128xf32, #tpu.memory_space<vmem>>, vector<4x8x128xf32>
    %13 = vector.shape_cast %12 : vector<4x8x128xf32> to vector<32x128xf32>
    %c0_13 = arith.constant 0 : index
    %c0_14 = arith.constant 0 : index
    %14 = vector.load %arg4[%c0_13, %c0_14] : memref<128x384xf32, #tpu.memory_space<vmem>>, vector<128x384xf32>
    %cst_15 = arith.constant dense<0.000000e+00> : vector<32x384xf32>
    %15 = tpu.matmul %13, %14, %cst_15 {dimension_numbers = #tpu.dot_dimension_numbers<[1], [0], [0], [1], [0, 0, 1, 1], [], []>} : vector<32x128xf32>, vector<128x384xf32>, vector<32x384xf32> -> vector<32x384xf32>
    %c0_16 = arith.constant 0 : index
    %c0_17 = arith.constant 0 : index
    %16 = vector.load %arg6[%c0_16, %c0_17] : memref<1x384xf32, #tpu.memory_space<vmem>>, vector<1x384xf32>
    %17 = vector.broadcast %16 : vector<1x384xf32> to vector<32x384xf32>
    %18 = arith.addf %15, %17 : vector<32x384xf32>
    %19 = vector.shape_cast %18 : vector<32x384xf32> to vector<4x8x384xf32>
    %c0_18 = arith.constant 0 : index
    %c0_19 = arith.constant 0 : index
    %c0_20 = arith.constant 0 : index
    %20 = vector.load %arg13[%c0_18, %c0_19, %c0_20] : memref<4x8x384xf32, #tpu.memory_space<vmem>>, vector<4x8x384xf32>
    tpu.vector_store %arg13[%c0_18, %c0_19, %c0_20], %19 {strides = array<i32>} : memref<4x8x384xf32, #tpu.memory_space<vmem>>, vector<4x8x384xf32>,
    %c0_21 = arith.constant 0 : index
    %c0_22 = arith.constant 0 : index
    %21 = vector.load %arg7[%c0_21, %c0_22] : memref<256x768xf32, #tpu.memory_space<vmem>>, vector<256x768xf32>
    %c0_23 = arith.constant 0 : index
    %c0_24 = arith.constant 0 : index
    %22 = vector.load %arg8[%c0_23, %c0_24] : memref<1x128xf32, #tpu.memory_space<vmem>>, vector<1x128xf32>
    %c0_25 = arith.constant 0 : index
    %c0_26 = arith.constant 0 : index
    %23 = vector.load %arg9[%c0_25, %c0_26] : memref<1x128xf32, #tpu.memory_space<vmem>>, vector<1x128xf32>
    %c0_27 = arith.constant 0 : index
    %c0_28 = arith.constant 0 : index
    %24 = vector.load %arg14[%c0_27, %c0_28] : memref<8x256xf32, #tpu.memory_space<vmem>>, vector<8x256xf32>
    %c0_i32_29 = arith.constant 0 : i32
    %c3_i32 = arith.constant 3 : i32
    %25 = arith.subi %c3_i32, %c0_i32_29 : i32
    %cst_30 = arith.constant dense<0.000000e+00> : vector<8x768xf32>
    %26 = tpu.matmul %24, %21, %cst_30 {dimension_numbers = #tpu.dot_dimension_numbers<[1], [0], [0], [1], [0, 0, 1, 1], [], []>} : vector<8x256xf32>, vector<256x768xf32>, vector<8x768xf32> -> vector<8x768xf32>
    %27 = arith.index_cast %c0_i32_29 : i32 to index
    %c0_31 = arith.constant 0 : index
    %c0_32 = arith.constant 0 : index
    %28 = vector.load %arg12[%27, %c0_31, %c0_32] : memref<4x8x384xf32, #tpu.memory_space<vmem>>, vector<1x8x384xf32>
    %29 = vector.shape_cast %28 : vector<1x8x384xf32> to vector<8x384xf32>
    %30 = vector.extract_strided_slice %26 {offsets = [0, 0], sizes = [8, 384], strides = [1, 1]} : vector<8x768xf32> to vector<8x384xf32>
    %31 = vector.extract_strided_slice %24 {offsets = [0, 0], sizes = [8, 128], strides = [1, 1]} : vector<8x256xf32> to vector<8x128xf32>
    %32 = vector.extract_strided_slice %29 {offsets = [0, 0], sizes = [8, 128], strides = [1, 1]} : vector<8x384xf32> to vector<8x128xf32>
    %33 = vector.extract_strided_slice %30 {offsets = [0, 0], sizes = [8, 128], strides = [1, 1]} : vector<8x384xf32> to vector<8x128xf32>
    %34 = arith.addf %32, %33 : vector<8x128xf32>
    %35 = arith.negf %34 : vector<8x128xf32>
    %36 = math.exp %35 : vector<8x128xf32>
    %cst_33 = arith.constant 1.000000e+00 : f32
    %37 = vector.broadcast %cst_33 : f32 to vector<8x128xf32>
    %38 = arith.addf %37, %36 : vector<8x128xf32>
    %39 = arith.divf %37, %38 : vector<8x128xf32>
    %40 = vector.extract_strided_slice %29 {offsets = [0, 128], sizes = [8, 128], strides = [1, 1]} : vector<8x384xf32> to vector<8x128xf32>
    %41 = vector.extract_strided_slice %30 {offsets = [0, 128], sizes = [8, 128], strides = [1, 1]} : vector<8x384xf32> to vector<8x128xf32>
    %42 = arith.addf %40, %41 : vector<8x128xf32>
    %43 = arith.negf %42 : vector<8x128xf32>
    %44 = math.exp %43 : vector<8x128xf32>
    %cst_34 = arith.constant 1.000000e+00 : f32
    %45 = vector.broadcast %cst_34 : f32 to vector<8x128xf32>
    %46 = arith.addf %45, %44 : vector<8x128xf32>
    %47 = arith.divf %45, %46 : vector<8x128xf32>
    %48 = vector.extract_strided_slice %29 {offsets = [0, 256], sizes = [8, 128], strides = [1, 1]} : vector<8x384xf32> to vector<8x128xf32>
    %49 = vector.extract_strided_slice %30 {offsets = [0, 256], sizes = [8, 128], strides = [1, 1]} : vector<8x384xf32> to vector<8x128xf32>
    %50 = vector.broadcast %22 : vector<1x128xf32> to vector<8x128xf32>
    %51 = arith.addf %49, %50 : vector<8x128xf32>
    %52 = arith.mulf %39, %51 : vector<8x128xf32>
    %53 = arith.addf %48, %52 : vector<8x128xf32>
    %54 = math.tanh %53 : vector<8x128xf32>
    %cst_35 = arith.constant 1.000000e+00 : f32
    %55 = vector.broadcast %cst_35 : f32 to vector<8x128xf32>
    %56 = arith.subf %55, %47 : vector<8x128xf32>
    %57 = arith.mulf %56, %54 : vector<8x128xf32>
    %58 = arith.mulf %47, %31 : vector<8x128xf32>
    %59 = arith.addf %57, %58 : vector<8x128xf32>
    %60 = arith.index_cast %25 : i32 to index
    %c0_36 = arith.constant 0 : index
    %c0_37 = arith.constant 0 : index
    %61 = vector.load %arg13[%60, %c0_36, %c0_37] : memref<4x8x384xf32, #tpu.memory_space<vmem>>, vector<1x8x384xf32>
    %62 = vector.shape_cast %61 : vector<1x8x384xf32> to vector<8x384xf32>
    %63 = vector.extract_strided_slice %26 {offsets = [0, 384], sizes = [8, 384], strides = [1, 1]} : vector<8x768xf32> to vector<8x384xf32>
    %64 = vector.extract_strided_slice %24 {offsets = [0, 128], sizes = [8, 128], strides = [1, 1]} : vector<8x256xf32> to vector<8x128xf32>
    %65 = vector.extract_strided_slice %62 {offsets = [0, 0], sizes = [8, 128], strides = [1, 1]} : vector<8x384xf32> to vector<8x128xf32>
    %66 = vector.extract_strided_slice %63 {offsets = [0, 0], sizes = [8, 128], strides = [1, 1]} : vector<8x384xf32> to vector<8x128xf32>
    %67 = arith.addf %65, %66 : vector<8x128xf32>
    %68 = arith.negf %67 : vector<8x128xf32>
    %69 = math.exp %68 : vector<8x128xf32>
    %cst_38 = arith.constant 1.000000e+00 : f32
    %70 = vector.broadcast %cst_38 : f32 to vector<8x128xf32>
    %71 = arith.addf %70, %69 : vector<8x128xf32>
    %72 = arith.divf %70, %71 : vector<8x128xf32>
    %73 = vector.extract_strided_slice %62 {offsets = [0, 128], sizes = [8, 128], strides = [1, 1]} : vector<8x384xf32> to vector<8x128xf32>
    %74 = vector.extract_strided_slice %63 {offsets = [0, 128], sizes = [8, 128], strides = [1, 1]} : vector<8x384xf32> to vector<8x128xf32>
    %75 = arith.addf %73, %74 : vector<8x128xf32>
    %76 = arith.negf %75 : vector<8x128xf32>
    %77 = math.exp %76 : vector<8x128xf32>
    %cst_39 = arith.constant 1.000000e+00 : f32
    %78 = vector.broadcast %cst_39 : f32 to vector<8x128xf32>
    %79 = arith.addf %78, %77 : vector<8x128xf32>
    %80 = arith.divf %78, %79 : vector<8x128xf32>
    %81 = vector.extract_strided_slice %62 {offsets = [0, 256], sizes = [8, 128], strides = [1, 1]} : vector<8x384xf32> to vector<8x128xf32>
    %82 = vector.extract_strided_slice %63 {offsets = [0, 256], sizes = [8, 128], strides = [1, 1]} : vector<8x384xf32> to vector<8x128xf32>
    %83 = vector.broadcast %23 : vector<1x128xf32> to vector<8x128xf32>
    %84 = arith.addf %82, %83 : vector<8x128xf32>
    %85 = arith.mulf %72, %84 : vector<8x128xf32>
    %86 = arith.addf %81, %85 : vector<8x128xf32>
    %87 = math.tanh %86 : vector<8x128xf32>
    %cst_40 = arith.constant 1.000000e+00 : f32
    %88 = vector.broadcast %cst_40 : f32 to vector<8x128xf32>
    %89 = arith.subf %88, %80 : vector<8x128xf32>
    %90 = arith.mulf %89, %87 : vector<8x128xf32>
    %91 = arith.mulf %80, %64 : vector<8x128xf32>
    %92 = arith.addf %90, %91 : vector<8x128xf32>
    %93 = arith.index_cast %c0_i32_29 : i32 to index
    %c0_41 = arith.constant 0 : index
    %c0_42 = arith.constant 0 : index
    %94 = vector.load %arg10[%93, %c0_41, %c0_42] : memref<4x8x128xf32, #tpu.memory_space<vmem>>, vector<1x8x128xf32>
    %95 = vector.shape_cast %94 : vector<1x8x128xf32> to vector<8x128xf32>
    %96 = vector.shape_cast %59 : vector<8x128xf32> to vector<1x8x128xf32>
    tpu.vector_store %arg10[%93, %c0_41, %c0_42], %96 {strides = array<i32>} : memref<4x8x128xf32, #tpu.memory_space<vmem>>, vector<1x8x128xf32>,
    %97 = arith.index_cast %25 : i32 to index
    %c0_43 = arith.constant 0 : index
    %c0_44 = arith.constant 0 : index
    %98 = vector.load %arg11[%97, %c0_43, %c0_44] : memref<4x8x128xf32, #tpu.memory_space<vmem>>, vector<1x8x128xf32>
    %99 = vector.shape_cast %98 : vector<1x8x128xf32> to vector<8x128xf32>
    %100 = vector.shape_cast %92 : vector<8x128xf32> to vector<1x8x128xf32>
    tpu.vector_store %arg11[%97, %c0_43, %c0_44], %100 {strides = array<i32>} : memref<4x8x128xf32, #tpu.memory_space<vmem>>, vector<1x8x128xf32>,
    %101 = tpu.concatenate %59, %92 in 1 : vector<8x128xf32>, vector<8x128xf32> -> vector<8x256xf32>
    %c1_i32 = arith.constant 1 : i32
    %c3_i32_45 = arith.constant 3 : i32
    %102 = arith.subi %c3_i32_45, %c1_i32 : i32
    %cst_46 = arith.constant dense<0.000000e+00> : vector<8x768xf32>
    %103 = tpu.matmul %101, %21, %cst_46 {dimension_numbers = #tpu.dot_dimension_numbers<[1], [0], [0], [1], [0, 0, 1, 1], [], []>} : vector<8x256xf32>, vector<256x768xf32>, vector<8x768xf32> -> vector<8x768xf32>
    %104 = arith.index_cast %c1_i32 : i32 to index
    %c0_47 = arith.constant 0 : index
    %c0_48 = arith.constant 0 : index
    %105 = vector.load %arg12[%104, %c0_47, %c0_48] : memref<4x8x384xf32, #tpu.memory_space<vmem>>, vector<1x8x384xf32>
    %106 = vector.shape_cast %105 : vector<1x8x384xf32> to vector<8x384xf32>
    %107 = vector.extract_strided_slice %103 {offsets = [0, 0], sizes = [8, 384], strides = [1, 1]} : vector<8x768xf32> to vector<8x384xf32>
    %108 = vector.extract_strided_slice %101 {offsets = [0, 0], sizes = [8, 128], strides = [1, 1]} : vector<8x256xf32> to vector<8x128xf32>
    %109 = vector.extract_strided_slice %106 {offsets = [0, 0], sizes = [8, 128], strides = [1, 1]} : vector<8x384xf32> to vector<8x128xf32>
    %110 = vector.extract_strided_slice %107 {offsets = [0, 0], sizes = [8, 128], strides = [1, 1]} : vector<8x384xf32> to vector<8x128xf32>
    %111 = arith.addf %109, %110 : vector<8x128xf32>
    %112 = arith.negf %111 : vector<8x128xf32>
    %113 = math.exp %112 : vector<8x128xf32>
    %cst_49 = arith.constant 1.000000e+00 : f32
    %114 = vector.broadcast %cst_49 : f32 to vector<8x128xf32>
    %115 = arith.addf %114, %113 : vector<8x128xf32>
    %116 = arith.divf %114, %115 : vector<8x128xf32>
    %117 = vector.extract_strided_slice %106 {offsets = [0, 128], sizes = [8, 128], strides = [1, 1]} : vector<8x384xf32> to vector<8x128xf32>
    %118 = vector.extract_strided_slice %107 {offsets = [0, 128], sizes = [8, 128], strides = [1, 1]} : vector<8x384xf32> to vector<8x128xf32>
    %119 = arith.addf %117, %118 : vector<8x128xf32>
    %120 = arith.negf %119 : vector<8x128xf32>
    %121 = math.exp %120 : vector<8x128xf32>
    %cst_50 = arith.constant 1.000000e+00 : f32
    %122 = vector.broadcast %cst_50 : f32 to vector<8x128xf32>
    %123 = arith.addf %122, %121 : vector<8x128xf32>
    %124 = arith.divf %122, %123 : vector<8x128xf32>
    %125 = vector.extract_strided_slice %106 {offsets = [0, 256], sizes = [8, 128], strides = [1, 1]} : vector<8x384xf32> to vector<8x128xf32>
    %126 = vector.extract_strided_slice %107 {offsets = [0, 256], sizes = [8, 128], strides = [1, 1]} : vector<8x384xf32> to vector<8x128xf32>
    %127 = vector.broadcast %22 : vector<1x128xf32> to vector<8x128xf32>
    %128 = arith.addf %126, %127 : vector<8x128xf32>
    %129 = arith.mulf %116, %128 : vector<8x128xf32>
    %130 = arith.addf %125, %129 : vector<8x128xf32>
    %131 = math.tanh %130 : vector<8x128xf32>
    %cst_51 = arith.constant 1.000000e+00 : f32
    %132 = vector.broadcast %cst_51 : f32 to vector<8x128xf32>
    %133 = arith.subf %132, %124 : vector<8x128xf32>
    %134 = arith.mulf %133, %131 : vector<8x128xf32>
    %135 = arith.mulf %124, %108 : vector<8x128xf32>
    %136 = arith.addf %134, %135 : vector<8x128xf32>
    %137 = arith.index_cast %102 : i32 to index
    %c0_52 = arith.constant 0 : index
    %c0_53 = arith.constant 0 : index
    %138 = vector.load %arg13[%137, %c0_52, %c0_53] : memref<4x8x384xf32, #tpu.memory_space<vmem>>, vector<1x8x384xf32>
    %139 = vector.shape_cast %138 : vector<1x8x384xf32> to vector<8x384xf32>
    %140 = vector.extract_strided_slice %103 {offsets = [0, 384], sizes = [8, 384], strides = [1, 1]} : vector<8x768xf32> to vector<8x384xf32>
    %141 = vector.extract_strided_slice %101 {offsets = [0, 128], sizes = [8, 128], strides = [1, 1]} : vector<8x256xf32> to vector<8x128xf32>
    %142 = vector.extract_strided_slice %139 {offsets = [0, 0], sizes = [8, 128], strides = [1, 1]} : vector<8x384xf32> to vector<8x128xf32>
    %143 = vector.extract_strided_slice %140 {offsets = [0, 0], sizes = [8, 128], strides = [1, 1]} : vector<8x384xf32> to vector<8x128xf32>
    %144 = arith.addf %142, %143 : vector<8x128xf32>
    %145 = arith.negf %144 : vector<8x128xf32>
    %146 = math.exp %145 : vector<8x128xf32>
    %cst_54 = arith.constant 1.000000e+00 : f32
    %147 = vector.broadcast %cst_54 : f32 to vector<8x128xf32>
    %148 = arith.addf %147, %146 : vector<8x128xf32>
    %149 = arith.divf %147, %148 : vector<8x128xf32>
    %150 = vector.extract_strided_slice %139 {offsets = [0, 128], sizes = [8, 128], strides = [1, 1]} : vector<8x384xf32> to vector<8x128xf32>
    %151 = vector.extract_strided_slice %140 {offsets = [0, 128], sizes = [8, 128], strides = [1, 1]} : vector<8x384xf32> to vector<8x128xf32>
    %152 = arith.addf %150, %151 : vector<8x128xf32>
    %153 = arith.negf %152 : vector<8x128xf32>
    %154 = math.exp %153 : vector<8x128xf32>
    %cst_55 = arith.constant 1.000000e+00 : f32
    %155 = vector.broadcast %cst_55 : f32 to vector<8x128xf32>
    %156 = arith.addf %155, %154 : vector<8x128xf32>
    %157 = arith.divf %155, %156 : vector<8x128xf32>
    %158 = vector.extract_strided_slice %139 {offsets = [0, 256], sizes = [8, 128], strides = [1, 1]} : vector<8x384xf32> to vector<8x128xf32>
    %159 = vector.extract_strided_slice %140 {offsets = [0, 256], sizes = [8, 128], strides = [1, 1]} : vector<8x384xf32> to vector<8x128xf32>
    %160 = vector.broadcast %23 : vector<1x128xf32> to vector<8x128xf32>
    %161 = arith.addf %159, %160 : vector<8x128xf32>
    %162 = arith.mulf %149, %161 : vector<8x128xf32>
    %163 = arith.addf %158, %162 : vector<8x128xf32>
    %164 = math.tanh %163 : vector<8x128xf32>
    %cst_56 = arith.constant 1.000000e+00 : f32
    %165 = vector.broadcast %cst_56 : f32 to vector<8x128xf32>
    %166 = arith.subf %165, %157 : vector<8x128xf32>
    %167 = arith.mulf %166, %164 : vector<8x128xf32>
    %168 = arith.mulf %157, %141 : vector<8x128xf32>
    %169 = arith.addf %167, %168 : vector<8x128xf32>
    %170 = arith.index_cast %c1_i32 : i32 to index
    %c0_57 = arith.constant 0 : index
    %c0_58 = arith.constant 0 : index
    %171 = vector.load %arg10[%170, %c0_57, %c0_58] : memref<4x8x128xf32, #tpu.memory_space<vmem>>, vector<1x8x128xf32>
    %172 = vector.shape_cast %171 : vector<1x8x128xf32> to vector<8x128xf32>
    %173 = vector.shape_cast %136 : vector<8x128xf32> to vector<1x8x128xf32>
    tpu.vector_store %arg10[%170, %c0_57, %c0_58], %173 {strides = array<i32>} : memref<4x8x128xf32, #tpu.memory_space<vmem>>, vector<1x8x128xf32>,
    %174 = arith.index_cast %102 : i32 to index
    %c0_59 = arith.constant 0 : index
    %c0_60 = arith.constant 0 : index
    %175 = vector.load %arg11[%174, %c0_59, %c0_60] : memref<4x8x128xf32, #tpu.memory_space<vmem>>, vector<1x8x128xf32>
    %176 = vector.shape_cast %175 : vector<1x8x128xf32> to vector<8x128xf32>
    %177 = vector.shape_cast %169 : vector<8x128xf32> to vector<1x8x128xf32>
    tpu.vector_store %arg11[%174, %c0_59, %c0_60], %177 {strides = array<i32>} : memref<4x8x128xf32, #tpu.memory_space<vmem>>, vector<1x8x128xf32>,
    %178 = tpu.concatenate %136, %169 in 1 : vector<8x128xf32>, vector<8x128xf32> -> vector<8x256xf32>
    %c2_i32 = arith.constant 2 : i32
    %c3_i32_61 = arith.constant 3 : i32
    %179 = arith.subi %c3_i32_61, %c2_i32 : i32
    %cst_62 = arith.constant dense<0.000000e+00> : vector<8x768xf32>
    %180 = tpu.matmul %178, %21, %cst_62 {dimension_numbers = #tpu.dot_dimension_numbers<[1], [0], [0], [1], [0, 0, 1, 1], [], []>} : vector<8x256xf32>, vector<256x768xf32>, vector<8x768xf32> -> vector<8x768xf32>
    %181 = arith.index_cast %c2_i32 : i32 to index
    %c0_63 = arith.constant 0 : index
    %c0_64 = arith.constant 0 : index
    %182 = vector.load %arg12[%181, %c0_63, %c0_64] : memref<4x8x384xf32, #tpu.memory_space<vmem>>, vector<1x8x384xf32>
    %183 = vector.shape_cast %182 : vector<1x8x384xf32> to vector<8x384xf32>
    %184 = vector.extract_strided_slice %180 {offsets = [0, 0], sizes = [8, 384], strides = [1, 1]} : vector<8x768xf32> to vector<8x384xf32>
    %185 = vector.extract_strided_slice %178 {offsets = [0, 0], sizes = [8, 128], strides = [1, 1]} : vector<8x256xf32> to vector<8x128xf32>
    %186 = vector.extract_strided_slice %183 {offsets = [0, 0], sizes = [8, 128], strides = [1, 1]} : vector<8x384xf32> to vector<8x128xf32>
    %187 = vector.extract_strided_slice %184 {offsets = [0, 0], sizes = [8, 128], strides = [1, 1]} : vector<8x384xf32> to vector<8x128xf32>
    %188 = arith.addf %186, %187 : vector<8x128xf32>
    %189 = arith.negf %188 : vector<8x128xf32>
    %190 = math.exp %189 : vector<8x128xf32>
    %cst_65 = arith.constant 1.000000e+00 : f32
    %191 = vector.broadcast %cst_65 : f32 to vector<8x128xf32>
    %192 = arith.addf %191, %190 : vector<8x128xf32>
    %193 = arith.divf %191, %192 : vector<8x128xf32>
    %194 = vector.extract_strided_slice %183 {offsets = [0, 128], sizes = [8, 128], strides = [1, 1]} : vector<8x384xf32> to vector<8x128xf32>
    %195 = vector.extract_strided_slice %184 {offsets = [0, 128], sizes = [8, 128], strides = [1, 1]} : vector<8x384xf32> to vector<8x128xf32>
    %196 = arith.addf %194, %195 : vector<8x128xf32>
    %197 = arith.negf %196 : vector<8x128xf32>
    %198 = math.exp %197 : vector<8x128xf32>
    %cst_66 = arith.constant 1.000000e+00 : f32
    %199 = vector.broadcast %cst_66 : f32 to vector<8x128xf32>
    %200 = arith.addf %199, %198 : vector<8x128xf32>
    %201 = arith.divf %199, %200 : vector<8x128xf32>
    %202 = vector.extract_strided_slice %183 {offsets = [0, 256], sizes = [8, 128], strides = [1, 1]} : vector<8x384xf32> to vector<8x128xf32>
    %203 = vector.extract_strided_slice %184 {offsets = [0, 256], sizes = [8, 128], strides = [1, 1]} : vector<8x384xf32> to vector<8x128xf32>
    %204 = vector.broadcast %22 : vector<1x128xf32> to vector<8x128xf32>
    %205 = arith.addf %203, %204 : vector<8x128xf32>
    %206 = arith.mulf %193, %205 : vector<8x128xf32>
    %207 = arith.addf %202, %206 : vector<8x128xf32>
    %208 = math.tanh %207 : vector<8x128xf32>
    %cst_67 = arith.constant 1.000000e+00 : f32
    %209 = vector.broadcast %cst_67 : f32 to vector<8x128xf32>
    %210 = arith.subf %209, %201 : vector<8x128xf32>
    %211 = arith.mulf %210, %208 : vector<8x128xf32>
    %212 = arith.mulf %201, %185 : vector<8x128xf32>
    %213 = arith.addf %211, %212 : vector<8x128xf32>
    %214 = arith.index_cast %179 : i32 to index
    %c0_68 = arith.constant 0 : index
    %c0_69 = arith.constant 0 : index
    %215 = vector.load %arg13[%214, %c0_68, %c0_69] : memref<4x8x384xf32, #tpu.memory_space<vmem>>, vector<1x8x384xf32>
    %216 = vector.shape_cast %215 : vector<1x8x384xf32> to vector<8x384xf32>
    %217 = vector.extract_strided_slice %180 {offsets = [0, 384], sizes = [8, 384], strides = [1, 1]} : vector<8x768xf32> to vector<8x384xf32>
    %218 = vector.extract_strided_slice %178 {offsets = [0, 128], sizes = [8, 128], strides = [1, 1]} : vector<8x256xf32> to vector<8x128xf32>
    %219 = vector.extract_strided_slice %216 {offsets = [0, 0], sizes = [8, 128], strides = [1, 1]} : vector<8x384xf32> to vector<8x128xf32>
    %220 = vector.extract_strided_slice %217 {offsets = [0, 0], sizes = [8, 128], strides = [1, 1]} : vector<8x384xf32> to vector<8x128xf32>
    %221 = arith.addf %219, %220 : vector<8x128xf32>
    %222 = arith.negf %221 : vector<8x128xf32>
    %223 = math.exp %222 : vector<8x128xf32>
    %cst_70 = arith.constant 1.000000e+00 : f32
    %224 = vector.broadcast %cst_70 : f32 to vector<8x128xf32>
    %225 = arith.addf %224, %223 : vector<8x128xf32>
    %226 = arith.divf %224, %225 : vector<8x128xf32>
    %227 = vector.extract_strided_slice %216 {offsets = [0, 128], sizes = [8, 128], strides = [1, 1]} : vector<8x384xf32> to vector<8x128xf32>
    %228 = vector.extract_strided_slice %217 {offsets = [0, 128], sizes = [8, 128], strides = [1, 1]} : vector<8x384xf32> to vector<8x128xf32>
    %229 = arith.addf %227, %228 : vector<8x128xf32>
    %230 = arith.negf %229 : vector<8x128xf32>
    %231 = math.exp %230 : vector<8x128xf32>
    %cst_71 = arith.constant 1.000000e+00 : f32
    %232 = vector.broadcast %cst_71 : f32 to vector<8x128xf32>
    %233 = arith.addf %232, %231 : vector<8x128xf32>
    %234 = arith.divf %232, %233 : vector<8x128xf32>
    %235 = vector.extract_strided_slice %216 {offsets = [0, 256], sizes = [8, 128], strides = [1, 1]} : vector<8x384xf32> to vector<8x128xf32>
    %236 = vector.extract_strided_slice %217 {offsets = [0, 256], sizes = [8, 128], strides = [1, 1]} : vector<8x384xf32> to vector<8x128xf32>
    %237 = vector.broadcast %23 : vector<1x128xf32> to vector<8x128xf32>
    %238 = arith.addf %236, %237 : vector<8x128xf32>
    %239 = arith.mulf %226, %238 : vector<8x128xf32>
    %240 = arith.addf %235, %239 : vector<8x128xf32>
    %241 = math.tanh %240 : vector<8x128xf32>
    %cst_72 = arith.constant 1.000000e+00 : f32
    %242 = vector.broadcast %cst_72 : f32 to vector<8x128xf32>
    %243 = arith.subf %242, %234 : vector<8x128xf32>
    %244 = arith.mulf %243, %241 : vector<8x128xf32>
    %245 = arith.mulf %234, %218 : vector<8x128xf32>
    %246 = arith.addf %244, %245 : vector<8x128xf32>
    %247 = arith.index_cast %c2_i32 : i32 to index
    %c0_73 = arith.constant 0 : index
    %c0_74 = arith.constant 0 : index
    %248 = vector.load %arg10[%247, %c0_73, %c0_74] : memref<4x8x128xf32, #tpu.memory_space<vmem>>, vector<1x8x128xf32>
    %249 = vector.shape_cast %248 : vector<1x8x128xf32> to vector<8x128xf32>
    %250 = vector.shape_cast %213 : vector<8x128xf32> to vector<1x8x128xf32>
    tpu.vector_store %arg10[%247, %c0_73, %c0_74], %250 {strides = array<i32>} : memref<4x8x128xf32, #tpu.memory_space<vmem>>, vector<1x8x128xf32>,
    %251 = arith.index_cast %179 : i32 to index
    %c0_75 = arith.constant 0 : index
    %c0_76 = arith.constant 0 : index
    %252 = vector.load %arg11[%251, %c0_75, %c0_76] : memref<4x8x128xf32, #tpu.memory_space<vmem>>, vector<1x8x128xf32>
    %253 = vector.shape_cast %252 : vector<1x8x128xf32> to vector<8x128xf32>
    %254 = vector.shape_cast %246 : vector<8x128xf32> to vector<1x8x128xf32>
    tpu.vector_store %arg11[%251, %c0_75, %c0_76], %254 {strides = array<i32>} : memref<4x8x128xf32, #tpu.memory_space<vmem>>, vector<1x8x128xf32>,
    %255 = tpu.concatenate %213, %246 in 1 : vector<8x128xf32>, vector<8x128xf32> -> vector<8x256xf32>
    %c3_i32_77 = arith.constant 3 : i32
    %c3_i32_78 = arith.constant 3 : i32
    %256 = arith.subi %c3_i32_78, %c3_i32_77 : i32
    %cst_79 = arith.constant dense<0.000000e+00> : vector<8x768xf32>
    %257 = tpu.matmul %255, %21, %cst_79 {dimension_numbers = #tpu.dot_dimension_numbers<[1], [0], [0], [1], [0, 0, 1, 1], [], []>} : vector<8x256xf32>, vector<256x768xf32>, vector<8x768xf32> -> vector<8x768xf32>
    %258 = arith.index_cast %c3_i32_77 : i32 to index
    %c0_80 = arith.constant 0 : index
    %c0_81 = arith.constant 0 : index
    %259 = vector.load %arg12[%258, %c0_80, %c0_81] : memref<4x8x384xf32, #tpu.memory_space<vmem>>, vector<1x8x384xf32>
    %260 = vector.shape_cast %259 : vector<1x8x384xf32> to vector<8x384xf32>
    %261 = vector.extract_strided_slice %257 {offsets = [0, 0], sizes = [8, 384], strides = [1, 1]} : vector<8x768xf32> to vector<8x384xf32>
    %262 = vector.extract_strided_slice %255 {offsets = [0, 0], sizes = [8, 128], strides = [1, 1]} : vector<8x256xf32> to vector<8x128xf32>
    %263 = vector.extract_strided_slice %260 {offsets = [0, 0], sizes = [8, 128], strides = [1, 1]} : vector<8x384xf32> to vector<8x128xf32>
    %264 = vector.extract_strided_slice %261 {offsets = [0, 0], sizes = [8, 128], strides = [1, 1]} : vector<8x384xf32> to vector<8x128xf32>
    %265 = arith.addf %263, %264 : vector<8x128xf32>
    %266 = arith.negf %265 : vector<8x128xf32>
    %267 = math.exp %266 : vector<8x128xf32>
    %cst_82 = arith.constant 1.000000e+00 : f32
    %268 = vector.broadcast %cst_82 : f32 to vector<8x128xf32>
    %269 = arith.addf %268, %267 : vector<8x128xf32>
    %270 = arith.divf %268, %269 : vector<8x128xf32>
    %271 = vector.extract_strided_slice %260 {offsets = [0, 128], sizes = [8, 128], strides = [1, 1]} : vector<8x384xf32> to vector<8x128xf32>
    %272 = vector.extract_strided_slice %261 {offsets = [0, 128], sizes = [8, 128], strides = [1, 1]} : vector<8x384xf32> to vector<8x128xf32>
    %273 = arith.addf %271, %272 : vector<8x128xf32>
    %274 = arith.negf %273 : vector<8x128xf32>
    %275 = math.exp %274 : vector<8x128xf32>
    %cst_83 = arith.constant 1.000000e+00 : f32
    %276 = vector.broadcast %cst_83 : f32 to vector<8x128xf32>
    %277 = arith.addf %276, %275 : vector<8x128xf32>
    %278 = arith.divf %276, %277 : vector<8x128xf32>
    %279 = vector.extract_strided_slice %260 {offsets = [0, 256], sizes = [8, 128], strides = [1, 1]} : vector<8x384xf32> to vector<8x128xf32>
    %280 = vector.extract_strided_slice %261 {offsets = [0, 256], sizes = [8, 128], strides = [1, 1]} : vector<8x384xf32> to vector<8x128xf32>
    %281 = vector.broadcast %22 : vector<1x128xf32> to vector<8x128xf32>
    %282 = arith.addf %280, %281 : vector<8x128xf32>
    %283 = arith.mulf %270, %282 : vector<8x128xf32>
    %284 = arith.addf %279, %283 : vector<8x128xf32>
    %285 = math.tanh %284 : vector<8x128xf32>
    %cst_84 = arith.constant 1.000000e+00 : f32
    %286 = vector.broadcast %cst_84 : f32 to vector<8x128xf32>
    %287 = arith.subf %286, %278 : vector<8x128xf32>
    %288 = arith.mulf %287, %285 : vector<8x128xf32>
    %289 = arith.mulf %278, %262 : vector<8x128xf32>
    %290 = arith.addf %288, %289 : vector<8x128xf32>
    %291 = arith.index_cast %256 : i32 to index
    %c0_85 = arith.constant 0 : index
    %c0_86 = arith.constant 0 : index
    %292 = vector.load %arg13[%291, %c0_85, %c0_86] : memref<4x8x384xf32, #tpu.memory_space<vmem>>, vector<1x8x384xf32>
    %293 = vector.shape_cast %292 : vector<1x8x384xf32> to vector<8x384xf32>
    %294 = vector.extract_strided_slice %257 {offsets = [0, 384], sizes = [8, 384], strides = [1, 1]} : vector<8x768xf32> to vector<8x384xf32>
    %295 = vector.extract_strided_slice %255 {offsets = [0, 128], sizes = [8, 128], strides = [1, 1]} : vector<8x256xf32> to vector<8x128xf32>
    %296 = vector.extract_strided_slice %293 {offsets = [0, 0], sizes = [8, 128], strides = [1, 1]} : vector<8x384xf32> to vector<8x128xf32>
    %297 = vector.extract_strided_slice %294 {offsets = [0, 0], sizes = [8, 128], strides = [1, 1]} : vector<8x384xf32> to vector<8x128xf32>
    %298 = arith.addf %296, %297 : vector<8x128xf32>
    %299 = arith.negf %298 : vector<8x128xf32>
    %300 = math.exp %299 : vector<8x128xf32>
    %cst_87 = arith.constant 1.000000e+00 : f32
    %301 = vector.broadcast %cst_87 : f32 to vector<8x128xf32>
    %302 = arith.addf %301, %300 : vector<8x128xf32>
    %303 = arith.divf %301, %302 : vector<8x128xf32>
    %304 = vector.extract_strided_slice %293 {offsets = [0, 128], sizes = [8, 128], strides = [1, 1]} : vector<8x384xf32> to vector<8x128xf32>
    %305 = vector.extract_strided_slice %294 {offsets = [0, 128], sizes = [8, 128], strides = [1, 1]} : vector<8x384xf32> to vector<8x128xf32>
    %306 = arith.addf %304, %305 : vector<8x128xf32>
    %307 = arith.negf %306 : vector<8x128xf32>
    %308 = math.exp %307 : vector<8x128xf32>
    %cst_88 = arith.constant 1.000000e+00 : f32
    %309 = vector.broadcast %cst_88 : f32 to vector<8x128xf32>
    %310 = arith.addf %309, %308 : vector<8x128xf32>
    %311 = arith.divf %309, %310 : vector<8x128xf32>
    %312 = vector.extract_strided_slice %293 {offsets = [0, 256], sizes = [8, 128], strides = [1, 1]} : vector<8x384xf32> to vector<8x128xf32>
    %313 = vector.extract_strided_slice %294 {offsets = [0, 256], sizes = [8, 128], strides = [1, 1]} : vector<8x384xf32> to vector<8x128xf32>
    %314 = vector.broadcast %23 : vector<1x128xf32> to vector<8x128xf32>
    %315 = arith.addf %313, %314 : vector<8x128xf32>
    %316 = arith.mulf %303, %315 : vector<8x128xf32>
    %317 = arith.addf %312, %316 : vector<8x128xf32>
    %318 = math.tanh %317 : vector<8x128xf32>
    %cst_89 = arith.constant 1.000000e+00 : f32
    %319 = vector.broadcast %cst_89 : f32 to vector<8x128xf32>
    %320 = arith.subf %319, %311 : vector<8x128xf32>
    %321 = arith.mulf %320, %318 : vector<8x128xf32>
    %322 = arith.mulf %311, %295 : vector<8x128xf32>
    %323 = arith.addf %321, %322 : vector<8x128xf32>
    %324 = arith.index_cast %c3_i32_77 : i32 to index
    %c0_90 = arith.constant 0 : index
    %c0_91 = arith.constant 0 : index
    %325 = vector.load %arg10[%324, %c0_90, %c0_91] : memref<4x8x128xf32, #tpu.memory_space<vmem>>, vector<1x8x128xf32>
    %326 = vector.shape_cast %325 : vector<1x8x128xf32> to vector<8x128xf32>
    %327 = vector.shape_cast %290 : vector<8x128xf32> to vector<1x8x128xf32>
    tpu.vector_store %arg10[%324, %c0_90, %c0_91], %327 {strides = array<i32>} : memref<4x8x128xf32, #tpu.memory_space<vmem>>, vector<1x8x128xf32>,
    %328 = arith.index_cast %256 : i32 to index
    %c0_92 = arith.constant 0 : index
    %c0_93 = arith.constant 0 : index
    %329 = vector.load %arg11[%328, %c0_92, %c0_93] : memref<4x8x128xf32, #tpu.memory_space<vmem>>, vector<1x8x128xf32>
    %330 = vector.shape_cast %329 : vector<1x8x128xf32> to vector<8x128xf32>
    %331 = vector.shape_cast %323 : vector<8x128xf32> to vector<1x8x128xf32>
    tpu.vector_store %arg11[%328, %c0_92, %c0_93], %331 {strides = array<i32>} : memref<4x8x128xf32, #tpu.memory_space<vmem>>, vector<1x8x128xf32>,
    %332 = tpu.concatenate %290, %323 in 1 : vector<8x128xf32>, vector<8x128xf32> -> vector<8x256xf32>
    %c4_i32 = arith.constant 4 : i32
    %c0_94 = arith.constant 0 : index
    %c0_95 = arith.constant 0 : index
    %333 = vector.load %arg14[%c0_94, %c0_95] : memref<8x256xf32, #tpu.memory_space<vmem>>, vector<8x256xf32>
    tpu.vector_store %arg14[%c0_94, %c0_95], %332 {strides = array<i32>} : memref<8x256xf32, #tpu.memory_space<vmem>>, vector<8x256xf32>,
    return
  }
  func.func @transform_0(%arg0: i32) -> (i32, i32, i32) {
    %c0_i32 = arith.constant 0 : i32
    %c0_i32_0 = arith.constant 0 : i32
    %c0_i32_1 = arith.constant 0 : i32
    return %arg0, %c0_i32, %c0_i32_0 : i32, i32, i32
  }
  func.func @transform_1(%arg0: i32) -> (i32, i32, i32) {
    %c1_i32 = arith.constant 1 : i32
    %0 = arith.subi %c1_i32, %arg0 : i32
    %c0_i32 = arith.constant 0 : i32
    %c0_i32_0 = arith.constant 0 : i32
    %c0_i32_1 = arith.constant 0 : i32
    return %0, %c0_i32, %c0_i32_0 : i32, i32, i32
  }
  func.func @transform_2(%arg0: i32) -> (i32, i32) {
    %c0_i32 = arith.constant 0 : i32
    %c0_i32_0 = arith.constant 0 : i32
    %c0_i32_1 = arith.constant 0 : i32
    return %c0_i32, %c0_i32_0 : i32, i32
  }
  func.func @transform_3(%arg0: i32) -> (i32, i32) {
    %c0_i32 = arith.constant 0 : i32
    %c0_i32_0 = arith.constant 0 : i32
    %c0_i32_1 = arith.constant 0 : i32
    return %c0_i32, %c0_i32_0 : i32, i32
  }
  func.func @transform_4(%arg0: i32) -> (i32, i32) {
    %c0_i32 = arith.constant 0 : i32
    %c0_i32_0 = arith.constant 0 : i32
    %c0_i32_1 = arith.constant 0 : i32
    return %c0_i32, %c0_i32_0 : i32, i32
  }
  func.func @transform_5(%arg0: i32) -> (i32, i32) {
    %c0_i32 = arith.constant 0 : i32
    %c0_i32_0 = arith.constant 0 : i32
    %c0_i32_1 = arith.constant 0 : i32
    return %c0_i32, %c0_i32_0 : i32, i32
  }
  func.func @transform_6(%arg0: i32) -> (i32, i32) {
    %c0_i32 = arith.constant 0 : i32
    %c0_i32_0 = arith.constant 0 : i32
    %c0_i32_1 = arith.constant 0 : i32
    return %c0_i32, %c0_i32_0 : i32, i32
  }
  func.func @transform_7(%arg0: i32) -> (i32, i32) {
    %c0_i32 = arith.constant 0 : i32
    %c0_i32_0 = arith.constant 0 : i32
    %c0_i32_1 = arith.constant 0 : i32
    return %c0_i32, %c0_i32_0 : i32, i32
  }
  func.func @transform_8(%arg0: i32) -> (i32, i32) {
    %c0_i32 = arith.constant 0 : i32
    %c0_i32_0 = arith.constant 0 : i32
    %c0_i32_1 = arith.constant 0 : i32
    return %c0_i32, %c0_i32_0 : i32, i32
  }
  func.func @transform_9(%arg0: i32) -> (i32, i32, i32) {
    %c0_i32 = arith.constant 0 : i32
    %c0_i32_0 = arith.constant 0 : i32
    %c0_i32_1 = arith.constant 0 : i32
    return %arg0, %c0_i32, %c0_i32_0 : i32, i32, i32
  }
  func.func @transform_10(%arg0: i32) -> (i32, i32, i32) {
    %c1_i32 = arith.constant 1 : i32
    %0 = arith.subi %c1_i32, %arg0 : i32
    %c0_i32 = arith.constant 0 : i32
    %c0_i32_0 = arith.constant 0 : i32
    %c0_i32_1 = arith.constant 0 : i32
    return %0, %c0_i32, %c0_i32_0 : i32, i32, i32
  }
}

</mosaic_0001>

<bundles_post_ra>
// kernel: seq_classifier_forward.3
= control target key start
LH: loop header
LB: loop body
LE: loop exit
PB: predicated region body
PF: predicated region fallthrough
CT: control target
= control target key end

     0   :  { %s3061_s29 = smov 0   ;;  %s4453_s0 = inlined_call_operand.vmem [shape: f32[8,8,128], index: 0, kind: input, shape index: {}]   ;;  %s4454_s1 = inlined_call_operand.vmem [shape: f32[8,8,128], index: 1, kind: input, shape index: {}]   ;;  %s4455_s2 = inlined_call_operand.vmem [shape: f32[128,384], index: 2, kind: input, shape index: {}]   ;;  %s4456_s3 = inlined_call_operand.vmem [shape: f32[128,384], index: 3, kind: input, shape index: {}]   ;;  %s4457_s4 = inlined_call_operand.vmem [shape: f32[128,384], index: 4, kind: input, shape index: {}]   ;;  %s4458_s5 = inlined_call_operand.vmem [shape: f32[128,384], index: 5, kind: input, shape index: {}]   ;;  %s4459_s6 = inlined_call_operand.vmem [shape: f32[1,384], index: 6, kind: input, shape index: {}]   ;;  %s4460_s7 = inlined_call_operand.vmem [shape: f32[128,384], index: 7, kind: input, shape index: {}]   ;;  %s4461_s8 = inlined_call_operand.vmem [shape: f32[1,128], index: 8, kind: input, shape index: {}]   ;;  %s4462_s9 = inlined_call_operand.vmem [shape: f32[1,384], index: 9, kind: input, shape index: {}]   ;;  %s4463_s10 = inlined_call_operand.vmem [shape: f32[1,128], index: 10, kind: input, shape index: {}]   ;;  %s4464_s11 = inlined_call_operand.vmem [shape: f32[128,128], index: 11, kind: input, shape index: {}]   ;;  %s4465_s12 = inlined_call_operand.vmem [shape: f32[128,128], index: 12, kind: input, shape index: {}]   ;;  %s4466_s13 = inlined_call_operand.vmem [shape: f32[1,128], index: 13, kind: input, shape index: {}]   ;;  %s4467_s14 = inlined_call_operand.vmem [shape: f32[8,128], index: 14, kind: output, shape index: {}]  }
   0x1 LB: > { %s3067_s30 = sadd.s32 4294967295, %s2979_s29   ;;  %p2354_p0 = scmp.ge.s32.totalorder %s2979_s29, 1  ;;  %s2979_s29 = sphi %s3061_s29, %s24_s29  }
   0x2   : > { %p419_p1 = scmp.lt.s32.totalorder %s2979_s29, 3 }
   0x4   : > { %p420_p2 = pnand %p2354_p0, %p419_p1 }
   0x6   : > { %423 = sbr.rel (%p420_p2) target bundleno = 1635 (0x663), region = 76 }
   0xb   : > { %s2355_s15 = sshll.u32 %s3067_s30, 2  ;;  %p2359_p4 = scmp.ne.s32.totalorder %s3067_s30, 0 }
   0xc   : > { %p466_p3 = scmp.lt.s32.totalorder %s2355_s15, 7 }
   0xd   : > { %480 = sbr.rel (%p2359_p4) target bundleno = 20 (0x14), region = 80 }
   0xe   : > { %s4575_s15 = smov (!%p466_p3, %s2355_s15), 7 }
   0xf   : > { %s2356_s16 = sshll.u32 %s4575_s15, 3 }
  0x10   : > { %s3075_s19 = scalar_lea.vmem %s4453_s0, %s2356_s16  ;;  %s3080_s22 = scalar_lea.vmem %s4454_s1, %s2356_s16 }
  0x12   : > { %v2981_v0 = vmov 0.0  }
  0x13   : > { %481 = vst [vmem:[#allocation3] sm:$0xff] %v2981_v0  ;;  %482 = vst [vmem:[%s4467_s14] sm:$0xff] %v2981_v0 }
  0x14 PF: > { %v585_v1 = vld [vmem:[%s4456_s3 + $0x170] sm:$0xff]  ;;  %v586_v2 = vld [vmem:[%s4456_s3 + $0x178] sm:$0xff]  ;;  %v584_v3 = vld [vmem:[%s4456_s3 + $0x168] sm:$0xff]  ;;  %v4468_v51 = vmov 0.0   ;;  %vm2983_vm0 = vmmov 0   ;;  %p2369_p5 = scmp.ne.s32.totalorder %s3067_s30, 1 }
  0x15   : > { %587 = vmatprep.subr.mxu0 %v585_v1  ;;  %2554 = vmatprep.subr.mxu1 %v586_v2  ;;  %v582_v4 = vld [vmem:[%s4456_s3 + $0x158] sm:$0xff]  ;;  %v583_v5 = vld [vmem:[%s4456_s3 + $0x160] sm:$0xff]  ;;  %v581_v6 = vld [vmem:[%s4456_s3 + $0x150] sm:$0xff] }
  0x16   : > { %588 = vmatpush1.msra.mxu0 %v584_v3  ;;  %2555 = vmatpush3.msra.mxu1 %v586_v2  ;;  %v579_v7 = vld [vmem:[%s4456_s3 + $0x140] sm:$0xff]  ;;  %v580_v8 = vld [vmem:[%s4456_s3 + $0x148] sm:$0xff]  ;;  %v578_v9 = vld [vmem:[%s4456_s3 + $0x138] sm:$0xff] }
  0x17   : > { %589 = vmatprep.subr.mxu0 %v582_v4  ;;  %2556 = vmatprep.subr.mxu1 %v583_v5  ;;  %v576_v10 = vld [vmem:[%s4456_s3 + $0x128] sm:$0xff]  ;;  %v577_v11 = vld [vmem:[%s4456_s3 + $0x130] sm:$0xff]  ;;  %v575_v12 = vld [vmem:[%s4456_s3 + $0x120] sm:$0xff] }
  0x18   : > { %590 = vmatpush1.msra.mxu0 %v581_v6  ;;  %2557 = vmatpush3.msra.mxu1 %v583_v5  ;;  %v573_v13 = vld [vmem:[%s4456_s3 + $0x110] sm:$0xff]  ;;  %v574_v14 = vld [vmem:[%s4456_s3 + $0x118] sm:$0xff]  ;;  %v572_v15 = vld [vmem:[%s4456_s3 + $0x108] sm:$0xff] }
  0x19   : > { %591 = vmatprep.subr.mxu0 %v579_v7  ;;  %2558 = vmatprep.subr.mxu1 %v580_v8  ;;  %v570_v16 = vld [vmem:[%s4456_s3 + $0xf8] sm:$0xff]  ;;  %v571_v17 = vld [vmem:[%s4456_s3 + $0x100] sm:$0xff]  ;;  %v569_v18 = vld [vmem:[%s4456_s3 + $0xf0] sm:$0xff] }
  0x1a   : > { %592 = vmatpush1.msra.mxu0 %v578_v9  ;;  %2559 = vmatpush3.msra.mxu1 %v580_v8  ;;  %v567_v19 = vld [vmem:[%s4456_s3 + $0xe0] sm:$0xff]  ;;  %v568_v20 = vld [vmem:[%s4456_s3 + $0xe8] sm:$0xff]  ;;  %v566_v21 = vld [vmem:[%s4456_s3 + $0xd8] sm:$0xff] }
  0x1b   : > { %593 = vmatprep.subr.mxu0 %v576_v10  ;;  %2560 = vmatprep.subr.mxu1 %v577_v11  ;;  %v564_v22 = vld [vmem:[%s4456_s3 + $0xc8] sm:$0xff]  ;;  %v565_v23 = vld [vmem:[%s4456_s3 + $0xd0] sm:$0xff]  ;;  %v563_v24 = vld [vmem:[%s4456_s3 + $0xc0] sm:$0xff] }
  0x1c   : > { %594 = vmatpush1.msra.mxu0 %v575_v12  ;;  %2561 = vmatpush3.msra.mxu1 %v577_v11  ;;  %v561_v25 = vld [vmem:[%s4456_s3 + $0xb0] sm:$0xff]  ;;  %v562_v26 = vld [vmem:[%s4456_s3 + $0xb8] sm:$0xff]  ;;  %v560_v27 = vld [vmem:[%s4456_s3 + $0xa8] sm:$0xff] }
  0x1d   : > { %595 = vmatprep.subr.mxu0 %v573_v13  ;;  %2562 = vmatprep.subr.mxu1 %v574_v14  ;;  %v558_v28 = vld [vmem:[%s4456_s3 + $0x98] sm:$0xff]  ;;  %v559_v29 = vld [vmem:[%s4456_s3 + $0xa0] sm:$0xff]  ;;  %v557_v30 = vld [vmem:[%s4456_s3 + $0x90] sm:$0xff] }
  0x1e   : > { %596 = vmatpush1.msra.mxu0 %v572_v15  ;;  %2563 = vmatpush3.msra.mxu1 %v574_v14  ;;  %v555_v31 = vld [vmem:[%s4456_s3 + $0x80] sm:$0xff]  ;;  %v556_v32 = vld [vmem:[%s4456_s3 + $0x88] sm:$0xff]  ;;  %v554_v33 = vld [vmem:[%s4456_s3 + $0x78] sm:$0xff] }
  0x1f   : > { %597 = vmatprep.subr.mxu0 %v570_v16  ;;  %2564 = vmatprep.subr.mxu1 %v571_v17  ;;  %v552_v34 = vld [vmem:[%s4456_s3 + $0x68] sm:$0xff]  ;;  %v553_v35 = vld [vmem:[%s4456_s3 + $0x70] sm:$0xff]  ;;  %v551_v36 = vld [vmem:[%s4456_s3 + $0x60] sm:$0xff] }
  0x20   : > { %598 = vmatpush1.msra.mxu0 %v569_v18  ;;  %2565 = vmatpush3.msra.mxu1 %v571_v17  ;;  %v549_v37 = vld [vmem:[%s4456_s3 + $0x50] sm:$0xff]  ;;  %v550_v38 = vld [vmem:[%s4456_s3 + $0x58] sm:$0xff]  ;;  %v548_v39 = vld [vmem:[%s4456_s3 + $0x48] sm:$0xff] }
  0x21   : > { %599 = vmatprep.subr.mxu0 %v567_v19  ;;  %2566 = vmatprep.subr.mxu1 %v568_v20  ;;  %v546_v40 = vld [vmem:[%s4456_s3 + $0x38] sm:$0xff]  ;;  %v547_v41 = vld [vmem:[%s4456_s3 + $0x40] sm:$0xff]  ;;  %v545_v42 = vld [vmem:[%s4456_s3 + $0x30] sm:$0xff] }
  0x22   : > { %600 = vmatpush1.msra.mxu0 %v566_v21  ;;  %2567 = vmatpush3.msra.mxu1 %v568_v20  ;;  %v543_v43 = vld [vmem:[%s4456_s3 + $0x20] sm:$0xff]  ;;  %v544_v44 = vld [vmem:[%s4456_s3 + $0x28] sm:$0xff]  ;;  %v542_v45 = vld [vmem:[%s4456_s3 + $0x18] sm:$0xff] }
  0x23   : > { %601 = vmatprep.subr.mxu0 %v564_v22  ;;  %2568 = vmatprep.subr.mxu1 %v565_v23  ;;  %v540_v46 = vld [vmem:[%s4456_s3 + $0x8] sm:$0xff]  ;;  %v541_v47 = vld [vmem:[%s4456_s3 + $0x10] sm:$0xff]  ;;  %v539_v48 = vld [vmem:[%s4456_s3] sm:$0xff] }
  0x24   : > { %602 = vmatpush1.msra.mxu0 %v563_v24  ;;  %2569 = vmatpush3.msra.mxu1 %v565_v23  ;;  %v535_v49 = vld [vmem:[%s3080_s22] sm:$0xff]  ;;  %v533_v50 = vld [vmem:[%s4455_s2 + $0x170] sm:$0xff]  ;;  %v534_v52 = vld [vmem:[%s4455_s2 + $0x178] sm:$0xff] }
  0x25   : > { %603 = vmatprep.subr.mxu0 %v561_v25  ;;  %2570 = vmatprep.subr.mxu1 %v562_v26  ;;  %v3239_v53 = vld [vmem:[%s3080_s22 + $0x8] sm:$0xff]  ;;  %v530_v55 = vld [vmem:[%s4455_s2 + $0x158] sm:$0xff]  ;;  %v531_v56 = vld [vmem:[%s4455_s2 + $0x160] sm:$0xff] }
  0x26   : > { %604 = vmatpush1.msra.mxu0 %v560_v27  ;;  %2571 = vmatpush3.msra.mxu1 %v562_v26  ;;  %v532_v54 = vld [vmem:[%s4455_s2 + $0x168] sm:$0xff]  ;;  %v529_v57 = vld [vmem:[%s4455_s2 + $0x150] sm:$0xff]  ;;  %v527_v58 = vld [vmem:[%s4455_s2 + $0x140] sm:$0xff] }
  0x27   : > { %605 = vmatprep.subr.mxu0 %v558_v28  ;;  %2572 = vmatprep.subr.mxu1 %v559_v29  ;;  %v528_v59 = vld [vmem:[%s4455_s2 + $0x148] sm:$0xff]  ;;  %v526_v60 = vld [vmem:[%s4455_s2 + $0x138] sm:$0xff]  ;;  %v525_v62 = vld [vmem:[%s4455_s2 + $0x130] sm:$0xff] }
  0x28   : > { %606 = vmatpush1.msra.mxu0 %v557_v30  ;;  %2573 = vmatpush3.msra.mxu1 %v559_v29  ;;  %v524_v61 = vld [vmem:[%s4455_s2 + $0x128] sm:$0xff]  ;;  %v523_v63 = vld [vmem:[%s4455_s2 + $0x120] sm:$0xff]  ;;  %v521_v0 = vld [vmem:[%s4455_s2 + $0x110] sm:$0xff] }
  0x29   : > { %607 = vmatprep.subr.mxu0 %v555_v31  ;;  %2574 = vmatprep.subr.mxu1 %v556_v32  ;;  %v522_v1 = vld [vmem:[%s4455_s2 + $0x118] sm:$0xff]  ;;  %v520_v2 = vld [vmem:[%s4455_s2 + $0x108] sm:$0xff]  ;;  %v519_v4 = vld [vmem:[%s4455_s2 + $0x100] sm:$0xff] }
  0x2a   : > { %608 = vmatpush1.msra.mxu0 %v554_v33  ;;  %2575 = vmatpush3.msra.mxu1 %v556_v32  ;;  %v518_v3 = vld [vmem:[%s4455_s2 + $0xf8] sm:$0xff]  ;;  %v517_v5 = vld [vmem:[%s4455_s2 + $0xf0] sm:$0xff]  ;;  %v515_v6 = vld [vmem:[%s4455_s2 + $0xe0] sm:$0xff] }
  0x2b   : > { %609 = vmatprep.subr.mxu0 %v552_v34  ;;  %2576 = vmatprep.subr.mxu1 %v553_v35  ;;  %v516_v7 = vld [vmem:[%s4455_s2 + $0xe8] sm:$0xff]  ;;  %v514_v8 = vld [vmem:[%s4455_s2 + $0xd8] sm:$0xff]  ;;  %v513_v10 = vld [vmem:[%s4455_s2 + $0xd0] sm:$0xff] }
  0x2c   : > { %610 = vmatpush1.msra.mxu0 %v551_v36  ;;  %2577 = vmatpush3.msra.mxu1 %v553_v35  ;;  %v512_v9 = vld [vmem:[%s4455_s2 + $0xc8] sm:$0xff]  ;;  %v511_v11 = vld [vmem:[%s4455_s2 + $0xc0] sm:$0xff]  ;;  %v509_v12 = vld [vmem:[%s4455_s2 + $0xb0] sm:$0xff] }
  0x2d   : > { %611 = vmatprep.subr.mxu0 %v549_v37  ;;  %2578 = vmatprep.subr.mxu1 %v550_v38  ;;  %v510_v13 = vld [vmem:[%s4455_s2 + $0xb8] sm:$0xff]  ;;  %v508_v14 = vld [vmem:[%s4455_s2 + $0xa8] sm:$0xff]  ;;  %v507_v16 = vld [vmem:[%s4455_s2 + $0xa0] sm:$0xff] }
  0x2e   : > { %612 = vmatpush1.msra.mxu0 %v548_v39  ;;  %2579 = vmatpush3.msra.mxu1 %v550_v38  ;;  %v506_v15 = vld [vmem:[%s4455_s2 + $0x98] sm:$0xff]  ;;  %v505_v17 = vld [vmem:[%s4455_s2 + $0x90] sm:$0xff]  ;;  %v503_v18 = vld [vmem:[%s4455_s2 + $0x80] sm:$0xff] }
  0x2f   : > { %613 = vmatprep.subr.mxu0 %v546_v40  ;;  %2580 = vmatprep.subr.mxu1 %v547_v41  ;;  %v504_v19 = vld [vmem:[%s4455_s2 + $0x88] sm:$0xff]  ;;  %v502_v20 = vld [vmem:[%s4455_s2 + $0x78] sm:$0xff]  ;;  %v501_v22 = vld [vmem:[%s4455_s2 + $0x70] sm:$0xff] }
  0x30   : > { %614 = vmatpush1.msra.mxu0 %v545_v42  ;;  %2581 = vmatpush3.msra.mxu1 %v547_v41  ;;  %v500_v21 = vld [vmem:[%s4455_s2 + $0x68] sm:$0xff]  ;;  %v537_v23 = vld [vmem:[%s3080_s22 + $0x10] sm:$0xff]  ;;  %v499_v24 = vld [vmem:[%s4455_s2 + $0x60] sm:$0xff] }
  0x31   : > { %615 = vmatprep.subr.mxu0 %v543_v43  ;;  %2582 = vmatprep.subr.mxu1 %v544_v44  ;;  %v497_v25 = vld [vmem:[%s4455_s2 + $0x50] sm:$0xff]  ;;  %v498_v26 = vld [vmem:[%s4455_s2 + $0x58] sm:$0xff]  ;;  %v496_v27 = vld [vmem:[%s4455_s2 + $0x48] sm:$0xff] }
  0x32   : > { %616 = vmatpush1.msra.mxu0 %v542_v45  ;;  %2583 = vmatpush3.msra.mxu1 %v544_v44  ;;  %v494_v28 = vld [vmem:[%s4455_s2 + $0x38] sm:$0xff]  ;;  %v495_v29 = vld [vmem:[%s4455_s2 + $0x40] sm:$0xff]  ;;  %v493_v31 = vld [vmem:[%s4455_s2 + $0x30] sm:$0xff] }
  0x33   : > { %617 = vmatprep.subr.mxu0 %v540_v46  ;;  %2584 = vmatprep.subr.mxu1 %v541_v47  ;;  %v538_v30 = vld [vmem:[%s3080_s22 + $0x18] sm:$0xff]  ;;  %v491_v32 = vld [vmem:[%s4455_s2 + $0x20] sm:$0xff]  ;;  %v492_v33 = vld [vmem:[%s4455_s2 + $0x28] sm:$0xff] }
  0x34   : > { %618 = vmatpush1.msra.mxu0 %v539_v48  ;;  %651 = vmatprep.mubr.f32.mxu0 %v4468_v51  ;;  %v490_v34 = vld [vmem:[%s4455_s2 + $0x18] sm:$0xff]  ;;  %v488_v35 = vld [vmem:[%s4455_s2 + $0x8] sm:$0xff]  ;;  %v489_v36 = vld [vmem:[%s4455_s2 + $0x10] sm:$0xff] }
  0x35   : > { %2585 = vmatpush3.msra.mxu1 %v541_v47  ;;  %652 = vmatmul.mubr.f32.vlgmr.msra.gmra.mxu0 %v535_v49  ;;  %v487_v37 = vld [vmem:[%s4455_s2] sm:$0xff]  ;;  %v484_v39 = vld [vmem:[%s3075_s19 + $0x8] sm:$0xff]  ;;  %v3392_v40 = vld [vmem:[%s4460_s7 + $0x170] sm:$0xff] }
  0x36   : > { %2586 = vmatprep.mubr.f32.mxu1 %v535_v49  ;;  %761 = vmatprep.subr.mxu0 %v533_v50  ;;  %v483_v38 = vld [vmem:[%s3075_s19] sm:$0xff]  ;;  %4512 = vst [vmem:[#allocation4_spill] sm:$0xff] %v3392_v40  ;;  %v3397_v41 = vld [vmem:[%s4460_s7 + $0x168] sm:$0xff]  ;;  %v3402_v42 = vld [vmem:[%s4460_s7 + $0x158] sm:$0xff] }
  0x37   : > { %2592 = vmatprep.subr.mxu1 %v534_v52  ;;  %2587 = vmatmul.mubr.f32.vlgmr.msra.gmra.mxu1 %v3239_v53  ;;  %v3409_v43 = vld [vmem:[%s4460_s7 + $0x150] sm:$0xff]  ;;  %v3416_v45 = vld [vmem:[%s4460_s7 + $0x140] sm:$0xff]  ;;  %v3422_v46 = vld [vmem:[%s4460_s7 + $0x138] sm:$0xff] }
  0x38   : > { %762 = vmatpush1.msra.mxu0 %v532_v54  ;;  %2593 = vmatpush3.msra.mxu1 %v534_v52  ;;  %v485_v44 = vld [vmem:[%s3075_s19 + $0x10] sm:$0xff]  ;;  %v486_v47 = vld [vmem:[%s3075_s19 + $0x18] sm:$0xff]  ;;  %v3430_v48 = vld [vmem:[%s4460_s7 + $0x128] sm:$0xff] }
  0x39   : > { %763 = vmatprep.subr.mxu0 %v530_v55  ;;  %2594 = vmatprep.subr.mxu1 %v531_v56  ;;  %v3435_v49 = vld [vmem:[%s4460_s7 + $0x178] sm:$0xff]  ;;  %v3441_v50 = vld [vmem:[%s4460_s7 + $0x120] sm:$0xff]  ;;  %v3448_v52 = vld [vmem:[%s4460_s7 + $0x110] sm:$0xff] }
  0x3a   : > { %764 = vmatpush1.msra.mxu0 %v529_v57  ;;  %2595 = vmatpush3.msra.mxu1 %v531_v56  ;;  %v3461_v54 = vld [vmem:[%s4460_s7 + $0xf8] sm:$0xff]  ;;  %v3467_v55 = vld [vmem:[%s4460_s7 + $0x160] sm:$0xff]  ;;  %v3473_v56 = vld [vmem:[%s4460_s7 + $0xf0] sm:$0xff] }
  0x3b   : > { %765 = vmatprep.subr.mxu0 %v527_v58  ;;  %2596 = vmatprep.subr.mxu1 %v528_v59  ;;  %v3480_v57 = vld [vmem:[%s4460_s7 + $0xe0] sm:$0xff]  ;;  %v3486_v58 = vld [vmem:[%s4460_s7 + $0xd8] sm:$0xff] }
  0x3c   : > { %766 = vmatpush1.msra.mxu0 %v526_v60  ;;  %2597 = vmatpush3.msra.mxu1 %v528_v59  ;;  %v3493_v59 = vld [vmem:[%s4460_s7 + $0xc8] sm:$0xff] }
  0x3d   : > { %767 = vmatprep.subr.mxu0 %v524_v61  ;;  %2598 = vmatprep.subr.mxu1 %v525_v62  ;;  %v3499_v60 = vld [vmem:[%s4460_s7 + $0x148] sm:$0xff]  ;;  %v3505_v61 = vld [vmem:[%s4460_s7 + $0xc0] sm:$0xff] }
  0x3e   : > { %768 = vmatpush1.msra.mxu0 %v523_v63  ;;  %2599 = vmatpush3.msra.mxu1 %v525_v62  ;;  %v3511_v62 = vld [vmem:[%s4460_s7 + $0xb0] sm:$0xff] }
  0x3f   : > { %769 = vmatprep.subr.mxu0 %v521_v0  ;;  %2600 = vmatprep.subr.mxu1 %v522_v1  ;;  %v3517_v63 = vld [vmem:[%s4460_s7 + $0x130] sm:$0xff]  ;;  %v3523_v0 = vld [vmem:[%s4460_s7 + $0xa8] sm:$0xff] }
  0x40   : > { %770 = vmatpush1.msra.mxu0 %v520_v2  ;;  %2601 = vmatpush3.msra.mxu1 %v522_v1  ;;  %v3530_v1 = vld [vmem:[%s4460_s7 + $0x98] sm:$0xff] }
  0x41   : > { %771 = vmatprep.subr.mxu0 %v518_v3  ;;  %2602 = vmatprep.subr.mxu1 %v519_v4  ;;  %v3536_v2 = vld [vmem:[%s4460_s7 + $0x118] sm:$0xff]  ;;  %v3542_v3 = vld [vmem:[%s4460_s7 + $0x90] sm:$0xff] }
  0x42   : > { %772 = vmatpush1.msra.mxu0 %v517_v5  ;;  %2603 = vmatpush3.msra.mxu1 %v519_v4  ;;  %v3549_v4 = vld [vmem:[%s4460_s7 + $0x80] sm:$0xff] }
  0x43   : > { %773 = vmatprep.subr.mxu0 %v515_v6  ;;  %2604 = vmatprep.subr.mxu1 %v516_v7  ;;  %4513 = vst [vmem:[#allocation5_spill] sm:$0xff] %v3549_v4  ;;  %v3555_v5 = vld [vmem:[%s4460_s7 + $0x100] sm:$0xff]  ;;  %v3561_v6 = vld [vmem:[%s4460_s7 + $0x78] sm:$0xff] }
  0x44   : > { %774 = vmatpush1.msra.mxu0 %v514_v8  ;;  %2605 = vmatpush3.msra.mxu1 %v516_v7  ;;  %4514 = vst [vmem:[#allocation6_spill] sm:$0xff] %v3561_v6  ;;  %v3568_v7 = vld [vmem:[%s4460_s7 + $0x68] sm:$0xff] }
  0x45   : > { %775 = vmatprep.subr.mxu0 %v512_v9  ;;  %2606 = vmatprep.subr.mxu1 %v513_v10  ;;  %4515 = vst [vmem:[#allocation7_spill] sm:$0xff] %v3568_v7  ;;  %v3574_v8 = vld [vmem:[%s4460_s7 + $0xe8] sm:$0xff]  ;;  %v3580_v9 = vld [vmem:[%s4460_s7 + $0x60] sm:$0xff] }
  0x46   : > { %776 = vmatpush1.msra.mxu0 %v511_v11  ;;  %2607 = vmatpush3.msra.mxu1 %v513_v10  ;;  %4516 = vst [vmem:[#allocation8_spill] sm:$0xff] %v3580_v9  ;;  %v3587_v10 = vld [vmem:[%s4460_s7 + $0x50] sm:$0xff] }
  0x47   : > { %777 = vmatprep.subr.mxu0 %v509_v12  ;;  %2608 = vmatprep.subr.mxu1 %v510_v13  ;;  %4517 = vst [vmem:[#allocation9_spill] sm:$0xff] %v3587_v10  ;;  %v3593_v11 = vld [vmem:[%s4460_s7 + $0xd0] sm:$0xff]  ;;  %v3599_v12 = vld [vmem:[%s4460_s7 + $0x48] sm:$0xff] }
  0x48   : > { %778 = vmatpush1.msra.mxu0 %v508_v14  ;;  %2609 = vmatpush3.msra.mxu1 %v510_v13  ;;  %4518 = vst [vmem:[#allocation10_spill] sm:$0xff] %v3599_v12  ;;  %v3606_v13 = vld [vmem:[%s4460_s7 + $0x38] sm:$0xff] }
  0x49   : > { %657 = vmatprep.mubr.f32.mxu0 %v4468_v51  ;;  %779 = vmatprep.subr.mxu0 %v506_v15  ;;  %4519 = vst [vmem:[#allocation11_spill] sm:$0xff] %v3606_v13  ;;  %v3612_v14 = vld [vmem:[%s4460_s7 + $0xb8] sm:$0xff]  ;;  %v3618_v15 = vld [vmem:[%s4460_s7 + $0x30] sm:$0xff] }
  0x4a   : > { %2610 = vmatprep.subr.mxu1 %v507_v16  ;;  %658 = vmatmul.mubr.f32.gmra.mxu0 %v3239_v53  ;;  %v3454_v53 = vld [vmem:[%s4460_s7 + $0x108] sm:$0xff]  ;;  %4520 = vst [vmem:[#allocation12_spill] sm:$0xff] %v3618_v15 }
  0x4b   : > { %780 = vmatpush1.msra.mxu0 %v505_v17  ;;  %2611 = vmatpush3.msra.mxu1 %v507_v16  ;;  %v3625_v16 = vld [vmem:[%s4460_s7 + $0x20] sm:$0xff] }
  0x4c   : > { %781 = vmatprep.subr.mxu0 %v503_v18  ;;  %2612 = vmatprep.subr.mxu1 %v504_v19  ;;  %4521 = vst [vmem:[#allocation13_spill] sm:$0xff] %v3625_v16  ;;  %v3631_v17 = vld [vmem:[%s4460_s7 + $0xa0] sm:$0xff]  ;;  %v3637_v18 = vld [vmem:[%s4460_s7 + $0x18] sm:$0xff] }
  0x4d   : > { %782 = vmatpush1.msra.mxu0 %v502_v20  ;;  %2613 = vmatpush3.msra.mxu1 %v504_v19  ;;  %4522 = vst [vmem:[#allocation14_spill] sm:$0xff] %v3637_v18  ;;  %v3644_v19 = vld [vmem:[%s4460_s7 + $0x8] sm:$0xff] }
  0x4e   : > { %663 = vmatprep.mubr.f32.mxu0 %v4468_v51  ;;  %783 = vmatprep.subr.mxu0 %v500_v21  ;;  %4523 = vst [vmem:[#allocation15_spill] sm:$0xff] %v3644_v19  ;;  %v3650_v20 = vld [vmem:[%s4460_s7 + $0x88] sm:$0xff]  ;;  %v3656_v21 = vld [vmem:[%s4460_s7] sm:$0xff] }
  0x4f   : > { %2614 = vmatprep.subr.mxu1 %v501_v22  ;;  %664 = vmatmul.mubr.f32.gmra.mxu0 %v537_v23  ;;  %4524 = vst [vmem:[#allocation16_spill] sm:$0xff] %v3650_v20  ;;  %4525 = vst [vmem:[#allocation17_spill] sm:$0xff] %v3656_v21 }
  0x50   : > { %784 = vmatpush1.msra.mxu0 %v499_v24  ;;  %2615 = vmatpush3.msra.mxu1 %v501_v22  ;;  %v3660_v22 = vld [vmem:[#allocation3] sm:$0xff] }
  0x51   : > { %785 = vmatprep.subr.mxu0 %v497_v25  ;;  %2616 = vmatprep.subr.mxu1 %v498_v26  ;;  %v3675_v24 = vld [vmem:[%s4460_s7 + $0x58] sm:$0xff]  ;;  %v3683_v25 = vld [vmem:[%s4460_s7 + $0x40] sm:$0xff] }
  0x52   : > { %786 = vmatpush1.msra.mxu0 %v496_v27  ;;  %2617 = vmatpush3.msra.mxu1 %v498_v26  ;;  %4527 = vst [vmem:[#allocation19_spill] sm:$0xff] %v3675_v24  ;;  %4528 = vst [vmem:[#allocation20_spill] sm:$0xff] %v3683_v25  ;;  %v3693_v26 = vld [vmem:[%s4460_s7 + $0x28] sm:$0xff]  ;;  %v3702_v27 = vld [vmem:[%s4460_s7 + $0x10] sm:$0xff] }
  0x53   : > { %669 = vmatprep.mubr.f32.mxu0 %v4468_v51  ;;  %787 = vmatprep.subr.mxu0 %v494_v28  ;;  %4529 = vst [vmem:[#allocation21_spill] sm:$0xff] %v3693_v26  ;;  %4530 = vst [vmem:[#allocation22_spill] sm:$0xff] %v3702_v27 }
  0x54   : > { %2618 = vmatprep.subr.mxu1 %v495_v29  ;;  %670 = vmatmul.mubr.f32.gmra.mxu0 %v538_v30 }
  0x55   : > { %2589 = vmatprep.mubr.f32.mxu1 %v537_v23  ;;  %788 = vmatpush1.msra.mxu0 %v493_v31  ;;  %v3666_v23 = vld [vmem:[%s4460_s7 + $0x70] sm:$0xff] }
  0x56   : > { %2619 = vmatpush3.msra.mxu1 %v495_v29  ;;  %789 = vmatprep.subr.mxu0 %v491_v32  ;;  %4526 = vst [vmem:[#allocation18_spill] sm:$0xff] %v3666_v23 }
  0x57   : > { %2590 = vmatmul.mubr.f32.gmra.mxu1 %v538_v30  ;;  %2620 = vmatprep.subr.mxu1 %v492_v33 }
  0x58   : > { %790 = vmatpush1.msra.mxu0 %v490_v34  ;;  %2621 = vmatpush3.msra.mxu1 %v492_v33  ;;  %v937_v34 = vlaneseq }
  0x59   : > { %791 = vmatprep.subr.mxu0 %v488_v35  ;;  %2622 = vmatprep.subr.mxu1 %v489_v36 }
  0x5a   : > { %792 = vmatpush1.msra.mxu0 %v487_v37  ;;  %825 = vmatprep.mubr.f32.mxu0 %v4468_v51  ;;  %v3774_v37 = vshrl.u32 %v937_v34, 7 }
  0x5b   : > { %2623 = vmatpush3.msra.mxu1 %v489_v36  ;;  %2624 = vmatprep.mubr.f32.mxu1 %v483_v38 }
  0x5c   : > { %826 = vmatmul.mubr.f32.vlgmr.msra.gmra.mxu0 %v483_v38  ;;  %2625 = vmatmul.mubr.f32.vlgmr.msra.gmra.mxu1 %v484_v39  ;;  %4531 = vst [vmem:[#allocation23_spill] sm:$0xff] %v3774_v37  ;;  %v4508_v34 = vsub.s32 0, %v3774_v37 }
  0x5d   : > { %1026 = vmatprep.subr.mxu0 %v3392_v40  ;;  %831 = vmatprep.mubr.f32.mxu0 %v4468_v51 }
  0x5e   : > { %1027 = vmatpush1.msra.mxu0 %v3397_v41  ;;  %2627 = vmatprep.mubr.f32.mxu1 %v485_v44 }
  0x5f   : > { %1028 = vmatprep.subr.mxu0 %v3402_v42  ;;  %2630 = vmatprep.subr.mxu1 %v4468_v51 }
  0x60   : > { %1029 = vmatpush1.msra.mxu0 %v3409_v43  ;;  %2628 = vmatmul.mubr.f32.gmra.mxu1 %v486_v47 }
  0x61   : > { %832 = vmatmul.mubr.f32.gmra.mxu0 %v484_v39  ;;  %1030 = vmatprep.subr.mxu0 %v3416_v45 }
  0x62   : > { %1031 = vmatpush1.msra.mxu0 %v3422_v46  ;;  %837 = vmatprep.mubr.f32.mxu0 %v4468_v51 }
  0x63   : > { %1032 = vmatprep.subr.mxu0 %v3430_v48  ;;  %2631 = vmatpush3.msra.mxu1 %v3435_v49 }
  0x64   : > { %1033 = vmatpush1.msra.mxu0 %v3441_v50  ;;  %2632 = vmatprep.subr.mxu1 %v4468_v51 }
  0x65   : > { %838 = vmatmul.mubr.f32.gmra.mxu0 %v485_v44  ;;  %1034 = vmatprep.subr.mxu0 %v3448_v52  ;;  %v4499_v44 = vsub.s32 2, %v3774_v37 }
  0x66   : > { %1035 = vmatpush1.msra.mxu0 %v3454_v53  ;;  %843 = vmatprep.mubr.f32.mxu0 %v4468_v51 }
  0x67   : > { %1036 = vmatprep.subr.mxu0 %v3461_v54  ;;  %2633 = vmatpush3.msra.mxu1 %v3467_v55 }
  0x68   : > { %1037 = vmatpush1.msra.mxu0 %v3473_v56  ;;  %2634 = vmatprep.subr.mxu1 %v4468_v51 }
  0x69   : > { %844 = vmatmul.mubr.f32.gmra.mxu0 %v486_v47  ;;  %1038 = vmatprep.subr.mxu0 %v3480_v57 }
  0x6a   : > { %1039 = vmatpush1.msra.mxu0 %v3486_v58  ;;  %1090 = vmatprep.mubr.f32.mxu0 %v4468_v51 }
  0x6b   : > { %1040 = vmatprep.subr.mxu0 %v3493_v59  ;;  %2635 = vmatpush3.msra.mxu1 %v3499_v60 }
  0x6c   : > { %1041 = vmatpush1.msra.mxu0 %v3505_v61  ;;  %2636 = vmatprep.subr.mxu1 %v4468_v51 }
  0x6d   : > { %1042 = vmatprep.subr.mxu0 %v3511_v62  ;;  %2637 = vmatpush3.msra.mxu1 %v3517_v63 }
  0x6e   : > { %1043 = vmatpush1.msra.mxu0 %v3523_v0  ;;  %2638 = vmatprep.subr.mxu1 %v4468_v51 }
  0x6f   : > { %1044 = vmatprep.subr.mxu0 %v3530_v1  ;;  %2639 = vmatpush3.msra.mxu1 %v3536_v2 }
  0x70   : > { %1045 = vmatpush1.msra.mxu0 %v3542_v3  ;;  %2640 = vmatprep.subr.mxu1 %v4468_v51 }
  0x71   : > { %1046 = vmatprep.subr.mxu0 %v3549_v4  ;;  %2641 = vmatpush3.msra.mxu1 %v3555_v5 }
  0x72   : > { %1047 = vmatpush1.msra.mxu0 %v3561_v6  ;;  %2642 = vmatprep.subr.mxu1 %v4468_v51 }
  0x73   : > { %1048 = vmatprep.subr.mxu0 %v3568_v7  ;;  %2643 = vmatpush3.msra.mxu1 %v3574_v8 }
  0x74   : > { %1049 = vmatpush1.msra.mxu0 %v3580_v9  ;;  %2644 = vmatprep.subr.mxu1 %v4468_v51 }
  0x75   : > { %1050 = vmatprep.subr.mxu0 %v3587_v10  ;;  %2645 = vmatpush3.msra.mxu1 %v3593_v11 }
  0x76   : > { %1051 = vmatpush1.msra.mxu0 %v3599_v12  ;;  %2646 = vmatprep.subr.mxu1 %v4468_v51 }
  0x77   : > { %1052 = vmatprep.subr.mxu0 %v3606_v13  ;;  %2647 = vmatpush3.msra.mxu1 %v3612_v14 }
  0x78   : > { %1053 = vmatpush1.msra.mxu0 %v3618_v15  ;;  %2648 = vmatprep.subr.mxu1 %v4468_v51 }
  0x79   : > { %1054 = vmatprep.subr.mxu0 %v3625_v16  ;;  %2649 = vmatpush3.msra.mxu1 %v3631_v17 }
  0x7a   : > { %1055 = vmatpush1.msra.mxu0 %v3637_v18  ;;  %2650 = vmatprep.subr.mxu1 %v4468_v51 }
  0x7b   : > { %1056 = vmatprep.subr.mxu0 %v3644_v19  ;;  %2651 = vmatpush3.msra.mxu1 %v3650_v20 }
  0x7c   : > { %1057 = vmatpush1.msra.mxu0 %v3656_v21  ;;  %2652 = vmatprep.subr.mxu1 %v4468_v51 }
  0x7d   : > { %1091 = vmatmul.mubr.f32.vlgmr.msra.gmra.mxu0 %v3660_v22  ;;  %2653 = vmatpush3.msra.mxu1 %v3666_v23 }
  0x7e   : > { %2654 = vmatprep.subr.mxu1 %v4468_v51  ;;  %2662 = vmatprep.mubr.msk.f32.mxu1 %vm2983_vm0, %v4468_v51 }
  0x7f   : > { %2655 = vmatpush3.msra.mxu1 %v3675_v24  ;;  %1198 = vmatprep.subr.mxu0 %v3392_v40 }
  0x80   : > { %2656 = vmatprep.subr.mxu1 %v4468_v51  ;;  %1199 = vmatpush1.msra.mxu0 %v3397_v41 }
  0x81   : > { %2657 = vmatpush3.msra.mxu1 %v3683_v25  ;;  %1200 = vmatprep.subr.mxu0 %v3402_v42 }
  0x82   : > { %2658 = vmatprep.subr.mxu1 %v4468_v51  ;;  %1201 = vmatpush1.msra.mxu0 %v3409_v43 }
  0x83   : > { %2659 = vmatpush3.msra.mxu1 %v3693_v26  ;;  %1202 = vmatprep.subr.mxu0 %v3416_v45 }
  0x84   : > { %2660 = vmatprep.subr.mxu1 %v4468_v51  ;;  %1203 = vmatpush1.msra.mxu0 %v3422_v46 }
  0x85   : > { %2661 = vmatpush3.msra.mxu1 %v3702_v27  ;;  %1204 = vmatprep.subr.mxu0 %v3430_v48 }
  0x86   : > { %2663 = vmatmul.mubr.f32.vlgmr.msra.gmra.mxu1 %v3660_v22  ;;  %2665 = vmatprep.subr.mxu1 %v4468_v51 }
  0x87   : > { %2666 = vmatpush3.msra.mxu1 %v3435_v49  ;;  %1205 = vmatpush1.msra.mxu0 %v3441_v50 }
  0x88   : > { %2667 = vmatprep.subr.mxu1 %v4468_v51  ;;  %1206 = vmatprep.subr.mxu0 %v3448_v52 }
  0x89   : > { %2668 = vmatpush3.msra.mxu1 %v3467_v55  ;;  %1207 = vmatpush1.msra.mxu0 %v3454_v53 }
  0x8a   : > { %2669 = vmatprep.subr.mxu1 %v4468_v51  ;;  %1208 = vmatprep.subr.mxu0 %v3461_v54 }
  0x8b   : > { %2670 = vmatpush3.msra.mxu1 %v3499_v60  ;;  %1209 = vmatpush1.msra.mxu0 %v3473_v56 }
  0x8c   : > { %2671 = vmatprep.subr.mxu1 %v4468_v51  ;;  %1210 = vmatprep.subr.mxu0 %v3480_v57 }
  0x8d   : > { %2672 = vmatpush3.msra.mxu1 %v3517_v63  ;;  %1211 = vmatpush1.msra.mxu0 %v3486_v58 }
  0x8e   : > { %2673 = vmatprep.subr.mxu1 %v4468_v51  ;;  %1212 = vmatprep.subr.mxu0 %v3493_v59 }
  0x8f   : > { %2674 = vmatpush3.msra.mxu1 %v3536_v2  ;;  %1213 = vmatpush1.msra.mxu0 %v3505_v61 }
  0x90   : > { %2675 = vmatprep.subr.mxu1 %v4468_v51  ;;  %1214 = vmatprep.subr.mxu0 %v3511_v62 }
  0x91   : > { %2676 = vmatpush3.msra.mxu1 %v3555_v5  ;;  %1215 = vmatpush1.msra.mxu0 %v3523_v0 }
  0x92   : > { %2677 = vmatprep.subr.mxu1 %v4468_v51  ;;  %1216 = vmatprep.subr.mxu0 %v3530_v1 }
  0x93   : > { %2678 = vmatpush3.msra.mxu1 %v3574_v8  ;;  %1217 = vmatpush1.msra.mxu0 %v3542_v3 }
  0x94   : > { %2679 = vmatprep.subr.mxu1 %v4468_v51  ;;  %1218 = vmatprep.subr.mxu0 %v3549_v4 }
  0x95   : > { %2680 = vmatpush3.msra.mxu1 %v3593_v11  ;;  %1219 = vmatpush1.msra.mxu0 %v3561_v6 }
  0x96   : > { %2681 = vmatprep.subr.mxu1 %v4468_v51  ;;  %1220 = vmatprep.subr.mxu0 %v3568_v7 }
  0x97   : > { %2682 = vmatpush3.msra.mxu1 %v3612_v14  ;;  %1221 = vmatpush1.msra.mxu0 %v3580_v9 }
  0x98   : > { %2683 = vmatprep.subr.mxu1 %v4468_v51  ;;  %1222 = vmatprep.subr.mxu0 %v3587_v10 }
  0x99   : > { %2684 = vmatpush3.msra.mxu1 %v3631_v17  ;;  %1223 = vmatpush1.msra.mxu0 %v3599_v12 }
  0x9a   : > { %2685 = vmatprep.subr.mxu1 %v4468_v51  ;;  %1224 = vmatprep.subr.mxu0 %v3606_v13  ;;  %v4509_v13 = vsub.s32 1, %v3774_v37 }
  0x9b   : > { %2686 = vmatpush3.msra.mxu1 %v3650_v20  ;;  %1225 = vmatpush1.msra.mxu0 %v3618_v15 }
  0x9c   : > { %2687 = vmatprep.subr.mxu1 %v4468_v51  ;;  %1226 = vmatprep.subr.mxu0 %v3625_v16 }
  0x9d   : > { %2688 = vmatpush3.msra.mxu1 %v3666_v23  ;;  %1227 = vmatpush1.msra.mxu0 %v3637_v18 }
  0x9e   : > { %2689 = vmatprep.subr.mxu1 %v4468_v51  ;;  %1228 = vmatprep.subr.mxu0 %v3644_v19 }
  0x9f   : > { %2690 = vmatpush3.msra.mxu1 %v3675_v24  ;;  %1229 = vmatpush1.msra.mxu0 %v3656_v21 }
  0xa0   : > { %2691 = vmatprep.subr.mxu1 %v4468_v51  ;;  %1262 = vmatprep.mubr.f32.mxu0 %v4468_v51 }
  0xa1   : > { %2692 = vmatpush3.msra.mxu1 %v3683_v25  ;;  %2697 = vmatprep.mubr.msk.f32.mxu1 %vm2983_vm0, %v4468_v51 }
  0xa2   : > { %2693 = vmatprep.subr.mxu1 %v4468_v51  ;;  %1365 = vmatprep.subr.mxu0 %v3392_v40 }
  0xa3   : > { %2694 = vmatpush3.msra.mxu1 %v3693_v26 }
  0xa4   : > { %2695 = vmatprep.subr.mxu1 %v4468_v51 }
  0xa5   : > { %2696 = vmatpush3.msra.mxu1 %v3702_v27 }
  0xa6   : > { %2700 = vmatprep.subr.mxu1 %v4468_v51  ;;  %v935_v51 = vld [vmem:[%s4459_s6] sm:$0x7] }
  0xa7   : > { %v948_v27 = vrot.slane %v935_v51, %v4499_v44  ;;  %v940_v9 = vrot.slane %v935_v51, %v4508_v34  ;;  %v944_v20 = vrot.slane %v935_v51, %v4509_v13 }
  0xf5   : > { %v653_v28 = vpop.f32.mrf.mxu0 }
  0xf7   : > { %v655_v29 = vpop.f32.mrf.mxu0  ;;  %v2588_v33 = vpop.f32.mrf.mxu1 }
  0xf9   : > { %v742_v36 = vpop.f32.mrf.mxu1 }
 0x10a   : > { %v659_v30 = vpop.f32.mrf.mxu0 }
 0x10c   : > { %v661_v31 = vpop.f32.mrf.mxu0 }
 0x10f   : > { %v665_v32 = vpop.f32.mrf.mxu0 }
 0x111   : > { %v667_v35 = vpop.f32.mrf.mxu0 }
 0x114   : > { %v671_v38 = vpop.f32.mrf.mxu0 }
 0x116   : > { %v673_v47 = vpop.f32.mrf.mxu0 }
 0x117   : > { %v2591_v39 = vpop.f32.mrf.mxu1 }
 0x119   : > { %v752_v40 = vpop.f32.mrf.mxu1 }
 0x11c   : > { %v827_v21 = vpop.f32.mrf.mxu0  ;;  %v2626_v19 = vpop.f32.mrf.mxu1 }
 0x11d   : > { %v922_v26 = vadd.f32 %v2626_v19, %v2588_v33 }
 0x11e   : > { %v829_v18 = vpop.f32.mrf.mxu0  ;;  %v916_v16 = vpop.f32.mrf.mxu1 }
 0x11f   : > { %v3783_v25 = vadd.f32 %v948_v27, %v922_v26 }
 0x120   : > { %v2629_v15 = vpop.f32.mrf.mxu1 }
 0x121   : > { %4532 = vst [vmem:[#allocation24_spill] sm:$0xff] %v3783_v25  ;;  %v833_v24 = vpop.f32.mrf.mxu0  ;;  %v932_v12 = vadd.f32 %v2629_v15, %v2591_v39 }
 0x122   : > { %v834_v10 = vadd.f32 %v833_v24, %v659_v30  ;;  %v926_v23 = vpop.f32.mrf.mxu1 }
 0x123   : > { %v835_v44 = vpop.f32.mrf.mxu0  ;;  %v3788_v7 = vadd.f32 %v948_v27, %v932_v12  ;;  %v927_v19 = vadd.f32 %v926_v23, %v752_v40 }
 0x124   : > { %v836_v33 = vadd.f32 %v835_v44, %v661_v31  ;;  %v3792_v26 = vadd.f32 %v940_v9, %v834_v10  ;;  %v828_v10 = vadd.f32 %v827_v21, %v653_v28 }
 0x125   : > { %4533 = vst [vmem:[#allocation25_spill] sm:$0xff] %v3788_v7  ;;  %v839_v25 = vpop.f32.mrf.mxu0  ;;  %v3794_v6 = vadd.f32 %v948_v27, %v927_v19 }
 0x126   : > { %v840_v4 = vadd.f32 %v839_v25, %v665_v32  ;;  %v3796_v15 = vadd.f32 %v944_v20, %v836_v33  ;;  %v952_v44 = vadd.f32 %v940_v9, %v828_v10  ;;  %v830_v25 = vadd.f32 %v829_v18, %v655_v29 }
 0x127   : > { %4534 = vst [vmem:[#allocation26_spill] sm:$0xff] %v3794_v6  ;;  %v841_v24 = vpop.f32.mrf.mxu0  ;;  %v917_v18 = vadd.f32 %v916_v16, %v742_v36  ;;  %v4539_v16 = vmov 0.0   ;;  %v4542_v36 = vld [vmem:[#allocation16_spill] sm:$0xff] }
 0x128   : > { %v842_v30 = vadd.f32 %v841_v24, %v667_v35  ;;  %v3798_v39 = vadd.f32 %v940_v9, %v840_v4  ;;  %v953_v4 = vadd.f32 %v944_v20, %v830_v25 }
 0x129   : > { %v845_v34 = vpop.f32.mrf.mxu0 }
 0x12a   : > { %4535 = vst [vmem:[#allocation27_spill] sm:$0xff] %v3798_v39  ;;  %v846_v12 = vadd.f32 %v845_v34, %v671_v38  ;;  %v3800_v7 = vadd.f32 %v944_v20, %v842_v30 }
 0x12b   : > { %v847_v40 = vpop.f32.mrf.mxu0 }
 0x12c   : > { %4536 = vst [vmem:[#allocation28_spill] sm:$0xff] %v3800_v7  ;;  %v848_v23 = vadd.f32 %v847_v40, %v673_v47  ;;  %v3802_v31 = vadd.f32 %v940_v9, %v846_v12  ;;  %v3809_v9 = vld [vmem:[%s4461_s8] ss:$0 sm:$0xff] }
 0x12e   : > { %4537 = vst [vmem:[#allocation29_spill] sm:$0xff] %v3802_v31  ;;  %v3804_v51 = vadd.f32 %v944_v20, %v848_v23  ;;  %v954_v20 = vadd.f32 %v948_v27, %v917_v18  ;;  %v4541_v27 = vld [vmem:[#allocation6_spill] sm:$0xff]  ;;  %v4552_v18 = vld [vmem:[#allocation13_spill] sm:$0xff] }
 0x130   : > { %4538 = vst [vmem:[#allocation30_spill] sm:$0xff] %v3804_v51 }
 0x13d   : > { %v1092_v19 = vpop.f32.mrf.mxu0 }
 0x13e   : > { %v1170_v32 = vadd.f32 %v1092_v19, %v952_v44 }
 0x13f   : > { %v1094_v13 = vpop.f32.mrf.mxu0 }
 0x140   : > { %v2360_v33 = vmul.f32 -1.442695, %v1170_v32  ;;  %v1177_v35 = vadd.f32 %v1094_v13, %v953_v4  ;;  %v4544_v4 = vld [vmem:[#allocation8_spill] sm:$0xff] }
 0x142   : > { %2923 = vpow2.f32 %v2360_v33  ;;  %v2361_v38 = vmul.f32 -1.442695, %v1177_v35  ;;  %v4543_v33 = vld [vmem:[#allocation7_spill] sm:$0xff]  ;;  %v4545_v35 = vld [vmem:[#allocation18_spill] sm:$0xff] }
 0x144   : > { %2925 = vpow2.f32 %v2361_v38  ;;  %v4547_v38 = vld [vmem:[#allocation10_spill] sm:$0xff] }
 0x146   : > { %v1163_v24 = vpop.f32.mrf.mxu1 }
 0x147   : > { %v1190_v28 = vadd.f32 %v3809_v9, %v1163_v24  ;;  %v4546_v24 = vld [vmem:[#allocation9_spill] sm:$0xff] }
 0x148   : > { %v2664_v34 = vpop.f32.mrf.mxu1 }
 0x149   : > { %v4548_v34 = vld [vmem:[#allocation19_spill] sm:$0xff] }
 0x14f   : > { %v2924_v30 = vpop.eup %2923 }
 0x150   : > { %v1174_v47 = vadd.f32 1.0, %v2924_v30  ;;  %v4549_v30 = vld [vmem:[#allocation11_spill] sm:$0xff] }
 0x151   : > { %v2926_v12 = vpop.eup %2925 }
 0x152   : > { %2927 = vrcp.f32 %v1174_v47  ;;  %v1181_v21 = vadd.f32 1.0, %v2926_v12  ;;  %v4550_v47 = vld [vmem:[#allocation12_spill] sm:$0xff] }
 0x153   : > { %v4551_v12 = vld [vmem:[#allocation20_spill] sm:$0xff] }
 0x154   : > { %2929 = vrcp.f32 %v1181_v21  ;;  %v4553_v21 = vld [vmem:[#allocation14_spill] sm:$0xff] }
 0x15f   : > { %v2928_v29 = vpop.eup %2927 }
 0x160   : > { %v1191_v13 = vmul.f32 %v2928_v29, %v1190_v28  ;;  %v4554_v28 = vld [vmem:[#allocation21_spill] sm:$0xff]  ;;  %v4555_v29 = vld [vmem:[#allocation15_spill] sm:$0xff] }
 0x161   : > { %v2930_v23 = vpop.eup %2929 }
 0x162   : > { %v1192_v40 = vadd.f32 %v1191_v13, %v954_v20  ;;  %v1194_v10 = vsub.f32 1.0, %v2930_v23  ;;  %v1196_v25 = vmul.f32 %v2930_v23, %v3660_v22  ;;  %v4540_v22 = vld [vmem:[#allocation5_spill] sm:$0xff]  ;;  %v4557_v13 = vld [vmem:[#allocation22_spill] sm:$0xff] }
 0x163   : > { %v4556_v20 = vld [vmem:[#allocation17_spill] sm:$0xff] }
 0x164   : > { %2931 = vtanh.f32 %v1192_v40  ;;  %v4558_v40 = vld [vmem:[#allocation4_spill] sm:$0xff] }
 0x171   : > { %v2932_v44 = vpop.eup %2931 }
 0x172   : > { %v1195_v19 = vmul.f32 %v2932_v44, %v1194_v10 }
 0x174   : > { %v3813_v32 = vadd.f32 %v1196_v25, %v1195_v19 }
 0x176   : > { %1263 = vmatmul.mubr.f32.vlgmr.msra.gmra.mxu0 %v3813_v32  ;;  %2698 = vmatmul.mubr.f32.vlgmr.msra.gmra.mxu1 %v3813_v32 }
 0x177   : > { %1366 = vmatpush1.msra.mxu0 %v3397_v41  ;;  %2701 = vmatpush3.msra.mxu1 %v3435_v49 }
 0x178   : > { %1367 = vmatprep.subr.mxu0 %v3402_v42  ;;  %2702 = vmatprep.subr.mxu1 %v4539_v16 }
 0x179   : > { %1368 = vmatpush1.msra.mxu0 %v3409_v43  ;;  %2703 = vmatpush3.msra.mxu1 %v3467_v55 }
 0x17a   : > { %1369 = vmatprep.subr.mxu0 %v3416_v45  ;;  %2704 = vmatprep.subr.mxu1 %v4539_v16 }
 0x17b   : > { %1370 = vmatpush1.msra.mxu0 %v3422_v46  ;;  %2705 = vmatpush3.msra.mxu1 %v3499_v60 }
 0x17c   : > { %1371 = vmatprep.subr.mxu0 %v3430_v48  ;;  %2706 = vmatprep.subr.mxu1 %v4539_v16 }
 0x17d   : > { %1372 = vmatpush1.msra.mxu0 %v3441_v50  ;;  %2707 = vmatpush3.msra.mxu1 %v3517_v63 }
 0x17e   : > { %1373 = vmatprep.subr.mxu0 %v3448_v52  ;;  %2708 = vmatprep.subr.mxu1 %v4539_v16 }
 0x17f   : > { %1374 = vmatpush1.msra.mxu0 %v3454_v53  ;;  %2709 = vmatpush3.msra.mxu1 %v3536_v2 }
 0x180   : > { %1375 = vmatprep.subr.mxu0 %v3461_v54  ;;  %2710 = vmatprep.subr.mxu1 %v4539_v16 }
 0x181   : > { %1376 = vmatpush1.msra.mxu0 %v3473_v56  ;;  %2711 = vmatpush3.msra.mxu1 %v3555_v5 }
 0x182   : > { %1377 = vmatprep.subr.mxu0 %v3480_v57  ;;  %2712 = vmatprep.subr.mxu1 %v4539_v16 }
 0x183   : > { %1378 = vmatpush1.msra.mxu0 %v3486_v58  ;;  %2713 = vmatpush3.msra.mxu1 %v3574_v8 }
 0x184   : > { %1379 = vmatprep.subr.mxu0 %v3493_v59  ;;  %2714 = vmatprep.subr.mxu1 %v4539_v16 }
 0x185   : > { %1380 = vmatpush1.msra.mxu0 %v3505_v61  ;;  %2715 = vmatpush3.msra.mxu1 %v3593_v11 }
 0x186   : > { %1381 = vmatprep.subr.mxu0 %v3511_v62  ;;  %2716 = vmatprep.subr.mxu1 %v4539_v16 }
 0x187   : > { %1382 = vmatpush1.msra.mxu0 %v3523_v0  ;;  %2717 = vmatpush3.msra.mxu1 %v3612_v14 }
 0x188   : > { %1383 = vmatprep.subr.mxu0 %v3530_v1  ;;  %2718 = vmatprep.subr.mxu1 %v4539_v16 }
 0x189   : > { %1384 = vmatpush1.msra.mxu0 %v3542_v3  ;;  %2719 = vmatpush3.msra.mxu1 %v3631_v17 }
 0x18a   : > { %1385 = vmatprep.subr.mxu0 %v4540_v22  ;;  %2720 = vmatprep.subr.mxu1 %v4539_v16 }
 0x18b   : > { %1386 = vmatpush1.msra.mxu0 %v4541_v27  ;;  %2721 = vmatpush3.msra.mxu1 %v4542_v36 }
 0x18c   : > { %1387 = vmatprep.subr.mxu0 %v4543_v33  ;;  %2722 = vmatprep.subr.mxu1 %v4539_v16 }
 0x18d   : > { %1388 = vmatpush1.msra.mxu0 %v4544_v4  ;;  %2723 = vmatpush3.msra.mxu1 %v4545_v35 }
 0x18e   : > { %1389 = vmatprep.subr.mxu0 %v4546_v24  ;;  %2724 = vmatprep.subr.mxu1 %v4539_v16 }
 0x18f   : > { %1390 = vmatpush1.msra.mxu0 %v4547_v38  ;;  %2725 = vmatpush3.msra.mxu1 %v4548_v34 }
 0x190   : > { %1391 = vmatprep.subr.mxu0 %v4549_v30  ;;  %2726 = vmatprep.subr.mxu1 %v4539_v16 }
 0x191   : > { %1392 = vmatpush1.msra.mxu0 %v4550_v47  ;;  %2727 = vmatpush3.msra.mxu1 %v4551_v12 }
 0x192   : > { %1393 = vmatprep.subr.mxu0 %v4552_v18  ;;  %2728 = vmatprep.subr.mxu1 %v4539_v16 }
 0x193   : > { %1394 = vmatpush1.msra.mxu0 %v4553_v21  ;;  %2729 = vmatpush3.msra.mxu1 %v4554_v28  ;;  %v4559_v28 = vld [vmem:[#allocation24_spill] sm:$0xff] }
 0x194   : > { %1395 = vmatprep.subr.mxu0 %v4555_v29  ;;  %2730 = vmatprep.subr.mxu1 %v4539_v16 }
 0x195   : > { %1396 = vmatpush1.msra.mxu0 %v4556_v20  ;;  %1429 = vmatprep.mubr.f32.mxu0 %v4539_v16 }
 0x196   : > { %2731 = vmatpush3.msra.mxu1 %v4557_v13  ;;  %2732 = vmatprep.mubr.msk.f32.mxu1 %vm2983_vm0, %v4539_v16 }
 0x197   : > { %1532 = vmatprep.subr.mxu0 %v4558_v40  ;;  %2735 = vmatprep.subr.mxu1 %v4539_v16 }
 0x236   : > { %v1264_v23 = vpop.f32.mrf.mxu0  ;;  %v1335_v10 = vpop.f32.mrf.mxu1 }
 0x237   : > { %v1343_v44 = vadd.f32 %v1264_v23, %v3792_v26  ;;  %v1357_v40 = vadd.f32 %v3809_v9, %v1335_v10 }
 0x238   : > { %v2699_v19 = vpop.f32.mrf.mxu1  ;;  %v1266_v37 = vpop.f32.mrf.mxu0 }
 0x239   : > { %v2363_v25 = vmul.f32 -1.442695, %v1343_v44  ;;  %v1350_v51 = vadd.f32 %v1266_v37, %v3796_v15 }
 0x23b   : > { %2933 = vpow2.f32 %v2363_v25  ;;  %v2364_v31 = vmul.f32 -1.442695, %v1350_v51 }
 0x23d   : > { %2935 = vpow2.f32 %v2364_v31 }
 0x248   : > { %v2934_v6 = vpop.eup %2933 }
 0x249   : > { %v1347_v7 = vadd.f32 1.0, %v2934_v6 }
 0x24a   : > { %v2936_v39 = vpop.eup %2935 }
 0x24b   : > { %2937 = vrcp.f32 %v1347_v7  ;;  %v1354_v13 = vadd.f32 1.0, %v2936_v39  ;;  %v4567_v39 = vld [vmem:[#allocation29_spill] sm:$0xff] }
 0x24d   : > { %2939 = vrcp.f32 %v1354_v13 }
 0x258   : > { %v2938_v20 = vpop.eup %2937 }
 0x259   : > { %v1358_v29 = vmul.f32 %v2938_v20, %v1357_v40 }
 0x25a   : > { %v2940_v23 = vpop.eup %2939 }
 0x25b   : > { %v1359_v26 = vadd.f32 %v1358_v29, %v4559_v28  ;;  %v1361_v44 = vsub.f32 1.0, %v2940_v23  ;;  %v1363_v37 = vmul.f32 %v2940_v23, %v3813_v32 }
 0x25d   : > { %2941 = vtanh.f32 %v1359_v26 }
 0x26a   : > { %v2942_v19 = vpop.eup %2941 }
 0x26b   : > { %v1362_v25 = vmul.f32 %v2942_v19, %v1361_v44 }
 0x26d   : > { %v3889_v15 = vadd.f32 %v1363_v37, %v1362_v25 }
 0x26f   : > { %1430 = vmatmul.mubr.f32.vlgmr.msra.gmra.mxu0 %v3889_v15  ;;  %2733 = vmatmul.mubr.f32.vlgmr.msra.gmra.mxu1 %v3889_v15 }
 0x270   : > { %1533 = vmatpush1.msra.mxu0 %v3397_v41  ;;  %2736 = vmatpush3.msra.mxu1 %v3435_v49  ;;  %v4560_v41 = vld [vmem:[#allocation21_spill] sm:$0xff]  ;;  %v4564_v49 = vld [vmem:[#allocation27_spill] sm:$0xff] }
 0x271   : > { %1534 = vmatprep.subr.mxu0 %v3402_v42  ;;  %2737 = vmatprep.subr.mxu1 %v4539_v16  ;;  %v4561_v42 = vld [vmem:[#allocation15_spill] sm:$0xff] }
 0x272   : > { %1535 = vmatpush1.msra.mxu0 %v3409_v43  ;;  %2738 = vmatpush3.msra.mxu1 %v3467_v55  ;;  %v4562_v43 = vld [vmem:[#allocation17_spill] sm:$0xff]  ;;  %v4565_v55 = vld [vmem:[#allocation28_spill] sm:$0xff] }
 0x273   : > { %1536 = vmatprep.subr.mxu0 %v3416_v45  ;;  %2739 = vmatprep.subr.mxu1 %v4539_v16  ;;  %v4563_v45 = vld [vmem:[#allocation22_spill] sm:$0xff] }
 0x274   : > { %1537 = vmatpush1.msra.mxu0 %v3422_v46  ;;  %2740 = vmatpush3.msra.mxu1 %v3499_v60 }
 0x275   : > { %1538 = vmatprep.subr.mxu0 %v3430_v48  ;;  %2741 = vmatprep.subr.mxu1 %v4539_v16 }
 0x276   : > { %1539 = vmatpush1.msra.mxu0 %v3441_v50  ;;  %2742 = vmatpush3.msra.mxu1 %v3517_v63 }
 0x277   : > { %1540 = vmatprep.subr.mxu0 %v3448_v52  ;;  %2743 = vmatprep.subr.mxu1 %v4539_v16 }
 0x278   : > { %1541 = vmatpush1.msra.mxu0 %v3454_v53  ;;  %2744 = vmatpush3.msra.mxu1 %v3536_v2 }
 0x279   : > { %1542 = vmatprep.subr.mxu0 %v3461_v54  ;;  %2745 = vmatprep.subr.mxu1 %v4539_v16 }
 0x27a   : > { %1543 = vmatpush1.msra.mxu0 %v3473_v56  ;;  %2746 = vmatpush3.msra.mxu1 %v3555_v5 }
 0x27b   : > { %1544 = vmatprep.subr.mxu0 %v3480_v57  ;;  %2747 = vmatprep.subr.mxu1 %v4539_v16 }
 0x27c   : > { %1545 = vmatpush1.msra.mxu0 %v3486_v58  ;;  %2748 = vmatpush3.msra.mxu1 %v3574_v8 }
 0x27d   : > { %1546 = vmatprep.subr.mxu0 %v3493_v59  ;;  %2749 = vmatprep.subr.mxu1 %v4539_v16 }
 0x27e   : > { %1547 = vmatpush1.msra.mxu0 %v3505_v61  ;;  %2750 = vmatpush3.msra.mxu1 %v3593_v11 }
 0x27f   : > { %1548 = vmatprep.subr.mxu0 %v3511_v62  ;;  %2751 = vmatprep.subr.mxu1 %v4539_v16 }
 0x280   : > { %1549 = vmatpush1.msra.mxu0 %v3523_v0  ;;  %2752 = vmatpush3.msra.mxu1 %v3612_v14 }
 0x281   : > { %1550 = vmatprep.subr.mxu0 %v3530_v1  ;;  %2753 = vmatprep.subr.mxu1 %v4539_v16  ;;  %v4566_v1 = vld [vmem:[#allocation26_spill] sm:$0xff] }
 0x282   : > { %1551 = vmatpush1.msra.mxu0 %v3542_v3  ;;  %2754 = vmatpush3.msra.mxu1 %v3631_v17 }
 0x283   : > { %1552 = vmatprep.subr.mxu0 %v4540_v22  ;;  %2755 = vmatprep.subr.mxu1 %v4539_v16  ;;  %v4568_v22 = vld [vmem:[#allocation30_spill] sm:$0xff] }
 0x284   : > { %1553 = vmatpush1.msra.mxu0 %v4541_v27  ;;  %2756 = vmatpush3.msra.mxu1 %v4542_v36 }
 0x285   : > { %1554 = vmatprep.subr.mxu0 %v4543_v33  ;;  %2757 = vmatprep.subr.mxu1 %v4539_v16 }
 0x286   : > { %1555 = vmatpush1.msra.mxu0 %v4544_v4  ;;  %2758 = vmatpush3.msra.mxu1 %v4545_v35 }
 0x287   : > { %1556 = vmatprep.subr.mxu0 %v4546_v24  ;;  %2759 = vmatprep.subr.mxu1 %v4539_v16 }
 0x288   : > { %1557 = vmatpush1.msra.mxu0 %v4547_v38  ;;  %2760 = vmatpush3.msra.mxu1 %v4548_v34 }
 0x289   : > { %1558 = vmatprep.subr.mxu0 %v4549_v30  ;;  %2761 = vmatprep.subr.mxu1 %v4539_v16 }
 0x28a   : > { %1559 = vmatpush1.msra.mxu0 %v4550_v47  ;;  %2762 = vmatpush3.msra.mxu1 %v4551_v12  ;;  %v4569_v47 = vld [vmem:[#allocation25_spill] sm:$0xff] }
 0x28b   : > { %1560 = vmatprep.subr.mxu0 %v4552_v18  ;;  %2763 = vmatprep.subr.mxu1 %v4539_v16 }
 0x28c   : > { %1561 = vmatpush1.msra.mxu0 %v4553_v21  ;;  %2764 = vmatpush3.msra.mxu1 %v4560_v41 }
 0x28d   : > { %1562 = vmatprep.subr.mxu0 %v4561_v42  ;;  %2765 = vmatprep.subr.mxu1 %v4539_v16 }
 0x28e   : > { %1563 = vmatpush1.msra.mxu0 %v4562_v43  ;;  %1596 = vmatprep.mubr.f32.mxu0 %v4539_v16 }
 0x28f   : > { %2766 = vmatpush3.msra.mxu1 %v4563_v45  ;;  %2767 = vmatprep.mubr.msk.f32.mxu1 %vm2983_vm0, %v4539_v16 }
 0x32f   : > { %v1431_v46 = vpop.f32.mrf.mxu0  ;;  %v1502_v48 = vpop.f32.mrf.mxu1 }
 0x330   : > { %v1510_v50 = vadd.f32 %v1431_v46, %v4564_v49  ;;  %v1524_v62 = vadd.f32 %v3809_v9, %v1502_v48 }
 0x331   : > { %v2734_v52 = vpop.f32.mrf.mxu1  ;;  %v1433_v54 = vpop.f32.mrf.mxu0 }
 0x332   : > { %v2365_v53 = vmul.f32 -1.442695, %v1510_v50  ;;  %v1517_v56 = vadd.f32 %v1433_v54, %v4565_v55 }
 0x334   : > { %2943 = vpow2.f32 %v2365_v53  ;;  %v2366_v57 = vmul.f32 -1.442695, %v1517_v56 }
 0x336   : > { %2945 = vpow2.f32 %v2366_v57 }
 0x341   : > { %v2944_v58 = vpop.eup %2943 }
 0x342   : > { %v1514_v59 = vadd.f32 1.0, %v2944_v58 }
 0x343   : > { %v2946_v60 = vpop.eup %2945 }
 0x344   : > { %2947 = vrcp.f32 %v1514_v59  ;;  %v1521_v61 = vadd.f32 1.0, %v2946_v60 }
 0x346   : > { %2949 = vrcp.f32 %v1521_v61 }
 0x351   : > { %v2948_v63 = vpop.eup %2947 }
 0x352   : > { %v1525_v0 = vmul.f32 %v2948_v63, %v1524_v62 }
 0x353   : > { %v2950_v3 = vpop.eup %2949 }
 0x354   : > { %v1526_v2 = vadd.f32 %v1525_v0, %v4566_v1  ;;  %v1528_v5 = vsub.f32 1.0, %v2950_v3  ;;  %v1530_v8 = vmul.f32 %v2950_v3, %v3889_v15 }
 0x356   : > { %2951 = vtanh.f32 %v1526_v2 }
 0x363   : > { %v2952_v6 = vpop.eup %2951 }
 0x364   : > { %v1529_v7 = vmul.f32 %v2952_v6, %v1528_v5 }
 0x366   : > { %v1531_v11 = vadd.f32 %v1530_v8, %v1529_v7 }
 0x368   : > { %1597 = vmatmul.mubr.f32.vlgmr.msra.gmra.mxu0 %v1531_v11  ;;  %2768 = vmatmul.mubr.f32.vlgmr.msra.gmra.mxu1 %v1531_v11 }
 0x428   : > { %v1598_v14 = vpop.f32.mrf.mxu0  ;;  %v1669_v17 = vpop.f32.mrf.mxu1 }
 0x429   : > { %v1677_v31 = vadd.f32 %v1598_v14, %v4567_v39  ;;  %v1691_v38 = vadd.f32 %v3809_v9, %v1669_v17 }
 0x42a   : > { %v2769_v51 = vpop.f32.mrf.mxu1  ;;  %v1600_v16 = vpop.f32.mrf.mxu0 }
 0x42b   : > { %v2367_v32 = vmul.f32 -1.442695, %v1677_v31  ;;  %v1684_v27 = vadd.f32 %v1600_v16, %v4568_v22 }
 0x42d   : > { %2953 = vpow2.f32 %v2367_v32  ;;  %v2368_v36 = vmul.f32 -1.442695, %v1684_v27 }
 0x42f   : > { %2955 = vpow2.f32 %v2368_v36 }
 0x43a   : > { %v2954_v33 = vpop.eup %2953 }
 0x43b   : > { %v1681_v4 = vadd.f32 1.0, %v2954_v33 }
 0x43c   : > { %v2956_v35 = vpop.eup %2955 }
 0x43d   : > { %2957 = vrcp.f32 %v1681_v4  ;;  %v1688_v24 = vadd.f32 1.0, %v2956_v35 }
 0x43f   : > { %2959 = vrcp.f32 %v1688_v24 }
 0x44a   : > { %v2958_v34 = vpop.eup %2957 }
 0x44b   : > { %v1692_v30 = vmul.f32 %v2958_v34, %v1691_v38 }
 0x44c   : > { %v2960_v18 = vpop.eup %2959 }
 0x44d   : > { %v1693_v12 = vadd.f32 %v1692_v30, %v4569_v47  ;;  %v1695_v21 = vsub.f32 1.0, %v2960_v18  ;;  %v1697_v20 = vmul.f32 %v2960_v18, %v1531_v11 }
 0x44f   : > { %2961 = vtanh.f32 %v1693_v12 }
 0x45c   : > { %v2962_v28 = vpop.eup %2961 }
 0x45d   : > { %v1696_v29 = vmul.f32 %v2962_v28, %v1695_v21  ;;  %1703 = sbr.rel (%p2369_p5) target bundleno = 1635 (0x663), region = 84 }
 0x45f   : > { %v3967_v13 = vadd.f32 %v1697_v20, %v1696_v29 }
 0x461   : > { %1699 = vst [vmem:[#allocation3] sm:$0xff] %v3967_v13 }
 0x462   : > { %v1802_v9 = vld [vmem:[%s4458_s5 + $0x170] sm:$0xff]  ;;  %v1801_v10 = vld [vmem:[%s4458_s5 + $0x168] sm:$0xff]  ;;  %v1799_v40 = vld [vmem:[%s4458_s5 + $0x158] sm:$0xff]  ;;  %v2984_v23 = vmov 0.0   ;;  %vm2985_vm1 = vmmov 0  }
 0x463   : > { %1804 = vmatprep.subr.mxu0 %v1802_v9  ;;  %v1798_v26 = vld [vmem:[%s4458_s5 + $0x150] sm:$0xff]  ;;  %2770 = vmatprep.subr.mxu1 %v2984_v23  ;;  %v1803_v44 = vld [vmem:[%s4458_s5 + $0x178] sm:$0xff]  ;;  %v1796_v19 = vld [vmem:[%s4458_s5 + $0x140] sm:$0xff] }
 0x464   : > { %1805 = vmatpush1.msra.mxu0 %v1801_v10  ;;  %2771 = vmatpush3.msra.mxu1 %v1803_v44  ;;  %v1800_v25 = vld [vmem:[%s4458_s5 + $0x160] sm:$0xff]  ;;  %v1795_v37 = vld [vmem:[%s4458_s5 + $0x138] sm:$0xff]  ;;  %v1797_v15 = vld [vmem:[%s4458_s5 + $0x148] sm:$0xff] }
 0x465   : > { %1806 = vmatprep.subr.mxu0 %v1799_v40  ;;  %2772 = vmatprep.subr.mxu1 %v2984_v23  ;;  %v1793_v41 = vld [vmem:[%s4458_s5 + $0x128] sm:$0xff]  ;;  %v1792_v42 = vld [vmem:[%s4458_s5 + $0x120] sm:$0xff]  ;;  %v1794_v43 = vld [vmem:[%s4458_s5 + $0x130] sm:$0xff] }
 0x466   : > { %1807 = vmatpush1.msra.mxu0 %v1798_v26  ;;  %2773 = vmatpush3.msra.mxu1 %v1800_v25  ;;  %v1790_v45 = vld [vmem:[%s4458_s5 + $0x110] sm:$0xff]  ;;  %v1789_v46 = vld [vmem:[%s4458_s5 + $0x108] sm:$0xff]  ;;  %v1791_v48 = vld [vmem:[%s4458_s5 + $0x118] sm:$0xff] }
 0x467   : > { %1808 = vmatprep.subr.mxu0 %v1796_v19  ;;  %2774 = vmatprep.subr.mxu1 %v2984_v23  ;;  %v1787_v49 = vld [vmem:[%s4458_s5 + $0xf8] sm:$0xff]  ;;  %v1786_v50 = vld [vmem:[%s4458_s5 + $0xf0] sm:$0xff]  ;;  %v1788_v52 = vld [vmem:[%s4458_s5 + $0x100] sm:$0xff] }
 0x468   : > { %1809 = vmatpush1.msra.mxu0 %v1795_v37  ;;  %2775 = vmatpush3.msra.mxu1 %v1797_v15  ;;  %v1784_v53 = vld [vmem:[%s4458_s5 + $0xe0] sm:$0xff]  ;;  %v1783_v54 = vld [vmem:[%s4458_s5 + $0xd8] sm:$0xff]  ;;  %v1785_v55 = vld [vmem:[%s4458_s5 + $0xe8] sm:$0xff] }
 0x469   : > { %1810 = vmatprep.subr.mxu0 %v1793_v41  ;;  %2776 = vmatprep.subr.mxu1 %v2984_v23  ;;  %v1781_v56 = vld [vmem:[%s4458_s5 + $0xc8] sm:$0xff]  ;;  %v1780_v57 = vld [vmem:[%s4458_s5 + $0xc0] sm:$0xff]  ;;  %v1782_v58 = vld [vmem:[%s4458_s5 + $0xd0] sm:$0xff] }
 0x46a   : > { %1811 = vmatpush1.msra.mxu0 %v1792_v42  ;;  %2777 = vmatpush3.msra.mxu1 %v1794_v43  ;;  %v1778_v59 = vld [vmem:[%s4458_s5 + $0xb0] sm:$0xff]  ;;  %v1777_v60 = vld [vmem:[%s4458_s5 + $0xa8] sm:$0xff]  ;;  %v1779_v61 = vld [vmem:[%s4458_s5 + $0xb8] sm:$0xff] }
 0x46b   : > { %1812 = vmatprep.subr.mxu0 %v1790_v45  ;;  %2778 = vmatprep.subr.mxu1 %v2984_v23  ;;  %v1775_v62 = vld [vmem:[%s4458_s5 + $0x98] sm:$0xff]  ;;  %v1774_v63 = vld [vmem:[%s4458_s5 + $0x90] sm:$0xff]  ;;  %v1776_v0 = vld [vmem:[%s4458_s5 + $0xa0] sm:$0xff] }
 0x46c   : > { %1813 = vmatpush1.msra.mxu0 %v1789_v46  ;;  %2779 = vmatpush3.msra.mxu1 %v1791_v48  ;;  %v1772_v1 = vld [vmem:[%s4458_s5 + $0x80] sm:$0xff]  ;;  %v1771_v2 = vld [vmem:[%s4458_s5 + $0x78] sm:$0xff]  ;;  %v1773_v3 = vld [vmem:[%s4458_s5 + $0x88] sm:$0xff] }
 0x46d   : > { %1814 = vmatprep.subr.mxu0 %v1787_v49  ;;  %2780 = vmatprep.subr.mxu1 %v2984_v23  ;;  %v1769_v5 = vld [vmem:[%s4458_s5 + $0x68] sm:$0xff]  ;;  %v1768_v6 = vld [vmem:[%s4458_s5 + $0x60] sm:$0xff]  ;;  %v1770_v7 = vld [vmem:[%s4458_s5 + $0x70] sm:$0xff] }
 0x46e   : > { %1815 = vmatpush1.msra.mxu0 %v1786_v50  ;;  %2781 = vmatpush3.msra.mxu1 %v1788_v52  ;;  %v1766_v8 = vld [vmem:[%s4458_s5 + $0x50] sm:$0xff]  ;;  %v1765_v11 = vld [vmem:[%s4458_s5 + $0x48] sm:$0xff]  ;;  %v1767_v14 = vld [vmem:[%s4458_s5 + $0x58] sm:$0xff] }
 0x46f   : > { %1816 = vmatprep.subr.mxu0 %v1784_v53  ;;  %2782 = vmatprep.subr.mxu1 %v2984_v23  ;;  %v1763_v17 = vld [vmem:[%s4458_s5 + $0x38] sm:$0xff]  ;;  %v1762_v39 = vld [vmem:[%s4458_s5 + $0x30] sm:$0xff]  ;;  %v1764_v31 = vld [vmem:[%s4458_s5 + $0x40] sm:$0xff] }
 0x470   : > { %1817 = vmatpush1.msra.mxu0 %v1783_v54  ;;  %2783 = vmatpush3.msra.mxu1 %v1785_v55  ;;  %v1760_v51 = vld [vmem:[%s4458_s5 + $0x20] sm:$0xff]  ;;  %v1759_v32 = vld [vmem:[%s4458_s5 + $0x18] sm:$0xff]  ;;  %v1757_v16 = vld [vmem:[%s4458_s5 + $0x8] sm:$0xff] }
 0x471   : > { %1818 = vmatprep.subr.mxu0 %v1781_v56  ;;  %2784 = vmatprep.subr.mxu1 %v2984_v23  ;;  %v1761_v22 = vld [vmem:[%s4458_s5 + $0x28] sm:$0xff]  ;;  %v1756_v27 = vld [vmem:[%s4458_s5] sm:$0xff]  ;;  %v2371_v36 = vld [vmem:[%s3080_s22 + $0x18] sm:$0xff] }
 0x472   : > { %1819 = vmatpush1.msra.mxu0 %v1780_v57  ;;  %2785 = vmatpush3.msra.mxu1 %v1782_v58  ;;  %v1752_v33 = vld [vmem:[%s4457_s4 + $0x170] sm:$0xff]  ;;  %v1751_v4 = vld [vmem:[%s4457_s4 + $0x168] sm:$0xff]  ;;  %v1749_v24 = vld [vmem:[%s4457_s4 + $0x158] sm:$0xff] }
 0x473   : > { %1820 = vmatprep.subr.mxu0 %v1778_v59  ;;  %2786 = vmatprep.subr.mxu1 %v2984_v23  ;;  %v1758_v35 = vld [vmem:[%s4458_s5 + $0x10] sm:$0xff]  ;;  %v1746_v34 = vld [vmem:[%s4457_s4 + $0x140] sm:$0xff]  ;;  %v1753_v30 = vld [vmem:[%s4457_s4 + $0x178] sm:$0xff] }
 0x474   : > { %1821 = vmatpush1.msra.mxu0 %v1777_v60  ;;  %2787 = vmatpush3.msra.mxu1 %v1779_v61  ;;  %v1748_v38 = vld [vmem:[%s4457_s4 + $0x150] sm:$0xff]  ;;  %v1745_v47 = vld [vmem:[%s4457_s4 + $0x138] sm:$0xff]  ;;  %v1743_v12 = vld [vmem:[%s4457_s4 + $0x128] sm:$0xff] }
 0x475   : > { %1822 = vmatprep.subr.mxu0 %v1775_v62  ;;  %2788 = vmatprep.subr.mxu1 %v2984_v23  ;;  %v1750_v18 = vld [vmem:[%s4457_s4 + $0x160] sm:$0xff]  ;;  %v1740_v28 = vld [vmem:[%s4457_s4 + $0x110] sm:$0xff]  ;;  %v1747_v29 = vld [vmem:[%s4457_s4 + $0x148] sm:$0xff] }
 0x476   : > { %1823 = vmatpush1.msra.mxu0 %v1774_v63  ;;  %2789 = vmatpush3.msra.mxu1 %v1776_v0  ;;  %v1742_v21 = vld [vmem:[%s4457_s4 + $0x120] sm:$0xff]  ;;  %v1739_v20 = vld [vmem:[%s4457_s4 + $0x108] sm:$0xff]  ;;  %v1737_v9 = vld [vmem:[%s4457_s4 + $0xf8] sm:$0xff] }
 0x477   : > { %1824 = vmatprep.subr.mxu0 %v1772_v1  ;;  %2790 = vmatprep.subr.mxu1 %v2984_v23  ;;  %v1744_v10 = vld [vmem:[%s4457_s4 + $0x130] sm:$0xff]  ;;  %v1734_v26 = vld [vmem:[%s4457_s4 + $0xe0] sm:$0xff]  ;;  %v1741_v44 = vld [vmem:[%s4457_s4 + $0x118] sm:$0xff] }
 0x478   : > { %1825 = vmatpush1.msra.mxu0 %v1771_v2  ;;  %2791 = vmatpush3.msra.mxu1 %v1773_v3  ;;  %v1736_v40 = vld [vmem:[%s4457_s4 + $0xf0] sm:$0xff]  ;;  %v1733_v19 = vld [vmem:[%s4457_s4 + $0xd8] sm:$0xff]  ;;  %v1731_v25 = vld [vmem:[%s4457_s4 + $0xc8] sm:$0xff] }
 0x479   : > { %1826 = vmatprep.subr.mxu0 %v1769_v5  ;;  %2792 = vmatprep.subr.mxu1 %v2984_v23  ;;  %v1738_v37 = vld [vmem:[%s4457_s4 + $0x100] sm:$0xff]  ;;  %v1728_v41 = vld [vmem:[%s4457_s4 + $0xb0] sm:$0xff]  ;;  %v1735_v42 = vld [vmem:[%s4457_s4 + $0xe8] sm:$0xff] }
 0x47a   : > { %1827 = vmatpush1.msra.mxu0 %v1768_v6  ;;  %2793 = vmatpush3.msra.mxu1 %v1770_v7  ;;  %v1730_v15 = vld [vmem:[%s4457_s4 + $0xc0] sm:$0xff]  ;;  %v1727_v43 = vld [vmem:[%s4457_s4 + $0xa8] sm:$0xff]  ;;  %v1725_v45 = vld [vmem:[%s4457_s4 + $0x98] sm:$0xff] }
 0x47b   : > { %1828 = vmatprep.subr.mxu0 %v1766_v8  ;;  %2794 = vmatprep.subr.mxu1 %v2984_v23  ;;  %v1732_v46 = vld [vmem:[%s4457_s4 + $0xd0] sm:$0xff]  ;;  %v1722_v49 = vld [vmem:[%s4457_s4 + $0x80] sm:$0xff]  ;;  %v1729_v50 = vld [vmem:[%s4457_s4 + $0xb8] sm:$0xff] }
 0x47c   : > { %1829 = vmatpush1.msra.mxu0 %v1765_v11  ;;  %2795 = vmatpush3.msra.mxu1 %v1767_v14  ;;  %v1724_v48 = vld [vmem:[%s4457_s4 + $0x90] sm:$0xff]  ;;  %v1721_v52 = vld [vmem:[%s4457_s4 + $0x78] sm:$0xff]  ;;  %v1719_v53 = vld [vmem:[%s4457_s4 + $0x68] sm:$0xff] }
 0x47d   : > { %1830 = vmatprep.subr.mxu0 %v1763_v17  ;;  %2796 = vmatprep.subr.mxu1 %v2984_v23  ;;  %v1726_v54 = vld [vmem:[%s4457_s4 + $0xa0] sm:$0xff]  ;;  %v1716_v56 = vld [vmem:[%s4457_s4 + $0x50] sm:$0xff]  ;;  %v1723_v57 = vld [vmem:[%s4457_s4 + $0x88] sm:$0xff] }
 0x47e   : > { %1831 = vmatpush1.msra.mxu0 %v1762_v39  ;;  %2797 = vmatpush3.msra.mxu1 %v1764_v31  ;;  %v1718_v55 = vld [vmem:[%s4457_s4 + $0x60] sm:$0xff]  ;;  %v1715_v58 = vld [vmem:[%s4457_s4 + $0x48] sm:$0xff]  ;;  %v1713_v59 = vld [vmem:[%s4457_s4 + $0x38] sm:$0xff] }
 0x47f   : > { %1832 = vmatprep.subr.mxu0 %v1760_v51  ;;  %1868 = vmatprep.mubr.f32.mxu0 %v2984_v23  ;;  %v1720_v60 = vld [vmem:[%s4457_s4 + $0x70] sm:$0xff]  ;;  %v1710_v62 = vld [vmem:[%s4457_s4 + $0x20] sm:$0xff]  ;;  %v1717_v63 = vld [vmem:[%s4457_s4 + $0x58] sm:$0xff] }
 0x480   : > { %1833 = vmatpush1.msra.mxu0 %v1759_v32  ;;  %2798 = vmatprep.subr.mxu1 %v2984_v23  ;;  %v1712_v61 = vld [vmem:[%s4457_s4 + $0x30] sm:$0xff]  ;;  %v1709_v0 = vld [vmem:[%s4457_s4 + $0x18] sm:$0xff]  ;;  %v1707_v1 = vld [vmem:[%s4457_s4 + $0x8] sm:$0xff] }
 0x481   : > { %1834 = vmatprep.subr.mxu0 %v1757_v16  ;;  %2799 = vmatpush3.msra.mxu1 %v1761_v22  ;;  %v1714_v2 = vld [vmem:[%s4457_s4 + $0x40] sm:$0xff]  ;;  %v2370_v5 = vld [vmem:[%s3075_s19 + $0x18] sm:$0xff]  ;;  %v1711_v6 = vld [vmem:[%s4457_s4 + $0x28] sm:$0xff] }
 0x482   : > { %1835 = vmatpush1.msra.mxu0 %v1756_v27  ;;  %2800 = vmatprep.subr.mxu1 %v2984_v23  ;;  %v1706_v3 = vld [vmem:[%s4457_s4] sm:$0xff]  ;;  %v1708_v7 = vld [vmem:[%s4457_s4 + $0x10] sm:$0xff]  ;;  %v2145_v8 = vld [vmem:[%s4464_s11 + $0x78] sm:$0xff] }
 0x483   : > { %1869 = vmatmul.mubr.f32.vlgmr.msra.gmra.mxu0 %v2371_v36  ;;  %1945 = vmatprep.subr.mxu0 %v1752_v33  ;;  %v2161_v11 = vld [vmem:[%s4465_s12 + $0x78] sm:$0xff]  ;;  %v2144_v14 = vld [vmem:[%s4464_s11 + $0x70] sm:$0xff]  ;;  %v2143_v39 = vld [vmem:[%s4464_s11 + $0x68] sm:$0xff] }
 0x484   : > { %1946 = vmatpush1.msra.mxu0 %v1751_v4  ;;  %2801 = vmatpush3.msra.mxu1 %v1758_v35  ;;  %v2160_v17 = vld [vmem:[%s4465_s12 + $0x70] sm:$0xff]  ;;  %v2159_v31 = vld [vmem:[%s4465_s12 + $0x68] sm:$0xff]  ;;  %v2142_v51 = vld [vmem:[%s4464_s11 + $0x60] sm:$0xff] }
 0x485   : > { %1947 = vmatprep.subr.mxu0 %v1749_v24  ;;  %2802 = vmatprep.mubr.msk.f32.mxu1 %vm2985_vm1, %v2984_v23  ;;  %v2158_v32 = vld [vmem:[%s4465_s12 + $0x60] sm:$0xff]  ;;  %v2141_v16 = vld [vmem:[%s4464_s11 + $0x58] sm:$0xff]  ;;  %v2140_v27 = vld [vmem:[%s4464_s11 + $0x50] sm:$0xff] }
 0x486   : > { %1948 = vmatpush1.msra.mxu0 %v1748_v38  ;;  %2805 = vmatprep.subr.mxu1 %v2984_v23  ;;  %v2157_v22 = vld [vmem:[%s4465_s12 + $0x58] sm:$0xff]  ;;  %v2139_v33 = vld [vmem:[%s4464_s11 + $0x48] sm:$0xff]  ;;  %v2138_v35 = vld [vmem:[%s4464_s11 + $0x40] sm:$0xff] }
 0x487   : > { %2803 = vmatmul.mubr.f32.vlgmr.msra.gmra.mxu1 %v2371_v36  ;;  %1949 = vmatprep.subr.mxu0 %v1746_v34  ;;  %v2156_v36 = vld [vmem:[%s4465_s12 + $0x50] sm:$0xff]  ;;  %v2155_v4 = vld [vmem:[%s4465_s12 + $0x48] sm:$0xff]  ;;  %v2154_v24 = vld [vmem:[%s4465_s12 + $0x40] sm:$0xff] }
 0x488   : > { %2806 = vmatpush3.msra.mxu1 %v1753_v30  ;;  %1950 = vmatpush1.msra.mxu0 %v1745_v47  ;;  %v2137_v38 = vld [vmem:[%s4464_s11 + $0x38] sm:$0xff]  ;;  %v2136_v30 = vld [vmem:[%s4464_s11 + $0x30] sm:$0xff] }
 0x489   : > { %2807 = vmatprep.subr.mxu1 %v2984_v23  ;;  %1951 = vmatprep.subr.mxu0 %v1743_v12  ;;  %v2153_v34 = vld [vmem:[%s4465_s12 + $0x38] sm:$0xff]  ;;  %v2152_v47 = vld [vmem:[%s4465_s12 + $0x30] sm:$0xff]  ;;  %v2135_v12 = vld [vmem:[%s4464_s11 + $0x28] sm:$0xff] }
 0x48a   : > { %2808 = vmatpush3.msra.mxu1 %v1750_v18  ;;  %1952 = vmatpush1.msra.mxu0 %v1742_v21  ;;  %v2151_v18 = vld [vmem:[%s4465_s12 + $0x28] sm:$0xff]  ;;  %v2134_v21 = vld [vmem:[%s4464_s11 + $0x20] sm:$0xff] }
 0x48b   : > { %2809 = vmatprep.subr.mxu1 %v2984_v23  ;;  %1953 = vmatprep.subr.mxu0 %v1740_v28  ;;  %v2150_v28 = vld [vmem:[%s4465_s12 + $0x20] sm:$0xff] }
 0x48c   : > { %2810 = vmatpush3.msra.mxu1 %v1747_v29  ;;  %1954 = vmatpush1.msra.mxu0 %v1739_v20  ;;  %v2133_v29 = vld [vmem:[%s4464_s11 + $0x18] sm:$0xff] }
 0x48d   : > { %2811 = vmatprep.subr.mxu1 %v2984_v23  ;;  %1955 = vmatprep.subr.mxu0 %v1737_v9  ;;  %v2149_v20 = vld [vmem:[%s4465_s12 + $0x18] sm:$0xff]  ;;  %v2132_v9 = vld [vmem:[%s4464_s11 + $0x10] sm:$0xff] }
 0x48e   : > { %2812 = vmatpush3.msra.mxu1 %v1744_v10  ;;  %1956 = vmatpush1.msra.mxu0 %v1736_v40  ;;  %v2148_v10 = vld [vmem:[%s4465_s12 + $0x10] sm:$0xff]  ;;  %v2131_v40 = vld [vmem:[%s4464_s11 + $0x8] sm:$0xff] }
 0x48f   : > { %2813 = vmatprep.subr.mxu1 %v2984_v23  ;;  %1957 = vmatprep.subr.mxu0 %v1734_v26  ;;  %v2147_v26 = vld [vmem:[%s4465_s12 + $0x8] sm:$0xff] }
 0x490   : > { %2814 = vmatpush3.msra.mxu1 %v1741_v44  ;;  %1958 = vmatpush1.msra.mxu0 %v1733_v19  ;;  %v2130_v44 = vld [vmem:[%s4464_s11] sm:$0xff] }
 0x491   : > { %2815 = vmatprep.subr.mxu1 %v2984_v23  ;;  %1959 = vmatprep.subr.mxu0 %v1731_v25  ;;  %v2146_v19 = vld [vmem:[%s4465_s12] sm:$0xff] }
 0x492   : > { %2816 = vmatpush3.msra.mxu1 %v1738_v37  ;;  %1960 = vmatpush1.msra.mxu0 %v1730_v15 }
 0x493   : > { %2817 = vmatprep.subr.mxu1 %v2984_v23  ;;  %1961 = vmatprep.subr.mxu0 %v1728_v41  ;;  %v2086_v41 = vld [vmem:[%s4462_s9] sm:$0x7] }
 0x494   : > { %2818 = vmatpush3.msra.mxu1 %v1735_v42  ;;  %1962 = vmatpush1.msra.mxu0 %v1727_v43  ;;  %v4570_v43 = vld [vmem:[#allocation23_spill] sm:$0xff] }
 0x495   : > { %2819 = vmatprep.subr.mxu1 %v2984_v23  ;;  %1963 = vmatprep.subr.mxu0 %v1725_v45  ;;  %v4571_v45 = vsub.s32 0, %v4570_v43 }
 0x496   : > { %2820 = vmatpush3.msra.mxu1 %v1732_v46  ;;  %1964 = vmatpush1.msra.mxu0 %v1724_v48 }
 0x497   : > { %2821 = vmatprep.subr.mxu1 %v2984_v23  ;;  %1965 = vmatprep.subr.mxu0 %v1722_v49  ;;  %v2091_v46 = vrot.slane %v2086_v41, %v4571_v45 }
 0x498   : > { %2822 = vmatpush3.msra.mxu1 %v1729_v50  ;;  %1966 = vmatpush1.msra.mxu0 %v1721_v52 }
 0x499   : > { %2823 = vmatprep.subr.mxu1 %v2984_v23  ;;  %1967 = vmatprep.subr.mxu0 %v1719_v53 }
 0x49a   : > { %2824 = vmatpush3.msra.mxu1 %v1726_v54  ;;  %1968 = vmatpush1.msra.mxu0 %v1718_v55 }
 0x49b   : > { %2825 = vmatprep.subr.mxu1 %v2984_v23  ;;  %1969 = vmatprep.subr.mxu0 %v1716_v56 }
 0x49c   : > { %2826 = vmatpush3.msra.mxu1 %v1723_v57  ;;  %1970 = vmatpush1.msra.mxu0 %v1715_v58 }
 0x49d   : > { %2827 = vmatprep.subr.mxu1 %v2984_v23  ;;  %1971 = vmatprep.subr.mxu0 %v1713_v59 }
 0x49e   : > { %2828 = vmatpush3.msra.mxu1 %v1720_v60  ;;  %1972 = vmatpush1.msra.mxu0 %v1712_v61 }
 0x49f   : > { %2829 = vmatprep.subr.mxu1 %v2984_v23  ;;  %1973 = vmatprep.subr.mxu0 %v1710_v62 }
 0x4a0   : > { %2830 = vmatpush3.msra.mxu1 %v1717_v63  ;;  %1974 = vmatpush1.msra.mxu0 %v1709_v0  ;;  %v4573_v0 = vsub.s32 2, %v4570_v43 }
 0x4a1   : > { %2831 = vmatprep.subr.mxu1 %v2984_v23  ;;  %1975 = vmatprep.subr.mxu0 %v1707_v1 }
 0x4a2   : > { %2832 = vmatpush3.msra.mxu1 %v1714_v2  ;;  %1976 = vmatpush1.msra.mxu0 %v1706_v3  ;;  %v2099_v1 = vrot.slane %v2086_v41, %v4573_v0  ;;  %v2374_v2 = vld [vmem:[%s4463_s10] ss:$0 sm:$0xff] }
 0x4a3   : > { %2009 = vmatprep.mubr.f32.mxu0 %v2984_v23  ;;  %2833 = vmatprep.subr.mxu1 %v2984_v23 }
 0x4a4   : > { %2010 = vmatmul.mubr.f32.vlgmr.msra.gmra.mxu0 %v2370_v5  ;;  %2834 = vmatpush3.msra.mxu1 %v1711_v6 }
 0x4a5   : > { %2835 = vmatprep.subr.mxu1 %v2984_v23  ;;  %2837 = vmatprep.mubr.msk.f32.mxu1 %vm2985_vm1, %v2984_v23 }
 0x4a6   : > { %2836 = vmatpush3.msra.mxu1 %v1708_v7  ;;  %2840 = vmatprep.subr.mxu0 %v2984_v23 }
 0x4a7   : > { %2838 = vmatmul.mubr.f32.vlgmr.msra.gmra.mxu1 %v2370_v5  ;;  %2875 = vmatprep.subr.mxu1 %v2984_v23 }
 0x4a8   : > { %2907 = vmatprep.mubr.msk.f32.mxu1 %vm2985_vm1, %v2984_v23  ;;  %2872 = vmatprep.mubr.msk.f32.mxu0 %vm2985_vm1, %v2984_v23 }
 0x4a9   : > { %2876 = vmatpush3.msra.mxu1 %v2145_v8  ;;  %2841 = vmatpush3.msra.mxu0 %v2161_v11 }
 0x4aa   : > { %2877 = vmatprep.subr.mxu1 %v2984_v23  ;;  %2842 = vmatprep.subr.mxu0 %v2984_v23 }
 0x4ab   : > { %2878 = vmatpush3.msra.mxu1 %v2144_v14  ;;  %2843 = vmatpush3.msra.mxu0 %v2160_v17 }
 0x4ac   : > { %2879 = vmatprep.subr.mxu1 %v2984_v23  ;;  %2844 = vmatprep.subr.mxu0 %v2984_v23 }
 0x4ad   : > { %2880 = vmatpush3.msra.mxu1 %v2143_v39  ;;  %2845 = vmatpush3.msra.mxu0 %v2159_v31 }
 0x4ae   : > { %2881 = vmatprep.subr.mxu1 %v2984_v23  ;;  %2846 = vmatprep.subr.mxu0 %v2984_v23 }
 0x4af   : > { %2882 = vmatpush3.msra.mxu1 %v2142_v51  ;;  %2847 = vmatpush3.msra.mxu0 %v2158_v32  ;;  %v2375_v32 = vld [vmem:[%s4466_s13] ss:$0 sm:$0xff] }
 0x4b0   : > { %2883 = vmatprep.subr.mxu1 %v2984_v23  ;;  %2848 = vmatprep.subr.mxu0 %v2984_v23 }
 0x4b1   : > { %2884 = vmatpush3.msra.mxu1 %v2141_v16  ;;  %2849 = vmatpush3.msra.mxu0 %v2157_v22 }
 0x4b2   : > { %2885 = vmatprep.subr.mxu1 %v2984_v23  ;;  %2850 = vmatprep.subr.mxu0 %v2984_v23 }
 0x4b3   : > { %2886 = vmatpush3.msra.mxu1 %v2140_v27  ;;  %2851 = vmatpush3.msra.mxu0 %v2156_v36 }
 0x4b4   : > { %2887 = vmatprep.subr.mxu1 %v2984_v23  ;;  %2852 = vmatprep.subr.mxu0 %v2984_v23 }
 0x4b5   : > { %2888 = vmatpush3.msra.mxu1 %v2139_v33  ;;  %2853 = vmatpush3.msra.mxu0 %v2155_v4 }
 0x4b6   : > { %2889 = vmatprep.subr.mxu1 %v2984_v23  ;;  %2854 = vmatprep.subr.mxu0 %v2984_v23 }
 0x4b7   : > { %2890 = vmatpush3.msra.mxu1 %v2138_v35  ;;  %2855 = vmatpush3.msra.mxu0 %v2154_v24 }
 0x4b8   : > { %2891 = vmatprep.subr.mxu1 %v2984_v23  ;;  %2856 = vmatprep.subr.mxu0 %v2984_v23 }
 0x4b9   : > { %2892 = vmatpush3.msra.mxu1 %v2137_v38  ;;  %2857 = vmatpush3.msra.mxu0 %v2153_v34 }
 0x4ba   : > { %2893 = vmatprep.subr.mxu1 %v2984_v23  ;;  %2858 = vmatprep.subr.mxu0 %v2984_v23 }
 0x4bb   : > { %2894 = vmatpush3.msra.mxu1 %v2136_v30  ;;  %2859 = vmatpush3.msra.mxu0 %v2152_v47 }
 0x4bc   : > { %2895 = vmatprep.subr.mxu1 %v2984_v23  ;;  %2860 = vmatprep.subr.mxu0 %v2984_v23 }
 0x4bd   : > { %2896 = vmatpush3.msra.mxu1 %v2135_v12  ;;  %2861 = vmatpush3.msra.mxu0 %v2151_v18 }
 0x4be   : > { %2897 = vmatprep.subr.mxu1 %v2984_v23  ;;  %2862 = vmatprep.subr.mxu0 %v2984_v23 }
 0x4bf   : > { %2898 = vmatpush3.msra.mxu1 %v2134_v21  ;;  %2863 = vmatpush3.msra.mxu0 %v2150_v28 }
 0x4c0   : > { %2899 = vmatprep.subr.mxu1 %v2984_v23  ;;  %2864 = vmatprep.subr.mxu0 %v2984_v23 }
 0x4c1   : > { %2900 = vmatpush3.msra.mxu1 %v2133_v29  ;;  %2865 = vmatpush3.msra.mxu0 %v2149_v20 }
 0x4c2   : > { %2901 = vmatprep.subr.mxu1 %v2984_v23  ;;  %2866 = vmatprep.subr.mxu0 %v2984_v23 }
 0x4c3   : > { %2902 = vmatpush3.msra.mxu1 %v2132_v9  ;;  %2867 = vmatpush3.msra.mxu0 %v2148_v10 }
 0x4c4   : > { %2903 = vmatprep.subr.mxu1 %v2984_v23  ;;  %2868 = vmatprep.subr.mxu0 %v2984_v23 }
 0x4c5   : > { %2904 = vmatpush3.msra.mxu1 %v2131_v40  ;;  %2869 = vmatpush3.msra.mxu0 %v2147_v26 }
 0x4c6   : > { %2905 = vmatprep.subr.mxu1 %v2984_v23  ;;  %2870 = vmatprep.subr.mxu0 %v2984_v23 }
 0x4c7   : > { %2906 = vmatpush3.msra.mxu1 %v2130_v44  ;;  %2871 = vmatpush3.msra.mxu0 %v2146_v19 }
 0x4c8   : > { %2908 = vmatmul.mubr.f32.vlgmr.msra.gmra.mxu1 %v3967_v13  ;;  %v4572_v13 = vsub.s32 1, %v4570_v43 }
 0x4ca   : > { %v2095_v55 = vrot.slane %v2086_v41, %v4572_v13 }
 0x543   : > { %v1870_v15 = vpop.f32.mrf.mxu0 }
 0x545   : > { %v1872_v42 = vpop.f32.mrf.mxu0 }
 0x547   : > { %v1941_v25 = vpop.f32.mrf.mxu1 }
 0x549   : > { %v2804_v37 = vpop.f32.mrf.mxu1 }
 0x564   : > { %v2011_v48 = vpop.f32.mrf.mxu0 }
 0x565   : > { %v2012_v49 = vadd.f32 %v2011_v48, %v1870_v15 }
 0x566   : > { %v2013_v50 = vpop.f32.mrf.mxu0 }
 0x567   : > { %v2103_v52 = vadd.f32 %v2091_v46, %v2012_v49  ;;  %v2082_v53 = vpop.f32.mrf.mxu1  ;;  %v2014_v54 = vadd.f32 %v2013_v50, %v1872_v42 }
 0x568   : > { %v2083_v63 = vadd.f32 %v2082_v53, %v1941_v25 }
 0x569   : > { %v2372_v23 = vmul.f32 -1.442695, %v2103_v52  ;;  %v2839_v56 = vpop.f32.mrf.mxu1  ;;  %v2104_v57 = vadd.f32 %v2095_v55, %v2014_v54 }
 0x56a   : > { %v2105_v5 = vadd.f32 %v2099_v1, %v2083_v63 }
 0x56b   : > { %2963 = vpow2.f32 %v2372_v23  ;;  %v2373_v58 = vmul.f32 -1.442695, %v2104_v57 }
 0x56d   : > { %2965 = vpow2.f32 %v2373_v58 }
 0x578   : > { %v2964_v59 = vpop.eup %2963 }
 0x579   : > { %v2109_v60 = vadd.f32 1.0, %v2964_v59 }
 0x57a   : > { %v2966_v61 = vpop.eup %2965 }
 0x57b   : > { %2967 = vrcp.f32 %v2109_v60  ;;  %v2115_v62 = vadd.f32 1.0, %v2966_v61 }
 0x57d   : > { %2969 = vrcp.f32 %v2115_v62 }
 0x588   : > { %v2968_v3 = vpop.eup %2967  ;;  %v2298_v39 = vpop.f32.mrf.mxu1 }
 0x589   : > { %v2125_v6 = vmul.f32 %v2968_v3, %v2374_v2 }
 0x58a   : > { %v2970_v8 = vpop.eup %2969  ;;  %v2909_v31 = vpop.f32.mrf.mxu1 }
 0x58b   : > { %v2126_v7 = vadd.f32 %v2125_v6, %v2105_v5  ;;  %v2128_v11 = vsub.f32 1.0, %v2970_v8 }
 0x58d   : > { %2971 = vtanh.f32 %v2126_v7 }
 0x59a   : > { %v2972_v14 = vpop.eup %2971 }
 0x59b   : > { %v2129_v17 = vmul.f32 %v2972_v14, %v2128_v11 }
 0x59d   : > { %2873 = vmatmul.mubr.f32.vlgmr.msra.gmra.mxu0 %v2129_v17 }
 0x65d   : > { %v2228_v51 = vpop.f32.mrf.mxu0 }
 0x65e   : > { %v2299_v16 = vadd.f32 %v2298_v39, %v2228_v51 }
 0x65f   : > { %v2874_v22 = vpop.f32.mrf.mxu0 }
 0x660   : > { %v2309_v27 = vadd.f32 %v2375_v32, %v2299_v16 }
 0x662   : > { %2310 = vst [vmem:[%s4467_s14] sm:$0xff] %v2309_v27 }
 0x663 PF: > { %s24_s29 = sadd.s32 1, %s2979_s29  }
 0x664   : > { %p21_p6 = scmp.ge.s32.totalorder %s24_s29, 4  }
 0x666   :  { %23 = sbr.rel (!%p21_p6) target bundleno = 1 (0x1), region = 118 }

// kernel: seq_classifier_forward.2
= control target key start
LH: loop header
LB: loop body
LE: loop exit
PB: predicated region body
PF: predicated region fallthrough
CT: control target
= control target key end

     0   :  { %16 = vsyncpa [#allocation6], 0  ;;  %s4886_s0 = inlined_call_operand.vmem [shape: f32[8,8,128], index: 0, kind: input, shape index: {}, may-alias: {0,1}]   ;;  %s4887_s1 = inlined_call_operand.vmem [shape: f32[8,8,128], index: 1, kind: input, shape index: {}, may-alias: {0,1}]   ;;  %s4888_s2 = inlined_call_operand.hbm [shape: f32[128,384], index: 2, kind: input, shape index: {}]   ;;  %s4889_s3 = inlined_call_operand.hbm [shape: f32[128,384], index: 3, kind: input, shape index: {}]   ;;  %s4890_s4 = inlined_call_operand.vmem [shape: f32[1,384], index: 4, kind: input, shape index: {}]   ;;  %s4891_s5 = inlined_call_operand.vmem [shape: f32[1,384], index: 5, kind: input, shape index: {}]   ;;  %s4892_s6 = inlined_call_operand.hbm [shape: f32[256,768], index: 6, kind: input, shape index: {}]   ;;  %s4893_s7 = inlined_call_operand.vmem [shape: f32[1,128], index: 7, kind: input, shape index: {}]   ;;  %s4894_s8 = inlined_call_operand.vmem [shape: f32[1,128], index: 8, kind: input, shape index: {}]   ;;  %s4895_s9 = inlined_call_operand.vmem [shape: f32[8,8,128], index: 9, kind: output, shape index: {0}]   ;;  %s4896_s10 = inlined_call_operand.vmem [shape: f32[8,8,128], index: 10, kind: output, shape index: {1}]  }
   0x1   :  { %17 = vsyncpa [#allocation8], 0  ;;  %s3028_s13 = smov 0  }
   0x2 LB: > { %s3034_s14 = sadd.s32 4294967295, %s2962_s13   ;;  %p2391_p0 = scmp.ge.s32.totalorder %s2962_s13, 1  ;;  %s2962_s13 = sphi %s3028_s13, %s23_s13  }
   0x3   : > { %p283_p1 = scmp.lt.s32.totalorder %s2962_s13, 3  ;;  %p2392_p2 = scmp.ne.s32.totalorder %s3034_s14, 0 }
   0x4   : > { %p2573_p3 = scmp.eq.s32.totalorder %s3034_s14, 0  ;;  %s2964_s16 = smov [#allocation7]  }
   0x5   : > { %p3040_p4 = pnand %p2391_p0, %p283_p1  ;;  %s308_s17 = sshll.u32 %s2964_s16, 4  ;;  %s309_s17 = int_to_ptr.vmem [resolvable:$true] %s308_s17 }
   0x6   : > { %s2965_s18 = smov [#allocation5]   ;;  %s2966_s21 = smov [#allocation9]  }
   0x7   : > { %p2563_p5 = pneg %p3040_p4  ;;  %s295_s19 = sshll.u32 %s2965_s18, 4  ;;  %s3046_s19 = int_to_ptr.vmem [resolvable:$true] %s295_s19 }
   0x8   : > { %s327_s22 = sshll.u32 %s2966_s21, 4  ;;  %s2881_s23 = scalar_lea.vmem %s309_s17, 6144  ;;  %s3054_s22 = int_to_ptr.vmem [resolvable:$true] %s327_s22 }
   0x9   : > { %p3050_p6 = pnand %p2573_p3, %p2563_p5  ;;  %p2882_p8 = scmp.ne.s32.totalorder %s309_s17, %s2881_s23 }
   0xa   : > { %p2889_p11 = scmp.lt.s32.totalorder %s309_s17, %s309_s17  ;;  %p2890_p12 = scmp.lt.s32.totalorder %s2881_s23, %s2881_s23 }
   0xb   : > { %p2872_p7 = pneg %p3050_p6 }
   0xc   : > { %p2891_p13 = por %p2890_p12, %p2889_p11 }
   0xd   : > { %p2884_p9 = pnand %p2882_p8, %p2872_p7 }
   0xf   : > { %p2885_p10 = pneg %p2884_p9 }
  0x11   : > { %p2892_p0 = pnand %p2891_p13, %p2885_p10 }
  0x13   : > { %2895 = shalt.err (!%p2892_p0)
}
  0x14   : > { %s2967_s24 = smov 384   ;;  %s2968_s25 = smov 24  }
  0x15   : > { %2569 = dma.hbm_to_vmem [thread:$0]  (!%p3050_p6), %s4889_s3, 6144, %s309_s17, [#allocation8], %s2967_s24, %s2967_s24, %s2968_s25  }
  0x16   : > { %s2907_s28 = scalar_lea.vmem %s3046_s19, 6144  ;;  %p2915_p9 = scmp.lt.s32.totalorder %s3046_s19, %s3046_s19 }
  0x17   : > { %p2908_p1 = scmp.ne.s32.totalorder %s3046_s19, %s2907_s28  ;;  %p2916_p10 = scmp.lt.s32.totalorder %s2907_s28, %s2907_s28 }
  0x19   : > { %p2910_p5 = pnand %p2908_p1, %p2872_p7  ;;  %p2917_p11 = por %p2916_p10, %p2915_p9 }
  0x1b   : > { %p2911_p8 = pneg %p2910_p5 }
  0x1d   : > { %p2918_p12 = pnand %p2917_p11, %p2911_p8 }
  0x1f   : > { %2921 = shalt.err (!%p2918_p12)
}
  0x20   : > { %2566 = dma.hbm_to_vmem [thread:$0]  (!%p3050_p6), %s4888_s2, 6144, %s3046_s19, [#allocation6], %s2967_s24, %s2967_s24, %s2968_s25  }
  0x21   : > { %s2933_s11 = scalar_lea.vmem %s3054_s22, 24576  ;;  %p2941_p5 = scmp.lt.s32.totalorder %s3054_s22, %s3054_s22 }
  0x22   : > { %p2934_p13 = scmp.ne.s32.totalorder %s3054_s22, %s2933_s11  ;;  %p2942_p8 = scmp.lt.s32.totalorder %s2933_s11, %s2933_s11 }
  0x24   : > { %p2936_p0 = pnand %p2934_p13, %p2872_p7  ;;  %p2943_p9 = por %p2942_p8, %p2941_p5 }
  0x26   : > { %p2937_p1 = pneg %p2936_p0 }
  0x28   : > { %p2944_p10 = pnand %p2943_p9, %p2937_p1 }
  0x2a   : > { %2947 = shalt.err (!%p2944_p10)
}
  0x2b   : > { %s2969_s12 = smov 768   ;;  %s2970_s16 = smov 48  }
  0x2c   : > { %2572 = dma.hbm_to_vmem [thread:$0]  (!%p3050_p6), %s4892_s6, 24576, %s3054_s22, [#allocation8], %s2969_s12, %s2969_s12, %s2970_s16  }
  0x2d   : > { %369 = sbr.rel (%p3040_p4) target bundleno = 1398 (0x576), region = 56 }
  0x32   : > { %2953 = dma.done.wait (%p2573_p3), [#allocation6], 6144  }
  0x33   : > { %2955 = vsyncadd (%p2573_p3), [#allocation6], 4294961152 }
  0x34   : > { %2957 = dma.done.wait (%p2573_p3), [#allocation8], 30720  }
  0x35   : > { %2959 = vsyncadd (%p2573_p3), [#allocation8], 4294936576  ;;  %s2400_s19 = sshll.u32 %s3034_s14, 2  ;;  %s433_s20 = ssub.s32 1, %s3034_s14 }
  0x36   : > { %p428_p6 = scmp.lt.s32.totalorder %s2400_s19, 7  ;;  %s2402_s21 = sshll.u32 %s433_s20, 2 }
  0x37   : > { %p435_p7 = scmp.lt.s32.totalorder %s2402_s21, 7 }
  0x38   : > { %s5566_s19 = smov (!%p428_p6, %s2400_s19), 7  ;;  %458 = sbr.rel (%p2392_p2) target bundleno = 63 (0x3f), region = 72 }
  0x39   : > { %s5568_s21 = smov (!%p435_p7, %s2402_s21), 7  ;;  %s2401_s15 = sshll.u32 %s5566_s19, 3 }
  0x3a   : > { %s3107_s24 = scalar_lea.vmem %s4886_s0, %s2401_s15  ;;  %s2403_s25 = sshll.u32 %s5568_s21, 3 }
  0x3b   : > { %s3112_s28 = scalar_lea.vmem %s4887_s1, %s2403_s25  ;;  %s3117_s11 = scalar_lea.vmem %s4895_s9, %s2401_s15 }
  0x3c   : > { %s3122_s17 = scalar_lea.vmem %s4896_s10, %s2403_s25 }
  0x3d   : > { %v2971_v0 = vmov 0.0  }
  0x3e   : > { %459 = vst [vmem:[#allocation4] sm:$0xff] %v2971_v0  ;;  %460 = vst [vmem:[#allocation4 + $0x8] sm:$0xff] %v2971_v0 }
  0x3f PF: > { %v511_v1 = vld [vmem:[#allocation5 + $0x170] sm:$0xff]  ;;  %v512_v2 = vld [vmem:[#allocation5 + $0x178] sm:$0xff]  ;;  %v510_v3 = vld [vmem:[#allocation5 + $0x168] sm:$0xff]  ;;  %v4897_v51 = vmov 0.0  }
  0x40   : > { %530 = vmatprep.subr.mxu0 %v511_v1  ;;  %2475 = vmatprep.subr.mxu1 %v512_v2  ;;  %v508_v4 = vld [vmem:[#allocation5 + $0x158] sm:$0xff]  ;;  %v509_v5 = vld [vmem:[#allocation5 + $0x160] sm:$0xff]  ;;  %v507_v6 = vld [vmem:[#allocation5 + $0x150] sm:$0xff] }
  0x41   : > { %531 = vmatpush1.msra.mxu0 %v510_v3  ;;  %2476 = vmatpush3.msra.mxu1 %v512_v2  ;;  %v505_v7 = vld [vmem:[#allocation5 + $0x140] sm:$0xff]  ;;  %v506_v8 = vld [vmem:[#allocation5 + $0x148] sm:$0xff]  ;;  %v504_v9 = vld [vmem:[#allocation5 + $0x138] sm:$0xff] }
  0x42   : > { %532 = vmatprep.subr.mxu0 %v508_v4  ;;  %2477 = vmatprep.subr.mxu1 %v509_v5  ;;  %v502_v10 = vld [vmem:[#allocation5 + $0x128] sm:$0xff]  ;;  %v503_v11 = vld [vmem:[#allocation5 + $0x130] sm:$0xff]  ;;  %v501_v12 = vld [vmem:[#allocation5 + $0x120] sm:$0xff] }
  0x43   : > { %533 = vmatpush1.msra.mxu0 %v507_v6  ;;  %2478 = vmatpush3.msra.mxu1 %v509_v5  ;;  %v499_v13 = vld [vmem:[#allocation5 + $0x110] sm:$0xff]  ;;  %v500_v14 = vld [vmem:[#allocation5 + $0x118] sm:$0xff]  ;;  %v498_v15 = vld [vmem:[#allocation5 + $0x108] sm:$0xff] }
  0x44   : > { %534 = vmatprep.subr.mxu0 %v505_v7  ;;  %2479 = vmatprep.subr.mxu1 %v506_v8  ;;  %v496_v16 = vld [vmem:[#allocation5 + $0xf8] sm:$0xff]  ;;  %v497_v17 = vld [vmem:[#allocation5 + $0x100] sm:$0xff]  ;;  %v495_v18 = vld [vmem:[#allocation5 + $0xf0] sm:$0xff] }
  0x45   : > { %535 = vmatpush1.msra.mxu0 %v504_v9  ;;  %2480 = vmatpush3.msra.mxu1 %v506_v8  ;;  %v493_v19 = vld [vmem:[#allocation5 + $0xe0] sm:$0xff]  ;;  %v494_v20 = vld [vmem:[#allocation5 + $0xe8] sm:$0xff]  ;;  %v492_v21 = vld [vmem:[#allocation5 + $0xd8] sm:$0xff] }
  0x46   : > { %536 = vmatprep.subr.mxu0 %v502_v10  ;;  %2481 = vmatprep.subr.mxu1 %v503_v11  ;;  %v490_v22 = vld [vmem:[#allocation5 + $0xc8] sm:$0xff]  ;;  %v491_v23 = vld [vmem:[#allocation5 + $0xd0] sm:$0xff]  ;;  %v489_v24 = vld [vmem:[#allocation5 + $0xc0] sm:$0xff] }
  0x47   : > { %537 = vmatpush1.msra.mxu0 %v501_v12  ;;  %2482 = vmatpush3.msra.mxu1 %v503_v11  ;;  %v487_v25 = vld [vmem:[#allocation5 + $0xb0] sm:$0xff]  ;;  %v488_v26 = vld [vmem:[#allocation5 + $0xb8] sm:$0xff]  ;;  %v486_v27 = vld [vmem:[#allocation5 + $0xa8] sm:$0xff] }
  0x48   : > { %538 = vmatprep.subr.mxu0 %v499_v13  ;;  %2483 = vmatprep.subr.mxu1 %v500_v14  ;;  %v484_v28 = vld [vmem:[#allocation5 + $0x98] sm:$0xff]  ;;  %v485_v29 = vld [vmem:[#allocation5 + $0xa0] sm:$0xff]  ;;  %v483_v30 = vld [vmem:[#allocation5 + $0x90] sm:$0xff] }
  0x49   : > { %539 = vmatpush1.msra.mxu0 %v498_v15  ;;  %2484 = vmatpush3.msra.mxu1 %v500_v14  ;;  %v481_v31 = vld [vmem:[#allocation5 + $0x80] sm:$0xff]  ;;  %v482_v32 = vld [vmem:[#allocation5 + $0x88] sm:$0xff]  ;;  %v480_v33 = vld [vmem:[#allocation5 + $0x78] sm:$0xff] }
  0x4a   : > { %540 = vmatprep.subr.mxu0 %v496_v16  ;;  %2485 = vmatprep.subr.mxu1 %v497_v17  ;;  %v478_v34 = vld [vmem:[#allocation5 + $0x68] sm:$0xff]  ;;  %v479_v35 = vld [vmem:[#allocation5 + $0x70] sm:$0xff]  ;;  %v477_v36 = vld [vmem:[#allocation5 + $0x60] sm:$0xff] }
  0x4b   : > { %541 = vmatpush1.msra.mxu0 %v495_v18  ;;  %2486 = vmatpush3.msra.mxu1 %v497_v17  ;;  %v475_v37 = vld [vmem:[#allocation5 + $0x50] sm:$0xff]  ;;  %v476_v38 = vld [vmem:[#allocation5 + $0x58] sm:$0xff]  ;;  %v474_v39 = vld [vmem:[#allocation5 + $0x48] sm:$0xff] }
  0x4c   : > { %542 = vmatprep.subr.mxu0 %v493_v19  ;;  %2487 = vmatprep.subr.mxu1 %v494_v20  ;;  %v472_v40 = vld [vmem:[#allocation5 + $0x38] sm:$0xff]  ;;  %v473_v41 = vld [vmem:[#allocation5 + $0x40] sm:$0xff]  ;;  %v471_v42 = vld [vmem:[#allocation5 + $0x30] sm:$0xff] }
  0x4d   : > { %543 = vmatpush1.msra.mxu0 %v492_v21  ;;  %2488 = vmatpush3.msra.mxu1 %v494_v20  ;;  %v469_v43 = vld [vmem:[#allocation5 + $0x20] sm:$0xff]  ;;  %v470_v44 = vld [vmem:[#allocation5 + $0x28] sm:$0xff]  ;;  %v468_v45 = vld [vmem:[#allocation5 + $0x18] sm:$0xff] }
  0x4e   : > { %544 = vmatprep.subr.mxu0 %v490_v22  ;;  %2489 = vmatprep.subr.mxu1 %v491_v23  ;;  %v466_v46 = vld [vmem:[#allocation5 + $0x8] sm:$0xff]  ;;  %v467_v47 = vld [vmem:[#allocation5 + $0x10] sm:$0xff]  ;;  %v465_v48 = vld [vmem:[#allocation5] sm:$0xff] }
  0x4f   : > { %545 = vmatpush1.msra.mxu0 %v489_v24  ;;  %2490 = vmatpush3.msra.mxu1 %v491_v23  ;;  %v461_v49 = vld [vmem:[%s3107_s24] sm:$0xff]  ;;  %v766_v50 = vld [vmem:[#allocation7 + $0x170] sm:$0xff]  ;;  %v3129_v53 = vld [vmem:[%s3107_s24 + $0x8] sm:$0xff] }
  0x50   : > { %546 = vmatprep.subr.mxu0 %v487_v25  ;;  %2491 = vmatprep.subr.mxu1 %v488_v26  ;;  %v767_v52 = vld [vmem:[#allocation7 + $0x178] sm:$0xff]  ;;  %v765_v54 = vld [vmem:[#allocation7 + $0x168] sm:$0xff]  ;;  %v764_v56 = vld [vmem:[#allocation7 + $0x160] sm:$0xff] }
  0x51   : > { %547 = vmatpush1.msra.mxu0 %v486_v27  ;;  %2492 = vmatpush3.msra.mxu1 %v488_v26  ;;  %v763_v55 = vld [vmem:[#allocation7 + $0x158] sm:$0xff]  ;;  %v762_v57 = vld [vmem:[#allocation7 + $0x150] sm:$0xff]  ;;  %v760_v58 = vld [vmem:[#allocation7 + $0x140] sm:$0xff] }
  0x52   : > { %548 = vmatprep.subr.mxu0 %v484_v28  ;;  %2493 = vmatprep.subr.mxu1 %v485_v29  ;;  %v761_v59 = vld [vmem:[#allocation7 + $0x148] sm:$0xff]  ;;  %v759_v60 = vld [vmem:[#allocation7 + $0x138] sm:$0xff]  ;;  %v758_v62 = vld [vmem:[#allocation7 + $0x130] sm:$0xff] }
  0x53   : > { %549 = vmatpush1.msra.mxu0 %v483_v30  ;;  %2494 = vmatpush3.msra.mxu1 %v485_v29  ;;  %v757_v61 = vld [vmem:[#allocation7 + $0x128] sm:$0xff]  ;;  %v756_v63 = vld [vmem:[#allocation7 + $0x120] sm:$0xff]  ;;  %v754_v0 = vld [vmem:[#allocation7 + $0x110] sm:$0xff] }
  0x54   : > { %550 = vmatprep.subr.mxu0 %v481_v31  ;;  %2495 = vmatprep.subr.mxu1 %v482_v32  ;;  %v755_v1 = vld [vmem:[#allocation7 + $0x118] sm:$0xff]  ;;  %v753_v2 = vld [vmem:[#allocation7 + $0x108] sm:$0xff]  ;;  %v752_v4 = vld [vmem:[#allocation7 + $0x100] sm:$0xff] }
  0x55   : > { %551 = vmatpush1.msra.mxu0 %v480_v33  ;;  %2496 = vmatpush3.msra.mxu1 %v482_v32  ;;  %v751_v3 = vld [vmem:[#allocation7 + $0xf8] sm:$0xff]  ;;  %v750_v5 = vld [vmem:[#allocation7 + $0xf0] sm:$0xff]  ;;  %v748_v6 = vld [vmem:[#allocation7 + $0xe0] sm:$0xff] }
  0x56   : > { %552 = vmatprep.subr.mxu0 %v478_v34  ;;  %2497 = vmatprep.subr.mxu1 %v479_v35  ;;  %v749_v7 = vld [vmem:[#allocation7 + $0xe8] sm:$0xff]  ;;  %v747_v8 = vld [vmem:[#allocation7 + $0xd8] sm:$0xff]  ;;  %v746_v10 = vld [vmem:[#allocation7 + $0xd0] sm:$0xff] }
  0x57   : > { %553 = vmatpush1.msra.mxu0 %v477_v36  ;;  %2498 = vmatpush3.msra.mxu1 %v479_v35  ;;  %v745_v9 = vld [vmem:[#allocation7 + $0xc8] sm:$0xff]  ;;  %v744_v11 = vld [vmem:[#allocation7 + $0xc0] sm:$0xff]  ;;  %v742_v12 = vld [vmem:[#allocation7 + $0xb0] sm:$0xff] }
  0x58   : > { %554 = vmatprep.subr.mxu0 %v475_v37  ;;  %2499 = vmatprep.subr.mxu1 %v476_v38  ;;  %v743_v13 = vld [vmem:[#allocation7 + $0xb8] sm:$0xff]  ;;  %v741_v14 = vld [vmem:[#allocation7 + $0xa8] sm:$0xff]  ;;  %v740_v16 = vld [vmem:[#allocation7 + $0xa0] sm:$0xff] }
  0x59   : > { %555 = vmatpush1.msra.mxu0 %v474_v39  ;;  %2500 = vmatpush3.msra.mxu1 %v476_v38  ;;  %v739_v15 = vld [vmem:[#allocation7 + $0x98] sm:$0xff]  ;;  %v738_v17 = vld [vmem:[#allocation7 + $0x90] sm:$0xff]  ;;  %v736_v18 = vld [vmem:[#allocation7 + $0x80] sm:$0xff] }
  0x5a   : > { %556 = vmatprep.subr.mxu0 %v472_v40  ;;  %2501 = vmatprep.subr.mxu1 %v473_v41  ;;  %v737_v19 = vld [vmem:[#allocation7 + $0x88] sm:$0xff]  ;;  %v735_v20 = vld [vmem:[#allocation7 + $0x78] sm:$0xff]  ;;  %v734_v22 = vld [vmem:[#allocation7 + $0x70] sm:$0xff] }
  0x5b   : > { %557 = vmatpush1.msra.mxu0 %v471_v42  ;;  %2502 = vmatpush3.msra.mxu1 %v473_v41  ;;  %v733_v21 = vld [vmem:[#allocation7 + $0x68] sm:$0xff]  ;;  %v732_v24 = vld [vmem:[#allocation7 + $0x60] sm:$0xff]  ;;  %v730_v25 = vld [vmem:[#allocation7 + $0x50] sm:$0xff] }
  0x5c   : > { %558 = vmatprep.subr.mxu0 %v469_v43  ;;  %2503 = vmatprep.subr.mxu1 %v470_v44  ;;  %v463_v23 = vld [vmem:[%s3107_s24 + $0x10] sm:$0xff]  ;;  %v731_v26 = vld [vmem:[#allocation7 + $0x58] sm:$0xff]  ;;  %v728_v29 = vld [vmem:[#allocation7 + $0x40] sm:$0xff] }
  0x5d   : > { %559 = vmatpush1.msra.mxu0 %v468_v45  ;;  %2504 = vmatpush3.msra.mxu1 %v470_v44  ;;  %v729_v27 = vld [vmem:[#allocation7 + $0x48] sm:$0xff]  ;;  %v727_v28 = vld [vmem:[#allocation7 + $0x38] sm:$0xff]  ;;  %v464_v30 = vld [vmem:[%s3107_s24 + $0x18] sm:$0xff] }
  0x5e   : > { %560 = vmatprep.subr.mxu0 %v466_v46  ;;  %2505 = vmatprep.subr.mxu1 %v467_v47  ;;  %v726_v31 = vld [vmem:[#allocation7 + $0x30] sm:$0xff]  ;;  %v724_v32 = vld [vmem:[#allocation7 + $0x20] sm:$0xff]  ;;  %v725_v33 = vld [vmem:[#allocation7 + $0x28] sm:$0xff] }
  0x5f   : > { %561 = vmatpush1.msra.mxu0 %v465_v48  ;;  %594 = vmatprep.mubr.f32.mxu0 %v4897_v51  ;;  %v723_v34 = vld [vmem:[#allocation7 + $0x18] sm:$0xff]  ;;  %v721_v35 = vld [vmem:[#allocation7 + $0x8] sm:$0xff]  ;;  %v722_v36 = vld [vmem:[#allocation7 + $0x10] sm:$0xff] }
  0x60   : > { %2506 = vmatpush3.msra.mxu1 %v467_v47  ;;  %595 = vmatmul.mubr.f32.vlgmr.msra.gmra.mxu0 %v461_v49  ;;  %v720_v37 = vld [vmem:[#allocation7] sm:$0xff]  ;;  %v716_v38 = vld [vmem:[%s3112_s28] sm:$0xff]  ;;  %v3142_v40 = vld [vmem:[#allocation9 + $0x2e8] sm:$0xff] }
  0x61   : > { %2507 = vmatprep.mubr.f32.mxu1 %v461_v49  ;;  %785 = vmatprep.subr.mxu0 %v766_v50  ;;  %v3139_v39 = vld [vmem:[#allocation9 + $0x2d8] sm:$0xff]  ;;  %5111 = vst [vmem:[#allocation12_spill] sm:$0xff] %v3142_v40  ;;  %v3145_v41 = vld [vmem:[%s3112_s28 + $0x8] sm:$0xff]  ;;  %v3147_v42 = vld [vmem:[#allocation9 + $0x2d0] sm:$0xff] }
  0x62   : > { %2513 = vmatprep.subr.mxu1 %v767_v52  ;;  %2508 = vmatmul.mubr.f32.vlgmr.msra.gmra.mxu1 %v3129_v53  ;;  %v3149_v43 = vld [vmem:[#allocation9 + $0x2e0] sm:$0xff]  ;;  %v3152_v44 = vld [vmem:[#allocation9 + $0x2a8] sm:$0xff]  ;;  %v3154_v45 = vld [vmem:[#allocation9 + $0x2b8] sm:$0xff] }
  0x63   : > { %786 = vmatpush1.msra.mxu0 %v765_v54  ;;  %2514 = vmatpush3.msra.mxu1 %v767_v52  ;;  %5112 = vst [vmem:[#allocation13_spill] sm:$0xff] %v3149_v43  ;;  %5113 = vst [vmem:[#allocation14_spill] sm:$0xff] %v3154_v45  ;;  %v3158_v46 = vld [vmem:[#allocation9 + $0x2a0] sm:$0xff]  ;;  %v3160_v47 = vld [vmem:[#allocation9 + $0x2b0] sm:$0xff] }
  0x64   : > { %787 = vmatprep.subr.mxu0 %v763_v55  ;;  %2515 = vmatprep.subr.mxu1 %v764_v56  ;;  %5114 = vst [vmem:[#allocation15_spill] sm:$0xff] %v3160_v47  ;;  %v3164_v48 = vld [vmem:[#allocation9 + $0x278] sm:$0xff]  ;;  %v3166_v49 = vld [vmem:[#allocation9 + $0x288] sm:$0xff]  ;;  %v3170_v50 = vld [vmem:[#allocation9 + $0x270] sm:$0xff] }
  0x65   : > { %788 = vmatpush1.msra.mxu0 %v762_v57  ;;  %2516 = vmatpush3.msra.mxu1 %v764_v56  ;;  %5115 = vst [vmem:[#allocation16_spill] sm:$0xff] %v3166_v49  ;;  %v3172_v52 = vld [vmem:[#allocation9 + $0x280] sm:$0xff]  ;;  %v3178_v54 = vld [vmem:[#allocation9 + $0x258] sm:$0xff]  ;;  %v3184_v56 = vld [vmem:[#allocation9 + $0x250] sm:$0xff] }
  0x66   : > { %789 = vmatprep.subr.mxu0 %v760_v58  ;;  %2517 = vmatprep.subr.mxu1 %v761_v59  ;;  %5116 = vst [vmem:[#allocation17_spill] sm:$0xff] %v3172_v52  ;;  %5117 = vst [vmem:[#allocation18_spill] sm:$0xff] %v3178_v54  ;;  %v3182_v55 = vld [vmem:[#allocation9 + $0x240] sm:$0xff]  ;;  %v3188_v57 = vld [vmem:[#allocation9 + $0x218] sm:$0xff] }
  0x67   : > { %790 = vmatpush1.msra.mxu0 %v759_v60  ;;  %2518 = vmatpush3.msra.mxu1 %v761_v59  ;;  %5118 = vst [vmem:[#allocation19_spill] sm:$0xff] %v3184_v56  ;;  %v3190_v58 = vld [vmem:[#allocation9 + $0x228] sm:$0xff]  ;;  %v3194_v59 = vld [vmem:[#allocation9 + $0x210] sm:$0xff]  ;;  %v3196_v60 = vld [vmem:[#allocation9 + $0x220] sm:$0xff] }
  0x68   : > { %791 = vmatprep.subr.mxu0 %v757_v61  ;;  %2519 = vmatprep.subr.mxu1 %v758_v62  ;;  %5119 = vst [vmem:[#allocation20_spill] sm:$0xff] %v3190_v58  ;;  %5120 = vst [vmem:[#allocation21_spill] sm:$0xff] %v3196_v60  ;;  %v3200_v61 = vld [vmem:[#allocation9 + $0x1e8] sm:$0xff] }
  0x69   : > { %792 = vmatpush1.msra.mxu0 %v756_v63  ;;  %2520 = vmatpush3.msra.mxu1 %v758_v62  ;;  %v3202_v62 = vld [vmem:[#allocation9 + $0x1f8] sm:$0xff]  ;;  %v3206_v63 = vld [vmem:[#allocation9 + $0x1e0] sm:$0xff] }
  0x6a   : > { %793 = vmatprep.subr.mxu0 %v754_v0  ;;  %2521 = vmatprep.subr.mxu1 %v755_v1  ;;  %5121 = vst [vmem:[#allocation22_spill] sm:$0xff] %v3202_v62  ;;  %v3208_v0 = vld [vmem:[#allocation9 + $0x1f0] sm:$0xff] }
  0x6b   : > { %794 = vmatpush1.msra.mxu0 %v753_v2  ;;  %2522 = vmatpush3.msra.mxu1 %v755_v1  ;;  %5122 = vst [vmem:[#allocation23_spill] sm:$0xff] %v3208_v0  ;;  %v3212_v1 = vld [vmem:[#allocation9 + $0x1b8] sm:$0xff]  ;;  %v3214_v2 = vld [vmem:[#allocation9 + $0x1c8] sm:$0xff] }
  0x6c   : > { %795 = vmatprep.subr.mxu0 %v751_v3  ;;  %2523 = vmatprep.subr.mxu1 %v752_v4  ;;  %5123 = vst [vmem:[#allocation24_spill] sm:$0xff] %v3214_v2  ;;  %v3218_v3 = vld [vmem:[#allocation9 + $0x1b0] sm:$0xff] }
  0x6d   : > { %796 = vmatpush1.msra.mxu0 %v750_v5  ;;  %2524 = vmatpush3.msra.mxu1 %v752_v4  ;;  %v3220_v4 = vld [vmem:[#allocation9 + $0x1c0] sm:$0xff]  ;;  %v3224_v5 = vld [vmem:[#allocation9 + $0x188] sm:$0xff] }
  0x6e   : > { %797 = vmatprep.subr.mxu0 %v748_v6  ;;  %2525 = vmatprep.subr.mxu1 %v749_v7  ;;  %5124 = vst [vmem:[#allocation25_spill] sm:$0xff] %v3220_v4  ;;  %v3226_v6 = vld [vmem:[#allocation9 + $0x198] sm:$0xff] }
  0x6f   : > { %798 = vmatpush1.msra.mxu0 %v747_v8  ;;  %2526 = vmatpush3.msra.mxu1 %v749_v7  ;;  %5125 = vst [vmem:[#allocation26_spill] sm:$0xff] %v3226_v6  ;;  %v3230_v7 = vld [vmem:[#allocation9 + $0x180] sm:$0xff]  ;;  %v3232_v8 = vld [vmem:[#allocation9 + $0x190] sm:$0xff] }
  0x70   : > { %799 = vmatprep.subr.mxu0 %v745_v9  ;;  %2527 = vmatprep.subr.mxu1 %v746_v10  ;;  %5126 = vst [vmem:[#allocation27_spill] sm:$0xff] %v3232_v8  ;;  %v3236_v9 = vld [vmem:[#allocation9 + $0x158] sm:$0xff] }
  0x71   : > { %800 = vmatpush1.msra.mxu0 %v744_v11  ;;  %2528 = vmatpush3.msra.mxu1 %v746_v10  ;;  %v3238_v10 = vld [vmem:[#allocation9 + $0x168] sm:$0xff]  ;;  %v3242_v11 = vld [vmem:[#allocation9 + $0x150] sm:$0xff] }
  0x72   : > { %801 = vmatprep.subr.mxu0 %v742_v12  ;;  %2529 = vmatprep.subr.mxu1 %v743_v13  ;;  %5127 = vst [vmem:[#allocation28_spill] sm:$0xff] %v3238_v10  ;;  %v3244_v12 = vld [vmem:[#allocation9 + $0x160] sm:$0xff] }
  0x73   : > { %802 = vmatpush1.msra.mxu0 %v741_v14  ;;  %2530 = vmatpush3.msra.mxu1 %v743_v13  ;;  %5128 = vst [vmem:[#allocation29_spill] sm:$0xff] %v3244_v12  ;;  %v3248_v13 = vld [vmem:[#allocation9 + $0x128] sm:$0xff]  ;;  %v3250_v14 = vld [vmem:[#allocation9 + $0x138] sm:$0xff] }
  0x74   : > { %600 = vmatprep.mubr.f32.mxu0 %v4897_v51  ;;  %803 = vmatprep.subr.mxu0 %v739_v15  ;;  %5129 = vst [vmem:[#allocation30_spill] sm:$0xff] %v3250_v14  ;;  %v3254_v15 = vld [vmem:[#allocation9 + $0x120] sm:$0xff] }
  0x75   : > { %2531 = vmatprep.subr.mxu1 %v740_v16  ;;  %601 = vmatmul.mubr.f32.gmra.mxu0 %v3129_v53  ;;  %v3176_v53 = vld [vmem:[#allocation9 + $0x248] sm:$0xff] }
  0x76   : > { %804 = vmatpush1.msra.mxu0 %v738_v17  ;;  %2532 = vmatpush3.msra.mxu1 %v740_v16  ;;  %v3256_v16 = vld [vmem:[#allocation9 + $0x130] sm:$0xff]  ;;  %v3260_v17 = vld [vmem:[#allocation9 + $0xf8] sm:$0xff] }
  0x77   : > { %805 = vmatprep.subr.mxu0 %v736_v18  ;;  %2533 = vmatprep.subr.mxu1 %v737_v19  ;;  %5130 = vst [vmem:[#allocation31_spill] sm:$0xff] %v3256_v16  ;;  %v3262_v18 = vld [vmem:[#allocation9 + $0x108] sm:$0xff] }
  0x78   : > { %806 = vmatpush1.msra.mxu0 %v735_v20  ;;  %2534 = vmatpush3.msra.mxu1 %v737_v19  ;;  %5131 = vst [vmem:[#allocation32_spill] sm:$0xff] %v3262_v18  ;;  %v3266_v19 = vld [vmem:[#allocation9 + $0xf0] sm:$0xff]  ;;  %v3268_v20 = vld [vmem:[#allocation9 + $0x100] sm:$0xff] }
  0x79   : > { %606 = vmatprep.mubr.f32.mxu0 %v4897_v51  ;;  %807 = vmatprep.subr.mxu0 %v733_v21  ;;  %5132 = vst [vmem:[#allocation33_spill] sm:$0xff] %v3268_v20  ;;  %v3272_v21 = vld [vmem:[#allocation9 + $0xc8] sm:$0xff] }
  0x7a   : > { %2535 = vmatprep.subr.mxu1 %v734_v22  ;;  %607 = vmatmul.mubr.f32.gmra.mxu0 %v463_v23 }
  0x7b   : > { %808 = vmatpush1.msra.mxu0 %v732_v24  ;;  %2536 = vmatpush3.msra.mxu1 %v734_v22  ;;  %v3274_v22 = vld [vmem:[#allocation9 + $0xd8] sm:$0xff]  ;;  %v3280_v24 = vld [vmem:[#allocation9 + $0xd0] sm:$0xff] }
  0x7c   : > { %809 = vmatprep.subr.mxu0 %v730_v25  ;;  %2537 = vmatprep.subr.mxu1 %v731_v26  ;;  %5133 = vst [vmem:[#allocation34_spill] sm:$0xff] %v3274_v22  ;;  %5134 = vst [vmem:[#allocation35_spill] sm:$0xff] %v3280_v24  ;;  %v3284_v25 = vld [vmem:[#allocation9 + $0x98] sm:$0xff] }
  0x7d   : > { %810 = vmatpush1.msra.mxu0 %v729_v27  ;;  %2538 = vmatpush3.msra.mxu1 %v731_v26  ;;  %v3286_v26 = vld [vmem:[#allocation9 + $0xa8] sm:$0xff]  ;;  %v3290_v27 = vld [vmem:[#allocation9 + $0x90] sm:$0xff] }
  0x7e   : > { %612 = vmatprep.mubr.f32.mxu0 %v4897_v51  ;;  %811 = vmatprep.subr.mxu0 %v727_v28  ;;  %5135 = vst [vmem:[#allocation36_spill] sm:$0xff] %v3286_v26  ;;  %v3292_v28 = vld [vmem:[#allocation9 + $0xa0] sm:$0xff] }
  0x7f   : > { %2539 = vmatprep.subr.mxu1 %v728_v29  ;;  %613 = vmatmul.mubr.f32.gmra.mxu0 %v464_v30  ;;  %5136 = vst [vmem:[#allocation37_spill] sm:$0xff] %v3292_v28 }
  0x80   : > { %812 = vmatpush1.msra.mxu0 %v726_v31  ;;  %2540 = vmatpush3.msra.mxu1 %v728_v29  ;;  %v3296_v29 = vld [vmem:[#allocation9 + $0x68] sm:$0xff]  ;;  %v3302_v31 = vld [vmem:[#allocation9 + $0x60] sm:$0xff] }
  0x81   : > { %2510 = vmatprep.mubr.f32.mxu1 %v463_v23  ;;  %813 = vmatprep.subr.mxu0 %v724_v32  ;;  %v3278_v23 = vld [vmem:[#allocation9 + $0xc0] sm:$0xff]  ;;  %v3304_v32 = vld [vmem:[#allocation9 + $0x70] sm:$0xff] }
  0x82   : > { %2541 = vmatprep.subr.mxu1 %v725_v33  ;;  %2511 = vmatmul.mubr.f32.gmra.mxu1 %v464_v30  ;;  %v3298_v30 = vld [vmem:[#allocation9 + $0x78] sm:$0xff]  ;;  %5138 = vst [vmem:[#allocation39_spill] sm:$0xff] %v3304_v32 }
  0x83   : > { %814 = vmatpush1.msra.mxu0 %v723_v34  ;;  %2542 = vmatpush3.msra.mxu1 %v725_v33  ;;  %5137 = vst [vmem:[#allocation38_spill] sm:$0xff] %v3298_v30  ;;  %v3308_v33 = vld [vmem:[#allocation9 + $0x38] sm:$0xff]  ;;  %v3310_v34 = vld [vmem:[#allocation9 + $0x48] sm:$0xff] }
  0x84   : > { %815 = vmatprep.subr.mxu0 %v721_v35  ;;  %2543 = vmatprep.subr.mxu1 %v722_v36  ;;  %5139 = vst [vmem:[#allocation40_spill] sm:$0xff] %v3310_v34  ;;  %v3314_v35 = vld [vmem:[#allocation9 + $0x30] sm:$0xff] }
  0x85   : > { %816 = vmatpush1.msra.mxu0 %v720_v37  ;;  %849 = vmatprep.mubr.f32.mxu0 %v4897_v51  ;;  %v3320_v37 = vld [vmem:[#allocation9 + $0x8] sm:$0xff]  ;;  %v3326_v51 = vld [vmem:[#allocation9] sm:$0xff] }
  0x86   : > { %2544 = vmatpush3.msra.mxu1 %v722_v36  ;;  %850 = vmatmul.mubr.f32.vlgmr.msra.gmra.mxu0 %v716_v38  ;;  %v3316_v36 = vld [vmem:[#allocation9 + $0x40] sm:$0xff] }
  0x87   : > { %2545 = vmatprep.mubr.f32.mxu1 %v716_v38  ;;  %1167 = vmatprep.subr.mxu0 %v3139_v39  ;;  %5140 = vst [vmem:[#allocation41_spill] sm:$0xff] %v3316_v36  ;;  %v3322_v38 = vld [vmem:[#allocation9 + $0x18] sm:$0xff] }
  0x88   : > { %1238 = vmatprep.subr.mxu1 %v3142_v40  ;;  %2546 = vmatmul.mubr.f32.vlgmr.msra.gmra.mxu1 %v3145_v41  ;;  %5141 = vst [vmem:[#allocation42_spill] sm:$0xff] %v3322_v38  ;;  %v3483_v40 = vld [vmem:[#allocation9 + $0x3a8] sm:$0xff] }
  0x89   : > { %1168 = vmatpush1.msra.mxu0 %v3147_v42  ;;  %1239 = vmatpush1.msra.mxu1 %v3149_v43  ;;  %v718_v43 = vld [vmem:[%s3112_s28 + $0x10] sm:$0xff]  ;;  %5172 = vst [vmem:[#allocation72_spill] sm:$0xff] %v3483_v40 }
  0x8a   : > { %1169 = vmatprep.subr.mxu0 %v3152_v44  ;;  %1240 = vmatprep.subr.mxu1 %v3154_v45  ;;  %v3470_v45 = vld [vmem:[#allocation9 + $0x3d8] sm:$0xff] }
  0x8b   : > { %1170 = vmatpush1.msra.mxu0 %v3158_v46  ;;  %1241 = vmatpush1.msra.mxu1 %v3160_v47  ;;  %v3466_v47 = vld [vmem:[#allocation9 + $0x3c8] sm:$0xff]  ;;  %5169 = vst [vmem:[#allocation69_spill] sm:$0xff] %v3470_v45 }
  0x8c   : > { %1171 = vmatprep.subr.mxu0 %v3164_v48  ;;  %1242 = vmatprep.subr.mxu1 %v3166_v49  ;;  %v3456_v49 = vld [vmem:[#allocation9 + $0x408] sm:$0xff]  ;;  %5168 = vst [vmem:[#allocation68_spill] sm:$0xff] %v3466_v47 }
  0x8d   : > { %1172 = vmatpush1.msra.mxu0 %v3170_v50  ;;  %1243 = vmatpush1.msra.mxu1 %v3172_v52  ;;  %v5163_v52 = vmov 0.0   ;;  %5165 = vst [vmem:[#allocation65_spill] sm:$0xff] %v3456_v49 }
  0x8e   : > { %1173 = vmatprep.subr.mxu0 %v3176_v53  ;;  %1244 = vmatprep.subr.mxu1 %v3178_v54  ;;  %v3450_v54 = vld [vmem:[#allocation9 + $0x430] sm:$0xff] }
  0x8f   : > { %1174 = vmatpush1.msra.mxu0 %v3182_v55  ;;  %1245 = vmatpush1.msra.mxu1 %v3184_v56  ;;  %v3436_v56 = vld [vmem:[#allocation9 + $0x460] sm:$0xff]  ;;  %5162 = vst [vmem:[#allocation63_spill] sm:$0xff] %v3450_v54 }
  0x90   : > { %1175 = vmatprep.subr.mxu0 %v3188_v57  ;;  %1246 = vmatprep.subr.mxu1 %v3190_v58  ;;  %v3430_v58 = vld [vmem:[#allocation9 + $0x468] sm:$0xff]  ;;  %5160 = vst [vmem:[#allocation61_spill] sm:$0xff] %v3436_v56 }
  0x91   : > { %1176 = vmatpush1.msra.mxu0 %v3194_v59  ;;  %1247 = vmatpush1.msra.mxu1 %v3196_v60  ;;  %v3424_v60 = vld [vmem:[#allocation9 + $0x490] sm:$0xff]  ;;  %5159 = vst [vmem:[#allocation60_spill] sm:$0xff] %v3430_v58 }
  0x92   : > { %1177 = vmatprep.subr.mxu0 %v3200_v61  ;;  %1248 = vmatprep.subr.mxu1 %v3202_v62  ;;  %v3418_v62 = vld [vmem:[#allocation9 + $0x498] sm:$0xff]  ;;  %5158 = vst [vmem:[#allocation59_spill] sm:$0xff] %v3424_v60 }
  0x93   : > { %1178 = vmatpush1.msra.mxu0 %v3206_v63  ;;  %1249 = vmatpush1.msra.mxu1 %v3208_v0  ;;  %v3412_v0 = vld [vmem:[#allocation9 + $0x4c0] sm:$0xff]  ;;  %5157 = vst [vmem:[#allocation58_spill] sm:$0xff] %v3418_v62 }
  0x94   : > { %1179 = vmatprep.subr.mxu0 %v3212_v1  ;;  %1250 = vmatprep.subr.mxu1 %v3214_v2  ;;  %v3406_v2 = vld [vmem:[#allocation9 + $0x4c8] sm:$0xff]  ;;  %5156 = vst [vmem:[#allocation57_spill] sm:$0xff] %v3412_v0 }
  0x95   : > { %1180 = vmatpush1.msra.mxu0 %v3218_v3  ;;  %1251 = vmatpush1.msra.mxu1 %v3220_v4  ;;  %v3400_v4 = vld [vmem:[#allocation9 + $0x4f0] sm:$0xff]  ;;  %5155 = vst [vmem:[#allocation56_spill] sm:$0xff] %v3406_v2 }
  0x96   : > { %1181 = vmatprep.subr.mxu0 %v3224_v5  ;;  %1252 = vmatprep.subr.mxu1 %v3226_v6  ;;  %v3394_v6 = vld [vmem:[#allocation9 + $0x4f8] sm:$0xff]  ;;  %5154 = vst [vmem:[#allocation55_spill] sm:$0xff] %v3400_v4 }
  0x97   : > { %1182 = vmatpush1.msra.mxu0 %v3230_v7  ;;  %1253 = vmatpush1.msra.mxu1 %v3232_v8  ;;  %v3388_v8 = vld [vmem:[#allocation9 + $0x520] sm:$0xff]  ;;  %5153 = vst [vmem:[#allocation54_spill] sm:$0xff] %v3394_v6 }
  0x98   : > { %1183 = vmatprep.subr.mxu0 %v3236_v9  ;;  %1254 = vmatprep.subr.mxu1 %v3238_v10  ;;  %v3382_v10 = vld [vmem:[#allocation9 + $0x528] sm:$0xff]  ;;  %5152 = vst [vmem:[#allocation53_spill] sm:$0xff] %v3388_v8 }
  0x99   : > { %1184 = vmatpush1.msra.mxu0 %v3242_v11  ;;  %1255 = vmatpush1.msra.mxu1 %v3244_v12  ;;  %v3376_v12 = vld [vmem:[#allocation9 + $0x550] sm:$0xff]  ;;  %5151 = vst [vmem:[#allocation52_spill] sm:$0xff] %v3382_v10 }
  0x9a   : > { %1185 = vmatprep.subr.mxu0 %v3248_v13  ;;  %1256 = vmatprep.subr.mxu1 %v3250_v14  ;;  %v3370_v14 = vld [vmem:[#allocation9 + $0x558] sm:$0xff]  ;;  %5150 = vst [vmem:[#allocation51_spill] sm:$0xff] %v3376_v12 }
  0x9b   : > { %1186 = vmatpush1.msra.mxu0 %v3254_v15  ;;  %1257 = vmatpush1.msra.mxu1 %v3256_v16  ;;  %v3364_v16 = vld [vmem:[#allocation9 + $0x580] sm:$0xff]  ;;  %5149 = vst [vmem:[#allocation50_spill] sm:$0xff] %v3370_v14 }
  0x9c   : > { %1187 = vmatprep.subr.mxu0 %v3260_v17  ;;  %1258 = vmatprep.subr.mxu1 %v3262_v18  ;;  %v3358_v18 = vld [vmem:[#allocation9 + $0x588] sm:$0xff]  ;;  %5148 = vst [vmem:[#allocation49_spill] sm:$0xff] %v3364_v16 }
  0x9d   : > { %1188 = vmatpush1.msra.mxu0 %v3266_v19  ;;  %1259 = vmatpush1.msra.mxu1 %v3268_v20  ;;  %v3352_v20 = vld [vmem:[#allocation9 + $0x5b0] sm:$0xff]  ;;  %5147 = vst [vmem:[#allocation48_spill] sm:$0xff] %v3358_v18 }
  0x9e   : > { %1189 = vmatprep.subr.mxu0 %v3272_v21  ;;  %1260 = vmatprep.subr.mxu1 %v3274_v22  ;;  %v3346_v22 = vld [vmem:[#allocation9 + $0x5b8] sm:$0xff]  ;;  %5146 = vst [vmem:[#allocation47_spill] sm:$0xff] %v3352_v20 }
  0x9f   : > { %1190 = vmatpush1.msra.mxu0 %v3278_v23  ;;  %1261 = vmatpush1.msra.mxu1 %v3280_v24  ;;  %v3340_v24 = vld [vmem:[#allocation9 + $0x5e0] sm:$0xff]  ;;  %5145 = vst [vmem:[#allocation46_spill] sm:$0xff] %v3346_v22 }
  0xa0   : > { %1191 = vmatprep.subr.mxu0 %v3284_v25  ;;  %1262 = vmatprep.subr.mxu1 %v3286_v26  ;;  %v3334_v26 = vld [vmem:[#allocation9 + $0x5e8] sm:$0xff]  ;;  %5144 = vst [vmem:[#allocation45_spill] sm:$0xff] %v3340_v24 }
  0xa1   : > { %1192 = vmatpush1.msra.mxu0 %v3290_v27  ;;  %1263 = vmatpush1.msra.mxu1 %v3292_v28  ;;  %v3328_v28 = vld [vmem:[#allocation9 + $0x10] sm:$0xff]  ;;  %5143 = vst [vmem:[#allocation44_spill] sm:$0xff] %v3334_v26 }
  0xa2   : > { %1193 = vmatprep.subr.mxu0 %v3296_v29  ;;  %1264 = vmatprep.subr.mxu1 %v3298_v30  ;;  %5142 = vst [vmem:[#allocation43_spill] sm:$0xff] %v3328_v28  ;;  %v3332_v30 = vld [vmem:[#allocation9 + $0x5d8] sm:$0xff] }
  0xa3   : > { %1194 = vmatpush1.msra.mxu0 %v3302_v31  ;;  %1265 = vmatpush1.msra.mxu1 %v3304_v32  ;;  %v3338_v32 = vld [vmem:[#allocation9 + $0x5d0] sm:$0xff] }
  0xa4   : > { %1195 = vmatprep.subr.mxu0 %v3308_v33  ;;  %1266 = vmatprep.subr.mxu1 %v3310_v34  ;;  %v3344_v34 = vld [vmem:[#allocation9 + $0x5a8] sm:$0xff] }
  0xa5   : > { %1196 = vmatpush1.msra.mxu0 %v3314_v35  ;;  %1267 = vmatpush1.msra.mxu1 %v3316_v36  ;;  %v3350_v36 = vld [vmem:[#allocation9 + $0x5a0] sm:$0xff] }
  0xa6   : > { %1197 = vmatprep.subr.mxu0 %v3320_v37  ;;  %1268 = vmatprep.subr.mxu1 %v3322_v38  ;;  %v3356_v38 = vld [vmem:[#allocation9 + $0x578] sm:$0xff] }
  0xa7   : > { %1198 = vmatpush1.msra.mxu0 %v3326_v51  ;;  %1269 = vmatpush1.msra.mxu1 %v3328_v28  ;;  %v3362_v28 = vld [vmem:[#allocation9 + $0x570] sm:$0xff] }
  0xa8   : > { %1199 = vmatprep.subr.mxu0 %v3332_v30  ;;  %1270 = vmatprep.subr.mxu1 %v3334_v26  ;;  %v3368_v26 = vld [vmem:[#allocation9 + $0x548] sm:$0xff] }
  0xa9   : > { %1200 = vmatpush2.msra.mxu0 %v3338_v32  ;;  %1271 = vmatpush2.msra.mxu1 %v3340_v24  ;;  %v3374_v24 = vld [vmem:[#allocation9 + $0x540] sm:$0xff] }
  0xaa   : > { %1201 = vmatprep.subr.mxu0 %v3344_v34  ;;  %1272 = vmatprep.subr.mxu1 %v3346_v22  ;;  %v3380_v22 = vld [vmem:[#allocation9 + $0x518] sm:$0xff] }
  0xab   : > { %1202 = vmatpush2.msra.mxu0 %v3350_v36  ;;  %1273 = vmatpush2.msra.mxu1 %v3352_v20  ;;  %v3386_v20 = vld [vmem:[#allocation9 + $0x510] sm:$0xff] }
  0xac   : > { %1203 = vmatprep.subr.mxu0 %v3356_v38  ;;  %1274 = vmatprep.subr.mxu1 %v3358_v18  ;;  %v3392_v18 = vld [vmem:[#allocation9 + $0x4e8] sm:$0xff] }
  0xad   : > { %1204 = vmatpush2.msra.mxu0 %v3362_v28  ;;  %1275 = vmatpush2.msra.mxu1 %v3364_v16  ;;  %v3398_v16 = vld [vmem:[#allocation9 + $0x4e0] sm:$0xff] }
  0xae   : > { %1205 = vmatprep.subr.mxu0 %v3368_v26  ;;  %1276 = vmatprep.subr.mxu1 %v3370_v14  ;;  %v3404_v14 = vld [vmem:[#allocation9 + $0x4b8] sm:$0xff] }
  0xaf   : > { %1206 = vmatpush2.msra.mxu0 %v3374_v24  ;;  %1277 = vmatpush2.msra.mxu1 %v3376_v12  ;;  %v3410_v12 = vld [vmem:[#allocation9 + $0x4b0] sm:$0xff] }
  0xb0   : > { %1207 = vmatprep.subr.mxu0 %v3380_v22  ;;  %1278 = vmatprep.subr.mxu1 %v3382_v10  ;;  %v3416_v10 = vld [vmem:[#allocation9 + $0x488] sm:$0xff] }
  0xb1   : > { %1208 = vmatpush2.msra.mxu0 %v3386_v20  ;;  %1279 = vmatpush2.msra.mxu1 %v3388_v8  ;;  %v3422_v8 = vld [vmem:[#allocation9 + $0x480] sm:$0xff] }
  0xb2   : > { %1209 = vmatprep.subr.mxu0 %v3392_v18  ;;  %1280 = vmatprep.subr.mxu1 %v3394_v6  ;;  %v3428_v6 = vld [vmem:[#allocation9 + $0x458] sm:$0xff] }
  0xb3   : > { %1210 = vmatpush2.msra.mxu0 %v3398_v16  ;;  %1281 = vmatpush2.msra.mxu1 %v3400_v4  ;;  %v3434_v4 = vld [vmem:[#allocation9 + $0x450] sm:$0xff] }
  0xb4   : > { %1211 = vmatprep.subr.mxu0 %v3404_v14  ;;  %1282 = vmatprep.subr.mxu1 %v3406_v2  ;;  %v3440_v2 = vld [vmem:[#allocation9 + $0x428] sm:$0xff] }
  0xb5   : > { %1212 = vmatpush2.msra.mxu0 %v3410_v12  ;;  %1283 = vmatpush2.msra.mxu1 %v3412_v0  ;;  %v3444_v0 = vld [vmem:[#allocation9 + $0x438] sm:$0xff] }
  0xb6   : > { %1213 = vmatprep.subr.mxu0 %v3416_v10  ;;  %1284 = vmatprep.subr.mxu1 %v3418_v62  ;;  %5161 = vst [vmem:[#allocation62_spill] sm:$0xff] %v3444_v0  ;;  %v3448_v62 = vld [vmem:[#allocation9 + $0x420] sm:$0xff] }
  0xb7   : > { %1214 = vmatpush2.msra.mxu0 %v3422_v8  ;;  %1285 = vmatpush2.msra.mxu1 %v3424_v60  ;;  %v3454_v60 = vld [vmem:[#allocation9 + $0x3f8] sm:$0xff] }
  0xb8   : > { %1215 = vmatprep.subr.mxu0 %v3428_v6  ;;  %1286 = vmatprep.subr.mxu1 %v3430_v58  ;;  %5164 = vst [vmem:[#allocation64_spill] sm:$0xff] %v3454_v60  ;;  %v3460_v58 = vld [vmem:[#allocation9 + $0x3f0] sm:$0xff] }
  0xb9   : > { %1216 = vmatpush2.msra.mxu0 %v3434_v4  ;;  %1287 = vmatpush2.msra.mxu1 %v3436_v56  ;;  %5166 = vst [vmem:[#allocation66_spill] sm:$0xff] %v3460_v58  ;;  %v3462_v56 = vld [vmem:[#allocation9 + $0x400] sm:$0xff] }
  0xba   : > { %855 = vmatprep.mubr.f32.mxu0 %v5163_v52  ;;  %1217 = vmatprep.subr.mxu0 %v3440_v2  ;;  %5167 = vst [vmem:[#allocation67_spill] sm:$0xff] %v3462_v56 }
  0xbb   : > { %1288 = vmatprep.subr.mxu1 %v3444_v0  ;;  %856 = vmatmul.mubr.f32.gmra.mxu0 %v3145_v41  ;;  %v3475_v41 = vld [vmem:[#allocation9 + $0x3c0] sm:$0xff]  ;;  %v3477_v0 = vld [vmem:[#allocation9 + $0x3d0] sm:$0xff] }
  0xbc   : > { %1218 = vmatpush2.msra.mxu0 %v3448_v62  ;;  %1289 = vmatpush2.msra.mxu1 %v3450_v54  ;;  %5170 = vst [vmem:[#allocation70_spill] sm:$0xff] %v3475_v41  ;;  %5171 = vst [vmem:[#allocation71_spill] sm:$0xff] %v3477_v0  ;;  %v3481_v54 = vld [vmem:[#allocation9 + $0x398] sm:$0xff] }
  0xbd   : > { %1219 = vmatprep.subr.mxu0 %v3454_v60  ;;  %1290 = vmatprep.subr.mxu1 %v3456_v49  ;;  %v3486_v49 = vld [vmem:[#allocation9 + $0x390] sm:$0xff] }
  0xbe   : > { %1220 = vmatpush2.msra.mxu0 %v3460_v58  ;;  %1291 = vmatpush2.msra.mxu1 %v3462_v56  ;;  %5173 = vst [vmem:[#allocation73_spill] sm:$0xff] %v3486_v49  ;;  %v3488_v58 = vld [vmem:[#allocation9 + $0x3a0] sm:$0xff]  ;;  %v3492_v56 = vld [vmem:[#allocation9 + $0x368] sm:$0xff]  ;;  %v719_v60 = vld [vmem:[%s3112_s28 + $0x18] sm:$0xff] }
  0xbf   : > { %861 = vmatprep.mubr.f32.mxu0 %v5163_v52  ;;  %1221 = vmatprep.subr.mxu0 %v3466_v47  ;;  %5174 = vst [vmem:[#allocation74_spill] sm:$0xff] %v3488_v58  ;;  %5175 = vst [vmem:[#allocation75_spill] sm:$0xff] %v3492_v56  ;;  %v3496_v47 = vld [vmem:[#allocation9 + $0x378] sm:$0xff] }
  0xc0   : > { %1292 = vmatprep.subr.mxu1 %v3470_v45  ;;  %862 = vmatmul.mubr.f32.gmra.mxu0 %v718_v43  ;;  %5176 = vst [vmem:[#allocation76_spill] sm:$0xff] %v3496_v47  ;;  %v3501_v45 = vld [vmem:[#allocation9 + $0x360] sm:$0xff] }
  0xc1   : > { %1222 = vmatpush2.msra.mxu0 %v3475_v41  ;;  %1293 = vmatpush2.msra.mxu1 %v3477_v0  ;;  %5177 = vst [vmem:[#allocation77_spill] sm:$0xff] %v3501_v45  ;;  %v3505_v0 = vld [vmem:[#allocation9 + $0x370] sm:$0xff]  ;;  %v3507_v41 = vld [vmem:[#allocation9 + $0x338] sm:$0xff] }
  0xc2   : > { %1223 = vmatprep.subr.mxu0 %v3481_v54  ;;  %1294 = vmatprep.subr.mxu1 %v3483_v40  ;;  %5178 = vst [vmem:[#allocation78_spill] sm:$0xff] %v3505_v0  ;;  %v3510_v40 = vld [vmem:[#allocation9 + $0x348] sm:$0xff] }
  0xc3   : > { %1224 = vmatpush2.msra.mxu0 %v3486_v49  ;;  %1295 = vmatpush2.msra.mxu1 %v3488_v58  ;;  %5179 = vst [vmem:[#allocation79_spill] sm:$0xff] %v3510_v40  ;;  %v3513_v49 = vld [vmem:[#allocation9 + $0x330] sm:$0xff]  ;;  %v3515_v58 = vld [vmem:[#allocation9 + $0x340] sm:$0xff] }
  0xc4   : > { %867 = vmatprep.mubr.f32.mxu0 %v5163_v52  ;;  %1225 = vmatprep.subr.mxu0 %v3492_v56  ;;  %5180 = vst [vmem:[#allocation80_spill] sm:$0xff] %v3515_v58  ;;  %v3519_v52 = vld [vmem:[#allocation9 + $0x308] sm:$0xff]  ;;  %v3521_v56 = vld [vmem:[#allocation9 + $0x318] sm:$0xff] }
  0xc5   : > { %1296 = vmatprep.subr.mxu1 %v3496_v47  ;;  %868 = vmatmul.mubr.f32.gmra.mxu0 %v719_v60  ;;  %5181 = vst [vmem:[#allocation81_spill] sm:$0xff] %v3521_v56  ;;  %v3524_v47 = vld [vmem:[#allocation9 + $0x300] sm:$0xff] }
  0xc6   : > { %2548 = vmatprep.mubr.f32.mxu1 %v718_v43  ;;  %1226 = vmatpush2.msra.mxu0 %v3501_v45  ;;  %5182 = vst [vmem:[#allocation82_spill] sm:$0xff] %v3524_v47  ;;  %v3526_v43 = vld [vmem:[#allocation4 + $0x8] sm:$0xff]  ;;  %v3530_v45 = vld [vmem:[#allocation9 + $0x310] sm:$0xff] }
  0xc7   : > { %1297 = vmatpush2.msra.mxu1 %v3505_v0  ;;  %1227 = vmatprep.subr.mxu0 %v3507_v41  ;;  %5183 = vst [vmem:[#allocation83_spill] sm:$0xff] %v3526_v43  ;;  %5184 = vst [vmem:[#allocation84_spill] sm:$0xff] %v3530_v45  ;;  %v3534_v0 = vld [vmem:[#allocation4] sm:$0xff] }
  0xc8   : > { %2549 = vmatmul.mubr.f32.gmra.mxu1 %v719_v60  ;;  %1298 = vmatprep.subr.mxu1 %v3510_v40  ;;  %5185 = vst [vmem:[#allocation85_spill] sm:$0xff] %v3534_v0  ;;  %v3538_v60 = vld [vmem:[#allocation9 + $0x2f8] sm:$0xff]  ;;  %v3542_v40 = vld [vmem:[#allocation9 + $0x2f0] sm:$0xff] }
  0xc9   : > { %1228 = vmatpush2.msra.mxu0 %v3513_v49  ;;  %1299 = vmatpush2.msra.mxu1 %v3515_v58  ;;  %v3546_v58 = vld [vmem:[#allocation9 + $0x2c8] sm:$0xff] }
  0xca   : > { %1229 = vmatprep.subr.mxu0 %v3519_v52  ;;  %1300 = vmatprep.subr.mxu1 %v3521_v56  ;;  %v3549_v56 = vld [vmem:[#allocation9 + $0x2c0] sm:$0xff] }
  0xcb   : > { %1230 = vmatpush2.msra.mxu0 %v3524_v47  ;;  %1231 = vmatprep.mubr.f32.mxu0 %v3526_v43  ;;  %v3553_v47 = vld [vmem:[#allocation9 + $0x298] sm:$0xff] }
  0xcc   : > { %1301 = vmatpush2.msra.mxu1 %v3530_v45  ;;  %1302 = vmatprep.mubr.f32.mxu1 %v3526_v43  ;;  %v3557_v45 = vld [vmem:[#allocation9 + $0x290] sm:$0xff] }
  0xcd   : > { %1232 = vmatmul.mubr.f32.vlgmr.msra.gmra.mxu0 %v3534_v0  ;;  %1303 = vmatmul.mubr.f32.vlgmr.msra.gmra.mxu1 %v3534_v0  ;;  %v3561_v0 = vld [vmem:[#allocation9 + $0x268] sm:$0xff] }
  0xce   : > { %1309 = vmatprep.subr.mxu0 %v3538_v60  ;;  %1373 = vmatprep.mubr.f32.mxu0 %v3526_v43  ;;  %v3565_v43 = vld [vmem:[#allocation9 + $0x260] sm:$0xff] }
  0xcf   : > { %1310 = vmatpush1.msra.mxu0 %v3542_v40  ;;  %1446 = vmatprep.subr.mxu1 %v3139_v39  ;;  %v3569_v39 = vld [vmem:[#allocation9 + $0x238] sm:$0xff] }
  0xd0   : > { %1311 = vmatprep.subr.mxu0 %v3546_v58  ;;  %1447 = vmatpush1.msra.mxu1 %v3147_v42  ;;  %v3573_v42 = vld [vmem:[#allocation9 + $0x230] sm:$0xff] }
  0xd1   : > { %1312 = vmatpush1.msra.mxu0 %v3549_v56  ;;  %1448 = vmatprep.subr.mxu1 %v3152_v44  ;;  %v3577_v44 = vld [vmem:[#allocation9 + $0x208] sm:$0xff] }
  0xd2   : > { %1313 = vmatprep.subr.mxu0 %v3553_v47  ;;  %1449 = vmatpush1.msra.mxu1 %v3158_v46  ;;  %v3581_v46 = vld [vmem:[#allocation9 + $0x200] sm:$0xff] }
  0xd3   : > { %1314 = vmatpush1.msra.mxu0 %v3557_v45  ;;  %1450 = vmatprep.subr.mxu1 %v3164_v48  ;;  %v3585_v48 = vld [vmem:[#allocation9 + $0x1d8] sm:$0xff] }
  0xd4   : > { %1315 = vmatprep.subr.mxu0 %v3561_v0  ;;  %1451 = vmatpush1.msra.mxu1 %v3170_v50  ;;  %v3589_v50 = vld [vmem:[#allocation9 + $0x1d0] sm:$0xff] }
  0xd5   : > { %1316 = vmatpush1.msra.mxu0 %v3565_v43  ;;  %1452 = vmatprep.subr.mxu1 %v3176_v53  ;;  %v3593_v53 = vld [vmem:[#allocation9 + $0x1a8] sm:$0xff] }
  0xd6   : > { %1317 = vmatprep.subr.mxu0 %v3569_v39  ;;  %1453 = vmatpush1.msra.mxu1 %v3182_v55  ;;  %v3597_v55 = vld [vmem:[#allocation9 + $0x1a0] sm:$0xff] }
  0xd7   : > { %1318 = vmatpush1.msra.mxu0 %v3573_v42  ;;  %1454 = vmatprep.subr.mxu1 %v3188_v57  ;;  %v3601_v57 = vld [vmem:[#allocation9 + $0x178] sm:$0xff] }
  0xd8   : > { %1319 = vmatprep.subr.mxu0 %v3577_v44  ;;  %1455 = vmatpush1.msra.mxu1 %v3194_v59  ;;  %v3605_v59 = vld [vmem:[#allocation9 + $0x170] sm:$0xff] }
  0xd9   : > { %1320 = vmatpush1.msra.mxu0 %v3581_v46  ;;  %1456 = vmatprep.subr.mxu1 %v3200_v61  ;;  %v3609_v61 = vld [vmem:[#allocation9 + $0x148] sm:$0xff] }
  0xda   : > { %1321 = vmatprep.subr.mxu0 %v3585_v48  ;;  %1457 = vmatpush1.msra.mxu1 %v3206_v63  ;;  %v3613_v63 = vld [vmem:[#allocation9 + $0x140] sm:$0xff] }
  0xdb   : > { %1322 = vmatpush1.msra.mxu0 %v3589_v50  ;;  %1458 = vmatprep.subr.mxu1 %v3212_v1  ;;  %v3617_v1 = vld [vmem:[#allocation9 + $0x118] sm:$0xff] }
  0xdc   : > { %1323 = vmatprep.subr.mxu0 %v3593_v53  ;;  %1459 = vmatpush1.msra.mxu1 %v3218_v3  ;;  %v3621_v3 = vld [vmem:[#allocation9 + $0x110] sm:$0xff] }
  0xdd   : > { %1324 = vmatpush1.msra.mxu0 %v3597_v55  ;;  %1460 = vmatprep.subr.mxu1 %v3224_v5  ;;  %v3625_v5 = vld [vmem:[#allocation9 + $0xe8] sm:$0xff] }
  0xde   : > { %1325 = vmatprep.subr.mxu0 %v3601_v57  ;;  %1461 = vmatpush1.msra.mxu1 %v3230_v7  ;;  %v3629_v7 = vld [vmem:[#allocation9 + $0xe0] sm:$0xff] }
  0xdf   : > { %1326 = vmatpush1.msra.mxu0 %v3605_v59  ;;  %1462 = vmatprep.subr.mxu1 %v3236_v9  ;;  %v3633_v9 = vld [vmem:[#allocation9 + $0xb8] sm:$0xff] }
  0xe0   : > { %1327 = vmatprep.subr.mxu0 %v3609_v61  ;;  %1463 = vmatpush1.msra.mxu1 %v3242_v11  ;;  %v3637_v11 = vld [vmem:[#allocation9 + $0xb0] sm:$0xff] }
  0xe1   : > { %1328 = vmatpush1.msra.mxu0 %v3613_v63  ;;  %1464 = vmatprep.subr.mxu1 %v3248_v13  ;;  %v3641_v13 = vld [vmem:[#allocation9 + $0x88] sm:$0xff] }
  0xe2   : > { %1329 = vmatprep.subr.mxu0 %v3617_v1  ;;  %1465 = vmatpush1.msra.mxu1 %v3254_v15  ;;  %v3645_v15 = vld [vmem:[#allocation9 + $0x80] sm:$0xff] }
  0xe3   : > { %1330 = vmatpush1.msra.mxu0 %v3621_v3  ;;  %1466 = vmatprep.subr.mxu1 %v3260_v17  ;;  %v3649_v17 = vld [vmem:[#allocation9 + $0x58] sm:$0xff] }
  0xe4   : > { %1331 = vmatprep.subr.mxu0 %v3625_v5  ;;  %1467 = vmatpush1.msra.mxu1 %v3266_v19  ;;  %v3653_v19 = vld [vmem:[#allocation9 + $0x50] sm:$0xff] }
  0xe5   : > { %1332 = vmatpush1.msra.mxu0 %v3629_v7  ;;  %1468 = vmatprep.subr.mxu1 %v3272_v21  ;;  %v3657_v21 = vld [vmem:[#allocation9 + $0x28] sm:$0xff] }
  0xe6   : > { %1333 = vmatprep.subr.mxu0 %v3633_v9  ;;  %1469 = vmatpush1.msra.mxu1 %v3278_v23  ;;  %v3661_v23 = vld [vmem:[#allocation9 + $0x20] sm:$0xff] }
  0xe7   : > { %1334 = vmatpush1.msra.mxu0 %v3637_v11  ;;  %1470 = vmatprep.subr.mxu1 %v3284_v25  ;;  %v3665_v25 = vld [vmem:[#allocation9 + $0x5f8] sm:$0xff] }
  0xe8   : > { %1335 = vmatprep.subr.mxu0 %v3641_v13  ;;  %1471 = vmatpush1.msra.mxu1 %v3290_v27  ;;  %v3669_v27 = vld [vmem:[#allocation9 + $0x5f0] sm:$0xff] }
  0xe9   : > { %1336 = vmatpush1.msra.mxu0 %v3645_v15  ;;  %1472 = vmatprep.subr.mxu1 %v3296_v29  ;;  %v3673_v29 = vld [vmem:[#allocation9 + $0x5c8] sm:$0xff] }
  0xea   : > { %1337 = vmatprep.subr.mxu0 %v3649_v17  ;;  %1473 = vmatpush1.msra.mxu1 %v3302_v31  ;;  %v3677_v31 = vld [vmem:[#allocation9 + $0x5c0] sm:$0xff] }
  0xeb   : > { %1338 = vmatpush1.msra.mxu0 %v3653_v19  ;;  %1474 = vmatprep.subr.mxu1 %v3308_v33  ;;  %v3681_v33 = vld [vmem:[#allocation9 + $0x598] sm:$0xff] }
  0xec   : > { %1339 = vmatprep.subr.mxu0 %v3657_v21  ;;  %1475 = vmatpush1.msra.mxu1 %v3314_v35  ;;  %v3685_v35 = vld [vmem:[#allocation9 + $0x590] sm:$0xff] }
  0xed   : > { %1340 = vmatpush1.msra.mxu0 %v3661_v23  ;;  %1476 = vmatprep.subr.mxu1 %v3320_v37  ;;  %v3689_v37 = vld [vmem:[#allocation9 + $0x568] sm:$0xff] }
  0xee   : > { %1341 = vmatprep.subr.mxu0 %v3665_v25  ;;  %1477 = vmatpush1.msra.mxu1 %v3326_v51  ;;  %5186 = vst [vmem:[#allocation86_spill] sm:$0xff] %v3689_v37  ;;  %v3693_v51 = vld [vmem:[#allocation9 + $0x560] sm:$0xff] }
  0xef   : > { %1342 = vmatpush2.msra.mxu0 %v3669_v27  ;;  %1478 = vmatprep.subr.mxu1 %v3332_v30  ;;  %5187 = vst [vmem:[#allocation87_spill] sm:$0xff] %v3693_v51  ;;  %v3697_v30 = vld [vmem:[#allocation9 + $0x538] sm:$0xff] }
  0xf0   : > { %1343 = vmatprep.subr.mxu0 %v3673_v29  ;;  %1479 = vmatpush2.msra.mxu1 %v3338_v32  ;;  %5188 = vst [vmem:[#allocation88_spill] sm:$0xff] %v3697_v30  ;;  %v3701_v32 = vld [vmem:[#allocation9 + $0x530] sm:$0xff] }
  0xf1   : > { %1344 = vmatpush2.msra.mxu0 %v3677_v31  ;;  %1480 = vmatprep.subr.mxu1 %v3344_v34  ;;  %5189 = vst [vmem:[#allocation89_spill] sm:$0xff] %v3701_v32  ;;  %v3705_v34 = vld [vmem:[#allocation9 + $0x508] sm:$0xff] }
  0xf2   : > { %1345 = vmatprep.subr.mxu0 %v3681_v33  ;;  %1481 = vmatpush2.msra.mxu1 %v3350_v36  ;;  %5190 = vst [vmem:[#allocation90_spill] sm:$0xff] %v3705_v34  ;;  %v3709_v36 = vld [vmem:[#allocation9 + $0x500] sm:$0xff] }
  0xf3   : > { %1346 = vmatpush2.msra.mxu0 %v3685_v35  ;;  %1482 = vmatprep.subr.mxu1 %v3356_v38  ;;  %5191 = vst [vmem:[#allocation91_spill] sm:$0xff] %v3709_v36  ;;  %v3713_v38 = vld [vmem:[#allocation9 + $0x4d8] sm:$0xff] }
  0xf4   : > { %1347 = vmatprep.subr.mxu0 %v3689_v37  ;;  %1483 = vmatpush2.msra.mxu1 %v3362_v28  ;;  %5192 = vst [vmem:[#allocation92_spill] sm:$0xff] %v3713_v38  ;;  %v3717_v28 = vld [vmem:[#allocation9 + $0x4d0] sm:$0xff] }
  0xf5   : > { %1348 = vmatpush2.msra.mxu0 %v3693_v51  ;;  %1484 = vmatprep.subr.mxu1 %v3368_v26  ;;  %5193 = vst [vmem:[#allocation93_spill] sm:$0xff] %v3717_v28  ;;  %v3721_v26 = vld [vmem:[#allocation9 + $0x4a8] sm:$0xff] }
  0xf6   : > { %1349 = vmatprep.subr.mxu0 %v3697_v30  ;;  %1485 = vmatpush2.msra.mxu1 %v3374_v24  ;;  %5194 = vst [vmem:[#allocation94_spill] sm:$0xff] %v3721_v26  ;;  %v3725_v24 = vld [vmem:[#allocation9 + $0x4a0] sm:$0xff] }
  0xf7   : > { %1350 = vmatpush2.msra.mxu0 %v3701_v32  ;;  %1486 = vmatprep.subr.mxu1 %v3380_v22  ;;  %5195 = vst [vmem:[#allocation95_spill] sm:$0xff] %v3725_v24  ;;  %v3729_v22 = vld [vmem:[#allocation9 + $0x478] sm:$0xff] }
  0xf8   : > { %1351 = vmatprep.subr.mxu0 %v3705_v34  ;;  %1487 = vmatpush2.msra.mxu1 %v3386_v20  ;;  %5196 = vst [vmem:[#allocation96_spill] sm:$0xff] %v3729_v22  ;;  %v3733_v20 = vld [vmem:[#allocation9 + $0x470] sm:$0xff]  ;;  %v5292_v34 = vld [vmem:[#allocation79_spill] sm:$0xff] }
  0xf9   : > { %1352 = vmatpush2.msra.mxu0 %v3709_v36  ;;  %1488 = vmatprep.subr.mxu1 %v3392_v18  ;;  %5197 = vst [vmem:[#allocation97_spill] sm:$0xff] %v3733_v20  ;;  %v3737_v18 = vld [vmem:[#allocation9 + $0x448] sm:$0xff] }
  0xfa   : > { %1353 = vmatprep.subr.mxu0 %v3713_v38  ;;  %1489 = vmatpush2.msra.mxu1 %v3398_v16  ;;  %5198 = vst [vmem:[#allocation98_spill] sm:$0xff] %v3737_v18  ;;  %v3741_v16 = vld [vmem:[#allocation9 + $0x440] sm:$0xff]  ;;  %v5283_v36 = vld [vmem:[#allocation69_spill] sm:$0xff] }
  0xfb   : > { %1354 = vmatpush2.msra.mxu0 %v3717_v28  ;;  %1490 = vmatprep.subr.mxu1 %v3404_v14  ;;  %5199 = vst [vmem:[#allocation99_spill] sm:$0xff] %v3741_v16  ;;  %v3745_v14 = vld [vmem:[#allocation9 + $0x418] sm:$0xff]  ;;  %v5268_v38 = vld [vmem:[#allocation56_spill] sm:$0xff] }
  0xfc   : > { %1355 = vmatprep.subr.mxu0 %v3721_v26  ;;  %1491 = vmatpush2.msra.mxu1 %v3410_v12  ;;  %5200 = vst [vmem:[#allocation100_spill] sm:$0xff] %v3745_v14  ;;  %v3749_v12 = vld [vmem:[#allocation9 + $0x410] sm:$0xff]  ;;  %v5267_v28 = vld [vmem:[#allocation55_spill] sm:$0xff] }
  0xfd   : > { %1356 = vmatpush2.msra.mxu0 %v3725_v24  ;;  %1492 = vmatprep.subr.mxu1 %v3416_v10  ;;  %5201 = vst [vmem:[#allocation101_spill] sm:$0xff] %v3749_v12  ;;  %v3753_v10 = vld [vmem:[#allocation9 + $0x3e8] sm:$0xff] }
  0xfe   : > { %1357 = vmatprep.subr.mxu0 %v3729_v22  ;;  %1493 = vmatpush2.msra.mxu1 %v3422_v8  ;;  %5202 = vst [vmem:[#allocation102_spill] sm:$0xff] %v3753_v10  ;;  %v3757_v8 = vld [vmem:[#allocation9 + $0x3e0] sm:$0xff] }
  0xff   : > { %1358 = vmatpush2.msra.mxu0 %v3733_v20  ;;  %1494 = vmatprep.subr.mxu1 %v3428_v6  ;;  %5203 = vst [vmem:[#allocation103_spill] sm:$0xff] %v3757_v8  ;;  %v3761_v6 = vld [vmem:[#allocation9 + $0x3b8] sm:$0xff] }
 0x100   : > { %1359 = vmatprep.subr.mxu0 %v3737_v18  ;;  %1495 = vmatpush2.msra.mxu1 %v3434_v4  ;;  %5204 = vst [vmem:[#allocation104_spill] sm:$0xff] %v3761_v6  ;;  %v5205_v18 = vld [vmem:[#allocation64_spill] sm:$0xff]  ;;  %v3765_v4 = vld [vmem:[#allocation9 + $0x3b0] sm:$0xff] }
 0x101   : > { %1360 = vmatpush2.msra.mxu0 %v3741_v16  ;;  %1496 = vmatprep.subr.mxu1 %v3440_v2  ;;  %5206 = vst [vmem:[#allocation64_spill] sm:$0xff] %v3765_v4  ;;  %v5207_v16 = vld [vmem:[#allocation66_spill] sm:$0xff]  ;;  %v3769_v2 = vld [vmem:[#allocation9 + $0x388] sm:$0xff] }
 0x102   : > { %1361 = vmatprep.subr.mxu0 %v3745_v14  ;;  %1497 = vmatpush2.msra.mxu1 %v3448_v62  ;;  %5208 = vst [vmem:[#allocation66_spill] sm:$0xff] %v3769_v2  ;;  %v5209_v14 = vld [vmem:[#allocation68_spill] sm:$0xff] }
 0x103   : > { %1362 = vmatpush2.msra.mxu0 %v3749_v12  ;;  %1498 = vmatprep.subr.mxu1 %v5205_v18  ;;  %v3773_v62 = vld [vmem:[#allocation9 + $0x380] sm:$0xff]  ;;  %v5211_v12 = vld [vmem:[#allocation70_spill] sm:$0xff]  ;;  %v3777_v18 = vld [vmem:[#allocation9 + $0x358] sm:$0xff] }
 0x104   : > { %1363 = vmatprep.subr.mxu0 %v3753_v10  ;;  %1499 = vmatpush2.msra.mxu1 %v5207_v16  ;;  %5210 = vst [vmem:[#allocation68_spill] sm:$0xff] %v3773_v62  ;;  %5212 = vst [vmem:[#allocation70_spill] sm:$0xff] %v3777_v18  ;;  %v3781_v16 = vld [vmem:[#allocation9 + $0x350] sm:$0xff]  ;;  %v5247_v10 = vld [vmem:[#allocation37_spill] sm:$0xff] }
 0x105   : > { %1364 = vmatpush2.msra.mxu0 %v3757_v8  ;;  %1500 = vmatprep.subr.mxu1 %v5209_v14  ;;  %5213 = vst [vmem:[#allocation105_spill] sm:$0xff] %v3781_v16  ;;  %v5214_v8 = vld [vmem:[#allocation73_spill] sm:$0xff] }
 0x106   : > { %1365 = vmatprep.subr.mxu0 %v3761_v6  ;;  %1501 = vmatpush2.msra.mxu1 %v5211_v12  ;;  %v3785_v14 = vld [vmem:[#allocation9 + $0x328] sm:$0xff]  ;;  %v5216_v6 = vld [vmem:[#allocation75_spill] sm:$0xff]  ;;  %v3789_v12 = vld [vmem:[#allocation9 + $0x320] sm:$0xff] }
 0x107   : > { %1366 = vmatpush2.msra.mxu0 %v3765_v4  ;;  %1502 = vmatprep.subr.mxu1 %v3481_v54  ;;  %5215 = vst [vmem:[#allocation73_spill] sm:$0xff] %v3785_v14  ;;  %5217 = vst [vmem:[#allocation75_spill] sm:$0xff] %v3789_v12  ;;  %v5218_v4 = vld [vmem:[#allocation77_spill] sm:$0xff] }
 0x108   : > { %1367 = vmatprep.subr.mxu0 %v3769_v2  ;;  %1503 = vmatpush2.msra.mxu1 %v5214_v8  ;;  %v5219_v54 = vld [vmem:[#allocation85_spill] sm:$0xff]  ;;  %v5220_v8 = vld [vmem:[#allocation12_spill] sm:$0xff]  ;;  %v5244_v2 = vld [vmem:[#allocation34_spill] sm:$0xff] }
 0x109   : > { %1368 = vmatpush2.msra.mxu0 %v3773_v62  ;;  %1504 = vmatprep.subr.mxu1 %v5216_v6  ;;  %v5221_v6 = vld [vmem:[#allocation13_spill] sm:$0xff]  ;;  %v5236_v62 = vld [vmem:[#allocation27_spill] sm:$0xff] }
 0x10a   : > { %1369 = vmatprep.subr.mxu0 %v3777_v18  ;;  %1505 = vmatpush2.msra.mxu1 %v5218_v4  ;;  %v5222_v18 = vld [vmem:[#allocation82_spill] sm:$0xff] }
 0x10b   : > { %1370 = vmatpush2.msra.mxu0 %v3781_v16  ;;  %1506 = vmatprep.subr.mxu1 %v3507_v41  ;;  %v5223_v4 = vld [vmem:[#allocation14_spill] sm:$0xff]  ;;  %v5224_v41 = vld [vmem:[#allocation15_spill] sm:$0xff] }
 0x10c   : > { %1371 = vmatprep.subr.mxu0 %v3785_v14  ;;  %1507 = vmatpush2.msra.mxu1 %v3513_v49  ;;  %v5225_v14 = vld [vmem:[#allocation16_spill] sm:$0xff]  ;;  %v5226_v49 = vld [vmem:[#allocation17_spill] sm:$0xff]  ;;  %v5228_v16 = vld [vmem:[#allocation19_spill] sm:$0xff] }
 0x10d   : > { %1372 = vmatpush2.msra.mxu0 %v3789_v12  ;;  %1508 = vmatprep.subr.mxu1 %v3519_v52  ;;  %v5227_v12 = vld [vmem:[#allocation18_spill] sm:$0xff]  ;;  %v515_v52 = vlaneseq }
 0x10e   : > { %1374 = vmatmul.mubr.f32.vlgmr.msra.gmra.mxu0 %v5219_v54  ;;  %1517 = vmatprep.subr.mxu0 %v5220_v8  ;;  %v5229_v8 = vld [vmem:[#allocation20_spill] sm:$0xff] }
 0x10f   : > { %1518 = vmatpush1.msra.mxu0 %v5221_v6  ;;  %1509 = vmatpush2.msra.mxu1 %v5222_v18  ;;  %v5230_v6 = vld [vmem:[#allocation21_spill] sm:$0xff]  ;;  %v5231_v18 = vld [vmem:[#allocation22_spill] sm:$0xff] }
 0x110   : > { %1519 = vmatprep.subr.mxu0 %v5223_v4  ;;  %1588 = vmatprep.subr.mxu1 %v3538_v60  ;;  %v3812_v4 = vshrl.u32 %v515_v52, 7  ;;  %v5232_v60 = vld [vmem:[#allocation23_spill] sm:$0xff] }
 0x111   : > { %1520 = vmatpush1.msra.mxu0 %v5224_v41  ;;  %v5233_v41 = vld [vmem:[#allocation24_spill] sm:$0xff] }
 0x112   : > { %1521 = vmatprep.subr.mxu0 %v5225_v14  ;;  %v4987_v14 = vsub.s32 2, %v3812_v4 }
 0x113   : > { %1522 = vmatpush1.msra.mxu0 %v5226_v49  ;;  %v5234_v49 = vld [vmem:[#allocation25_spill] sm:$0xff] }
 0x114   : > { %1523 = vmatprep.subr.mxu0 %v5227_v12  ;;  %v5235_v12 = vld [vmem:[#allocation26_spill] sm:$0xff] }
 0x115   : > { %1524 = vmatpush1.msra.mxu0 %v5228_v16  ;;  %v513_v16 = vld [vmem:[%s4890_s4] sm:$0x7] }
 0x116   : > { %1525 = vmatprep.subr.mxu0 %v5229_v8  ;;  %v5237_v8 = vld [vmem:[#allocation28_spill] sm:$0xff]  ;;  %v3826_v52 = vrot.slane %v513_v16, %v4987_v14 }
 0x117   : > { %1526 = vmatpush1.msra.mxu0 %v5230_v6  ;;  %v5238_v6 = vld [vmem:[#allocation29_spill] sm:$0xff]  ;;  %v5246_v14 = vld [vmem:[#allocation36_spill] sm:$0xff] }
 0x118   : > { %1527 = vmatprep.subr.mxu0 %v5231_v18  ;;  %v5239_v18 = vld [vmem:[#allocation30_spill] sm:$0xff] }
 0x119   : > { %1528 = vmatpush1.msra.mxu0 %v5232_v60  ;;  %v5240_v60 = vld [vmem:[#allocation31_spill] sm:$0xff] }
 0x11a   : > { %1529 = vmatprep.subr.mxu0 %v5233_v41 }
 0x11b   : > { %1530 = vmatpush1.msra.mxu0 %v5234_v49  ;;  %v5241_v49 = vld [vmem:[#allocation32_spill] sm:$0xff] }
 0x11c   : > { %1531 = vmatprep.subr.mxu0 %v5235_v12  ;;  %v5243_v12 = vld [vmem:[#allocation33_spill] sm:$0xff] }
 0x11d   : > { %1532 = vmatpush1.msra.mxu0 %v5236_v62 }
 0x11e   : > { %1533 = vmatprep.subr.mxu0 %v5237_v8  ;;  %v5245_v8 = vld [vmem:[#allocation35_spill] sm:$0xff] }
 0x11f   : > { %1534 = vmatpush1.msra.mxu0 %v5238_v6  ;;  %v5248_v6 = vld [vmem:[#allocation38_spill] sm:$0xff] }
 0x120   : > { %1535 = vmatprep.subr.mxu0 %v5239_v18  ;;  %v5249_v18 = vld [vmem:[#allocation39_spill] sm:$0xff] }
 0x121   : > { %1536 = vmatpush1.msra.mxu0 %v5240_v60  ;;  %v5250_v60 = vld [vmem:[#allocation40_spill] sm:$0xff] }
 0x122   : > { %v2509_v41 = vpop.f32.mrf.mxu1  ;;  %1537 = vmatprep.subr.mxu0 %v5241_v49  ;;  %v5251_v49 = vld [vmem:[#allocation41_spill] sm:$0xff] }
 0x123   : > { %v3833_v62 = vadd.f32 %v2509_v41, %v3826_v52  ;;  %1538 = vmatpush1.msra.mxu0 %v5243_v12  ;;  %v5252_v41 = vld [vmem:[#allocation42_spill] sm:$0xff]  ;;  %v5254_v12 = vld [vmem:[#allocation44_spill] sm:$0xff] }
 0x124   : > { %1539 = vmatprep.subr.mxu0 %v5244_v2  ;;  %v3847_v2 = vpop.f32.mrf.mxu0 }
 0x125   : > { %5242 = vst [vmem:[#allocation77_spill] sm:$0xff] %v3833_v62  ;;  %1540 = vmatpush1.msra.mxu0 %v5245_v8  ;;  %v5253_v62 = vld [vmem:[#allocation43_spill] sm:$0xff]  ;;  %v5255_v8 = vld [vmem:[#allocation45_spill] sm:$0xff] }
 0x126   : > { %1541 = vmatprep.subr.mxu0 %v5246_v14  ;;  %v5256_v14 = vld [vmem:[#allocation46_spill] sm:$0xff] }
 0x127   : > { %1542 = vmatpush1.msra.mxu0 %v5247_v10  ;;  %v517_v10 = vsub.s32 0, %v3812_v4 }
 0x128   : > { %1543 = vmatprep.subr.mxu0 %v5248_v6  ;;  %v5257_v6 = vld [vmem:[#allocation47_spill] sm:$0xff] }
 0x129   : > { %1544 = vmatpush1.msra.mxu0 %v5249_v18  ;;  %v521_v18 = vsub.s32 1, %v3812_v4 }
 0x12a   : > { %1545 = vmatprep.subr.mxu0 %v5250_v60  ;;  %v5258_v60 = vld [vmem:[#allocation48_spill] sm:$0xff] }
 0x12b   : > { %1546 = vmatpush1.msra.mxu0 %v5251_v49  ;;  %v3855_v49 = vpop.f32.mrf.mxu0  ;;  %v3862_v22 = vrot.slane %v513_v16, %v521_v18 }
 0x12c   : > { %1547 = vmatprep.subr.mxu0 %v5252_v41  ;;  %v5259_v41 = vld [vmem:[#allocation49_spill] sm:$0xff] }
 0x12d   : > { %1548 = vmatpush1.msra.mxu0 %v5253_v62  ;;  %v3858_v62 = vrot.slane %v513_v16, %v517_v10 }
 0x12e   : > { %1549 = vmatprep.subr.mxu0 %v5254_v12  ;;  %v5260_v12 = vld [vmem:[#allocation50_spill] sm:$0xff] }
 0x12f   : > { %1550 = vmatpush2.msra.mxu0 %v5255_v8  ;;  %v5261_v8 = vld [vmem:[#allocation51_spill] sm:$0xff] }
 0x130   : > { %1551 = vmatprep.subr.mxu0 %v5256_v14 }
 0x131   : > { %1552 = vmatpush2.msra.mxu0 %v5257_v6  ;;  %v5263_v6 = vld [vmem:[#allocation52_spill] sm:$0xff] }
 0x132   : > { %1553 = vmatprep.subr.mxu0 %v5258_v60  ;;  %v5264_v60 = vld [vmem:[#allocation53_spill] sm:$0xff] }
 0x133   : > { %1554 = vmatpush2.msra.mxu0 %v5259_v41  ;;  %v5266_v41 = vld [vmem:[#allocation54_spill] sm:$0xff] }
 0x134   : > { %1555 = vmatprep.subr.mxu0 %v5260_v12 }
 0x135   : > { %v602_v20 = vpop.f32.mrf.mxu0  ;;  %1556 = vmatpush2.msra.mxu0 %v5261_v8 }
 0x136   : > { %v3865_v14 = vadd.f32 %v602_v20, %v3858_v62  ;;  %1557 = vmatprep.subr.mxu0 %v5263_v6  ;;  %v5270_v20 = vld [vmem:[#allocation57_spill] sm:$0xff]  ;;  %v5271_v6 = vld [vmem:[#allocation58_spill] sm:$0xff] }
 0x137   : > { %v604_v24 = vpop.f32.mrf.mxu0  ;;  %1558 = vmatpush2.msra.mxu0 %v5264_v60 }
 0x138   : > { %5262 = vst [vmem:[#allocation85_spill] sm:$0xff] %v3865_v14  ;;  %v3870_v26 = vadd.f32 %v604_v24, %v3862_v22  ;;  %1559 = vmatprep.subr.mxu0 %v5266_v41  ;;  %v5273_v24 = vld [vmem:[#allocation59_spill] sm:$0xff] }
 0x139   : > { %1560 = vmatpush2.msra.mxu0 %v5267_v28  ;;  %v5275_v28 = vld [vmem:[#allocation61_spill] sm:$0xff] }
 0x13a   : > { %5265 = vst [vmem:[#allocation12_spill] sm:$0xff] %v3870_v26  ;;  %v608_v12 = vpop.f32.mrf.mxu0  ;;  %1561 = vmatprep.subr.mxu0 %v5268_v38  ;;  %v5274_v26 = vld [vmem:[#allocation60_spill] sm:$0xff] }
 0x13b   : > { %v3876_v16 = vadd.f32 %v608_v12, %v3858_v62  ;;  %1562 = vmatpush2.msra.mxu0 %v5270_v20  ;;  %v3892_v12 = vld [vmem:[%s4891_s5] sm:$0x7]  ;;  %v685_v20 = vpop.f32.mrf.mxu1 }
 0x13c   : > { %v610_v8 = vpop.f32.mrf.mxu0  ;;  %1563 = vmatprep.subr.mxu0 %v5271_v6  ;;  %v5277_v6 = vld [vmem:[#allocation62_spill] sm:$0xff] }
 0x13d   : > { %5269 = vst [vmem:[#allocation13_spill] sm:$0xff] %v3876_v16  ;;  %v3881_v60 = vadd.f32 %v610_v8, %v3862_v22  ;;  %1564 = vmatpush2.msra.mxu0 %v5273_v24  ;;  %v5280_v16 = vld [vmem:[#allocation65_spill] sm:$0xff] }
 0x13e   : > { %1565 = vmatprep.subr.mxu0 %v5274_v26 }
 0x13f   : > { %5272 = vst [vmem:[#allocation82_spill] sm:$0xff] %v3881_v60  ;;  %v614_v41 = vpop.f32.mrf.mxu0  ;;  %1566 = vmatpush2.msra.mxu0 %v5275_v28  ;;  %v5278_v60 = vld [vmem:[#allocation63_spill] sm:$0xff] }
 0x140   : > { %v3887_v38 = vadd.f32 %v614_v41, %v3858_v62  ;;  %1567 = vmatprep.subr.mxu0 %v5277_v6  ;;  %v773_v41 = vrot.slane %v3892_v12, %v517_v10  ;;  %v3907_v6 = vrot.slane %v3892_v12, %v521_v18  ;;  %v5291_v18 = vld [vmem:[#allocation78_spill] sm:$0xff] }
 0x141   : > { %v616_v8 = vpop.f32.mrf.mxu0  ;;  %1568 = vmatpush2.msra.mxu0 %v5278_v60 }
 0x142   : > { %5276 = vst [vmem:[#allocation14_spill] sm:$0xff] %v3887_v38  ;;  %v3897_v24 = vadd.f32 %v616_v8, %v3862_v22  ;;  %v2512_v26 = vpop.f32.mrf.mxu1  ;;  %1569 = vmatprep.subr.mxu0 %v5280_v16  ;;  %v5282_v38 = vld [vmem:[#allocation67_spill] sm:$0xff]  ;;  %v5286_v16 = vld [vmem:[#allocation72_spill] sm:$0xff] }
 0x143   : > { %v3902_v28 = vadd.f32 %v2512_v26, %v3826_v52  ;;  %1570 = vmatpush2.msra.mxu0 %v5282_v38  ;;  %v5285_v8 = vld [vmem:[#allocation71_spill] sm:$0xff]  ;;  %v5288_v26 = vld [vmem:[#allocation74_spill] sm:$0xff]  ;;  %v5289_v38 = vld [vmem:[#allocation76_spill] sm:$0xff] }
 0x144   : > { %5279 = vst [vmem:[#allocation15_spill] sm:$0xff] %v3897_v24  ;;  %v695_v14 = vpop.f32.mrf.mxu1  ;;  %1571 = vmatprep.subr.mxu0 %v5283_v36 }
 0x145   : > { %5281 = vst [vmem:[#allocation16_spill] sm:$0xff] %v3902_v28  ;;  %v3910_v60 = vadd.f32 %v695_v14, %v3826_v52  ;;  %1572 = vmatpush2.msra.mxu0 %v5285_v8  ;;  %v5293_v14 = vld [vmem:[#allocation80_spill] sm:$0xff]  ;;  %v5294_v8 = vld [vmem:[#allocation81_spill] sm:$0xff] }
 0x146   : > { %v851_v24 = vpop.f32.mrf.mxu0  ;;  %1573 = vmatprep.subr.mxu0 %v5286_v16 }
 0x147   : > { %5284 = vst [vmem:[#allocation17_spill] sm:$0xff] %v3910_v60  ;;  %v3914_v10 = vadd.f32 %v851_v24, %v773_v41  ;;  %1574 = vmatpush2.msra.mxu0 %v5288_v26  ;;  %v5295_v60 = vld [vmem:[#allocation84_spill] sm:$0xff]  ;;  %v3926_v24 = vld [vmem:[#allocation9 + $0x2d8] sm:$0xff] }
 0x148   : > { %v853_v28 = vpop.f32.mrf.mxu0  ;;  %1575 = vmatprep.subr.mxu0 %v5289_v38  ;;  %5296 = vst [vmem:[#allocation20_spill] sm:$0xff] %v3926_v24 }
 0x149   : > { %5287 = vst [vmem:[#allocation18_spill] sm:$0xff] %v3914_v10  ;;  %v3919_v36 = vadd.f32 %v853_v28, %v3907_v6  ;;  %1576 = vmatpush2.msra.mxu0 %v5291_v18  ;;  %v597_v10 = vadd.f32 %v3847_v2, %v3858_v62 }
 0x14a   : > { %1577 = vmatprep.subr.mxu0 %v5292_v34 }
 0x14b   : > { %5290 = vst [vmem:[#allocation19_spill] sm:$0xff] %v3919_v36  ;;  %1578 = vmatpush2.msra.mxu0 %v5293_v14 }
 0x14c   : > { %1579 = vmatprep.subr.mxu0 %v5294_v8 }
 0x14d   : > { %1580 = vmatpush2.msra.mxu0 %v5295_v60 }
 0x14e   : > { %1715 = vmatprep.subr.mxu0 %v3926_v24 }
 0x17b   : > { %v857_v16 = vpop.f32.mrf.mxu0 }
 0x17c   : > { %v3929_v26 = vadd.f32 %v857_v16, %v773_v41 }
 0x17d   : > { %v859_v38 = vpop.f32.mrf.mxu0 }
 0x17e   : > { %5297 = vst [vmem:[#allocation21_spill] sm:$0xff] %v3929_v26  ;;  %v3932_v28 = vadd.f32 %v859_v38, %v3907_v6  ;;  %v599_v38 = vadd.f32 %v3855_v49, %v3862_v22 }
 0x180   : > { %5298 = vst [vmem:[#allocation22_spill] sm:$0xff] %v3932_v28  ;;  %v863_v18 = vpop.f32.mrf.mxu0 }
 0x181   : > { %v3934_v36 = vadd.f32 %v863_v18, %v773_v41 }
 0x182   : > { %v865_v34 = vpop.f32.mrf.mxu0 }
 0x183   : > { %5299 = vst [vmem:[#allocation23_spill] sm:$0xff] %v3934_v36  ;;  %v3937_v14 = vadd.f32 %v865_v34, %v3907_v6  ;;  %v3943_v36 = vpop.f32.mrf.mxu1 }
 0x184   : > { %5301 = vst [vmem:[#allocation25_spill] sm:$0xff] %v3943_v36 }
 0x185   : > { %5300 = vst [vmem:[#allocation24_spill] sm:$0xff] %v3937_v14  ;;  %v869_v8 = vpop.f32.mrf.mxu0  ;;  %v3945_v30 = vpop.f32.mrf.mxu1 }
 0x186   : > { %5302 = vst [vmem:[#allocation26_spill] sm:$0xff] %v3945_v30 }
 0x187   : > { %v871_v60 = vpop.f32.mrf.mxu0 }
 0x188   : > { %v2550_v51 = vpop.f32.mrf.mxu1 }
 0x18a   : > { %v3947_v2 = vpop.f32.mrf.mxu1 }
 0x18b   : > { %5303 = vst [vmem:[#allocation27_spill] sm:$0xff] %v3947_v2 }
 0x18d   : > { %v1233_v24 = vpop.f32.mrf.mxu0  ;;  %v1304_v22 = vpop.f32.mrf.mxu1 }
 0x18e   : > { %v1383_v32 = vadd.f32 %v1233_v24, %v597_v10 }
 0x18f   : > { %v1235_v26 = vpop.f32.mrf.mxu0 }
 0x190   : > { %v2409_v16 = vmul.f32 -1.442695, %v1383_v32  ;;  %v1390_v28 = vadd.f32 %v1235_v26, %v599_v38  ;;  %v3952_v32 = vld [vmem:[%s4893_s7] ss:$0 sm:$0xff]  ;;  %v686_v26 = vadd.f32 %v685_v20, %v3826_v52 }
 0x191   : > { %v1403_v49 = vadd.f32 %v3952_v32, %v1304_v22 }
 0x192   : > { %2596 = vpow2.f32 %v2409_v16  ;;  %v2410_v18 = vmul.f32 -1.442695, %v1390_v28  ;;  %v870_v16 = vadd.f32 %v869_v8, %v773_v41 }
 0x194   : > { %2598 = vpow2.f32 %v2410_v18 }
 0x19f   : > { %v2597_v34 = vpop.eup %2596 }
 0x1a0   : > { %v1387_v14 = vadd.f32 1.0, %v2597_v34 }
 0x1a1   : > { %v2599_v62 = vpop.eup %2598 }
 0x1a2   : > { %2600 = vrcp.f32 %v1387_v14  ;;  %v1394_v10 = vadd.f32 1.0, %v2599_v62  ;;  %v1306_v14 = vpop.f32.mrf.mxu1 }
 0x1a3   : > { %v1415_v18 = vadd.f32 %v1306_v14, %v870_v16 }
 0x1a4   : > { %2602 = vrcp.f32 %v1394_v10 }
 0x1a5   : > { %v2412_v34 = vmul.f32 -1.442695, %v1415_v18 }
 0x1af   : > { %v2601_v24 = vpop.eup %2600 }
 0x1b0   : > { %v1404_v28 = vmul.f32 %v2601_v24, %v1403_v49  ;;  %v872_v49 = vadd.f32 %v871_v60, %v3907_v6  ;;  %v3965_v24 = vld [vmem:[%s4894_s8] ss:$0 sm:$0xff] }
 0x1b1   : > { %v2603_v30 = vpop.eup %2602 }
 0x1b2   : > { %v1405_v38 = vadd.f32 %v1404_v28, %v686_v26  ;;  %v1407_v36 = vsub.f32 1.0, %v2603_v30  ;;  %v1409_v22 = vmul.f32 %v2603_v30, %v5219_v54  ;;  %v5304_v54 = vsub.s32 2, %v3812_v4  ;;  %v3990_v4 = vld [vmem:[#allocation9 + $0x2a8] sm:$0xff] }
 0x1b4   : > { %2604 = vtanh.f32 %v1405_v38 }
 0x1b5   : > { %2606 = vpow2.f32 %v2412_v34 }
 0x1c1   : > { %v2605_v2 = vpop.eup %2604 }
 0x1c2   : > { %v1408_v37 = vmul.f32 %v2605_v2, %v1407_v36  ;;  %v2607_v52 = vpop.eup %2606  ;;  %v3971_v2 = vrot.slane %v3892_v12, %v5304_v54  ;;  %v3994_v12 = vld [vmem:[#allocation9 + $0x2a0] sm:$0xff]  ;;  %v4150_v54 = vld [vmem:[#allocation9 + $0x4e8] sm:$0xff] }
 0x1c3   : > { %v1419_v20 = vadd.f32 1.0, %v2607_v52  ;;  %5312 = vst [vmem:[#allocation28_spill] sm:$0xff] %v4150_v54 }
 0x1c4   : > { %v3957_v62 = vadd.f32 %v1409_v22, %v1408_v37  ;;  %v956_v60 = vadd.f32 %v2550_v51, %v3971_v2  ;;  %v5305_v22 = vld [vmem:[#allocation83_spill] sm:$0xff]  ;;  %v3986_v51 = vld [vmem:[#allocation9 + $0x2d0] sm:$0xff] }
 0x1c5   : > { %2608 = vrcp.f32 %v1419_v20 }
 0x1c6   : > { %1443 = vst [vmem:[%s3117_s11] sm:$0xff] %v3957_v62 }
 0x1ce   : > { %v1375_v41 = vpop.f32.mrf.mxu0 }
 0x1cf   : > { %v1422_v8 = vadd.f32 %v1375_v41, %v872_v49  ;;  %v4130_v49 = vld [vmem:[#allocation9 + $0x570] sm:$0xff]  ;;  %v4134_v41 = vld [vmem:[#allocation9 + $0x548] sm:$0xff] }
 0x1d0   : > { %v1377_v36 = vpop.f32.mrf.mxu0 }
 0x1d1   : > { %v2413_v10 = vmul.f32 -1.442695, %v1422_v8  ;;  %v1435_v37 = vadd.f32 %v3965_v24, %v1377_v36  ;;  %v4138_v8 = vld [vmem:[#allocation9 + $0x540] sm:$0xff]  ;;  %v5310_v36 = vld [vmem:[#allocation90_spill] sm:$0xff] }
 0x1d2   : > { %v2609_v30 = vpop.eup %2608 }
 0x1d3   : > { %2610 = vpow2.f32 %v2413_v10  ;;  %v1436_v6 = vmul.f32 %v2609_v30, %v1435_v37  ;;  %v4142_v10 = vld [vmem:[#allocation9 + $0x518] sm:$0xff]  ;;  %v4146_v37 = vld [vmem:[#allocation9 + $0x510] sm:$0xff] }
 0x1d4   : > { %v5311_v30 = vld [vmem:[#allocation91_spill] sm:$0xff] }
 0x1d5   : > { %v1437_v14 = vadd.f32 %v1436_v6, %v956_v60  ;;  %v5313_v6 = vld [vmem:[#allocation92_spill] sm:$0xff] }
 0x1d6   : > { %v4154_v60 = vld [vmem:[#allocation9 + $0x4e0] sm:$0xff] }
 0x1d7   : > { %5314 = vst [vmem:[#allocation29_spill] sm:$0xff] %v4154_v60 }
 0x1e0   : > { %v2611_v26 = vpop.eup %2610 }
 0x1e1   : > { %v1426_v28 = vadd.f32 1.0, %v2611_v26  ;;  %v5315_v26 = vld [vmem:[#allocation93_spill] sm:$0xff] }
 0x1e3   : > { %2612 = vrcp.f32 %v1426_v28  ;;  %v4158_v28 = vld [vmem:[#allocation9 + $0x4b8] sm:$0xff] }
 0x1e4   : > { %2614 = vtanh.f32 %v1437_v14  ;;  %5316 = vst [vmem:[#allocation30_spill] sm:$0xff] %v4158_v28  ;;  %v5317_v14 = vld [vmem:[#allocation94_spill] sm:$0xff] }
 0x1f0   : > { %v2613_v16 = vpop.eup %2612 }
 0x1f1   : > { %v1439_v38 = vsub.f32 1.0, %v2613_v16  ;;  %v2615_v18 = vpop.eup %2614  ;;  %v1441_v52 = vmul.f32 %v2613_v16, %v5305_v22  ;;  %v4162_v16 = vld [vmem:[#allocation9 + $0x4b0] sm:$0xff]  ;;  %v4170_v22 = vld [vmem:[#allocation9 + $0x480] sm:$0xff] }
 0x1f2   : > { %5318 = vst [vmem:[#allocation31_spill] sm:$0xff] %v4162_v16  ;;  %5322 = vst [vmem:[#allocation33_spill] sm:$0xff] %v4170_v22 }
 0x1f3   : > { %v1440_v34 = vmul.f32 %v2615_v18, %v1439_v38  ;;  %v5319_v38 = vld [vmem:[#allocation95_spill] sm:$0xff]  ;;  %v4166_v18 = vld [vmem:[#allocation9 + $0x488] sm:$0xff] }
 0x1f4   : > { %5320 = vst [vmem:[#allocation32_spill] sm:$0xff] %v4166_v18 }
 0x1f5   : > { %v3975_v20 = vadd.f32 %v1441_v52, %v1440_v34  ;;  %v5321_v34 = vld [vmem:[#allocation96_spill] sm:$0xff]  ;;  %v5323_v52 = vld [vmem:[#allocation97_spill] sm:$0xff] }
 0x1f7   : > { %2415 = vst [vmem:[%s3122_s17 + $0x18] sm:$0xff] %v3975_v20  ;;  %1510 = vmatprep.mubr.f32.mxu1 %v3975_v20  ;;  %1581 = vmatprep.mubr.f32.mxu0 %v3975_v20 }
 0x1f8   : > { %1511 = vmatmul.mubr.f32.vlgmr.msra.gmra.mxu1 %v3957_v62  ;;  %1582 = vmatmul.mubr.f32.vlgmr.msra.gmra.mxu0 %v3957_v62 }
 0x1f9   : > { %1589 = vmatpush1.msra.mxu1 %v3542_v40  ;;  %1652 = vmatprep.mubr.f32.mxu1 %v3975_v20  ;;  %v3998_v40 = vld [vmem:[#allocation9 + $0x278] sm:$0xff] }
 0x1fa   : > { %1590 = vmatprep.subr.mxu1 %v3546_v58  ;;  %1716 = vmatpush1.msra.mxu0 %v3986_v51  ;;  %v4002_v58 = vld [vmem:[#allocation9 + $0x270] sm:$0xff] }
 0x1fb   : > { %1591 = vmatpush1.msra.mxu1 %v3549_v56  ;;  %1717 = vmatprep.subr.mxu0 %v3990_v4  ;;  %v4006_v56 = vld [vmem:[#allocation9 + $0x248] sm:$0xff] }
 0x1fc   : > { %1592 = vmatprep.subr.mxu1 %v3553_v47  ;;  %1718 = vmatpush1.msra.mxu0 %v3994_v12  ;;  %v4010_v47 = vld [vmem:[#allocation9 + $0x240] sm:$0xff] }
 0x1fd   : > { %1593 = vmatpush1.msra.mxu1 %v3557_v45  ;;  %1719 = vmatprep.subr.mxu0 %v3998_v40  ;;  %v4014_v45 = vld [vmem:[#allocation9 + $0x218] sm:$0xff] }
 0x1fe   : > { %1594 = vmatprep.subr.mxu1 %v3561_v0  ;;  %1720 = vmatpush1.msra.mxu0 %v4002_v58  ;;  %v4018_v0 = vld [vmem:[#allocation9 + $0x210] sm:$0xff] }
 0x1ff   : > { %1595 = vmatpush1.msra.mxu1 %v3565_v43  ;;  %1721 = vmatprep.subr.mxu0 %v4006_v56  ;;  %v4022_v43 = vld [vmem:[#allocation9 + $0x1e8] sm:$0xff] }
 0x200   : > { %1596 = vmatprep.subr.mxu1 %v3569_v39  ;;  %1722 = vmatpush1.msra.mxu0 %v4010_v47  ;;  %v4026_v39 = vld [vmem:[#allocation9 + $0x1e0] sm:$0xff] }
 0x201   : > { %1597 = vmatpush1.msra.mxu1 %v3573_v42  ;;  %1723 = vmatprep.subr.mxu0 %v4014_v45  ;;  %v4030_v42 = vld [vmem:[#allocation9 + $0x1b8] sm:$0xff] }
 0x202   : > { %1598 = vmatprep.subr.mxu1 %v3577_v44  ;;  %1724 = vmatpush1.msra.mxu0 %v4018_v0  ;;  %v4034_v44 = vld [vmem:[#allocation9 + $0x1b0] sm:$0xff] }
 0x203   : > { %1599 = vmatpush1.msra.mxu1 %v3581_v46  ;;  %1725 = vmatprep.subr.mxu0 %v4022_v43  ;;  %v4038_v46 = vld [vmem:[#allocation9 + $0x188] sm:$0xff] }
 0x204   : > { %1600 = vmatprep.subr.mxu1 %v3585_v48  ;;  %1726 = vmatpush1.msra.mxu0 %v4026_v39  ;;  %v4042_v48 = vld [vmem:[#allocation9 + $0x180] sm:$0xff] }
 0x205   : > { %1601 = vmatpush1.msra.mxu1 %v3589_v50  ;;  %1727 = vmatprep.subr.mxu0 %v4030_v42  ;;  %v4046_v50 = vld [vmem:[#allocation9 + $0x158] sm:$0xff] }
 0x206   : > { %1602 = vmatprep.subr.mxu1 %v3593_v53  ;;  %1728 = vmatpush1.msra.mxu0 %v4034_v44  ;;  %v4050_v53 = vld [vmem:[#allocation9 + $0x150] sm:$0xff] }
 0x207   : > { %1603 = vmatpush1.msra.mxu1 %v3597_v55  ;;  %1729 = vmatprep.subr.mxu0 %v4038_v46  ;;  %v4054_v55 = vld [vmem:[#allocation9 + $0x128] sm:$0xff] }
 0x208   : > { %1604 = vmatprep.subr.mxu1 %v3601_v57  ;;  %1730 = vmatpush1.msra.mxu0 %v4042_v48  ;;  %v4058_v57 = vld [vmem:[#allocation9 + $0x120] sm:$0xff] }
 0x209   : > { %1605 = vmatpush1.msra.mxu1 %v3605_v59  ;;  %1731 = vmatprep.subr.mxu0 %v4046_v50  ;;  %v4062_v59 = vld [vmem:[#allocation9 + $0xf8] sm:$0xff] }
 0x20a   : > { %1606 = vmatprep.subr.mxu1 %v3609_v61  ;;  %1732 = vmatpush1.msra.mxu0 %v4050_v53  ;;  %v4066_v61 = vld [vmem:[#allocation9 + $0xf0] sm:$0xff] }
 0x20b   : > { %1607 = vmatpush1.msra.mxu1 %v3613_v63  ;;  %1733 = vmatprep.subr.mxu0 %v4054_v55  ;;  %v4070_v63 = vld [vmem:[#allocation9 + $0xc8] sm:$0xff] }
 0x20c   : > { %1608 = vmatprep.subr.mxu1 %v3617_v1  ;;  %1734 = vmatpush1.msra.mxu0 %v4058_v57  ;;  %v4074_v1 = vld [vmem:[#allocation9 + $0xc0] sm:$0xff] }
 0x20d   : > { %1609 = vmatpush1.msra.mxu1 %v3621_v3  ;;  %1735 = vmatprep.subr.mxu0 %v4062_v59  ;;  %v4078_v3 = vld [vmem:[#allocation9 + $0x98] sm:$0xff] }
 0x20e   : > { %1610 = vmatprep.subr.mxu1 %v3625_v5  ;;  %1736 = vmatpush1.msra.mxu0 %v4066_v61  ;;  %v4082_v5 = vld [vmem:[#allocation9 + $0x90] sm:$0xff] }
 0x20f   : > { %1611 = vmatpush1.msra.mxu1 %v3629_v7  ;;  %1737 = vmatprep.subr.mxu0 %v4070_v63  ;;  %v4086_v7 = vld [vmem:[#allocation9 + $0x68] sm:$0xff] }
 0x210   : > { %1612 = vmatprep.subr.mxu1 %v3633_v9  ;;  %1738 = vmatpush1.msra.mxu0 %v4074_v1  ;;  %v4090_v9 = vld [vmem:[#allocation9 + $0x60] sm:$0xff] }
 0x211   : > { %1613 = vmatpush1.msra.mxu1 %v3637_v11  ;;  %1739 = vmatprep.subr.mxu0 %v4078_v3  ;;  %v4094_v11 = vld [vmem:[#allocation9 + $0x38] sm:$0xff] }
 0x212   : > { %1614 = vmatprep.subr.mxu1 %v3641_v13  ;;  %1740 = vmatpush1.msra.mxu0 %v4082_v5  ;;  %v4098_v13 = vld [vmem:[#allocation9 + $0x30] sm:$0xff] }
 0x213   : > { %1615 = vmatpush1.msra.mxu1 %v3645_v15  ;;  %1741 = vmatprep.subr.mxu0 %v4086_v7  ;;  %v4102_v15 = vld [vmem:[#allocation9 + $0x8] sm:$0xff] }
 0x214   : > { %1616 = vmatprep.subr.mxu1 %v3649_v17  ;;  %1742 = vmatpush1.msra.mxu0 %v4090_v9  ;;  %v4106_v17 = vld [vmem:[#allocation9] sm:$0xff] }
 0x215   : > { %1617 = vmatpush1.msra.mxu1 %v3653_v19  ;;  %1743 = vmatprep.subr.mxu0 %v4094_v11  ;;  %v4110_v19 = vld [vmem:[#allocation9 + $0x5d8] sm:$0xff] }
 0x216   : > { %1618 = vmatprep.subr.mxu1 %v3657_v21  ;;  %1744 = vmatpush1.msra.mxu0 %v4098_v13  ;;  %v4114_v21 = vld [vmem:[#allocation9 + $0x5d0] sm:$0xff] }
 0x217   : > { %1619 = vmatpush1.msra.mxu1 %v3661_v23  ;;  %1745 = vmatprep.subr.mxu0 %v4102_v15  ;;  %v4118_v23 = vld [vmem:[#allocation9 + $0x5a8] sm:$0xff] }
 0x218   : > { %1620 = vmatprep.subr.mxu1 %v3665_v25  ;;  %1746 = vmatpush1.msra.mxu0 %v4106_v17  ;;  %v4122_v25 = vld [vmem:[#allocation9 + $0x5a0] sm:$0xff] }
 0x219   : > { %1621 = vmatpush2.msra.mxu1 %v3669_v27  ;;  %1747 = vmatprep.subr.mxu0 %v4110_v19  ;;  %v4126_v27 = vld [vmem:[#allocation9 + $0x578] sm:$0xff] }
 0x21a   : > { %1622 = vmatprep.subr.mxu1 %v3673_v29  ;;  %1748 = vmatpush2.msra.mxu0 %v4114_v21  ;;  %v5306_v29 = vld [vmem:[#allocation86_spill] sm:$0xff] }
 0x21b   : > { %1623 = vmatpush2.msra.mxu1 %v3677_v31  ;;  %1749 = vmatprep.subr.mxu0 %v4118_v23  ;;  %v5307_v31 = vld [vmem:[#allocation87_spill] sm:$0xff] }
 0x21c   : > { %1624 = vmatprep.subr.mxu1 %v3681_v33  ;;  %1750 = vmatpush2.msra.mxu0 %v4122_v25  ;;  %v5308_v33 = vld [vmem:[#allocation88_spill] sm:$0xff] }
 0x21d   : > { %1625 = vmatpush2.msra.mxu1 %v3685_v35  ;;  %1751 = vmatprep.subr.mxu0 %v4126_v27  ;;  %v5309_v35 = vld [vmem:[#allocation89_spill] sm:$0xff] }
 0x21e   : > { %1626 = vmatprep.subr.mxu1 %v5306_v29  ;;  %1752 = vmatpush2.msra.mxu0 %v4130_v49  ;;  %v4174_v29 = vld [vmem:[#allocation9 + $0x458] sm:$0xff] }
 0x21f   : > { %1627 = vmatpush2.msra.mxu1 %v5307_v31  ;;  %1753 = vmatprep.subr.mxu0 %v4134_v41  ;;  %5324 = vst [vmem:[#allocation34_spill] sm:$0xff] %v4174_v29  ;;  %v5325_v31 = vld [vmem:[#allocation98_spill] sm:$0xff] }
 0x220   : > { %1628 = vmatprep.subr.mxu1 %v5308_v33  ;;  %1754 = vmatpush2.msra.mxu0 %v4138_v8  ;;  %v4178_v33 = vld [vmem:[#allocation9 + $0x450] sm:$0xff] }
 0x221   : > { %1629 = vmatpush2.msra.mxu1 %v5309_v35  ;;  %1755 = vmatprep.subr.mxu0 %v4142_v10  ;;  %5326 = vst [vmem:[#allocation35_spill] sm:$0xff] %v4178_v33  ;;  %v5327_v35 = vld [vmem:[#allocation99_spill] sm:$0xff] }
 0x222   : > { %1630 = vmatprep.subr.mxu1 %v5310_v36  ;;  %1756 = vmatpush2.msra.mxu0 %v4146_v37  ;;  %v4182_v36 = vld [vmem:[#allocation9 + $0x428] sm:$0xff] }
 0x223   : > { %1631 = vmatpush2.msra.mxu1 %v5311_v30  ;;  %1757 = vmatprep.subr.mxu0 %v4150_v54  ;;  %5328 = vst [vmem:[#allocation36_spill] sm:$0xff] %v4182_v36  ;;  %v5329_v30 = vld [vmem:[#allocation100_spill] sm:$0xff] }
 0x224   : > { %1632 = vmatprep.subr.mxu1 %v5313_v6  ;;  %1758 = vmatpush2.msra.mxu0 %v4154_v60  ;;  %v4186_v6 = vld [vmem:[#allocation9 + $0x420] sm:$0xff] }
 0x225   : > { %1633 = vmatpush2.msra.mxu1 %v5315_v26  ;;  %1759 = vmatprep.subr.mxu0 %v4158_v28  ;;  %5330 = vst [vmem:[#allocation37_spill] sm:$0xff] %v4186_v6  ;;  %v5331_v26 = vld [vmem:[#allocation101_spill] sm:$0xff] }
 0x226   : > { %1634 = vmatprep.subr.mxu1 %v5317_v14  ;;  %1760 = vmatpush2.msra.mxu0 %v4162_v16  ;;  %v4190_v14 = vld [vmem:[#allocation9 + $0x3f8] sm:$0xff] }
 0x227   : > { %1635 = vmatpush2.msra.mxu1 %v5319_v38  ;;  %1761 = vmatprep.subr.mxu0 %v4166_v18  ;;  %5332 = vst [vmem:[#allocation38_spill] sm:$0xff] %v4190_v14  ;;  %v5333_v38 = vld [vmem:[#allocation102_spill] sm:$0xff]  ;;  %v5422_v16 = vld [vmem:[#allocation23_spill] sm:$0xff] }
 0x228   : > { %1636 = vmatprep.subr.mxu1 %v5321_v34  ;;  %1762 = vmatpush2.msra.mxu0 %v4170_v22  ;;  %v4194_v34 = vld [vmem:[#allocation9 + $0x3f0] sm:$0xff] }
 0x229   : > { %1637 = vmatpush2.msra.mxu1 %v5323_v52  ;;  %1763 = vmatprep.subr.mxu0 %v4174_v29  ;;  %5334 = vst [vmem:[#allocation39_spill] sm:$0xff] %v4194_v34  ;;  %v5335_v52 = vld [vmem:[#allocation103_spill] sm:$0xff] }
 0x22a   : > { %1638 = vmatprep.subr.mxu1 %v5325_v31  ;;  %1764 = vmatpush2.msra.mxu0 %v4178_v33  ;;  %v4198_v31 = vld [vmem:[#allocation9 + $0x3c8] sm:$0xff] }
 0x22b   : > { %1639 = vmatpush2.msra.mxu1 %v5327_v35  ;;  %1765 = vmatprep.subr.mxu0 %v4182_v36  ;;  %5336 = vst [vmem:[#allocation40_spill] sm:$0xff] %v4198_v31  ;;  %v5337_v35 = vld [vmem:[#allocation104_spill] sm:$0xff] }
 0x22c   : > { %1640 = vmatprep.subr.mxu1 %v5329_v30  ;;  %1766 = vmatpush2.msra.mxu0 %v4186_v6  ;;  %v4202_v30 = vld [vmem:[#allocation9 + $0x3c0] sm:$0xff] }
 0x22d   : > { %1641 = vmatpush2.msra.mxu1 %v5331_v26  ;;  %1767 = vmatprep.subr.mxu0 %v4190_v14  ;;  %5338 = vst [vmem:[#allocation41_spill] sm:$0xff] %v4202_v30  ;;  %v5339_v26 = vld [vmem:[#allocation64_spill] sm:$0xff]  ;;  %v4206_v14 = vld [vmem:[#allocation9 + $0x398] sm:$0xff] }
 0x22e   : > { %1642 = vmatprep.subr.mxu1 %v5333_v38  ;;  %1768 = vmatpush2.msra.mxu0 %v4194_v34  ;;  %5340 = vst [vmem:[#allocation42_spill] sm:$0xff] %v4206_v14  ;;  %v5341_v38 = vld [vmem:[#allocation66_spill] sm:$0xff] }
 0x22f   : > { %1643 = vmatpush2.msra.mxu1 %v5335_v52  ;;  %1769 = vmatprep.subr.mxu0 %v4198_v31  ;;  %v4210_v34 = vld [vmem:[#allocation9 + $0x390] sm:$0xff]  ;;  %v5343_v52 = vld [vmem:[#allocation68_spill] sm:$0xff]  ;;  %v4214_v31 = vld [vmem:[#allocation9 + $0x368] sm:$0xff] }
 0x230   : > { %1644 = vmatprep.subr.mxu1 %v5337_v35  ;;  %1770 = vmatpush2.msra.mxu0 %v4202_v30  ;;  %5342 = vst [vmem:[#allocation43_spill] sm:$0xff] %v4210_v34  ;;  %5344 = vst [vmem:[#allocation44_spill] sm:$0xff] %v4214_v31  ;;  %v5345_v35 = vld [vmem:[#allocation70_spill] sm:$0xff]  ;;  %v4218_v30 = vld [vmem:[#allocation9 + $0x360] sm:$0xff] }
 0x231   : > { %1645 = vmatpush2.msra.mxu1 %v5339_v26  ;;  %1771 = vmatprep.subr.mxu0 %v4206_v14  ;;  %5346 = vst [vmem:[#allocation45_spill] sm:$0xff] %v4218_v30  ;;  %v5347_v26 = vld [vmem:[#allocation105_spill] sm:$0xff]  ;;  %v4222_v14 = vld [vmem:[#allocation9 + $0x338] sm:$0xff] }
 0x232   : > { %1646 = vmatprep.subr.mxu1 %v5341_v38  ;;  %1772 = vmatpush2.msra.mxu0 %v4210_v34  ;;  %5348 = vst [vmem:[#allocation46_spill] sm:$0xff] %v4222_v14  ;;  %v5349_v38 = vld [vmem:[#allocation73_spill] sm:$0xff]  ;;  %v4226_v34 = vld [vmem:[#allocation9 + $0x330] sm:$0xff] }
 0x233   : > { %1647 = vmatpush2.msra.mxu1 %v5343_v52  ;;  %1773 = vmatprep.subr.mxu0 %v4214_v31  ;;  %5350 = vst [vmem:[#allocation47_spill] sm:$0xff] %v4226_v34  ;;  %v5351_v52 = vld [vmem:[#allocation75_spill] sm:$0xff]  ;;  %v4230_v31 = vld [vmem:[#allocation9 + $0x308] sm:$0xff] }
 0x234   : > { %1648 = vmatprep.subr.mxu1 %v5345_v35  ;;  %1774 = vmatpush2.msra.mxu0 %v4218_v30  ;;  %5352 = vst [vmem:[#allocation48_spill] sm:$0xff] %v4230_v31  ;;  %v4234_v35 = vld [vmem:[#allocation9 + $0x2e8] sm:$0xff] }
 0x235   : > { %1649 = vmatpush2.msra.mxu1 %v5347_v26  ;;  %1775 = vmatprep.subr.mxu0 %v4222_v14  ;;  %5353 = vst [vmem:[#allocation49_spill] sm:$0xff] %v4234_v35  ;;  %v4237_v26 = vld [vmem:[#allocation9 + $0x2e0] sm:$0xff] }
 0x236   : > { %1650 = vmatprep.subr.mxu1 %v5349_v38  ;;  %1776 = vmatpush2.msra.mxu0 %v4226_v34  ;;  %5354 = vst [vmem:[#allocation50_spill] sm:$0xff] %v4237_v26  ;;  %v4240_v38 = vld [vmem:[#allocation9 + $0x300] sm:$0xff]  ;;  %v4243_v34 = vld [vmem:[#allocation9 + $0x2b8] sm:$0xff] }
 0x237   : > { %1651 = vmatpush2.msra.mxu1 %v5351_v52  ;;  %1777 = vmatprep.subr.mxu0 %v4230_v31  ;;  %5355 = vst [vmem:[#allocation51_spill] sm:$0xff] %v4240_v38  ;;  %5356 = vst [vmem:[#allocation52_spill] sm:$0xff] %v4243_v34  ;;  %v4246_v52 = vld [vmem:[#allocation9 + $0x2f8] sm:$0xff]  ;;  %v4249_v31 = vld [vmem:[#allocation9 + $0x2b0] sm:$0xff] }
 0x238   : > { %1653 = vmatmul.mubr.f32.vlgmr.msra.gmra.mxu1 %v3957_v62  ;;  %1786 = vmatprep.subr.mxu1 %v4234_v35  ;;  %5357 = vst [vmem:[#allocation53_spill] sm:$0xff] %v4246_v52  ;;  %5358 = vst [vmem:[#allocation54_spill] sm:$0xff] %v4249_v31  ;;  %v4252_v35 = vld [vmem:[#allocation9 + $0x288] sm:$0xff] }
 0x239   : > { %1787 = vmatpush1.msra.mxu1 %v4237_v26  ;;  %1778 = vmatpush2.msra.mxu0 %v4240_v38  ;;  %5359 = vst [vmem:[#allocation55_spill] sm:$0xff] %v4252_v35  ;;  %v4255_v26 = vld [vmem:[#allocation9 + $0x280] sm:$0xff]  ;;  %v4258_v38 = vld [vmem:[#allocation9 + $0x258] sm:$0xff] }
 0x23a   : > { %1788 = vmatprep.subr.mxu1 %v4243_v34  ;;  %1857 = vmatprep.subr.mxu0 %v4246_v52  ;;  %5360 = vst [vmem:[#allocation56_spill] sm:$0xff] %v4255_v26  ;;  %5361 = vst [vmem:[#allocation57_spill] sm:$0xff] %v4258_v38  ;;  %v4261_v34 = vld [vmem:[#allocation9 + $0x250] sm:$0xff]  ;;  %v4264_v52 = vld [vmem:[#allocation9 + $0x228] sm:$0xff] }
 0x23b   : > { %1789 = vmatpush1.msra.mxu1 %v4249_v31  ;;  %5362 = vst [vmem:[#allocation58_spill] sm:$0xff] %v4261_v34  ;;  %5363 = vst [vmem:[#allocation59_spill] sm:$0xff] %v4264_v52  ;;  %v4267_v31 = vld [vmem:[#allocation9 + $0x220] sm:$0xff] }
 0x23c   : > { %1790 = vmatprep.subr.mxu1 %v4252_v35  ;;  %5364 = vst [vmem:[#allocation60_spill] sm:$0xff] %v4267_v31  ;;  %v4270_v35 = vld [vmem:[#allocation9 + $0x1f8] sm:$0xff] }
 0x23d   : > { %1791 = vmatpush1.msra.mxu1 %v4255_v26  ;;  %5365 = vst [vmem:[#allocation61_spill] sm:$0xff] %v4270_v35  ;;  %v4273_v26 = vld [vmem:[#allocation9 + $0x1f0] sm:$0xff] }
 0x23e   : > { %1792 = vmatprep.subr.mxu1 %v4258_v38  ;;  %5366 = vst [vmem:[#allocation62_spill] sm:$0xff] %v4273_v26  ;;  %v4276_v38 = vld [vmem:[#allocation9 + $0x1c8] sm:$0xff] }
 0x23f   : > { %1793 = vmatpush1.msra.mxu1 %v4261_v34  ;;  %5367 = vst [vmem:[#allocation63_spill] sm:$0xff] %v4276_v38  ;;  %v4279_v34 = vld [vmem:[#allocation9 + $0x1c0] sm:$0xff] }
 0x240   : > { %1794 = vmatprep.subr.mxu1 %v4264_v52  ;;  %5368 = vst [vmem:[#allocation65_spill] sm:$0xff] %v4279_v34  ;;  %v4282_v52 = vld [vmem:[#allocation9 + $0x198] sm:$0xff] }
 0x241   : > { %1795 = vmatpush1.msra.mxu1 %v4267_v31  ;;  %5369 = vst [vmem:[#allocation67_spill] sm:$0xff] %v4282_v52  ;;  %v4285_v31 = vld [vmem:[#allocation9 + $0x190] sm:$0xff] }
 0x242   : > { %1796 = vmatprep.subr.mxu1 %v4270_v35  ;;  %5370 = vst [vmem:[#allocation69_spill] sm:$0xff] %v4285_v31  ;;  %v4288_v35 = vld [vmem:[#allocation9 + $0x168] sm:$0xff] }
 0x243   : > { %1797 = vmatpush1.msra.mxu1 %v4273_v26  ;;  %5371 = vst [vmem:[#allocation71_spill] sm:$0xff] %v4288_v35  ;;  %v4291_v26 = vld [vmem:[#allocation9 + $0x160] sm:$0xff] }
 0x244   : > { %1798 = vmatprep.subr.mxu1 %v4276_v38  ;;  %5372 = vst [vmem:[#allocation72_spill] sm:$0xff] %v4291_v26  ;;  %v4294_v38 = vld [vmem:[#allocation9 + $0x138] sm:$0xff] }
 0x245   : > { %1799 = vmatpush1.msra.mxu1 %v4279_v34  ;;  %5373 = vst [vmem:[#allocation74_spill] sm:$0xff] %v4294_v38  ;;  %v4297_v34 = vld [vmem:[#allocation9 + $0x130] sm:$0xff] }
 0x246   : > { %1800 = vmatprep.subr.mxu1 %v4282_v52  ;;  %5374 = vst [vmem:[#allocation76_spill] sm:$0xff] %v4297_v34  ;;  %v4300_v52 = vld [vmem:[#allocation9 + $0x108] sm:$0xff] }
 0x247   : > { %1801 = vmatpush1.msra.mxu1 %v4285_v31  ;;  %5375 = vst [vmem:[#allocation78_spill] sm:$0xff] %v4300_v52  ;;  %v4303_v31 = vld [vmem:[#allocation9 + $0x100] sm:$0xff] }
 0x248   : > { %1802 = vmatprep.subr.mxu1 %v4288_v35  ;;  %5376 = vst [vmem:[#allocation79_spill] sm:$0xff] %v4303_v31  ;;  %v4306_v35 = vld [vmem:[#allocation9 + $0xd8] sm:$0xff] }
 0x249   : > { %1803 = vmatpush1.msra.mxu1 %v4291_v26  ;;  %5377 = vst [vmem:[#allocation80_spill] sm:$0xff] %v4306_v35  ;;  %v4309_v26 = vld [vmem:[#allocation9 + $0xd0] sm:$0xff] }
 0x24a   : > { %1804 = vmatprep.subr.mxu1 %v4294_v38  ;;  %5378 = vst [vmem:[#allocation81_spill] sm:$0xff] %v4309_v26  ;;  %v4312_v38 = vld [vmem:[#allocation9 + $0xa8] sm:$0xff] }
 0x24b   : > { %1805 = vmatpush1.msra.mxu1 %v4297_v34  ;;  %5379 = vst [vmem:[#allocation84_spill] sm:$0xff] %v4312_v38  ;;  %v4315_v34 = vld [vmem:[#allocation9 + $0xa0] sm:$0xff] }
 0x24c   : > { %1806 = vmatprep.subr.mxu1 %v4300_v52  ;;  %5380 = vst [vmem:[#allocation83_spill] sm:$0xff] %v4315_v34  ;;  %v4318_v52 = vld [vmem:[#allocation9 + $0x78] sm:$0xff] }
 0x24d   : > { %1807 = vmatpush1.msra.mxu1 %v4303_v31  ;;  %5381 = vst [vmem:[#allocation86_spill] sm:$0xff] %v4318_v52  ;;  %v4321_v31 = vld [vmem:[#allocation9 + $0x70] sm:$0xff] }
 0x24e   : > { %1808 = vmatprep.subr.mxu1 %v4306_v35  ;;  %5382 = vst [vmem:[#allocation87_spill] sm:$0xff] %v4321_v31  ;;  %v4324_v35 = vld [vmem:[#allocation9 + $0x48] sm:$0xff] }
 0x24f   : > { %1809 = vmatpush1.msra.mxu1 %v4309_v26  ;;  %5383 = vst [vmem:[#allocation88_spill] sm:$0xff] %v4324_v35  ;;  %v4327_v26 = vld [vmem:[#allocation9 + $0x40] sm:$0xff] }
 0x250   : > { %1810 = vmatprep.subr.mxu1 %v4312_v38  ;;  %5384 = vst [vmem:[#allocation89_spill] sm:$0xff] %v4327_v26  ;;  %v4330_v38 = vld [vmem:[#allocation9 + $0x18] sm:$0xff] }
 0x251   : > { %1811 = vmatpush1.msra.mxu1 %v4315_v34  ;;  %5385 = vst [vmem:[#allocation90_spill] sm:$0xff] %v4330_v38  ;;  %v4333_v34 = vld [vmem:[#allocation9 + $0x10] sm:$0xff] }
 0x252   : > { %1812 = vmatprep.subr.mxu1 %v4318_v52  ;;  %5386 = vst [vmem:[#allocation91_spill] sm:$0xff] %v4333_v34  ;;  %v4336_v52 = vld [vmem:[#allocation9 + $0x5e8] sm:$0xff] }
 0x253   : > { %1813 = vmatpush1.msra.mxu1 %v4321_v31  ;;  %5387 = vst [vmem:[#allocation92_spill] sm:$0xff] %v4336_v52  ;;  %v4339_v31 = vld [vmem:[#allocation9 + $0x5e0] sm:$0xff] }
 0x254   : > { %1814 = vmatprep.subr.mxu1 %v4324_v35  ;;  %5388 = vst [vmem:[#allocation93_spill] sm:$0xff] %v4339_v31  ;;  %v4342_v35 = vld [vmem:[#allocation9 + $0x5b8] sm:$0xff] }
 0x255   : > { %1815 = vmatpush1.msra.mxu1 %v4327_v26  ;;  %5389 = vst [vmem:[#allocation94_spill] sm:$0xff] %v4342_v35  ;;  %v4345_v26 = vld [vmem:[#allocation9 + $0x5b0] sm:$0xff] }
 0x256   : > { %1816 = vmatprep.subr.mxu1 %v4330_v38  ;;  %5390 = vst [vmem:[#allocation95_spill] sm:$0xff] %v4345_v26  ;;  %v4348_v38 = vld [vmem:[#allocation9 + $0x588] sm:$0xff] }
 0x257   : > { %1817 = vmatpush1.msra.mxu1 %v4333_v34  ;;  %5391 = vst [vmem:[#allocation96_spill] sm:$0xff] %v4348_v38  ;;  %v4351_v34 = vld [vmem:[#allocation9 + $0x580] sm:$0xff] }
 0x258   : > { %1818 = vmatprep.subr.mxu1 %v4336_v52  ;;  %5392 = vst [vmem:[#allocation97_spill] sm:$0xff] %v4351_v34  ;;  %v4354_v52 = vld [vmem:[#allocation9 + $0x558] sm:$0xff] }
 0x259   : > { %1819 = vmatpush2.msra.mxu1 %v4339_v31  ;;  %5393 = vst [vmem:[#allocation98_spill] sm:$0xff] %v4354_v52  ;;  %v4357_v31 = vld [vmem:[#allocation9 + $0x550] sm:$0xff] }
 0x25a   : > { %1820 = vmatprep.subr.mxu1 %v4342_v35  ;;  %5394 = vst [vmem:[#allocation99_spill] sm:$0xff] %v4357_v31  ;;  %v4360_v35 = vld [vmem:[#allocation9 + $0x528] sm:$0xff] }
 0x25b   : > { %1821 = vmatpush2.msra.mxu1 %v4345_v26  ;;  %5395 = vst [vmem:[#allocation100_spill] sm:$0xff] %v4360_v35  ;;  %v4363_v26 = vld [vmem:[#allocation9 + $0x520] sm:$0xff] }
 0x25c   : > { %1822 = vmatprep.subr.mxu1 %v4348_v38  ;;  %5396 = vst [vmem:[#allocation101_spill] sm:$0xff] %v4363_v26  ;;  %v4366_v38 = vld [vmem:[#allocation9 + $0x4f8] sm:$0xff] }
 0x25d   : > { %1823 = vmatpush2.msra.mxu1 %v4351_v34  ;;  %5397 = vst [vmem:[#allocation102_spill] sm:$0xff] %v4366_v38  ;;  %v4369_v34 = vld [vmem:[#allocation9 + $0x4f0] sm:$0xff] }
 0x25e   : > { %1824 = vmatprep.subr.mxu1 %v4354_v52  ;;  %5398 = vst [vmem:[#allocation103_spill] sm:$0xff] %v4369_v34  ;;  %v4372_v52 = vld [vmem:[#allocation9 + $0x4c8] sm:$0xff] }
 0x25f   : > { %1825 = vmatpush2.msra.mxu1 %v4357_v31  ;;  %5399 = vst [vmem:[#allocation104_spill] sm:$0xff] %v4372_v52  ;;  %v4375_v31 = vld [vmem:[#allocation9 + $0x4c0] sm:$0xff] }
 0x260   : > { %1826 = vmatprep.subr.mxu1 %v4360_v35  ;;  %5400 = vst [vmem:[#allocation64_spill] sm:$0xff] %v4375_v31  ;;  %v4378_v35 = vld [vmem:[#allocation9 + $0x498] sm:$0xff] }
 0x261   : > { %1827 = vmatpush2.msra.mxu1 %v4363_v26  ;;  %5401 = vst [vmem:[#allocation66_spill] sm:$0xff] %v4378_v35  ;;  %v4381_v26 = vld [vmem:[#allocation9 + $0x490] sm:$0xff] }
 0x262   : > { %1828 = vmatprep.subr.mxu1 %v4366_v38  ;;  %5402 = vst [vmem:[#allocation68_spill] sm:$0xff] %v4381_v26  ;;  %v4384_v38 = vld [vmem:[#allocation9 + $0x468] sm:$0xff] }
 0x263   : > { %1829 = vmatpush2.msra.mxu1 %v4369_v34  ;;  %5403 = vst [vmem:[#allocation70_spill] sm:$0xff] %v4384_v38  ;;  %v4387_v34 = vld [vmem:[#allocation9 + $0x460] sm:$0xff] }
 0x264   : > { %1830 = vmatprep.subr.mxu1 %v4372_v52  ;;  %5404 = vst [vmem:[#allocation105_spill] sm:$0xff] %v4387_v34  ;;  %v4390_v52 = vld [vmem:[#allocation9 + $0x438] sm:$0xff] }
 0x265   : > { %1831 = vmatpush2.msra.mxu1 %v4375_v31  ;;  %5405 = vst [vmem:[#allocation73_spill] sm:$0xff] %v4390_v52  ;;  %v4393_v31 = vld [vmem:[#allocation9 + $0x430] sm:$0xff] }
 0x266   : > { %1832 = vmatprep.subr.mxu1 %v4378_v35  ;;  %5406 = vst [vmem:[#allocation75_spill] sm:$0xff] %v4393_v31  ;;  %v4396_v35 = vld [vmem:[#allocation9 + $0x408] sm:$0xff] }
 0x267   : > { %1833 = vmatpush2.msra.mxu1 %v4381_v26  ;;  %5407 = vst [vmem:[#allocation106_spill] sm:$0xff] %v4396_v35  ;;  %v4399_v26 = vld [vmem:[#allocation9 + $0x400] sm:$0xff] }
 0x268   : > { %1834 = vmatprep.subr.mxu1 %v4384_v38  ;;  %5408 = vst [vmem:[#allocation107_spill] sm:$0xff] %v4399_v26  ;;  %v4402_v38 = vld [vmem:[#allocation9 + $0x3d8] sm:$0xff] }
 0x269   : > { %1835 = vmatpush2.msra.mxu1 %v4387_v34  ;;  %5409 = vst [vmem:[#allocation108_spill] sm:$0xff] %v4402_v38  ;;  %v4405_v34 = vld [vmem:[#allocation9 + $0x3d0] sm:$0xff] }
 0x26a   : > { %1836 = vmatprep.subr.mxu1 %v4390_v52  ;;  %5410 = vst [vmem:[#allocation109_spill] sm:$0xff] %v4405_v34  ;;  %v4408_v52 = vld [vmem:[#allocation9 + $0x3a8] sm:$0xff] }
 0x26b   : > { %1837 = vmatpush2.msra.mxu1 %v4393_v31  ;;  %5411 = vst [vmem:[#allocation110_spill] sm:$0xff] %v4408_v52  ;;  %v4411_v31 = vld [vmem:[#allocation9 + $0x3a0] sm:$0xff] }
 0x26c   : > { %1838 = vmatprep.subr.mxu1 %v4396_v35  ;;  %5412 = vst [vmem:[#allocation111_spill] sm:$0xff] %v4411_v31  ;;  %v4414_v35 = vld [vmem:[#allocation9 + $0x378] sm:$0xff] }
 0x26d   : > { %1839 = vmatpush2.msra.mxu1 %v4399_v26  ;;  %5413 = vst [vmem:[#allocation112_spill] sm:$0xff] %v4414_v35  ;;  %v4417_v26 = vld [vmem:[#allocation9 + $0x370] sm:$0xff] }
 0x26e   : > { %1840 = vmatprep.subr.mxu1 %v4402_v38  ;;  %5414 = vst [vmem:[#allocation113_spill] sm:$0xff] %v4417_v26  ;;  %v4420_v38 = vld [vmem:[#allocation9 + $0x348] sm:$0xff] }
 0x26f   : > { %1841 = vmatpush2.msra.mxu1 %v4405_v34  ;;  %5415 = vst [vmem:[#allocation114_spill] sm:$0xff] %v4420_v38  ;;  %v4423_v34 = vld [vmem:[#allocation9 + $0x340] sm:$0xff] }
 0x270   : > { %1842 = vmatprep.subr.mxu1 %v4408_v52  ;;  %5416 = vst [vmem:[#allocation115_spill] sm:$0xff] %v4423_v34  ;;  %v4426_v52 = vld [vmem:[#allocation9 + $0x318] sm:$0xff] }
 0x271   : > { %1843 = vmatpush2.msra.mxu1 %v4411_v31  ;;  %5417 = vst [vmem:[#allocation116_spill] sm:$0xff] %v4426_v52  ;;  %v4429_v31 = vld [vmem:[#allocation9 + $0x310] sm:$0xff] }
 0x272   : > { %1844 = vmatprep.subr.mxu1 %v4414_v35  ;;  %5418 = vst [vmem:[#allocation117_spill] sm:$0xff] %v4429_v31  ;;  %v5419_v35 = vld [vmem:[#allocation20_spill] sm:$0xff] }
 0x273   : > { %1845 = vmatpush2.msra.mxu1 %v4417_v26  ;;  %v5420_v26 = vld [vmem:[#allocation85_spill] sm:$0xff] }
 0x274   : > { %1846 = vmatprep.subr.mxu1 %v4420_v38  ;;  %v5421_v38 = vld [vmem:[#allocation12_spill] sm:$0xff] }
 0x275   : > { %1847 = vmatpush2.msra.mxu1 %v4423_v34 }
 0x276   : > { %1848 = vmatprep.subr.mxu1 %v4426_v52 }
 0x277   : > { %1849 = vmatpush2.msra.mxu1 %v4429_v31 }
 0x278   : > { %1984 = vmatprep.subr.mxu1 %v5419_v35 }
 0x2b8   : > { %v1512_v14 = vpop.f32.mrf.mxu1  ;;  %v1583_v18 = vpop.f32.mrf.mxu0 }
 0x2b9   : > { %v1663_v30 = vadd.f32 %v1512_v14, %v5420_v26  ;;  %v1677_v54 = vadd.f32 %v3952_v32, %v1583_v18 }
 0x2ba   : > { %v1514_v36 = vpop.f32.mrf.mxu1  ;;  %v1585_v52 = vpop.f32.mrf.mxu0 }
 0x2bb   : > { %v2416_v6 = vmul.f32 -1.442695, %v1663_v30  ;;  %v1670_v33 = vadd.f32 %v1514_v36, %v5421_v38  ;;  %v1689_v28 = vadd.f32 %v1585_v52, %v5422_v16  ;;  %v5423_v36 = vld [vmem:[#allocation77_spill] sm:$0xff] }
 0x2bd   : > { %2616 = vpow2.f32 %v2416_v6  ;;  %v2417_v29 = vmul.f32 -1.442695, %v1670_v33  ;;  %v2418_v60 = vmul.f32 -1.442695, %v1689_v28 }
 0x2bf   : > { %2618 = vpow2.f32 %v2417_v29 }
 0x2ca   : > { %v2617_v34 = vpop.eup %2616 }
 0x2cb   : > { %v1667_v22 = vadd.f32 1.0, %v2617_v34 }
 0x2cc   : > { %v2619_v31 = vpop.eup %2618 }
 0x2cd   : > { %2620 = vrcp.f32 %v1667_v22  ;;  %v1674_v35 = vadd.f32 1.0, %v2619_v31 }
 0x2ce   : > { %2622 = vpow2.f32 %v2418_v60  ;;  %v5424_v60 = vld [vmem:[#allocation24_spill] sm:$0xff] }
 0x2cf   : > { %2624 = vrcp.f32 %v1674_v35 }
 0x2da   : > { %v2621_v14 = vpop.eup %2620 }
 0x2db   : > { %v1678_v6 = vmul.f32 %v2621_v14, %v1677_v54  ;;  %v2623_v29 = vpop.eup %2622  ;;  %v5425_v14 = vld [vmem:[#allocation27_spill] sm:$0xff] }
 0x2dc   : > { %v2625_v34 = vpop.eup %2624  ;;  %v1693_v30 = vadd.f32 1.0, %v2623_v29 }
 0x2dd   : > { %v1679_v33 = vadd.f32 %v1678_v6, %v5423_v36  ;;  %v1681_v22 = vsub.f32 1.0, %v2625_v34  ;;  %v1683_v16 = vmul.f32 %v2625_v34, %v3957_v62  ;;  %v951_v6 = vadd.f32 %v5425_v14, %v3971_v2  ;;  %v4636_v14 = vld [vmem:[#allocation9 + $0x4a8] sm:$0xff] }
 0x2de   : > { %5431 = vst [vmem:[#allocation12_spill] sm:$0xff] %v4636_v14 }
 0x2df   : > { %2626 = vtanh.f32 %v1679_v33 }
 0x2e0   : > { %2628 = vrcp.f32 %v1693_v30 }
 0x2ec   : > { %v2627_v26 = vpop.eup %2626 }
 0x2ed   : > { %v1682_v38 = vmul.f32 %v2627_v26, %v1681_v22  ;;  %v2629_v35 = vpop.eup %2628 }
 0x2ef   : > { %v4439_v28 = vadd.f32 %v1683_v16, %v1682_v38 }
 0x2f1   : > { %2420 = vst [vmem:[%s3117_s11 + $0x8] sm:$0xff] %v4439_v28 }
 0x2f8   : > { %v1654_v32 = vpop.f32.mrf.mxu1 }
 0x2f9   : > { %v1696_v54 = vadd.f32 %v1654_v32, %v5424_v60  ;;  %v4456_v32 = vld [vmem:[#allocation9 + $0x2f0] sm:$0xff]  ;;  %v4460_v60 = vld [vmem:[#allocation9 + $0x2c8] sm:$0xff] }
 0x2fa   : > { %v1656_v18 = vpop.f32.mrf.mxu1 }
 0x2fb   : > { %v2419_v31 = vmul.f32 -1.442695, %v1696_v54  ;;  %v1703_v52 = vadd.f32 %v3965_v24, %v1656_v18  ;;  %v4468_v54 = vld [vmem:[#allocation9 + $0x298] sm:$0xff]  ;;  %v4472_v18 = vld [vmem:[#allocation9 + $0x290] sm:$0xff] }
 0x2fd   : > { %2630 = vpow2.f32 %v2419_v31  ;;  %v1704_v36 = vmul.f32 %v2629_v35, %v1703_v52  ;;  %v4476_v31 = vld [vmem:[#allocation9 + $0x268] sm:$0xff]  ;;  %v4628_v52 = vld [vmem:[#allocation9 + $0x4d8] sm:$0xff]  ;;  %v4632_v35 = vld [vmem:[#allocation9 + $0x4d0] sm:$0xff] }
 0x2fe   : > { %5427 = vst [vmem:[#allocation20_spill] sm:$0xff] %v4628_v52  ;;  %5429 = vst [vmem:[#allocation85_spill] sm:$0xff] %v4632_v35 }
 0x2ff   : > { %v1705_v62 = vadd.f32 %v1704_v36, %v951_v6  ;;  %v4640_v6 = vld [vmem:[#allocation9 + $0x4a0] sm:$0xff] }
 0x300   : > { %5433 = vst [vmem:[#allocation23_spill] sm:$0xff] %v4640_v6  ;;  %v5434_v36 = vld [vmem:[#allocation32_spill] sm:$0xff] }
 0x30a   : > { %v2631_v33 = vpop.eup %2630 }
 0x30b   : > { %v1700_v29 = vadd.f32 1.0, %v2631_v33  ;;  %v5436_v33 = vld [vmem:[#allocation33_spill] sm:$0xff] }
 0x30d   : > { %2632 = vrcp.f32 %v1700_v29  ;;  %v4648_v29 = vld [vmem:[#allocation9 + $0x470] sm:$0xff] }
 0x30e   : > { %2634 = vtanh.f32 %v1705_v62  ;;  %v4644_v62 = vld [vmem:[#allocation9 + $0x478] sm:$0xff]  ;;  %5437 = vst [vmem:[#allocation24_spill] sm:$0xff] %v4648_v29 }
 0x30f   : > { %5435 = vst [vmem:[#allocation77_spill] sm:$0xff] %v4644_v62 }
 0x31a   : > { %v2633_v34 = vpop.eup %2632 }
 0x31b   : > { %v1707_v30 = vsub.f32 1.0, %v2633_v34  ;;  %v2635_v22 = vpop.eup %2634  ;;  %v1709_v38 = vmul.f32 %v2633_v34, %v3975_v20  ;;  %v4464_v20 = vld [vmem:[#allocation9 + $0x2c0] sm:$0xff]  ;;  %v5438_v34 = vld [vmem:[#allocation34_spill] sm:$0xff] }
 0x31d   : > { %v1708_v26 = vmul.f32 %v2635_v22, %v1707_v30  ;;  %v4652_v30 = vld [vmem:[#allocation9 + $0x448] sm:$0xff]  ;;  %v5440_v22 = vld [vmem:[#allocation35_spill] sm:$0xff] }
 0x31e   : > { %5439 = vst [vmem:[#allocation27_spill] sm:$0xff] %v4652_v30 }
 0x31f   : > { %v4448_v16 = vadd.f32 %v1709_v38, %v1708_v26  ;;  %v4656_v26 = vld [vmem:[#allocation9 + $0x440] sm:$0xff] }
 0x320   : > { %v5442_v38 = vld [vmem:[#allocation36_spill] sm:$0xff] }
 0x321   : > { %2421 = vst [vmem:[%s3122_s17 + $0x10] sm:$0xff] %v4448_v16  ;;  %1779 = vmatprep.mubr.f32.mxu0 %v4448_v16  ;;  %1850 = vmatprep.mubr.f32.mxu1 %v4448_v16 }
 0x322   : > { %1780 = vmatmul.mubr.f32.vlgmr.msra.gmra.mxu0 %v4439_v28  ;;  %1851 = vmatmul.mubr.f32.vlgmr.msra.gmra.mxu1 %v4439_v28 }
 0x323   : > { %1858 = vmatpush1.msra.mxu0 %v4456_v32  ;;  %1921 = vmatprep.mubr.f32.mxu0 %v4448_v16 }
 0x324   : > { %1859 = vmatprep.subr.mxu0 %v4460_v60  ;;  %1985 = vmatpush1.msra.mxu1 %v3986_v51  ;;  %v4480_v51 = vld [vmem:[#allocation9 + $0x260] sm:$0xff] }
 0x325   : > { %1860 = vmatpush1.msra.mxu0 %v4464_v20  ;;  %1986 = vmatprep.subr.mxu1 %v3990_v4  ;;  %v4484_v4 = vld [vmem:[#allocation9 + $0x238] sm:$0xff] }
 0x326   : > { %1861 = vmatprep.subr.mxu0 %v4468_v54  ;;  %1987 = vmatpush1.msra.mxu1 %v3994_v12  ;;  %v4488_v12 = vld [vmem:[#allocation9 + $0x230] sm:$0xff] }
 0x327   : > { %1862 = vmatpush1.msra.mxu0 %v4472_v18  ;;  %1988 = vmatprep.subr.mxu1 %v3998_v40  ;;  %v4492_v40 = vld [vmem:[#allocation9 + $0x208] sm:$0xff] }
 0x328   : > { %1863 = vmatprep.subr.mxu0 %v4476_v31  ;;  %1989 = vmatpush1.msra.mxu1 %v4002_v58  ;;  %v4496_v58 = vld [vmem:[#allocation9 + $0x200] sm:$0xff] }
 0x329   : > { %1864 = vmatpush1.msra.mxu0 %v4480_v51  ;;  %1990 = vmatprep.subr.mxu1 %v4006_v56  ;;  %v4500_v56 = vld [vmem:[#allocation9 + $0x1d8] sm:$0xff] }
 0x32a   : > { %1865 = vmatprep.subr.mxu0 %v4484_v4  ;;  %1991 = vmatpush1.msra.mxu1 %v4010_v47  ;;  %v4504_v47 = vld [vmem:[#allocation9 + $0x1d0] sm:$0xff] }
 0x32b   : > { %1866 = vmatpush1.msra.mxu0 %v4488_v12  ;;  %1992 = vmatprep.subr.mxu1 %v4014_v45  ;;  %v4508_v45 = vld [vmem:[#allocation9 + $0x1a8] sm:$0xff] }
 0x32c   : > { %1867 = vmatprep.subr.mxu0 %v4492_v40  ;;  %1993 = vmatpush1.msra.mxu1 %v4018_v0  ;;  %v4512_v0 = vld [vmem:[#allocation9 + $0x1a0] sm:$0xff] }
 0x32d   : > { %1868 = vmatpush1.msra.mxu0 %v4496_v58  ;;  %1994 = vmatprep.subr.mxu1 %v4022_v43  ;;  %v4516_v43 = vld [vmem:[#allocation9 + $0x178] sm:$0xff] }
 0x32e   : > { %1869 = vmatprep.subr.mxu0 %v4500_v56  ;;  %1995 = vmatpush1.msra.mxu1 %v4026_v39  ;;  %v4520_v39 = vld [vmem:[#allocation9 + $0x170] sm:$0xff] }
 0x32f   : > { %1870 = vmatpush1.msra.mxu0 %v4504_v47  ;;  %1996 = vmatprep.subr.mxu1 %v4030_v42  ;;  %v4524_v42 = vld [vmem:[#allocation9 + $0x148] sm:$0xff] }
 0x330   : > { %1871 = vmatprep.subr.mxu0 %v4508_v45  ;;  %1997 = vmatpush1.msra.mxu1 %v4034_v44  ;;  %v4528_v44 = vld [vmem:[#allocation9 + $0x140] sm:$0xff] }
 0x331   : > { %1872 = vmatpush1.msra.mxu0 %v4512_v0  ;;  %1998 = vmatprep.subr.mxu1 %v4038_v46  ;;  %v4532_v46 = vld [vmem:[#allocation9 + $0x118] sm:$0xff] }
 0x332   : > { %1873 = vmatprep.subr.mxu0 %v4516_v43  ;;  %1999 = vmatpush1.msra.mxu1 %v4042_v48  ;;  %v4536_v48 = vld [vmem:[#allocation9 + $0x110] sm:$0xff] }
 0x333   : > { %1874 = vmatpush1.msra.mxu0 %v4520_v39  ;;  %2000 = vmatprep.subr.mxu1 %v4046_v50  ;;  %v4540_v50 = vld [vmem:[#allocation9 + $0xe8] sm:$0xff] }
 0x334   : > { %1875 = vmatprep.subr.mxu0 %v4524_v42  ;;  %2001 = vmatpush1.msra.mxu1 %v4050_v53  ;;  %v4544_v53 = vld [vmem:[#allocation9 + $0xe0] sm:$0xff] }
 0x335   : > { %1876 = vmatpush1.msra.mxu0 %v4528_v44  ;;  %2002 = vmatprep.subr.mxu1 %v4054_v55  ;;  %v4548_v55 = vld [vmem:[#allocation9 + $0xb8] sm:$0xff] }
 0x336   : > { %1877 = vmatprep.subr.mxu0 %v4532_v46  ;;  %2003 = vmatpush1.msra.mxu1 %v4058_v57  ;;  %v4552_v57 = vld [vmem:[#allocation9 + $0xb0] sm:$0xff] }
 0x337   : > { %1878 = vmatpush1.msra.mxu0 %v4536_v48  ;;  %2004 = vmatprep.subr.mxu1 %v4062_v59  ;;  %v4556_v59 = vld [vmem:[#allocation9 + $0x88] sm:$0xff] }
 0x338   : > { %1879 = vmatprep.subr.mxu0 %v4540_v50  ;;  %2005 = vmatpush1.msra.mxu1 %v4066_v61  ;;  %v4560_v61 = vld [vmem:[#allocation9 + $0x80] sm:$0xff] }
 0x339   : > { %1880 = vmatpush1.msra.mxu0 %v4544_v53  ;;  %2006 = vmatprep.subr.mxu1 %v4070_v63  ;;  %v4564_v63 = vld [vmem:[#allocation9 + $0x58] sm:$0xff] }
 0x33a   : > { %1881 = vmatprep.subr.mxu0 %v4548_v55  ;;  %2007 = vmatpush1.msra.mxu1 %v4074_v1  ;;  %v4568_v1 = vld [vmem:[#allocation9 + $0x50] sm:$0xff] }
 0x33b   : > { %1882 = vmatpush1.msra.mxu0 %v4552_v57  ;;  %2008 = vmatprep.subr.mxu1 %v4078_v3  ;;  %v4572_v3 = vld [vmem:[#allocation9 + $0x28] sm:$0xff] }
 0x33c   : > { %1883 = vmatprep.subr.mxu0 %v4556_v59  ;;  %2009 = vmatpush1.msra.mxu1 %v4082_v5  ;;  %v4576_v5 = vld [vmem:[#allocation9 + $0x20] sm:$0xff] }
 0x33d   : > { %1884 = vmatpush1.msra.mxu0 %v4560_v61  ;;  %2010 = vmatprep.subr.mxu1 %v4086_v7  ;;  %v4580_v7 = vld [vmem:[#allocation9 + $0x5f8] sm:$0xff] }
 0x33e   : > { %1885 = vmatprep.subr.mxu0 %v4564_v63  ;;  %2011 = vmatpush1.msra.mxu1 %v4090_v9  ;;  %v4584_v9 = vld [vmem:[#allocation9 + $0x5f0] sm:$0xff] }
 0x33f   : > { %1886 = vmatpush1.msra.mxu0 %v4568_v1  ;;  %2012 = vmatprep.subr.mxu1 %v4094_v11  ;;  %v4588_v11 = vld [vmem:[#allocation9 + $0x5c8] sm:$0xff] }
 0x340   : > { %1887 = vmatprep.subr.mxu0 %v4572_v3  ;;  %2013 = vmatpush1.msra.mxu1 %v4098_v13  ;;  %v4592_v13 = vld [vmem:[#allocation9 + $0x5c0] sm:$0xff] }
 0x341   : > { %1888 = vmatpush1.msra.mxu0 %v4576_v5  ;;  %2014 = vmatprep.subr.mxu1 %v4102_v15  ;;  %v4596_v15 = vld [vmem:[#allocation9 + $0x598] sm:$0xff] }
 0x342   : > { %1889 = vmatprep.subr.mxu0 %v4580_v7  ;;  %2015 = vmatpush1.msra.mxu1 %v4106_v17  ;;  %v4600_v17 = vld [vmem:[#allocation9 + $0x590] sm:$0xff] }
 0x343   : > { %1890 = vmatpush2.msra.mxu0 %v4584_v9  ;;  %2016 = vmatprep.subr.mxu1 %v4110_v19  ;;  %v4604_v19 = vld [vmem:[#allocation9 + $0x568] sm:$0xff] }
 0x344   : > { %1891 = vmatprep.subr.mxu0 %v4588_v11  ;;  %2017 = vmatpush2.msra.mxu1 %v4114_v21  ;;  %v4608_v21 = vld [vmem:[#allocation9 + $0x560] sm:$0xff] }
 0x345   : > { %1892 = vmatpush2.msra.mxu0 %v4592_v13  ;;  %2018 = vmatprep.subr.mxu1 %v4118_v23  ;;  %v4612_v23 = vld [vmem:[#allocation9 + $0x538] sm:$0xff] }
 0x346   : > { %1893 = vmatprep.subr.mxu0 %v4596_v15  ;;  %2019 = vmatpush2.msra.mxu1 %v4122_v25  ;;  %v4616_v25 = vld [vmem:[#allocation9 + $0x530] sm:$0xff] }
 0x347   : > { %1894 = vmatpush2.msra.mxu0 %v4600_v17  ;;  %2020 = vmatprep.subr.mxu1 %v4126_v27  ;;  %v4620_v27 = vld [vmem:[#allocation9 + $0x508] sm:$0xff] }
 0x348   : > { %1895 = vmatprep.subr.mxu0 %v4604_v19  ;;  %2021 = vmatpush2.msra.mxu1 %v4130_v49  ;;  %v4624_v49 = vld [vmem:[#allocation9 + $0x500] sm:$0xff] }
 0x349   : > { %1896 = vmatpush2.msra.mxu0 %v4608_v21  ;;  %2022 = vmatprep.subr.mxu1 %v4134_v41  ;;  %v5426_v41 = vld [vmem:[#allocation28_spill] sm:$0xff] }
 0x34a   : > { %1897 = vmatprep.subr.mxu0 %v4612_v23  ;;  %2023 = vmatpush2.msra.mxu1 %v4138_v8  ;;  %v5428_v8 = vld [vmem:[#allocation29_spill] sm:$0xff]  ;;  %5441 = vst [vmem:[#allocation28_spill] sm:$0xff] %v4656_v26 }
 0x34b   : > { %1898 = vmatpush2.msra.mxu0 %v4616_v25  ;;  %2024 = vmatprep.subr.mxu1 %v4142_v10  ;;  %v5430_v10 = vld [vmem:[#allocation30_spill] sm:$0xff] }
 0x34c   : > { %1899 = vmatprep.subr.mxu0 %v4620_v27  ;;  %2025 = vmatpush2.msra.mxu1 %v4146_v37  ;;  %v5432_v37 = vld [vmem:[#allocation31_spill] sm:$0xff] }
 0x34d   : > { %1900 = vmatpush2.msra.mxu0 %v4624_v49  ;;  %2026 = vmatprep.subr.mxu1 %v5426_v41  ;;  %v4660_v41 = vld [vmem:[#allocation9 + $0x418] sm:$0xff] }
 0x34e   : > { %1901 = vmatprep.subr.mxu0 %v4628_v52  ;;  %2027 = vmatpush2.msra.mxu1 %v5428_v8  ;;  %5443 = vst [vmem:[#allocation29_spill] sm:$0xff] %v4660_v41  ;;  %v5444_v8 = vld [vmem:[#allocation37_spill] sm:$0xff] }
 0x34f   : > { %1902 = vmatpush2.msra.mxu0 %v4632_v35  ;;  %2028 = vmatprep.subr.mxu1 %v5430_v10  ;;  %v4664_v10 = vld [vmem:[#allocation9 + $0x410] sm:$0xff] }
 0x350   : > { %1903 = vmatprep.subr.mxu0 %v4636_v14  ;;  %2029 = vmatpush2.msra.mxu1 %v5432_v37  ;;  %5445 = vst [vmem:[#allocation30_spill] sm:$0xff] %v4664_v10  ;;  %v5446_v37 = vld [vmem:[#allocation38_spill] sm:$0xff] }
 0x351   : > { %1904 = vmatpush2.msra.mxu0 %v4640_v6  ;;  %2030 = vmatprep.subr.mxu1 %v5434_v36  ;;  %v4668_v36 = vld [vmem:[#allocation9 + $0x3e8] sm:$0xff] }
 0x352   : > { %1905 = vmatprep.subr.mxu0 %v4644_v62  ;;  %2031 = vmatpush2.msra.mxu1 %v5436_v33  ;;  %5447 = vst [vmem:[#allocation31_spill] sm:$0xff] %v4668_v36  ;;  %v5448_v33 = vld [vmem:[#allocation39_spill] sm:$0xff] }
 0x353   : > { %1906 = vmatpush2.msra.mxu0 %v4648_v29  ;;  %2032 = vmatprep.subr.mxu1 %v5438_v34  ;;  %v4672_v34 = vld [vmem:[#allocation9 + $0x3e0] sm:$0xff] }
 0x354   : > { %1907 = vmatprep.subr.mxu0 %v4652_v30  ;;  %2033 = vmatpush2.msra.mxu1 %v5440_v22  ;;  %5449 = vst [vmem:[#allocation32_spill] sm:$0xff] %v4672_v34  ;;  %v5450_v22 = vld [vmem:[#allocation40_spill] sm:$0xff]  ;;  %v5477_v30 = vld [vmem:[#allocation59_spill] sm:$0xff] }
 0x355   : > { %1908 = vmatpush2.msra.mxu0 %v4656_v26  ;;  %2034 = vmatprep.subr.mxu1 %v5442_v38  ;;  %v4676_v38 = vld [vmem:[#allocation9 + $0x3b8] sm:$0xff]  ;;  %v5474_v26 = vld [vmem:[#allocation56_spill] sm:$0xff] }
 0x356   : > { %1909 = vmatprep.subr.mxu0 %v4660_v41  ;;  %2035 = vmatpush2.msra.mxu1 %v5444_v8  ;;  %5451 = vst [vmem:[#allocation33_spill] sm:$0xff] %v4676_v38  ;;  %v5452_v8 = vld [vmem:[#allocation41_spill] sm:$0xff] }
 0x357   : > { %1910 = vmatpush2.msra.mxu0 %v4664_v10  ;;  %2036 = vmatprep.subr.mxu1 %v5446_v37  ;;  %v4680_v10 = vld [vmem:[#allocation9 + $0x3b0] sm:$0xff]  ;;  %v5471_v41 = vld [vmem:[#allocation53_spill] sm:$0xff] }
 0x358   : > { %1911 = vmatprep.subr.mxu0 %v4668_v36  ;;  %2037 = vmatpush2.msra.mxu1 %v5448_v33  ;;  %5453 = vst [vmem:[#allocation34_spill] sm:$0xff] %v4680_v10  ;;  %v5454_v37 = vld [vmem:[#allocation42_spill] sm:$0xff]  ;;  %v4684_v36 = vld [vmem:[#allocation9 + $0x388] sm:$0xff]  ;;  %v5456_v33 = vld [vmem:[#allocation43_spill] sm:$0xff] }
 0x359   : > { %1912 = vmatpush2.msra.mxu0 %v4672_v34  ;;  %2038 = vmatprep.subr.mxu1 %v5450_v22  ;;  %5455 = vst [vmem:[#allocation35_spill] sm:$0xff] %v4684_v36  ;;  %v4688_v34 = vld [vmem:[#allocation9 + $0x380] sm:$0xff] }
 0x35a   : > { %1913 = vmatprep.subr.mxu0 %v4676_v38  ;;  %2039 = vmatpush2.msra.mxu1 %v5452_v8  ;;  %5457 = vst [vmem:[#allocation36_spill] sm:$0xff] %v4688_v34  ;;  %v5458_v22 = vld [vmem:[#allocation44_spill] sm:$0xff]  ;;  %v4692_v38 = vld [vmem:[#allocation9 + $0x358] sm:$0xff]  ;;  %v5460_v8 = vld [vmem:[#allocation45_spill] sm:$0xff] }
 0x35b   : > { %1914 = vmatpush2.msra.mxu0 %v4680_v10  ;;  %2040 = vmatprep.subr.mxu1 %v5454_v37  ;;  %5459 = vst [vmem:[#allocation37_spill] sm:$0xff] %v4692_v38  ;;  %v4696_v10 = vld [vmem:[#allocation9 + $0x350] sm:$0xff] }
 0x35c   : > { %1915 = vmatprep.subr.mxu0 %v4684_v36  ;;  %2041 = vmatpush2.msra.mxu1 %v5456_v33  ;;  %5461 = vst [vmem:[#allocation38_spill] sm:$0xff] %v4696_v10  ;;  %v5462_v37 = vld [vmem:[#allocation46_spill] sm:$0xff]  ;;  %v4700_v36 = vld [vmem:[#allocation9 + $0x328] sm:$0xff]  ;;  %v5464_v33 = vld [vmem:[#allocation47_spill] sm:$0xff] }
 0x35d   : > { %1916 = vmatpush2.msra.mxu0 %v4688_v34  ;;  %2042 = vmatprep.subr.mxu1 %v5458_v22  ;;  %5463 = vst [vmem:[#allocation39_spill] sm:$0xff] %v4700_v36  ;;  %v4704_v34 = vld [vmem:[#allocation9 + $0x320] sm:$0xff] }
 0x35e   : > { %1917 = vmatprep.subr.mxu0 %v4692_v38  ;;  %2043 = vmatpush2.msra.mxu1 %v5460_v8  ;;  %5465 = vst [vmem:[#allocation40_spill] sm:$0xff] %v4704_v34  ;;  %v5466_v22 = vld [vmem:[#allocation48_spill] sm:$0xff]  ;;  %v5467_v8 = vld [vmem:[#allocation49_spill] sm:$0xff]  ;;  %v5468_v38 = vld [vmem:[#allocation50_spill] sm:$0xff] }
 0x35f   : > { %1918 = vmatpush2.msra.mxu0 %v4696_v10  ;;  %2044 = vmatprep.subr.mxu1 %v5462_v37  ;;  %v5469_v10 = vld [vmem:[#allocation51_spill] sm:$0xff]  ;;  %v5470_v37 = vld [vmem:[#allocation52_spill] sm:$0xff] }
 0x360   : > { %1919 = vmatprep.subr.mxu0 %v4700_v36  ;;  %2045 = vmatpush2.msra.mxu1 %v5464_v33  ;;  %v5472_v36 = vld [vmem:[#allocation54_spill] sm:$0xff]  ;;  %v5473_v33 = vld [vmem:[#allocation55_spill] sm:$0xff] }
 0x361   : > { %1920 = vmatpush2.msra.mxu0 %v4704_v34  ;;  %2046 = vmatprep.subr.mxu1 %v5466_v22  ;;  %v5475_v34 = vld [vmem:[#allocation57_spill] sm:$0xff]  ;;  %v5476_v22 = vld [vmem:[#allocation58_spill] sm:$0xff] }
 0x362   : > { %1922 = vmatmul.mubr.f32.vlgmr.msra.gmra.mxu0 %v4439_v28  ;;  %2055 = vmatprep.subr.mxu0 %v5467_v8  ;;  %v5478_v8 = vld [vmem:[#allocation60_spill] sm:$0xff] }
 0x363   : > { %2056 = vmatpush1.msra.mxu0 %v5468_v38  ;;  %2047 = vmatpush2.msra.mxu1 %v5469_v10  ;;  %v5479_v38 = vld [vmem:[#allocation61_spill] sm:$0xff]  ;;  %v5480_v10 = vld [vmem:[#allocation62_spill] sm:$0xff] }
 0x364   : > { %2057 = vmatprep.subr.mxu0 %v5470_v37  ;;  %2126 = vmatprep.subr.mxu1 %v5471_v41  ;;  %v5481_v37 = vld [vmem:[#allocation63_spill] sm:$0xff]  ;;  %v5482_v41 = vld [vmem:[#allocation65_spill] sm:$0xff] }
 0x365   : > { %2058 = vmatpush1.msra.mxu0 %v5472_v36  ;;  %v5483_v36 = vld [vmem:[#allocation67_spill] sm:$0xff] }
 0x366   : > { %2059 = vmatprep.subr.mxu0 %v5473_v33  ;;  %v5484_v33 = vld [vmem:[#allocation69_spill] sm:$0xff] }
 0x367   : > { %2060 = vmatpush1.msra.mxu0 %v5474_v26  ;;  %v5485_v26 = vld [vmem:[#allocation71_spill] sm:$0xff] }
 0x368   : > { %2061 = vmatprep.subr.mxu0 %v5475_v34  ;;  %v5486_v34 = vld [vmem:[#allocation72_spill] sm:$0xff] }
 0x369   : > { %2062 = vmatpush1.msra.mxu0 %v5476_v22  ;;  %v5487_v22 = vld [vmem:[#allocation74_spill] sm:$0xff] }
 0x36a   : > { %2063 = vmatprep.subr.mxu0 %v5477_v30  ;;  %v5488_v30 = vld [vmem:[#allocation76_spill] sm:$0xff] }
 0x36b   : > { %2064 = vmatpush1.msra.mxu0 %v5478_v8  ;;  %v5489_v8 = vld [vmem:[#allocation78_spill] sm:$0xff] }
 0x36c   : > { %2065 = vmatprep.subr.mxu0 %v5479_v38  ;;  %v5490_v38 = vld [vmem:[#allocation79_spill] sm:$0xff] }
 0x36d   : > { %2066 = vmatpush1.msra.mxu0 %v5480_v10  ;;  %v5491_v10 = vld [vmem:[#allocation80_spill] sm:$0xff] }
 0x36e   : > { %2067 = vmatprep.subr.mxu0 %v5481_v37  ;;  %v5492_v37 = vld [vmem:[#allocation81_spill] sm:$0xff] }
 0x36f   : > { %2068 = vmatpush1.msra.mxu0 %v5482_v41  ;;  %v5493_v41 = vld [vmem:[#allocation84_spill] sm:$0xff] }
 0x370   : > { %2069 = vmatprep.subr.mxu0 %v5483_v36  ;;  %v5494_v36 = vld [vmem:[#allocation83_spill] sm:$0xff] }
 0x371   : > { %2070 = vmatpush1.msra.mxu0 %v5484_v33  ;;  %v5495_v33 = vld [vmem:[#allocation86_spill] sm:$0xff] }
 0x372   : > { %2071 = vmatprep.subr.mxu0 %v5485_v26  ;;  %v5496_v26 = vld [vmem:[#allocation87_spill] sm:$0xff] }
 0x373   : > { %2072 = vmatpush1.msra.mxu0 %v5486_v34  ;;  %v5497_v34 = vld [vmem:[#allocation88_spill] sm:$0xff] }
 0x374   : > { %2073 = vmatprep.subr.mxu0 %v5487_v22  ;;  %v5498_v22 = vld [vmem:[#allocation89_spill] sm:$0xff] }
 0x375   : > { %2074 = vmatpush1.msra.mxu0 %v5488_v30  ;;  %v5499_v30 = vld [vmem:[#allocation90_spill] sm:$0xff] }
 0x376   : > { %2075 = vmatprep.subr.mxu0 %v5489_v8  ;;  %v5500_v8 = vld [vmem:[#allocation91_spill] sm:$0xff] }
 0x377   : > { %2076 = vmatpush1.msra.mxu0 %v5490_v38  ;;  %v5501_v38 = vld [vmem:[#allocation92_spill] sm:$0xff] }
 0x378   : > { %2077 = vmatprep.subr.mxu0 %v5491_v10  ;;  %v5502_v10 = vld [vmem:[#allocation93_spill] sm:$0xff] }
 0x379   : > { %2078 = vmatpush1.msra.mxu0 %v5492_v37  ;;  %v5503_v37 = vld [vmem:[#allocation94_spill] sm:$0xff] }
 0x37a   : > { %2079 = vmatprep.subr.mxu0 %v5493_v41  ;;  %v5504_v41 = vld [vmem:[#allocation95_spill] sm:$0xff] }
 0x37b   : > { %2080 = vmatpush1.msra.mxu0 %v5494_v36  ;;  %v5505_v36 = vld [vmem:[#allocation96_spill] sm:$0xff] }
 0x37c   : > { %2081 = vmatprep.subr.mxu0 %v5495_v33  ;;  %v5506_v33 = vld [vmem:[#allocation97_spill] sm:$0xff] }
 0x37d   : > { %2082 = vmatpush1.msra.mxu0 %v5496_v26  ;;  %v5507_v26 = vld [vmem:[#allocation98_spill] sm:$0xff] }
 0x37e   : > { %2083 = vmatprep.subr.mxu0 %v5497_v34  ;;  %v5508_v34 = vld [vmem:[#allocation99_spill] sm:$0xff] }
 0x37f   : > { %2084 = vmatpush1.msra.mxu0 %v5498_v22  ;;  %v5509_v22 = vld [vmem:[#allocation100_spill] sm:$0xff] }
 0x380   : > { %2085 = vmatprep.subr.mxu0 %v5499_v30  ;;  %v5510_v30 = vld [vmem:[#allocation101_spill] sm:$0xff] }
 0x381   : > { %2086 = vmatpush1.msra.mxu0 %v5500_v8  ;;  %v5511_v8 = vld [vmem:[#allocation102_spill] sm:$0xff] }
 0x382   : > { %2087 = vmatprep.subr.mxu0 %v5501_v38  ;;  %v5512_v38 = vld [vmem:[#allocation103_spill] sm:$0xff] }
 0x383   : > { %2088 = vmatpush2.msra.mxu0 %v5502_v10  ;;  %v5513_v10 = vld [vmem:[#allocation104_spill] sm:$0xff] }
 0x384   : > { %2089 = vmatprep.subr.mxu0 %v5503_v37  ;;  %v5514_v37 = vld [vmem:[#allocation64_spill] sm:$0xff] }
 0x385   : > { %2090 = vmatpush2.msra.mxu0 %v5504_v41  ;;  %v5515_v41 = vld [vmem:[#allocation66_spill] sm:$0xff] }
 0x386   : > { %2091 = vmatprep.subr.mxu0 %v5505_v36  ;;  %v5516_v36 = vld [vmem:[#allocation68_spill] sm:$0xff] }
 0x387   : > { %2092 = vmatpush2.msra.mxu0 %v5506_v33  ;;  %v5517_v33 = vld [vmem:[#allocation70_spill] sm:$0xff] }
 0x388   : > { %2093 = vmatprep.subr.mxu0 %v5507_v26  ;;  %v5518_v26 = vld [vmem:[#allocation105_spill] sm:$0xff] }
 0x389   : > { %2094 = vmatpush2.msra.mxu0 %v5508_v34  ;;  %v5519_v34 = vld [vmem:[#allocation73_spill] sm:$0xff] }
 0x38a   : > { %2095 = vmatprep.subr.mxu0 %v5509_v22  ;;  %v5520_v22 = vld [vmem:[#allocation75_spill] sm:$0xff] }
 0x38b   : > { %2096 = vmatpush2.msra.mxu0 %v5510_v30  ;;  %v5521_v30 = vld [vmem:[#allocation106_spill] sm:$0xff] }
 0x38c   : > { %2097 = vmatprep.subr.mxu0 %v5511_v8  ;;  %v5522_v8 = vld [vmem:[#allocation107_spill] sm:$0xff] }
 0x38d   : > { %2098 = vmatpush2.msra.mxu0 %v5512_v38  ;;  %v5523_v38 = vld [vmem:[#allocation108_spill] sm:$0xff] }
 0x38e   : > { %2099 = vmatprep.subr.mxu0 %v5513_v10  ;;  %v5524_v10 = vld [vmem:[#allocation109_spill] sm:$0xff] }
 0x38f   : > { %2100 = vmatpush2.msra.mxu0 %v5514_v37  ;;  %v5525_v37 = vld [vmem:[#allocation110_spill] sm:$0xff] }
 0x390   : > { %2101 = vmatprep.subr.mxu0 %v5515_v41  ;;  %v5526_v41 = vld [vmem:[#allocation111_spill] sm:$0xff] }
 0x391   : > { %2102 = vmatpush2.msra.mxu0 %v5516_v36  ;;  %v5527_v36 = vld [vmem:[#allocation112_spill] sm:$0xff] }
 0x392   : > { %2103 = vmatprep.subr.mxu0 %v5517_v33  ;;  %v5528_v33 = vld [vmem:[#allocation113_spill] sm:$0xff] }
 0x393   : > { %2104 = vmatpush2.msra.mxu0 %v5518_v26  ;;  %v5529_v26 = vld [vmem:[#allocation114_spill] sm:$0xff] }
 0x394   : > { %2105 = vmatprep.subr.mxu0 %v5519_v34  ;;  %v5530_v34 = vld [vmem:[#allocation115_spill] sm:$0xff] }
 0x395   : > { %2106 = vmatpush2.msra.mxu0 %v5520_v22  ;;  %v5531_v22 = vld [vmem:[#allocation116_spill] sm:$0xff] }
 0x396   : > { %2107 = vmatprep.subr.mxu0 %v5521_v30  ;;  %v5532_v30 = vld [vmem:[#allocation117_spill] sm:$0xff] }
 0x397   : > { %2108 = vmatpush2.msra.mxu0 %v5522_v8 }
 0x398   : > { %2109 = vmatprep.subr.mxu0 %v5523_v38  ;;  %v5533_v38 = vld [vmem:[#allocation13_spill] sm:$0xff] }
 0x399   : > { %2110 = vmatpush2.msra.mxu0 %v5524_v10 }
 0x39a   : > { %2111 = vmatprep.subr.mxu0 %v5525_v37  ;;  %v5534_v37 = vld [vmem:[#allocation82_spill] sm:$0xff] }
 0x39b   : > { %2112 = vmatpush2.msra.mxu0 %v5526_v41 }
 0x39c   : > { %2113 = vmatprep.subr.mxu0 %v5527_v36 }
 0x39d   : > { %2114 = vmatpush2.msra.mxu0 %v5528_v33 }
 0x39e   : > { %2115 = vmatprep.subr.mxu0 %v5529_v26 }
 0x39f   : > { %2116 = vmatpush2.msra.mxu0 %v5530_v34  ;;  %v5535_v34 = vld [vmem:[#allocation21_spill] sm:$0xff] }
 0x3a0   : > { %2117 = vmatprep.subr.mxu0 %v5531_v22 }
 0x3a1   : > { %2118 = vmatpush2.msra.mxu0 %v5532_v30 }
 0x3e2   : > { %v1781_v8 = vpop.f32.mrf.mxu0  ;;  %v1852_v14 = vpop.f32.mrf.mxu1 }
 0x3e3   : > { %v1932_v29 = vadd.f32 %v1781_v8, %v5533_v38  ;;  %v5536_v38 = vld [vmem:[#allocation17_spill] sm:$0xff] }
 0x3e4   : > { %v1783_v62 = vpop.f32.mrf.mxu0  ;;  %v1854_v26 = vpop.f32.mrf.mxu1 }
 0x3e5   : > { %v2422_v10 = vmul.f32 -1.442695, %v1932_v29  ;;  %v1939_v41 = vadd.f32 %v1783_v62, %v5534_v37  ;;  %v1958_v35 = vadd.f32 %v1854_v26, %v5535_v34  ;;  %v4781_v29 = vld [vmem:[%s4893_s7] ss:$0 sm:$0xff] }
 0x3e6   : > { %v1946_v8 = vadd.f32 %v4781_v29, %v1852_v14 }
 0x3e7   : > { %2636 = vpow2.f32 %v2422_v10  ;;  %v2423_v6 = vmul.f32 -1.442695, %v1939_v41  ;;  %v2424_v52 = vmul.f32 -1.442695, %v1958_v35 }
 0x3e9   : > { %2638 = vpow2.f32 %v2423_v6 }
 0x3f4   : > { %v2637_v36 = vpop.eup %2636 }
 0x3f5   : > { %v1936_v33 = vadd.f32 1.0, %v2637_v36 }
 0x3f6   : > { %v2639_v22 = vpop.eup %2638 }
 0x3f7   : > { %2640 = vrcp.f32 %v1936_v33  ;;  %v1943_v30 = vadd.f32 1.0, %v2639_v22 }
 0x3f8   : > { %2642 = vpow2.f32 %v2424_v52  ;;  %v5537_v52 = vld [vmem:[#allocation22_spill] sm:$0xff] }
 0x3f9   : > { %2644 = vrcp.f32 %v1943_v30 }
 0x404   : > { %v2641_v62 = vpop.eup %2640 }
 0x405   : > { %v1947_v6 = vmul.f32 %v2641_v62, %v1946_v8  ;;  %v2643_v37 = vpop.eup %2642 }
 0x406   : > { %v2645_v41 = vpop.eup %2644  ;;  %v1962_v36 = vadd.f32 1.0, %v2643_v37 }
 0x407   : > { %v1948_v10 = vadd.f32 %v1947_v6, %v5536_v38  ;;  %v1950_v35 = vsub.f32 1.0, %v2645_v41  ;;  %v1952_v34 = vmul.f32 %v2645_v41, %v4439_v28 }
 0x409   : > { %2646 = vtanh.f32 %v1948_v10  ;;  %v5538_v10 = vld [vmem:[#allocation25_spill] sm:$0xff] }
 0x40a   : > { %2648 = vrcp.f32 %v1962_v36  ;;  %v946_v37 = vadd.f32 %v5538_v10, %v3971_v2 }
 0x416   : > { %v2647_v33 = vpop.eup %2646 }
 0x417   : > { %v1951_v26 = vmul.f32 %v2647_v33, %v1950_v35  ;;  %v2649_v38 = vpop.eup %2648 }
 0x419   : > { %v4786_v22 = vadd.f32 %v1952_v34, %v1951_v26 }
 0x41b   : > { %2426 = vst [vmem:[%s3117_s11 + $0x10] sm:$0xff] %v4786_v22 }
 0x422   : > { %v1923_v14 = vpop.f32.mrf.mxu0 }
 0x423   : > { %v1965_v8 = vadd.f32 %v1923_v14, %v5537_v52 }
 0x424   : > { %v1925_v30 = vpop.f32.mrf.mxu0 }
 0x425   : > { %v2425_v62 = vmul.f32 -1.442695, %v1965_v8  ;;  %v1972_v6 = vadd.f32 %v3965_v24, %v1925_v30  ;;  %v5539_v24 = vld [vmem:[#allocation20_spill] sm:$0xff] }
 0x427   : > { %2650 = vpow2.f32 %v2425_v62  ;;  %v1973_v35 = vmul.f32 %v2649_v38, %v1972_v6 }
 0x429   : > { %v1974_v28 = vadd.f32 %v1973_v35, %v946_v37  ;;  %v5563_v37 = vld [vmem:[#allocation19_spill] sm:$0xff] }
 0x434   : > { %v2651_v41 = vpop.eup %2650 }
 0x435   : > { %v1969_v36 = vadd.f32 1.0, %v2651_v41 }
 0x437   : > { %2652 = vrcp.f32 %v1969_v36  ;;  %v2869_v36 = vld [vmem:[%s4894_s8] ss:$0 sm:$0xff] }
 0x438   : > { %2654 = vtanh.f32 %v1974_v28 }
 0x444   : > { %v2653_v33 = vpop.eup %2652 }
 0x445   : > { %v1976_v26 = vsub.f32 1.0, %v2653_v33  ;;  %v2655_v34 = vpop.eup %2654  ;;  %v1978_v52 = vmul.f32 %v2653_v33, %v4448_v16  ;;  %v5540_v16 = vld [vmem:[#allocation85_spill] sm:$0xff] }
 0x447   : > { %v1977_v14 = vmul.f32 %v2655_v34, %v1976_v26  ;;  %v5564_v34 = vld [vmem:[#allocation26_spill] sm:$0xff] }
 0x449   : > { %v4795_v8 = vadd.f32 %v1978_v52, %v1977_v14  ;;  %v941_v14 = vadd.f32 %v5564_v34, %v3971_v2 }
 0x44b   : > { %2048 = vmatprep.mubr.f32.mxu1 %v4795_v8  ;;  %2427 = vst [vmem:[%s3122_s17 + $0x8] sm:$0xff] %v4795_v8  ;;  %2119 = vmatprep.mubr.f32.mxu0 %v4795_v8 }
 0x44c   : > { %2049 = vmatmul.mubr.f32.vlgmr.msra.gmra.mxu1 %v4786_v22  ;;  %2120 = vmatmul.mubr.f32.vlgmr.msra.gmra.mxu0 %v4786_v22 }
 0x44d   : > { %2127 = vmatpush1.msra.mxu1 %v4456_v32  ;;  %2190 = vmatprep.mubr.f32.mxu1 %v4795_v8  ;;  %v5541_v32 = vld [vmem:[#allocation12_spill] sm:$0xff] }
 0x44e   : > { %2128 = vmatprep.subr.mxu1 %v4460_v60  ;;  %v5542_v60 = vld [vmem:[#allocation23_spill] sm:$0xff] }
 0x44f   : > { %2129 = vmatpush1.msra.mxu1 %v4464_v20  ;;  %v5543_v20 = vld [vmem:[#allocation77_spill] sm:$0xff] }
 0x450   : > { %2130 = vmatprep.subr.mxu1 %v4468_v54  ;;  %v5544_v54 = vld [vmem:[#allocation24_spill] sm:$0xff] }
 0x451   : > { %2131 = vmatpush1.msra.mxu1 %v4472_v18  ;;  %v5545_v18 = vld [vmem:[#allocation27_spill] sm:$0xff] }
 0x452   : > { %2132 = vmatprep.subr.mxu1 %v4476_v31  ;;  %v5546_v31 = vld [vmem:[#allocation28_spill] sm:$0xff] }
 0x453   : > { %2133 = vmatpush1.msra.mxu1 %v4480_v51  ;;  %v5547_v51 = vld [vmem:[#allocation29_spill] sm:$0xff] }
 0x454   : > { %2134 = vmatprep.subr.mxu1 %v4484_v4  ;;  %v5548_v4 = vld [vmem:[#allocation30_spill] sm:$0xff] }
 0x455   : > { %2135 = vmatpush1.msra.mxu1 %v4488_v12  ;;  %v5549_v12 = vld [vmem:[#allocation31_spill] sm:$0xff] }
 0x456   : > { %2136 = vmatprep.subr.mxu1 %v4492_v40  ;;  %v5550_v40 = vld [vmem:[#allocation32_spill] sm:$0xff] }
 0x457   : > { %2137 = vmatpush1.msra.mxu1 %v4496_v58  ;;  %v5551_v58 = vld [vmem:[#allocation33_spill] sm:$0xff] }
 0x458   : > { %2138 = vmatprep.subr.mxu1 %v4500_v56  ;;  %v5552_v56 = vld [vmem:[#allocation34_spill] sm:$0xff] }
 0x459   : > { %2139 = vmatpush1.msra.mxu1 %v4504_v47  ;;  %v5553_v47 = vld [vmem:[#allocation35_spill] sm:$0xff] }
 0x45a   : > { %2140 = vmatprep.subr.mxu1 %v4508_v45  ;;  %v5554_v45 = vld [vmem:[#allocation36_spill] sm:$0xff] }
 0x45b   : > { %2141 = vmatpush1.msra.mxu1 %v4512_v0  ;;  %v5555_v0 = vld [vmem:[#allocation37_spill] sm:$0xff] }
 0x45c   : > { %2142 = vmatprep.subr.mxu1 %v4516_v43  ;;  %v5556_v43 = vld [vmem:[#allocation38_spill] sm:$0xff] }
 0x45d   : > { %2143 = vmatpush1.msra.mxu1 %v4520_v39  ;;  %v5557_v39 = vld [vmem:[#allocation39_spill] sm:$0xff] }
 0x45e   : > { %2144 = vmatprep.subr.mxu1 %v4524_v42  ;;  %v5558_v42 = vld [vmem:[#allocation40_spill] sm:$0xff] }
 0x45f   : > { %2145 = vmatpush1.msra.mxu1 %v4528_v44 }
 0x460   : > { %2146 = vmatprep.subr.mxu1 %v4532_v46  ;;  %v5559_v46 = vld [vmem:[#allocation14_spill] sm:$0xff] }
 0x461   : > { %2147 = vmatpush1.msra.mxu1 %v4536_v48 }
 0x462   : > { %2148 = vmatprep.subr.mxu1 %v4540_v50 }
 0x463   : > { %2149 = vmatpush1.msra.mxu1 %v4544_v53 }
 0x464   : > { %2150 = vmatprep.subr.mxu1 %v4548_v55  ;;  %v5560_v55 = vld [vmem:[#allocation15_spill] sm:$0xff] }
 0x465   : > { %2151 = vmatpush1.msra.mxu1 %v4552_v57 }
 0x466   : > { %2152 = vmatprep.subr.mxu1 %v4556_v59 }
 0x467   : > { %2153 = vmatpush1.msra.mxu1 %v4560_v61 }
 0x468   : > { %2154 = vmatprep.subr.mxu1 %v4564_v63 }
 0x469   : > { %2155 = vmatpush1.msra.mxu1 %v4568_v1 }
 0x46a   : > { %2156 = vmatprep.subr.mxu1 %v4572_v3 }
 0x46b   : > { %2157 = vmatpush1.msra.mxu1 %v4576_v5  ;;  %v5561_v5 = vld [vmem:[#allocation18_spill] sm:$0xff] }
 0x46c   : > { %2158 = vmatprep.subr.mxu1 %v4580_v7 }
 0x46d   : > { %2159 = vmatpush2.msra.mxu1 %v4584_v9 }
 0x46e   : > { %2160 = vmatprep.subr.mxu1 %v4588_v11 }
 0x46f   : > { %2161 = vmatpush2.msra.mxu1 %v4592_v13 }
 0x470   : > { %2162 = vmatprep.subr.mxu1 %v4596_v15 }
 0x471   : > { %2163 = vmatpush2.msra.mxu1 %v4600_v17 }
 0x472   : > { %2164 = vmatprep.subr.mxu1 %v4604_v19 }
 0x473   : > { %2165 = vmatpush2.msra.mxu1 %v4608_v21  ;;  %v5562_v21 = vld [vmem:[#allocation16_spill] sm:$0xff] }
 0x474   : > { %2166 = vmatprep.subr.mxu1 %v4612_v23 }
 0x475   : > { %2167 = vmatpush2.msra.mxu1 %v4616_v25 }
 0x476   : > { %2168 = vmatprep.subr.mxu1 %v4620_v27 }
 0x477   : > { %2169 = vmatpush2.msra.mxu1 %v4624_v49 }
 0x478   : > { %2170 = vmatprep.subr.mxu1 %v5539_v24 }
 0x479   : > { %2171 = vmatpush2.msra.mxu1 %v5540_v16 }
 0x47a   : > { %2172 = vmatprep.subr.mxu1 %v5541_v32 }
 0x47b   : > { %2173 = vmatpush2.msra.mxu1 %v5542_v60 }
 0x47c   : > { %2174 = vmatprep.subr.mxu1 %v5543_v20 }
 0x47d   : > { %2175 = vmatpush2.msra.mxu1 %v5544_v54 }
 0x47e   : > { %2176 = vmatprep.subr.mxu1 %v5545_v18 }
 0x47f   : > { %2177 = vmatpush2.msra.mxu1 %v5546_v31 }
 0x480   : > { %2178 = vmatprep.subr.mxu1 %v5547_v51 }
 0x481   : > { %2179 = vmatpush2.msra.mxu1 %v5548_v4 }
 0x482   : > { %2180 = vmatprep.subr.mxu1 %v5549_v12 }
 0x483   : > { %2181 = vmatpush2.msra.mxu1 %v5550_v40 }
 0x484   : > { %2182 = vmatprep.subr.mxu1 %v5551_v58 }
 0x485   : > { %2183 = vmatpush2.msra.mxu1 %v5552_v56 }
 0x486   : > { %2184 = vmatprep.subr.mxu1 %v5553_v47 }
 0x487   : > { %2185 = vmatpush2.msra.mxu1 %v5554_v45 }
 0x488   : > { %2186 = vmatprep.subr.mxu1 %v5555_v0 }
 0x489   : > { %2187 = vmatpush2.msra.mxu1 %v5556_v43 }
 0x48a   : > { %2188 = vmatprep.subr.mxu1 %v5557_v39 }
 0x48b   : > { %2189 = vmatpush2.msra.mxu1 %v5558_v42 }
 0x48c   : > { %2191 = vmatmul.mubr.f32.vlgmr.msra.gmra.mxu1 %v4786_v22 }
 0x50c   : > { %v2050_v44 = vpop.f32.mrf.mxu1  ;;  %v2121_v1 = vpop.f32.mrf.mxu0 }
 0x50d   : > { %v2201_v48 = vadd.f32 %v2050_v44, %v5559_v46  ;;  %v2215_v15 = vadd.f32 %v4781_v29, %v2121_v1 }
 0x50e   : > { %v2052_v53 = vpop.f32.mrf.mxu1  ;;  %v2123_v3 = vpop.f32.mrf.mxu0 }
 0x50f   : > { %v2428_v50 = vmul.f32 -1.442695, %v2201_v48  ;;  %v2208_v57 = vadd.f32 %v2052_v53, %v5560_v55  ;;  %v2226_v7 = vadd.f32 %v2123_v3, %v5561_v5 }
 0x511   : > { %2656 = vpow2.f32 %v2428_v50  ;;  %v2429_v59 = vmul.f32 -1.442695, %v2208_v57  ;;  %v2430_v11 = vmul.f32 -1.442695, %v2226_v7 }
 0x513   : > { %2658 = vpow2.f32 %v2429_v59 }
 0x51e   : > { %v2657_v61 = vpop.eup %2656 }
 0x51f   : > { %v2205_v63 = vadd.f32 1.0, %v2657_v61 }
 0x520   : > { %v2659_v9 = vpop.eup %2658 }
 0x521   : > { %2660 = vrcp.f32 %v2205_v63  ;;  %v2212_v13 = vadd.f32 1.0, %v2659_v9 }
 0x522   : > { %2662 = vpow2.f32 %v2430_v11 }
 0x523   : > { %2664 = vrcp.f32 %v2212_v13 }
 0x52e   : > { %v2661_v17 = vpop.eup %2660 }
 0x52f   : > { %v2216_v19 = vmul.f32 %v2661_v17, %v2215_v15  ;;  %v2663_v25 = vpop.eup %2662 }
 0x530   : > { %v2665_v27 = vpop.eup %2664  ;;  %v2230_v30 = vadd.f32 1.0, %v2663_v25 }
 0x531   : > { %v2217_v23 = vadd.f32 %v2216_v19, %v5562_v21  ;;  %v2219_v49 = vsub.f32 1.0, %v2665_v27  ;;  %v2221_v38 = vmul.f32 %v2665_v27, %v4786_v22 }
 0x533   : > { %2666 = vtanh.f32 %v2217_v23 }
 0x534   : > { %2668 = vrcp.f32 %v2230_v30 }
 0x540   : > { %v2667_v62 = vpop.eup %2666 }
 0x541   : > { %v2220_v6 = vmul.f32 %v2667_v62, %v2219_v49  ;;  %v2669_v26 = vpop.eup %2668 }
 0x543   : > { %v2222_v10 = vadd.f32 %v2221_v38, %v2220_v6 }
 0x545   : > { %2432 = vst [vmem:[%s3117_s11 + $0x18] sm:$0xff] %v2222_v10  ;;  %2251 = vst [vmem:[#allocation4] sm:$0xff] %v2222_v10 }
 0x54c   : > { %v2192_v29 = vpop.f32.mrf.mxu1 }
 0x54d   : > { %v2233_v35 = vadd.f32 %v2192_v29, %v5563_v37 }
 0x54e   : > { %v2194_v28 = vpop.f32.mrf.mxu1 }
 0x54f   : > { %v2431_v41 = vmul.f32 -1.442695, %v2233_v35  ;;  %v2240_v33 = vadd.f32 %v2869_v36, %v2194_v28 }
 0x551   : > { %2670 = vpow2.f32 %v2431_v41  ;;  %v2241_v22 = vmul.f32 %v2669_v26, %v2240_v33 }
 0x553   : > { %v2242_v52 = vadd.f32 %v2241_v22, %v941_v14 }
 0x55e   : > { %v2671_v24 = vpop.eup %2670 }
 0x55f   : > { %v2237_v16 = vadd.f32 1.0, %v2671_v24 }
 0x561   : > { %2672 = vrcp.f32 %v2237_v16 }
 0x562   : > { %2674 = vtanh.f32 %v2242_v52 }
 0x56e   : > { %v2673_v32 = vpop.eup %2672 }
 0x56f   : > { %v2244_v60 = vsub.f32 1.0, %v2673_v32  ;;  %v2675_v20 = vpop.eup %2674  ;;  %v2246_v54 = vmul.f32 %v2673_v32, %v4795_v8 }
 0x571   : > { %v2245_v18 = vmul.f32 %v2675_v20, %v2244_v60 }
 0x573   : > { %v2247_v31 = vadd.f32 %v2246_v54, %v2245_v18 }
 0x575   : > { %2250 = vst [vmem:[%s3122_s17] sm:$0xff] %v2247_v31  ;;  %2252 = vst [vmem:[#allocation4 + $0x8] sm:$0xff] %v2247_v31 }
 0x576 PF: > { %s23_s13 = sadd.s32 1, %s2962_s13  }
 0x577   : > { %p20_p2 = scmp.ge.s32.totalorder %s23_s13, 4  }
 0x579   :  { %22 = sbr.rel (!%p20_p2) target bundleno = 2 (0x2), region = 130 }
 0x57e   :  { %2295 = vsyncpa [#allocation6], 1 }
 0x57f   :  { %2297 = vsyncpa [#allocation6 + $0x1], 1 }
 0x580   :  { %2298 = vsyncpa [#allocation8], 1 }

</bundles_post_ra>
